<compile_context>
chip_gen: v6e
topology: v6e:2x2x1
jax: 0.10.0
libtpu: 0.0.40
codegen_flags: <defaults>
</compile_context>

<pallas_src>
import functools

import jax
import jax.numpy as jnp
from jax.experimental import pallas as pl
from jax.experimental.pallas import tpu as pltpu


def _sca_kernel(x_ref, w1_ref, w2_ref, o_ref, *, H, W, K, P,
                cin, cmid, cout):
    """One grid step processes TN images.

    x_ref : (TN, cin, H*W)   f32 VMEM  -- flattened channel planes, lanes = H*W
    w1_ref: (K*K*cin*cmid,)  f32 SMEM  -- conv1 weights, HWIO flattened
    w2_ref: (K*K*cmid*cout,) f32 SMEM  -- conv2 weights, HWIO flattened
    o_ref : (TN, cout, H*W)  f32 VMEM  -- lane-dense output
    """
    HW = H * W

    # ---- per-tap validity masks for 'same' padding (computed once, shared by
    #      both convs; replaces the spatial pad + mid_pad scratch) ----
    ii = jax.lax.broadcasted_iota(jnp.int32, (1, HW), 1)
    if W & (W - 1) == 0:
        col = jnp.bitwise_and(ii, W - 1)
    else:
        col = jax.lax.rem(ii, W)  # TODO(synk): non-power-of-two W fallback path

    masks = {}
    for dh in range(K):
        for dw in range(K):
            if dh == P and dw == P:
                masks[(dh, dw)] = None          # centre tap: always valid
                continue
            roff = (dh - P) * W
            row_ok = (ii + roff >= 0) & (ii + roff < HW)
            cshift = col + (dw - P)
            col_ok = (cshift >= 0) & (cshift < W)
            masks[(dh, dw)] = row_ok & col_ok   # (1, HW) bool

    def tap(arr, dh, dw):
        # arr: (TN, HW).  Spatially shift by tap (dh, dw); out-of-image source
        # positions become zero ('same' padding).  Shift is a lane rotation on
        # the XLU (pltpu.roll), no slice/reshape relayout copies.
        off = (dh - P) * W + (dw - P)
        shifted = arr if off == 0 else pltpu.roll(arr, shift=(-off) % HW, axis=1)
        m = masks[(dh, dw)]
        return shifted if m is None else jnp.where(m, shifted, 0.0)

    # ---- conv1 + ReLU: channel mixing on the VPU, weights as SMEM scalars ----
    x_ch = [x_ref[:, ci, :] for ci in range(cin)]            # each (TN, HW)
    acc1 = [None] * cmid
    for dh in range(K):
        for dw in range(K):
            for ci in range(cin):
                t = tap(x_ch[ci], dh, dw)
                base = ((dh * K + dw) * cin + ci) * cmid
                for m in range(cmid):
                    contrib = t * w1_ref[base + m]
                    acc1[m] = contrib if acc1[m] is None else acc1[m] + contrib
    mid = [jnp.maximum(a, 0.0) for a in acc1]                # stays in vregs

    # ---- conv2 ----
    acc2 = [None] * cout
    for dh in range(K):
        for dw in range(K):
            for m in range(cmid):
                t = tap(mid[m], dh, dw)
                base = ((dh * K + dw) * cmid + m) * cout
                for o in range(cout):
                    contrib = t * w2_ref[base + o]
                    acc2[o] = contrib if acc2[o] is None else acc2[o] + contrib

    for o in range(cout):
        o_ref[:, o, :] = acc2[o].astype(o_ref.dtype)


def _pick_tn(n_images):
    """Images per grid step: largest divisor of N that is <= 8 (keeps all live
    (TN, H*W) values in vregs), preferring >= 2 grid steps so megacore (v7x)
    has work to split."""
    best = 1
    for d in range(1, n_images + 1):
        if n_images % d != 0 or d > 8:
            continue
        if n_images // d >= 2 or n_images == 1:
            best = d
    return best


def sca_forward(x, w1, w2, kernel_size):
    """x: (b, t, c, h, w) f32.  w1: (K,K,Cin,Cmid), w2: (K,K,Cmid,Cout) (HWIO)."""
    b, t, c, h, w = x.shape
    K = kernel_size
    assert K % 2 == 1, "padding='same' with even kernel is asymmetric"
    # TODO(synk): even kernel_size would need PyTorch's asymmetric 'same' pad.
    P = (K - 1) // 2

    cin, cmid = w1.shape[2], w1.shape[3]
    cout = w2.shape[3]
    assert cin == c and cout == c

    N = b * t
    HW = h * w

    # Pure reshapes only (no transpose, no pad => no extra HBM passes).
    x2 = x.reshape(N, c, HW)
    w1f = w1.reshape(-1)
    w2f = w2.reshape(-1)

    TN = _pick_tn(N)
    grid = (N // TN,)

    kernel = functools.partial(_sca_kernel, H=h, W=w, K=K, P=P,
                               cin=cin, cmid=cmid, cout=cout)

    out = pl.pallas_call(
        kernel,
        out_shape=jax.ShapeDtypeStruct((N, cout, HW), x.dtype),
        grid_spec=pltpu.PrefetchScalarGridSpec(
            num_scalar_prefetch=0,
            grid=grid,
            in_specs=[
                pl.BlockSpec((TN, cin, HW), lambda n: (n, 0, 0)),
                pl.BlockSpec(memory_space=pltpu.MemorySpace.SMEM),
                pl.BlockSpec(memory_space=pltpu.MemorySpace.SMEM),
            ],
            out_specs=pl.BlockSpec((TN, cout, HW), lambda n: (n, 0, 0)),
        ),
        compiler_params=pltpu.CompilerParams(
            dimension_semantics=("parallel",)),
    )(x2, w1f, w2f)

    return out.reshape(b, t, c, h, w)


def _reference(x, w1, w2, kernel_size):
    """Pure-JAX reference (lax.conv) for correctness checking."""
    b, t, c, h, w = x.shape
    P = (kernel_size - 1) // 2
    xf = x.reshape(b * t, c, h, w)
    # lax expects OIHW kernels for NCHW; our weights are HWIO.
    k1 = jnp.transpose(w1, (3, 2, 0, 1))
    k2 = jnp.transpose(w2, (3, 2, 0, 1))
    y = jax.lax.conv_general_dilated(
        xf, k1, window_strides=(1, 1), padding=[(P, P), (P, P)],
        dimension_numbers=("NCHW", "OIHW", "NCHW"))
    y = jnp.maximum(y, 0.0)
    y = jax.lax.conv_general_dilated(
        y, k2, window_strides=(1, 1), padding=[(P, P), (P, P)],
        dimension_numbers=("NCHW", "OIHW", "NCHW"))
    return y.reshape(b, t, c, h, w)


if __name__ == "__main__":
    # Small shapes consistent with the module: in_planes=c, ratio=1, k=3.
    b, t, c, h, w = 2, 3, 4, 16, 16
    kernel_size = 3
    ratio = 1
    cmid = c // ratio

    key = jax.random.PRNGKey(0)
    kx, k1, k2 = jax.random.split(key, 3)

    x = jax.random.normal(kx, (b, t, c, h, w), dtype=jnp.float32)
    # Deterministic synthetic weights (HWIO layout).
    w1 = jax.random.normal(k1, (kernel_size, kernel_size, c, cmid),
                           dtype=jnp.float32) * 0.1
    w2 = jax.random.normal(k2, (kernel_size, kernel_size, cmid, c),
                           dtype=jnp.float32) * 0.1

    out = jax.block_until_ready(sca_forward(x, w1, w2, kernel_size))
    ref = jax.block_until_ready(_reference(x, w1, w2, kernel_size))

    assert out.shape == (b, t, c, h, w)
    assert jnp.allclose(out, ref, atol=1e-4, rtol=1e-4), "mismatch vs reference"

    print("KERNEL_OK")
</pallas_src>

<mosaic_0001>
module attributes {stable_mosaic.version = 11 : i64} {
  func.func @_sca_kernel(%arg0: i32, %arg1: memref<3x4x256xf32, #tpu.memory_space<vmem>>, %arg2: memref<144xf32, #tpu.memory_space<smem>>, %arg3: memref<144xf32, #tpu.memory_space<smem>>, %arg4: memref<3x4x256xf32, #tpu.memory_space<vmem>>) attributes {dimension_semantics = [#tpu.dimension_semantics<parallel>], iteration_bounds = array<i64: 2>, scalar_prefetch = 0 : i64, scratch_operands = 0 : i64, tpu.core_type = #tpu.core_type<tc>, window_params = [{transform_indices = @transform_0, window_bounds = array<i64: 3, 4, 256>}, {transform_indices = @transform_1, window_bounds = array<i64: 144>}, {transform_indices = @transform_2, window_bounds = array<i64: 144>}, {transform_indices = @transform_3, window_bounds = array<i64: 3, 4, 256>}]} {
    %0 = tpu.iota {dimensions = array<i32: 1>} : vector<1x256xi32>
    %c15_i32 = arith.constant 15 : i32
    %1 = vector.broadcast %c15_i32 : i32 to vector<1x256xi32>
    %2 = arith.andi %0, %1 : vector<1x256xi32>
    %c-16_i32 = arith.constant -16 : i32
    %3 = vector.broadcast %c-16_i32 : i32 to vector<1x256xi32>
    %4 = arith.addi %0, %3 : vector<1x256xi32>
    %c0_i32 = arith.constant 0 : i32
    %5 = vector.broadcast %c0_i32 : i32 to vector<1x256xi32>
    %6 = arith.cmpi sge, %4, %5 : vector<1x256xi32>
    %c-16_i32_0 = arith.constant -16 : i32
    %7 = vector.broadcast %c-16_i32_0 : i32 to vector<1x256xi32>
    %8 = arith.addi %0, %7 : vector<1x256xi32>
    %c256_i32 = arith.constant 256 : i32
    %9 = vector.broadcast %c256_i32 : i32 to vector<1x256xi32>
    %10 = arith.cmpi slt, %8, %9 : vector<1x256xi32>
    %11 = arith.andi %6, %10 : vector<1x256xi1>
    %c-1_i32 = arith.constant -1 : i32
    %12 = vector.broadcast %c-1_i32 : i32 to vector<1x256xi32>
    %13 = arith.addi %2, %12 : vector<1x256xi32>
    %c0_i32_1 = arith.constant 0 : i32
    %14 = vector.broadcast %c0_i32_1 : i32 to vector<1x256xi32>
    %15 = arith.cmpi sge, %13, %14 : vector<1x256xi32>
    %c16_i32 = arith.constant 16 : i32
    %16 = vector.broadcast %c16_i32 : i32 to vector<1x256xi32>
    %17 = arith.cmpi slt, %13, %16 : vector<1x256xi32>
    %18 = arith.andi %15, %17 : vector<1x256xi1>
    %19 = arith.andi %11, %18 : vector<1x256xi1>
    %c-16_i32_2 = arith.constant -16 : i32
    %20 = vector.broadcast %c-16_i32_2 : i32 to vector<1x256xi32>
    %21 = arith.addi %0, %20 : vector<1x256xi32>
    %c0_i32_3 = arith.constant 0 : i32
    %22 = vector.broadcast %c0_i32_3 : i32 to vector<1x256xi32>
    %23 = arith.cmpi sge, %21, %22 : vector<1x256xi32>
    %c-16_i32_4 = arith.constant -16 : i32
    %24 = vector.broadcast %c-16_i32_4 : i32 to vector<1x256xi32>
    %25 = arith.addi %0, %24 : vector<1x256xi32>
    %c256_i32_5 = arith.constant 256 : i32
    %26 = vector.broadcast %c256_i32_5 : i32 to vector<1x256xi32>
    %27 = arith.cmpi slt, %25, %26 : vector<1x256xi32>
    %28 = arith.andi %23, %27 : vector<1x256xi1>
    %c0_i32_6 = arith.constant 0 : i32
    %29 = vector.broadcast %c0_i32_6 : i32 to vector<1x256xi32>
    %30 = arith.addi %2, %29 : vector<1x256xi32>
    %c0_i32_7 = arith.constant 0 : i32
    %31 = vector.broadcast %c0_i32_7 : i32 to vector<1x256xi32>
    %32 = arith.cmpi sge, %30, %31 : vector<1x256xi32>
    %c16_i32_8 = arith.constant 16 : i32
    %33 = vector.broadcast %c16_i32_8 : i32 to vector<1x256xi32>
    %34 = arith.cmpi slt, %30, %33 : vector<1x256xi32>
    %35 = arith.andi %32, %34 : vector<1x256xi1>
    %36 = arith.andi %28, %35 : vector<1x256xi1>
    %c-16_i32_9 = arith.constant -16 : i32
    %37 = vector.broadcast %c-16_i32_9 : i32 to vector<1x256xi32>
    %38 = arith.addi %0, %37 : vector<1x256xi32>
    %c0_i32_10 = arith.constant 0 : i32
    %39 = vector.broadcast %c0_i32_10 : i32 to vector<1x256xi32>
    %40 = arith.cmpi sge, %38, %39 : vector<1x256xi32>
    %c-16_i32_11 = arith.constant -16 : i32
    %41 = vector.broadcast %c-16_i32_11 : i32 to vector<1x256xi32>
    %42 = arith.addi %0, %41 : vector<1x256xi32>
    %c256_i32_12 = arith.constant 256 : i32
    %43 = vector.broadcast %c256_i32_12 : i32 to vector<1x256xi32>
    %44 = arith.cmpi slt, %42, %43 : vector<1x256xi32>
    %45 = arith.andi %40, %44 : vector<1x256xi1>
    %c1_i32 = arith.constant 1 : i32
    %46 = vector.broadcast %c1_i32 : i32 to vector<1x256xi32>
    %47 = arith.addi %2, %46 : vector<1x256xi32>
    %c0_i32_13 = arith.constant 0 : i32
    %48 = vector.broadcast %c0_i32_13 : i32 to vector<1x256xi32>
    %49 = arith.cmpi sge, %47, %48 : vector<1x256xi32>
    %c16_i32_14 = arith.constant 16 : i32
    %50 = vector.broadcast %c16_i32_14 : i32 to vector<1x256xi32>
    %51 = arith.cmpi slt, %47, %50 : vector<1x256xi32>
    %52 = arith.andi %49, %51 : vector<1x256xi1>
    %53 = arith.andi %45, %52 : vector<1x256xi1>
    %c0_i32_15 = arith.constant 0 : i32
    %54 = vector.broadcast %c0_i32_15 : i32 to vector<1x256xi32>
    %55 = arith.addi %0, %54 : vector<1x256xi32>
    %c0_i32_16 = arith.constant 0 : i32
    %56 = vector.broadcast %c0_i32_16 : i32 to vector<1x256xi32>
    %57 = arith.cmpi sge, %55, %56 : vector<1x256xi32>
    %c0_i32_17 = arith.constant 0 : i32
    %58 = vector.broadcast %c0_i32_17 : i32 to vector<1x256xi32>
    %59 = arith.addi %0, %58 : vector<1x256xi32>
    %c256_i32_18 = arith.constant 256 : i32
    %60 = vector.broadcast %c256_i32_18 : i32 to vector<1x256xi32>
    %61 = arith.cmpi slt, %59, %60 : vector<1x256xi32>
    %62 = arith.andi %57, %61 : vector<1x256xi1>
    %c-1_i32_19 = arith.constant -1 : i32
    %63 = vector.broadcast %c-1_i32_19 : i32 to vector<1x256xi32>
    %64 = arith.addi %2, %63 : vector<1x256xi32>
    %c0_i32_20 = arith.constant 0 : i32
    %65 = vector.broadcast %c0_i32_20 : i32 to vector<1x256xi32>
    %66 = arith.cmpi sge, %64, %65 : vector<1x256xi32>
    %c16_i32_21 = arith.constant 16 : i32
    %67 = vector.broadcast %c16_i32_21 : i32 to vector<1x256xi32>
    %68 = arith.cmpi slt, %64, %67 : vector<1x256xi32>
    %69 = arith.andi %66, %68 : vector<1x256xi1>
    %70 = arith.andi %62, %69 : vector<1x256xi1>
    %c0_i32_22 = arith.constant 0 : i32
    %71 = vector.broadcast %c0_i32_22 : i32 to vector<1x256xi32>
    %72 = arith.addi %0, %71 : vector<1x256xi32>
    %c0_i32_23 = arith.constant 0 : i32
    %73 = vector.broadcast %c0_i32_23 : i32 to vector<1x256xi32>
    %74 = arith.cmpi sge, %72, %73 : vector<1x256xi32>
    %c0_i32_24 = arith.constant 0 : i32
    %75 = vector.broadcast %c0_i32_24 : i32 to vector<1x256xi32>
    %76 = arith.addi %0, %75 : vector<1x256xi32>
    %c256_i32_25 = arith.constant 256 : i32
    %77 = vector.broadcast %c256_i32_25 : i32 to vector<1x256xi32>
    %78 = arith.cmpi slt, %76, %77 : vector<1x256xi32>
    %79 = arith.andi %74, %78 : vector<1x256xi1>
    %c1_i32_26 = arith.constant 1 : i32
    %80 = vector.broadcast %c1_i32_26 : i32 to vector<1x256xi32>
    %81 = arith.addi %2, %80 : vector<1x256xi32>
    %c0_i32_27 = arith.constant 0 : i32
    %82 = vector.broadcast %c0_i32_27 : i32 to vector<1x256xi32>
    %83 = arith.cmpi sge, %81, %82 : vector<1x256xi32>
    %c16_i32_28 = arith.constant 16 : i32
    %84 = vector.broadcast %c16_i32_28 : i32 to vector<1x256xi32>
    %85 = arith.cmpi slt, %81, %84 : vector<1x256xi32>
    %86 = arith.andi %83, %85 : vector<1x256xi1>
    %87 = arith.andi %79, %86 : vector<1x256xi1>
    %c16_i32_29 = arith.constant 16 : i32
    %88 = vector.broadcast %c16_i32_29 : i32 to vector<1x256xi32>
    %89 = arith.addi %0, %88 : vector<1x256xi32>
    %c0_i32_30 = arith.constant 0 : i32
    %90 = vector.broadcast %c0_i32_30 : i32 to vector<1x256xi32>
    %91 = arith.cmpi sge, %89, %90 : vector<1x256xi32>
    %c16_i32_31 = arith.constant 16 : i32
    %92 = vector.broadcast %c16_i32_31 : i32 to vector<1x256xi32>
    %93 = arith.addi %0, %92 : vector<1x256xi32>
    %c256_i32_32 = arith.constant 256 : i32
    %94 = vector.broadcast %c256_i32_32 : i32 to vector<1x256xi32>
    %95 = arith.cmpi slt, %93, %94 : vector<1x256xi32>
    %96 = arith.andi %91, %95 : vector<1x256xi1>
    %c-1_i32_33 = arith.constant -1 : i32
    %97 = vector.broadcast %c-1_i32_33 : i32 to vector<1x256xi32>
    %98 = arith.addi %2, %97 : vector<1x256xi32>
    %c0_i32_34 = arith.constant 0 : i32
    %99 = vector.broadcast %c0_i32_34 : i32 to vector<1x256xi32>
    %100 = arith.cmpi sge, %98, %99 : vector<1x256xi32>
    %c16_i32_35 = arith.constant 16 : i32
    %101 = vector.broadcast %c16_i32_35 : i32 to vector<1x256xi32>
    %102 = arith.cmpi slt, %98, %101 : vector<1x256xi32>
    %103 = arith.andi %100, %102 : vector<1x256xi1>
    %104 = arith.andi %96, %103 : vector<1x256xi1>
    %c16_i32_36 = arith.constant 16 : i32
    %105 = vector.broadcast %c16_i32_36 : i32 to vector<1x256xi32>
    %106 = arith.addi %0, %105 : vector<1x256xi32>
    %c0_i32_37 = arith.constant 0 : i32
    %107 = vector.broadcast %c0_i32_37 : i32 to vector<1x256xi32>
    %108 = arith.cmpi sge, %106, %107 : vector<1x256xi32>
    %c16_i32_38 = arith.constant 16 : i32
    %109 = vector.broadcast %c16_i32_38 : i32 to vector<1x256xi32>
    %110 = arith.addi %0, %109 : vector<1x256xi32>
    %c256_i32_39 = arith.constant 256 : i32
    %111 = vector.broadcast %c256_i32_39 : i32 to vector<1x256xi32>
    %112 = arith.cmpi slt, %110, %111 : vector<1x256xi32>
    %113 = arith.andi %108, %112 : vector<1x256xi1>
    %c0_i32_40 = arith.constant 0 : i32
    %114 = vector.broadcast %c0_i32_40 : i32 to vector<1x256xi32>
    %115 = arith.addi %2, %114 : vector<1x256xi32>
    %c0_i32_41 = arith.constant 0 : i32
    %116 = vector.broadcast %c0_i32_41 : i32 to vector<1x256xi32>
    %117 = arith.cmpi sge, %115, %116 : vector<1x256xi32>
    %c16_i32_42 = arith.constant 16 : i32
    %118 = vector.broadcast %c16_i32_42 : i32 to vector<1x256xi32>
    %119 = arith.cmpi slt, %115, %118 : vector<1x256xi32>
    %120 = arith.andi %117, %119 : vector<1x256xi1>
    %121 = arith.andi %113, %120 : vector<1x256xi1>
    %c16_i32_43 = arith.constant 16 : i32
    %122 = vector.broadcast %c16_i32_43 : i32 to vector<1x256xi32>
    %123 = arith.addi %0, %122 : vector<1x256xi32>
    %c0_i32_44 = arith.constant 0 : i32
    %124 = vector.broadcast %c0_i32_44 : i32 to vector<1x256xi32>
    %125 = arith.cmpi sge, %123, %124 : vector<1x256xi32>
    %c16_i32_45 = arith.constant 16 : i32
    %126 = vector.broadcast %c16_i32_45 : i32 to vector<1x256xi32>
    %127 = arith.addi %0, %126 : vector<1x256xi32>
    %c256_i32_46 = arith.constant 256 : i32
    %128 = vector.broadcast %c256_i32_46 : i32 to vector<1x256xi32>
    %129 = arith.cmpi slt, %127, %128 : vector<1x256xi32>
    %130 = arith.andi %125, %129 : vector<1x256xi1>
    %c1_i32_47 = arith.constant 1 : i32
    %131 = vector.broadcast %c1_i32_47 : i32 to vector<1x256xi32>
    %132 = arith.addi %2, %131 : vector<1x256xi32>
    %c0_i32_48 = arith.constant 0 : i32
    %133 = vector.broadcast %c0_i32_48 : i32 to vector<1x256xi32>
    %134 = arith.cmpi sge, %132, %133 : vector<1x256xi32>
    %c16_i32_49 = arith.constant 16 : i32
    %135 = vector.broadcast %c16_i32_49 : i32 to vector<1x256xi32>
    %136 = arith.cmpi slt, %132, %135 : vector<1x256xi32>
    %137 = arith.andi %134, %136 : vector<1x256xi1>
    %138 = arith.andi %130, %137 : vector<1x256xi1>
    %c0 = arith.constant 0 : index
    %c0_50 = arith.constant 0 : index
    %c0_51 = arith.constant 0 : index
    %139 = vector.load %arg1[%c0, %c0_50, %c0_51] : memref<3x4x256xf32, #tpu.memory_space<vmem>>, vector<3x1x256xf32>
    %140 = vector.shape_cast %139 : vector<3x1x256xf32> to vector<3x256xf32>
    %c0_52 = arith.constant 0 : index
    %c1 = arith.constant 1 : index
    %c0_53 = arith.constant 0 : index
    %141 = vector.load %arg1[%c0_52, %c1, %c0_53] : memref<3x4x256xf32, #tpu.memory_space<vmem>>, vector<3x1x256xf32>
    %142 = vector.shape_cast %141 : vector<3x1x256xf32> to vector<3x256xf32>
    %c0_54 = arith.constant 0 : index
    %c2 = arith.constant 2 : index
    %c0_55 = arith.constant 0 : index
    %143 = vector.load %arg1[%c0_54, %c2, %c0_55] : memref<3x4x256xf32, #tpu.memory_space<vmem>>, vector<3x1x256xf32>
    %144 = vector.shape_cast %143 : vector<3x1x256xf32> to vector<3x256xf32>
    %c0_56 = arith.constant 0 : index
    %c3 = arith.constant 3 : index
    %c0_57 = arith.constant 0 : index
    %145 = vector.load %arg1[%c0_56, %c3, %c0_57] : memref<3x4x256xf32, #tpu.memory_space<vmem>>, vector<3x1x256xf32>
    %146 = vector.shape_cast %145 : vector<3x1x256xf32> to vector<3x256xf32>
    %c17_i32 = arith.constant 17 : i32
    %147 = tpu.dynamic_rotate %140 by %c17_i32 dim 1 : vector<3x256xf32>, i32 -> vector<3x256xf32>
    %cst = arith.constant 0.000000e+00 : f32
    %148 = vector.shape_cast %19 : vector<1x256xi1> to vector<1x256xi1>
    %149 = vector.broadcast %148 : vector<1x256xi1> to vector<3x256xi1>
    %150 = vector.broadcast %cst : f32 to vector<3x256xf32>
    %151 = arith.select %149, %147, %150 : vector<3x256xi1>, vector<3x256xf32>
    %c0_58 = arith.constant 0 : index
    %152 = memref.load %arg2[%c0_58] : memref<144xf32, #tpu.memory_space<smem>>
    %153 = vector.broadcast %152 : f32 to vector<3x256xf32>
    %154 = arith.mulf %151, %153 : vector<3x256xf32>
    %c1_59 = arith.constant 1 : index
    %155 = memref.load %arg2[%c1_59] : memref<144xf32, #tpu.memory_space<smem>>
    %156 = vector.broadcast %155 : f32 to vector<3x256xf32>
    %157 = arith.mulf %151, %156 : vector<3x256xf32>
    %c2_60 = arith.constant 2 : index
    %158 = memref.load %arg2[%c2_60] : memref<144xf32, #tpu.memory_space<smem>>
    %159 = vector.broadcast %158 : f32 to vector<3x256xf32>
    %160 = arith.mulf %151, %159 : vector<3x256xf32>
    %c3_61 = arith.constant 3 : index
    %161 = memref.load %arg2[%c3_61] : memref<144xf32, #tpu.memory_space<smem>>
    %162 = vector.broadcast %161 : f32 to vector<3x256xf32>
    %163 = arith.mulf %151, %162 : vector<3x256xf32>
    %c17_i32_62 = arith.constant 17 : i32
    %164 = tpu.dynamic_rotate %142 by %c17_i32_62 dim 1 : vector<3x256xf32>, i32 -> vector<3x256xf32>
    %cst_63 = arith.constant 0.000000e+00 : f32
    %165 = vector.shape_cast %19 : vector<1x256xi1> to vector<1x256xi1>
    %166 = vector.broadcast %165 : vector<1x256xi1> to vector<3x256xi1>
    %167 = vector.broadcast %cst_63 : f32 to vector<3x256xf32>
    %168 = arith.select %166, %164, %167 : vector<3x256xi1>, vector<3x256xf32>
    %c4 = arith.constant 4 : index
    %169 = memref.load %arg2[%c4] : memref<144xf32, #tpu.memory_space<smem>>
    %170 = vector.broadcast %169 : f32 to vector<3x256xf32>
    %171 = arith.mulf %168, %170 : vector<3x256xf32>
    %172 = arith.addf %154, %171 : vector<3x256xf32>
    %c5 = arith.constant 5 : index
    %173 = memref.load %arg2[%c5] : memref<144xf32, #tpu.memory_space<smem>>
    %174 = vector.broadcast %173 : f32 to vector<3x256xf32>
    %175 = arith.mulf %168, %174 : vector<3x256xf32>
    %176 = arith.addf %157, %175 : vector<3x256xf32>
    %c6 = arith.constant 6 : index
    %177 = memref.load %arg2[%c6] : memref<144xf32, #tpu.memory_space<smem>>
    %178 = vector.broadcast %177 : f32 to vector<3x256xf32>
    %179 = arith.mulf %168, %178 : vector<3x256xf32>
    %180 = arith.addf %160, %179 : vector<3x256xf32>
    %c7 = arith.constant 7 : index
    %181 = memref.load %arg2[%c7] : memref<144xf32, #tpu.memory_space<smem>>
    %182 = vector.broadcast %181 : f32 to vector<3x256xf32>
    %183 = arith.mulf %168, %182 : vector<3x256xf32>
    %184 = arith.addf %163, %183 : vector<3x256xf32>
    %c17_i32_64 = arith.constant 17 : i32
    %185 = tpu.dynamic_rotate %144 by %c17_i32_64 dim 1 : vector<3x256xf32>, i32 -> vector<3x256xf32>
    %cst_65 = arith.constant 0.000000e+00 : f32
    %186 = vector.shape_cast %19 : vector<1x256xi1> to vector<1x256xi1>
    %187 = vector.broadcast %186 : vector<1x256xi1> to vector<3x256xi1>
    %188 = vector.broadcast %cst_65 : f32 to vector<3x256xf32>
    %189 = arith.select %187, %185, %188 : vector<3x256xi1>, vector<3x256xf32>
    %c8 = arith.constant 8 : index
    %190 = memref.load %arg2[%c8] : memref<144xf32, #tpu.memory_space<smem>>
    %191 = vector.broadcast %190 : f32 to vector<3x256xf32>
    %192 = arith.mulf %189, %191 : vector<3x256xf32>
    %193 = arith.addf %172, %192 : vector<3x256xf32>
    %c9 = arith.constant 9 : index
    %194 = memref.load %arg2[%c9] : memref<144xf32, #tpu.memory_space<smem>>
    %195 = vector.broadcast %194 : f32 to vector<3x256xf32>
    %196 = arith.mulf %189, %195 : vector<3x256xf32>
    %197 = arith.addf %176, %196 : vector<3x256xf32>
    %c10 = arith.constant 10 : index
    %198 = memref.load %arg2[%c10] : memref<144xf32, #tpu.memory_space<smem>>
    %199 = vector.broadcast %198 : f32 to vector<3x256xf32>
    %200 = arith.mulf %189, %199 : vector<3x256xf32>
    %201 = arith.addf %180, %200 : vector<3x256xf32>
    %c11 = arith.constant 11 : index
    %202 = memref.load %arg2[%c11] : memref<144xf32, #tpu.memory_space<smem>>
    %203 = vector.broadcast %202 : f32 to vector<3x256xf32>
    %204 = arith.mulf %189, %203 : vector<3x256xf32>
    %205 = arith.addf %184, %204 : vector<3x256xf32>
    %c17_i32_66 = arith.constant 17 : i32
    %206 = tpu.dynamic_rotate %146 by %c17_i32_66 dim 1 : vector<3x256xf32>, i32 -> vector<3x256xf32>
    %cst_67 = arith.constant 0.000000e+00 : f32
    %207 = vector.shape_cast %19 : vector<1x256xi1> to vector<1x256xi1>
    %208 = vector.broadcast %207 : vector<1x256xi1> to vector<3x256xi1>
    %209 = vector.broadcast %cst_67 : f32 to vector<3x256xf32>
    %210 = arith.select %208, %206, %209 : vector<3x256xi1>, vector<3x256xf32>
    %c12 = arith.constant 12 : index
    %211 = memref.load %arg2[%c12] : memref<144xf32, #tpu.memory_space<smem>>
    %212 = vector.broadcast %211 : f32 to vector<3x256xf32>
    %213 = arith.mulf %210, %212 : vector<3x256xf32>
    %214 = arith.addf %193, %213 : vector<3x256xf32>
    %c13 = arith.constant 13 : index
    %215 = memref.load %arg2[%c13] : memref<144xf32, #tpu.memory_space<smem>>
    %216 = vector.broadcast %215 : f32 to vector<3x256xf32>
    %217 = arith.mulf %210, %216 : vector<3x256xf32>
    %218 = arith.addf %197, %217 : vector<3x256xf32>
    %c14 = arith.constant 14 : index
    %219 = memref.load %arg2[%c14] : memref<144xf32, #tpu.memory_space<smem>>
    %220 = vector.broadcast %219 : f32 to vector<3x256xf32>
    %221 = arith.mulf %210, %220 : vector<3x256xf32>
    %222 = arith.addf %201, %221 : vector<3x256xf32>
    %c15 = arith.constant 15 : index
    %223 = memref.load %arg2[%c15] : memref<144xf32, #tpu.memory_space<smem>>
    %224 = vector.broadcast %223 : f32 to vector<3x256xf32>
    %225 = arith.mulf %210, %224 : vector<3x256xf32>
    %226 = arith.addf %205, %225 : vector<3x256xf32>
    %c16_i32_68 = arith.constant 16 : i32
    %227 = tpu.dynamic_rotate %140 by %c16_i32_68 dim 1 : vector<3x256xf32>, i32 -> vector<3x256xf32>
    %cst_69 = arith.constant 0.000000e+00 : f32
    %228 = vector.shape_cast %36 : vector<1x256xi1> to vector<1x256xi1>
    %229 = vector.broadcast %228 : vector<1x256xi1> to vector<3x256xi1>
    %230 = vector.broadcast %cst_69 : f32 to vector<3x256xf32>
    %231 = arith.select %229, %227, %230 : vector<3x256xi1>, vector<3x256xf32>
    %c16 = arith.constant 16 : index
    %232 = memref.load %arg2[%c16] : memref<144xf32, #tpu.memory_space<smem>>
    %233 = vector.broadcast %232 : f32 to vector<3x256xf32>
    %234 = arith.mulf %231, %233 : vector<3x256xf32>
    %235 = arith.addf %214, %234 : vector<3x256xf32>
    %c17 = arith.constant 17 : index
    %236 = memref.load %arg2[%c17] : memref<144xf32, #tpu.memory_space<smem>>
    %237 = vector.broadcast %236 : f32 to vector<3x256xf32>
    %238 = arith.mulf %231, %237 : vector<3x256xf32>
    %239 = arith.addf %218, %238 : vector<3x256xf32>
    %c18 = arith.constant 18 : index
    %240 = memref.load %arg2[%c18] : memref<144xf32, #tpu.memory_space<smem>>
    %241 = vector.broadcast %240 : f32 to vector<3x256xf32>
    %242 = arith.mulf %231, %241 : vector<3x256xf32>
    %243 = arith.addf %222, %242 : vector<3x256xf32>
    %c19 = arith.constant 19 : index
    %244 = memref.load %arg2[%c19] : memref<144xf32, #tpu.memory_space<smem>>
    %245 = vector.broadcast %244 : f32 to vector<3x256xf32>
    %246 = arith.mulf %231, %245 : vector<3x256xf32>
    %247 = arith.addf %226, %246 : vector<3x256xf32>
    %c16_i32_70 = arith.constant 16 : i32
    %248 = tpu.dynamic_rotate %142 by %c16_i32_70 dim 1 : vector<3x256xf32>, i32 -> vector<3x256xf32>
    %cst_71 = arith.constant 0.000000e+00 : f32
    %249 = vector.shape_cast %36 : vector<1x256xi1> to vector<1x256xi1>
    %250 = vector.broadcast %249 : vector<1x256xi1> to vector<3x256xi1>
    %251 = vector.broadcast %cst_71 : f32 to vector<3x256xf32>
    %252 = arith.select %250, %248, %251 : vector<3x256xi1>, vector<3x256xf32>
    %c20 = arith.constant 20 : index
    %253 = memref.load %arg2[%c20] : memref<144xf32, #tpu.memory_space<smem>>
    %254 = vector.broadcast %253 : f32 to vector<3x256xf32>
    %255 = arith.mulf %252, %254 : vector<3x256xf32>
    %256 = arith.addf %235, %255 : vector<3x256xf32>
    %c21 = arith.constant 21 : index
    %257 = memref.load %arg2[%c21] : memref<144xf32, #tpu.memory_space<smem>>
    %258 = vector.broadcast %257 : f32 to vector<3x256xf32>
    %259 = arith.mulf %252, %258 : vector<3x256xf32>
    %260 = arith.addf %239, %259 : vector<3x256xf32>
    %c22 = arith.constant 22 : index
    %261 = memref.load %arg2[%c22] : memref<144xf32, #tpu.memory_space<smem>>
    %262 = vector.broadcast %261 : f32 to vector<3x256xf32>
    %263 = arith.mulf %252, %262 : vector<3x256xf32>
    %264 = arith.addf %243, %263 : vector<3x256xf32>
    %c23 = arith.constant 23 : index
    %265 = memref.load %arg2[%c23] : memref<144xf32, #tpu.memory_space<smem>>
    %266 = vector.broadcast %265 : f32 to vector<3x256xf32>
    %267 = arith.mulf %252, %266 : vector<3x256xf32>
    %268 = arith.addf %247, %267 : vector<3x256xf32>
    %c16_i32_72 = arith.constant 16 : i32
    %269 = tpu.dynamic_rotate %144 by %c16_i32_72 dim 1 : vector<3x256xf32>, i32 -> vector<3x256xf32>
    %cst_73 = arith.constant 0.000000e+00 : f32
    %270 = vector.shape_cast %36 : vector<1x256xi1> to vector<1x256xi1>
    %271 = vector.broadcast %270 : vector<1x256xi1> to vector<3x256xi1>
    %272 = vector.broadcast %cst_73 : f32 to vector<3x256xf32>
    %273 = arith.select %271, %269, %272 : vector<3x256xi1>, vector<3x256xf32>
    %c24 = arith.constant 24 : index
    %274 = memref.load %arg2[%c24] : memref<144xf32, #tpu.memory_space<smem>>
    %275 = vector.broadcast %274 : f32 to vector<3x256xf32>
    %276 = arith.mulf %273, %275 : vector<3x256xf32>
    %277 = arith.addf %256, %276 : vector<3x256xf32>
    %c25 = arith.constant 25 : index
    %278 = memref.load %arg2[%c25] : memref<144xf32, #tpu.memory_space<smem>>
    %279 = vector.broadcast %278 : f32 to vector<3x256xf32>
    %280 = arith.mulf %273, %279 : vector<3x256xf32>
    %281 = arith.addf %260, %280 : vector<3x256xf32>
    %c26 = arith.constant 26 : index
    %282 = memref.load %arg2[%c26] : memref<144xf32, #tpu.memory_space<smem>>
    %283 = vector.broadcast %282 : f32 to vector<3x256xf32>
    %284 = arith.mulf %273, %283 : vector<3x256xf32>
    %285 = arith.addf %264, %284 : vector<3x256xf32>
    %c27 = arith.constant 27 : index
    %286 = memref.load %arg2[%c27] : memref<144xf32, #tpu.memory_space<smem>>
    %287 = vector.broadcast %286 : f32 to vector<3x256xf32>
    %288 = arith.mulf %273, %287 : vector<3x256xf32>
    %289 = arith.addf %268, %288 : vector<3x256xf32>
    %c16_i32_74 = arith.constant 16 : i32
    %290 = tpu.dynamic_rotate %146 by %c16_i32_74 dim 1 : vector<3x256xf32>, i32 -> vector<3x256xf32>
    %cst_75 = arith.constant 0.000000e+00 : f32
    %291 = vector.shape_cast %36 : vector<1x256xi1> to vector<1x256xi1>
    %292 = vector.broadcast %291 : vector<1x256xi1> to vector<3x256xi1>
    %293 = vector.broadcast %cst_75 : f32 to vector<3x256xf32>
    %294 = arith.select %292, %290, %293 : vector<3x256xi1>, vector<3x256xf32>
    %c28 = arith.constant 28 : index
    %295 = memref.load %arg2[%c28] : memref<144xf32, #tpu.memory_space<smem>>
    %296 = vector.broadcast %295 : f32 to vector<3x256xf32>
    %297 = arith.mulf %294, %296 : vector<3x256xf32>
    %298 = arith.addf %277, %297 : vector<3x256xf32>
    %c29 = arith.constant 29 : index
    %299 = memref.load %arg2[%c29] : memref<144xf32, #tpu.memory_space<smem>>
    %300 = vector.broadcast %299 : f32 to vector<3x256xf32>
    %301 = arith.mulf %294, %300 : vector<3x256xf32>
    %302 = arith.addf %281, %301 : vector<3x256xf32>
    %c30 = arith.constant 30 : index
    %303 = memref.load %arg2[%c30] : memref<144xf32, #tpu.memory_space<smem>>
    %304 = vector.broadcast %303 : f32 to vector<3x256xf32>
    %305 = arith.mulf %294, %304 : vector<3x256xf32>
    %306 = arith.addf %285, %305 : vector<3x256xf32>
    %c31 = arith.constant 31 : index
    %307 = memref.load %arg2[%c31] : memref<144xf32, #tpu.memory_space<smem>>
    %308 = vector.broadcast %307 : f32 to vector<3x256xf32>
    %309 = arith.mulf %294, %308 : vector<3x256xf32>
    %310 = arith.addf %289, %309 : vector<3x256xf32>
    %c15_i32_76 = arith.constant 15 : i32
    %311 = tpu.dynamic_rotate %140 by %c15_i32_76 dim 1 : vector<3x256xf32>, i32 -> vector<3x256xf32>
    %cst_77 = arith.constant 0.000000e+00 : f32
    %312 = vector.shape_cast %53 : vector<1x256xi1> to vector<1x256xi1>
    %313 = vector.broadcast %312 : vector<1x256xi1> to vector<3x256xi1>
    %314 = vector.broadcast %cst_77 : f32 to vector<3x256xf32>
    %315 = arith.select %313, %311, %314 : vector<3x256xi1>, vector<3x256xf32>
    %c32 = arith.constant 32 : index
    %316 = memref.load %arg2[%c32] : memref<144xf32, #tpu.memory_space<smem>>
    %317 = vector.broadcast %316 : f32 to vector<3x256xf32>
    %318 = arith.mulf %315, %317 : vector<3x256xf32>
    %319 = arith.addf %298, %318 : vector<3x256xf32>
    %c33 = arith.constant 33 : index
    %320 = memref.load %arg2[%c33] : memref<144xf32, #tpu.memory_space<smem>>
    %321 = vector.broadcast %320 : f32 to vector<3x256xf32>
    %322 = arith.mulf %315, %321 : vector<3x256xf32>
    %323 = arith.addf %302, %322 : vector<3x256xf32>
    %c34 = arith.constant 34 : index
    %324 = memref.load %arg2[%c34] : memref<144xf32, #tpu.memory_space<smem>>
    %325 = vector.broadcast %324 : f32 to vector<3x256xf32>
    %326 = arith.mulf %315, %325 : vector<3x256xf32>
    %327 = arith.addf %306, %326 : vector<3x256xf32>
    %c35 = arith.constant 35 : index
    %328 = memref.load %arg2[%c35] : memref<144xf32, #tpu.memory_space<smem>>
    %329 = vector.broadcast %328 : f32 to vector<3x256xf32>
    %330 = arith.mulf %315, %329 : vector<3x256xf32>
    %331 = arith.addf %310, %330 : vector<3x256xf32>
    %c15_i32_78 = arith.constant 15 : i32
    %332 = tpu.dynamic_rotate %142 by %c15_i32_78 dim 1 : vector<3x256xf32>, i32 -> vector<3x256xf32>
    %cst_79 = arith.constant 0.000000e+00 : f32
    %333 = vector.shape_cast %53 : vector<1x256xi1> to vector<1x256xi1>
    %334 = vector.broadcast %333 : vector<1x256xi1> to vector<3x256xi1>
    %335 = vector.broadcast %cst_79 : f32 to vector<3x256xf32>
    %336 = arith.select %334, %332, %335 : vector<3x256xi1>, vector<3x256xf32>
    %c36 = arith.constant 36 : index
    %337 = memref.load %arg2[%c36] : memref<144xf32, #tpu.memory_space<smem>>
    %338 = vector.broadcast %337 : f32 to vector<3x256xf32>
    %339 = arith.mulf %336, %338 : vector<3x256xf32>
    %340 = arith.addf %319, %339 : vector<3x256xf32>
    %c37 = arith.constant 37 : index
    %341 = memref.load %arg2[%c37] : memref<144xf32, #tpu.memory_space<smem>>
    %342 = vector.broadcast %341 : f32 to vector<3x256xf32>
    %343 = arith.mulf %336, %342 : vector<3x256xf32>
    %344 = arith.addf %323, %343 : vector<3x256xf32>
    %c38 = arith.constant 38 : index
    %345 = memref.load %arg2[%c38] : memref<144xf32, #tpu.memory_space<smem>>
    %346 = vector.broadcast %345 : f32 to vector<3x256xf32>
    %347 = arith.mulf %336, %346 : vector<3x256xf32>
    %348 = arith.addf %327, %347 : vector<3x256xf32>
    %c39 = arith.constant 39 : index
    %349 = memref.load %arg2[%c39] : memref<144xf32, #tpu.memory_space<smem>>
    %350 = vector.broadcast %349 : f32 to vector<3x256xf32>
    %351 = arith.mulf %336, %350 : vector<3x256xf32>
    %352 = arith.addf %331, %351 : vector<3x256xf32>
    %c15_i32_80 = arith.constant 15 : i32
    %353 = tpu.dynamic_rotate %144 by %c15_i32_80 dim 1 : vector<3x256xf32>, i32 -> vector<3x256xf32>
    %cst_81 = arith.constant 0.000000e+00 : f32
    %354 = vector.shape_cast %53 : vector<1x256xi1> to vector<1x256xi1>
    %355 = vector.broadcast %354 : vector<1x256xi1> to vector<3x256xi1>
    %356 = vector.broadcast %cst_81 : f32 to vector<3x256xf32>
    %357 = arith.select %355, %353, %356 : vector<3x256xi1>, vector<3x256xf32>
    %c40 = arith.constant 40 : index
    %358 = memref.load %arg2[%c40] : memref<144xf32, #tpu.memory_space<smem>>
    %359 = vector.broadcast %358 : f32 to vector<3x256xf32>
    %360 = arith.mulf %357, %359 : vector<3x256xf32>
    %361 = arith.addf %340, %360 : vector<3x256xf32>
    %c41 = arith.constant 41 : index
    %362 = memref.load %arg2[%c41] : memref<144xf32, #tpu.memory_space<smem>>
    %363 = vector.broadcast %362 : f32 to vector<3x256xf32>
    %364 = arith.mulf %357, %363 : vector<3x256xf32>
    %365 = arith.addf %344, %364 : vector<3x256xf32>
    %c42 = arith.constant 42 : index
    %366 = memref.load %arg2[%c42] : memref<144xf32, #tpu.memory_space<smem>>
    %367 = vector.broadcast %366 : f32 to vector<3x256xf32>
    %368 = arith.mulf %357, %367 : vector<3x256xf32>
    %369 = arith.addf %348, %368 : vector<3x256xf32>
    %c43 = arith.constant 43 : index
    %370 = memref.load %arg2[%c43] : memref<144xf32, #tpu.memory_space<smem>>
    %371 = vector.broadcast %370 : f32 to vector<3x256xf32>
    %372 = arith.mulf %357, %371 : vector<3x256xf32>
    %373 = arith.addf %352, %372 : vector<3x256xf32>
    %c15_i32_82 = arith.constant 15 : i32
    %374 = tpu.dynamic_rotate %146 by %c15_i32_82 dim 1 : vector<3x256xf32>, i32 -> vector<3x256xf32>
    %cst_83 = arith.constant 0.000000e+00 : f32
    %375 = vector.shape_cast %53 : vector<1x256xi1> to vector<1x256xi1>
    %376 = vector.broadcast %375 : vector<1x256xi1> to vector<3x256xi1>
    %377 = vector.broadcast %cst_83 : f32 to vector<3x256xf32>
    %378 = arith.select %376, %374, %377 : vector<3x256xi1>, vector<3x256xf32>
    %c44 = arith.constant 44 : index
    %379 = memref.load %arg2[%c44] : memref<144xf32, #tpu.memory_space<smem>>
    %380 = vector.broadcast %379 : f32 to vector<3x256xf32>
    %381 = arith.mulf %378, %380 : vector<3x256xf32>
    %382 = arith.addf %361, %381 : vector<3x256xf32>
    %c45 = arith.constant 45 : index
    %383 = memref.load %arg2[%c45] : memref<144xf32, #tpu.memory_space<smem>>
    %384 = vector.broadcast %383 : f32 to vector<3x256xf32>
    %385 = arith.mulf %378, %384 : vector<3x256xf32>
    %386 = arith.addf %365, %385 : vector<3x256xf32>
    %c46 = arith.constant 46 : index
    %387 = memref.load %arg2[%c46] : memref<144xf32, #tpu.memory_space<smem>>
    %388 = vector.broadcast %387 : f32 to vector<3x256xf32>
    %389 = arith.mulf %378, %388 : vector<3x256xf32>
    %390 = arith.addf %369, %389 : vector<3x256xf32>
    %c47 = arith.constant 47 : index
    %391 = memref.load %arg2[%c47] : memref<144xf32, #tpu.memory_space<smem>>
    %392 = vector.broadcast %391 : f32 to vector<3x256xf32>
    %393 = arith.mulf %378, %392 : vector<3x256xf32>
    %394 = arith.addf %373, %393 : vector<3x256xf32>
    %c1_i32_84 = arith.constant 1 : i32
    %395 = tpu.dynamic_rotate %140 by %c1_i32_84 dim 1 : vector<3x256xf32>, i32 -> vector<3x256xf32>
    %cst_85 = arith.constant 0.000000e+00 : f32
    %396 = vector.shape_cast %70 : vector<1x256xi1> to vector<1x256xi1>
    %397 = vector.broadcast %396 : vector<1x256xi1> to vector<3x256xi1>
    %398 = vector.broadcast %cst_85 : f32 to vector<3x256xf32>
    %399 = arith.select %397, %395, %398 : vector<3x256xi1>, vector<3x256xf32>
    %c48 = arith.constant 48 : index
    %400 = memref.load %arg2[%c48] : memref<144xf32, #tpu.memory_space<smem>>
    %401 = vector.broadcast %400 : f32 to vector<3x256xf32>
    %402 = arith.mulf %399, %401 : vector<3x256xf32>
    %403 = arith.addf %382, %402 : vector<3x256xf32>
    %c49 = arith.constant 49 : index
    %404 = memref.load %arg2[%c49] : memref<144xf32, #tpu.memory_space<smem>>
    %405 = vector.broadcast %404 : f32 to vector<3x256xf32>
    %406 = arith.mulf %399, %405 : vector<3x256xf32>
    %407 = arith.addf %386, %406 : vector<3x256xf32>
    %c50 = arith.constant 50 : index
    %408 = memref.load %arg2[%c50] : memref<144xf32, #tpu.memory_space<smem>>
    %409 = vector.broadcast %408 : f32 to vector<3x256xf32>
    %410 = arith.mulf %399, %409 : vector<3x256xf32>
    %411 = arith.addf %390, %410 : vector<3x256xf32>
    %c51 = arith.constant 51 : index
    %412 = memref.load %arg2[%c51] : memref<144xf32, #tpu.memory_space<smem>>
    %413 = vector.broadcast %412 : f32 to vector<3x256xf32>
    %414 = arith.mulf %399, %413 : vector<3x256xf32>
    %415 = arith.addf %394, %414 : vector<3x256xf32>
    %c1_i32_86 = arith.constant 1 : i32
    %416 = tpu.dynamic_rotate %142 by %c1_i32_86 dim 1 : vector<3x256xf32>, i32 -> vector<3x256xf32>
    %cst_87 = arith.constant 0.000000e+00 : f32
    %417 = vector.shape_cast %70 : vector<1x256xi1> to vector<1x256xi1>
    %418 = vector.broadcast %417 : vector<1x256xi1> to vector<3x256xi1>
    %419 = vector.broadcast %cst_87 : f32 to vector<3x256xf32>
    %420 = arith.select %418, %416, %419 : vector<3x256xi1>, vector<3x256xf32>
    %c52 = arith.constant 52 : index
    %421 = memref.load %arg2[%c52] : memref<144xf32, #tpu.memory_space<smem>>
    %422 = vector.broadcast %421 : f32 to vector<3x256xf32>
    %423 = arith.mulf %420, %422 : vector<3x256xf32>
    %424 = arith.addf %403, %423 : vector<3x256xf32>
    %c53 = arith.constant 53 : index
    %425 = memref.load %arg2[%c53] : memref<144xf32, #tpu.memory_space<smem>>
    %426 = vector.broadcast %425 : f32 to vector<3x256xf32>
    %427 = arith.mulf %420, %426 : vector<3x256xf32>
    %428 = arith.addf %407, %427 : vector<3x256xf32>
    %c54 = arith.constant 54 : index
    %429 = memref.load %arg2[%c54] : memref<144xf32, #tpu.memory_space<smem>>
    %430 = vector.broadcast %429 : f32 to vector<3x256xf32>
    %431 = arith.mulf %420, %430 : vector<3x256xf32>
    %432 = arith.addf %411, %431 : vector<3x256xf32>
    %c55 = arith.constant 55 : index
    %433 = memref.load %arg2[%c55] : memref<144xf32, #tpu.memory_space<smem>>
    %434 = vector.broadcast %433 : f32 to vector<3x256xf32>
    %435 = arith.mulf %420, %434 : vector<3x256xf32>
    %436 = arith.addf %415, %435 : vector<3x256xf32>
    %c1_i32_88 = arith.constant 1 : i32
    %437 = tpu.dynamic_rotate %144 by %c1_i32_88 dim 1 : vector<3x256xf32>, i32 -> vector<3x256xf32>
    %cst_89 = arith.constant 0.000000e+00 : f32
    %438 = vector.shape_cast %70 : vector<1x256xi1> to vector<1x256xi1>
    %439 = vector.broadcast %438 : vector<1x256xi1> to vector<3x256xi1>
    %440 = vector.broadcast %cst_89 : f32 to vector<3x256xf32>
    %441 = arith.select %439, %437, %440 : vector<3x256xi1>, vector<3x256xf32>
    %c56 = arith.constant 56 : index
    %442 = memref.load %arg2[%c56] : memref<144xf32, #tpu.memory_space<smem>>
    %443 = vector.broadcast %442 : f32 to vector<3x256xf32>
    %444 = arith.mulf %441, %443 : vector<3x256xf32>
    %445 = arith.addf %424, %444 : vector<3x256xf32>
    %c57 = arith.constant 57 : index
    %446 = memref.load %arg2[%c57] : memref<144xf32, #tpu.memory_space<smem>>
    %447 = vector.broadcast %446 : f32 to vector<3x256xf32>
    %448 = arith.mulf %441, %447 : vector<3x256xf32>
    %449 = arith.addf %428, %448 : vector<3x256xf32>
    %c58 = arith.constant 58 : index
    %450 = memref.load %arg2[%c58] : memref<144xf32, #tpu.memory_space<smem>>
    %451 = vector.broadcast %450 : f32 to vector<3x256xf32>
    %452 = arith.mulf %441, %451 : vector<3x256xf32>
    %453 = arith.addf %432, %452 : vector<3x256xf32>
    %c59 = arith.constant 59 : index
    %454 = memref.load %arg2[%c59] : memref<144xf32, #tpu.memory_space<smem>>
    %455 = vector.broadcast %454 : f32 to vector<3x256xf32>
    %456 = arith.mulf %441, %455 : vector<3x256xf32>
    %457 = arith.addf %436, %456 : vector<3x256xf32>
    %c1_i32_90 = arith.constant 1 : i32
    %458 = tpu.dynamic_rotate %146 by %c1_i32_90 dim 1 : vector<3x256xf32>, i32 -> vector<3x256xf32>
    %cst_91 = arith.constant 0.000000e+00 : f32
    %459 = vector.shape_cast %70 : vector<1x256xi1> to vector<1x256xi1>
    %460 = vector.broadcast %459 : vector<1x256xi1> to vector<3x256xi1>
    %461 = vector.broadcast %cst_91 : f32 to vector<3x256xf32>
    %462 = arith.select %460, %458, %461 : vector<3x256xi1>, vector<3x256xf32>
    %c60 = arith.constant 60 : index
    %463 = memref.load %arg2[%c60] : memref<144xf32, #tpu.memory_space<smem>>
    %464 = vector.broadcast %463 : f32 to vector<3x256xf32>
    %465 = arith.mulf %462, %464 : vector<3x256xf32>
    %466 = arith.addf %445, %465 : vector<3x256xf32>
    %c61 = arith.constant 61 : index
    %467 = memref.load %arg2[%c61] : memref<144xf32, #tpu.memory_space<smem>>
    %468 = vector.broadcast %467 : f32 to vector<3x256xf32>
    %469 = arith.mulf %462, %468 : vector<3x256xf32>
    %470 = arith.addf %449, %469 : vector<3x256xf32>
    %c62 = arith.constant 62 : index
    %471 = memref.load %arg2[%c62] : memref<144xf32, #tpu.memory_space<smem>>
    %472 = vector.broadcast %471 : f32 to vector<3x256xf32>
    %473 = arith.mulf %462, %472 : vector<3x256xf32>
    %474 = arith.addf %453, %473 : vector<3x256xf32>
    %c63 = arith.constant 63 : index
    %475 = memref.load %arg2[%c63] : memref<144xf32, #tpu.memory_space<smem>>
    %476 = vector.broadcast %475 : f32 to vector<3x256xf32>
    %477 = arith.mulf %462, %476 : vector<3x256xf32>
    %478 = arith.addf %457, %477 : vector<3x256xf32>
    %c64 = arith.constant 64 : index
    %479 = memref.load %arg2[%c64] : memref<144xf32, #tpu.memory_space<smem>>
    %480 = vector.broadcast %479 : f32 to vector<3x256xf32>
    %481 = arith.mulf %140, %480 : vector<3x256xf32>
    %482 = arith.addf %466, %481 : vector<3x256xf32>
    %c65 = arith.constant 65 : index
    %483 = memref.load %arg2[%c65] : memref<144xf32, #tpu.memory_space<smem>>
    %484 = vector.broadcast %483 : f32 to vector<3x256xf32>
    %485 = arith.mulf %140, %484 : vector<3x256xf32>
    %486 = arith.addf %470, %485 : vector<3x256xf32>
    %c66 = arith.constant 66 : index
    %487 = memref.load %arg2[%c66] : memref<144xf32, #tpu.memory_space<smem>>
    %488 = vector.broadcast %487 : f32 to vector<3x256xf32>
    %489 = arith.mulf %140, %488 : vector<3x256xf32>
    %490 = arith.addf %474, %489 : vector<3x256xf32>
    %c67 = arith.constant 67 : index
    %491 = memref.load %arg2[%c67] : memref<144xf32, #tpu.memory_space<smem>>
    %492 = vector.broadcast %491 : f32 to vector<3x256xf32>
    %493 = arith.mulf %140, %492 : vector<3x256xf32>
    %494 = arith.addf %478, %493 : vector<3x256xf32>
    %c68 = arith.constant 68 : index
    %495 = memref.load %arg2[%c68] : memref<144xf32, #tpu.memory_space<smem>>
    %496 = vector.broadcast %495 : f32 to vector<3x256xf32>
    %497 = arith.mulf %142, %496 : vector<3x256xf32>
    %498 = arith.addf %482, %497 : vector<3x256xf32>
    %c69 = arith.constant 69 : index
    %499 = memref.load %arg2[%c69] : memref<144xf32, #tpu.memory_space<smem>>
    %500 = vector.broadcast %499 : f32 to vector<3x256xf32>
    %501 = arith.mulf %142, %500 : vector<3x256xf32>
    %502 = arith.addf %486, %501 : vector<3x256xf32>
    %c70 = arith.constant 70 : index
    %503 = memref.load %arg2[%c70] : memref<144xf32, #tpu.memory_space<smem>>
    %504 = vector.broadcast %503 : f32 to vector<3x256xf32>
    %505 = arith.mulf %142, %504 : vector<3x256xf32>
    %506 = arith.addf %490, %505 : vector<3x256xf32>
    %c71 = arith.constant 71 : index
    %507 = memref.load %arg2[%c71] : memref<144xf32, #tpu.memory_space<smem>>
    %508 = vector.broadcast %507 : f32 to vector<3x256xf32>
    %509 = arith.mulf %142, %508 : vector<3x256xf32>
    %510 = arith.addf %494, %509 : vector<3x256xf32>
    %c72 = arith.constant 72 : index
    %511 = memref.load %arg2[%c72] : memref<144xf32, #tpu.memory_space<smem>>
    %512 = vector.broadcast %511 : f32 to vector<3x256xf32>
    %513 = arith.mulf %144, %512 : vector<3x256xf32>
    %514 = arith.addf %498, %513 : vector<3x256xf32>
    %c73 = arith.constant 73 : index
    %515 = memref.load %arg2[%c73] : memref<144xf32, #tpu.memory_space<smem>>
    %516 = vector.broadcast %515 : f32 to vector<3x256xf32>
    %517 = arith.mulf %144, %516 : vector<3x256xf32>
    %518 = arith.addf %502, %517 : vector<3x256xf32>
    %c74 = arith.constant 74 : index
    %519 = memref.load %arg2[%c74] : memref<144xf32, #tpu.memory_space<smem>>
    %520 = vector.broadcast %519 : f32 to vector<3x256xf32>
    %521 = arith.mulf %144, %520 : vector<3x256xf32>
    %522 = arith.addf %506, %521 : vector<3x256xf32>
    %c75 = arith.constant 75 : index
    %523 = memref.load %arg2[%c75] : memref<144xf32, #tpu.memory_space<smem>>
    %524 = vector.broadcast %523 : f32 to vector<3x256xf32>
    %525 = arith.mulf %144, %524 : vector<3x256xf32>
    %526 = arith.addf %510, %525 : vector<3x256xf32>
    %c76 = arith.constant 76 : index
    %527 = memref.load %arg2[%c76] : memref<144xf32, #tpu.memory_space<smem>>
    %528 = vector.broadcast %527 : f32 to vector<3x256xf32>
    %529 = arith.mulf %146, %528 : vector<3x256xf32>
    %530 = arith.addf %514, %529 : vector<3x256xf32>
    %c77 = arith.constant 77 : index
    %531 = memref.load %arg2[%c77] : memref<144xf32, #tpu.memory_space<smem>>
    %532 = vector.broadcast %531 : f32 to vector<3x256xf32>
    %533 = arith.mulf %146, %532 : vector<3x256xf32>
    %534 = arith.addf %518, %533 : vector<3x256xf32>
    %c78 = arith.constant 78 : index
    %535 = memref.load %arg2[%c78] : memref<144xf32, #tpu.memory_space<smem>>
    %536 = vector.broadcast %535 : f32 to vector<3x256xf32>
    %537 = arith.mulf %146, %536 : vector<3x256xf32>
    %538 = arith.addf %522, %537 : vector<3x256xf32>
    %c79 = arith.constant 79 : index
    %539 = memref.load %arg2[%c79] : memref<144xf32, #tpu.memory_space<smem>>
    %540 = vector.broadcast %539 : f32 to vector<3x256xf32>
    %541 = arith.mulf %146, %540 : vector<3x256xf32>
    %542 = arith.addf %526, %541 : vector<3x256xf32>
    %c255_i32 = arith.constant 255 : i32
    %543 = tpu.dynamic_rotate %140 by %c255_i32 dim 1 : vector<3x256xf32>, i32 -> vector<3x256xf32>
    %cst_92 = arith.constant 0.000000e+00 : f32
    %544 = vector.shape_cast %87 : vector<1x256xi1> to vector<1x256xi1>
    %545 = vector.broadcast %544 : vector<1x256xi1> to vector<3x256xi1>
    %546 = vector.broadcast %cst_92 : f32 to vector<3x256xf32>
    %547 = arith.select %545, %543, %546 : vector<3x256xi1>, vector<3x256xf32>
    %c80 = arith.constant 80 : index
    %548 = memref.load %arg2[%c80] : memref<144xf32, #tpu.memory_space<smem>>
    %549 = vector.broadcast %548 : f32 to vector<3x256xf32>
    %550 = arith.mulf %547, %549 : vector<3x256xf32>
    %551 = arith.addf %530, %550 : vector<3x256xf32>
    %c81 = arith.constant 81 : index
    %552 = memref.load %arg2[%c81] : memref<144xf32, #tpu.memory_space<smem>>
    %553 = vector.broadcast %552 : f32 to vector<3x256xf32>
    %554 = arith.mulf %547, %553 : vector<3x256xf32>
    %555 = arith.addf %534, %554 : vector<3x256xf32>
    %c82 = arith.constant 82 : index
    %556 = memref.load %arg2[%c82] : memref<144xf32, #tpu.memory_space<smem>>
    %557 = vector.broadcast %556 : f32 to vector<3x256xf32>
    %558 = arith.mulf %547, %557 : vector<3x256xf32>
    %559 = arith.addf %538, %558 : vector<3x256xf32>
    %c83 = arith.constant 83 : index
    %560 = memref.load %arg2[%c83] : memref<144xf32, #tpu.memory_space<smem>>
    %561 = vector.broadcast %560 : f32 to vector<3x256xf32>
    %562 = arith.mulf %547, %561 : vector<3x256xf32>
    %563 = arith.addf %542, %562 : vector<3x256xf32>
    %c255_i32_93 = arith.constant 255 : i32
    %564 = tpu.dynamic_rotate %142 by %c255_i32_93 dim 1 : vector<3x256xf32>, i32 -> vector<3x256xf32>
    %cst_94 = arith.constant 0.000000e+00 : f32
    %565 = vector.shape_cast %87 : vector<1x256xi1> to vector<1x256xi1>
    %566 = vector.broadcast %565 : vector<1x256xi1> to vector<3x256xi1>
    %567 = vector.broadcast %cst_94 : f32 to vector<3x256xf32>
    %568 = arith.select %566, %564, %567 : vector<3x256xi1>, vector<3x256xf32>
    %c84 = arith.constant 84 : index
    %569 = memref.load %arg2[%c84] : memref<144xf32, #tpu.memory_space<smem>>
    %570 = vector.broadcast %569 : f32 to vector<3x256xf32>
    %571 = arith.mulf %568, %570 : vector<3x256xf32>
    %572 = arith.addf %551, %571 : vector<3x256xf32>
    %c85 = arith.constant 85 : index
    %573 = memref.load %arg2[%c85] : memref<144xf32, #tpu.memory_space<smem>>
    %574 = vector.broadcast %573 : f32 to vector<3x256xf32>
    %575 = arith.mulf %568, %574 : vector<3x256xf32>
    %576 = arith.addf %555, %575 : vector<3x256xf32>
    %c86 = arith.constant 86 : index
    %577 = memref.load %arg2[%c86] : memref<144xf32, #tpu.memory_space<smem>>
    %578 = vector.broadcast %577 : f32 to vector<3x256xf32>
    %579 = arith.mulf %568, %578 : vector<3x256xf32>
    %580 = arith.addf %559, %579 : vector<3x256xf32>
    %c87 = arith.constant 87 : index
    %581 = memref.load %arg2[%c87] : memref<144xf32, #tpu.memory_space<smem>>
    %582 = vector.broadcast %581 : f32 to vector<3x256xf32>
    %583 = arith.mulf %568, %582 : vector<3x256xf32>
    %584 = arith.addf %563, %583 : vector<3x256xf32>
    %c255_i32_95 = arith.constant 255 : i32
    %585 = tpu.dynamic_rotate %144 by %c255_i32_95 dim 1 : vector<3x256xf32>, i32 -> vector<3x256xf32>
    %cst_96 = arith.constant 0.000000e+00 : f32
    %586 = vector.shape_cast %87 : vector<1x256xi1> to vector<1x256xi1>
    %587 = vector.broadcast %586 : vector<1x256xi1> to vector<3x256xi1>
    %588 = vector.broadcast %cst_96 : f32 to vector<3x256xf32>
    %589 = arith.select %587, %585, %588 : vector<3x256xi1>, vector<3x256xf32>
    %c88 = arith.constant 88 : index
    %590 = memref.load %arg2[%c88] : memref<144xf32, #tpu.memory_space<smem>>
    %591 = vector.broadcast %590 : f32 to vector<3x256xf32>
    %592 = arith.mulf %589, %591 : vector<3x256xf32>
    %593 = arith.addf %572, %592 : vector<3x256xf32>
    %c89 = arith.constant 89 : index
    %594 = memref.load %arg2[%c89] : memref<144xf32, #tpu.memory_space<smem>>
    %595 = vector.broadcast %594 : f32 to vector<3x256xf32>
    %596 = arith.mulf %589, %595 : vector<3x256xf32>
    %597 = arith.addf %576, %596 : vector<3x256xf32>
    %c90 = arith.constant 90 : index
    %598 = memref.load %arg2[%c90] : memref<144xf32, #tpu.memory_space<smem>>
    %599 = vector.broadcast %598 : f32 to vector<3x256xf32>
    %600 = arith.mulf %589, %599 : vector<3x256xf32>
    %601 = arith.addf %580, %600 : vector<3x256xf32>
    %c91 = arith.constant 91 : index
    %602 = memref.load %arg2[%c91] : memref<144xf32, #tpu.memory_space<smem>>
    %603 = vector.broadcast %602 : f32 to vector<3x256xf32>
    %604 = arith.mulf %589, %603 : vector<3x256xf32>
    %605 = arith.addf %584, %604 : vector<3x256xf32>
    %c255_i32_97 = arith.constant 255 : i32
    %606 = tpu.dynamic_rotate %146 by %c255_i32_97 dim 1 : vector<3x256xf32>, i32 -> vector<3x256xf32>
    %cst_98 = arith.constant 0.000000e+00 : f32
    %607 = vector.shape_cast %87 : vector<1x256xi1> to vector<1x256xi1>
    %608 = vector.broadcast %607 : vector<1x256xi1> to vector<3x256xi1>
    %609 = vector.broadcast %cst_98 : f32 to vector<3x256xf32>
    %610 = arith.select %608, %606, %609 : vector<3x256xi1>, vector<3x256xf32>
    %c92 = arith.constant 92 : index
    %611 = memref.load %arg2[%c92] : memref<144xf32, #tpu.memory_space<smem>>
    %612 = vector.broadcast %611 : f32 to vector<3x256xf32>
    %613 = arith.mulf %610, %612 : vector<3x256xf32>
    %614 = arith.addf %593, %613 : vector<3x256xf32>
    %c93 = arith.constant 93 : index
    %615 = memref.load %arg2[%c93] : memref<144xf32, #tpu.memory_space<smem>>
    %616 = vector.broadcast %615 : f32 to vector<3x256xf32>
    %617 = arith.mulf %610, %616 : vector<3x256xf32>
    %618 = arith.addf %597, %617 : vector<3x256xf32>
    %c94 = arith.constant 94 : index
    %619 = memref.load %arg2[%c94] : memref<144xf32, #tpu.memory_space<smem>>
    %620 = vector.broadcast %619 : f32 to vector<3x256xf32>
    %621 = arith.mulf %610, %620 : vector<3x256xf32>
    %622 = arith.addf %601, %621 : vector<3x256xf32>
    %c95 = arith.constant 95 : index
    %623 = memref.load %arg2[%c95] : memref<144xf32, #tpu.memory_space<smem>>
    %624 = vector.broadcast %623 : f32 to vector<3x256xf32>
    %625 = arith.mulf %610, %624 : vector<3x256xf32>
    %626 = arith.addf %605, %625 : vector<3x256xf32>
    %c241_i32 = arith.constant 241 : i32
    %627 = tpu.dynamic_rotate %140 by %c241_i32 dim 1 : vector<3x256xf32>, i32 -> vector<3x256xf32>
    %cst_99 = arith.constant 0.000000e+00 : f32
    %628 = vector.shape_cast %104 : vector<1x256xi1> to vector<1x256xi1>
    %629 = vector.broadcast %628 : vector<1x256xi1> to vector<3x256xi1>
    %630 = vector.broadcast %cst_99 : f32 to vector<3x256xf32>
    %631 = arith.select %629, %627, %630 : vector<3x256xi1>, vector<3x256xf32>
    %c96 = arith.constant 96 : index
    %632 = memref.load %arg2[%c96] : memref<144xf32, #tpu.memory_space<smem>>
    %633 = vector.broadcast %632 : f32 to vector<3x256xf32>
    %634 = arith.mulf %631, %633 : vector<3x256xf32>
    %635 = arith.addf %614, %634 : vector<3x256xf32>
    %c97 = arith.constant 97 : index
    %636 = memref.load %arg2[%c97] : memref<144xf32, #tpu.memory_space<smem>>
    %637 = vector.broadcast %636 : f32 to vector<3x256xf32>
    %638 = arith.mulf %631, %637 : vector<3x256xf32>
    %639 = arith.addf %618, %638 : vector<3x256xf32>
    %c98 = arith.constant 98 : index
    %640 = memref.load %arg2[%c98] : memref<144xf32, #tpu.memory_space<smem>>
    %641 = vector.broadcast %640 : f32 to vector<3x256xf32>
    %642 = arith.mulf %631, %641 : vector<3x256xf32>
    %643 = arith.addf %622, %642 : vector<3x256xf32>
    %c99 = arith.constant 99 : index
    %644 = memref.load %arg2[%c99] : memref<144xf32, #tpu.memory_space<smem>>
    %645 = vector.broadcast %644 : f32 to vector<3x256xf32>
    %646 = arith.mulf %631, %645 : vector<3x256xf32>
    %647 = arith.addf %626, %646 : vector<3x256xf32>
    %c241_i32_100 = arith.constant 241 : i32
    %648 = tpu.dynamic_rotate %142 by %c241_i32_100 dim 1 : vector<3x256xf32>, i32 -> vector<3x256xf32>
    %cst_101 = arith.constant 0.000000e+00 : f32
    %649 = vector.shape_cast %104 : vector<1x256xi1> to vector<1x256xi1>
    %650 = vector.broadcast %649 : vector<1x256xi1> to vector<3x256xi1>
    %651 = vector.broadcast %cst_101 : f32 to vector<3x256xf32>
    %652 = arith.select %650, %648, %651 : vector<3x256xi1>, vector<3x256xf32>
    %c100 = arith.constant 100 : index
    %653 = memref.load %arg2[%c100] : memref<144xf32, #tpu.memory_space<smem>>
    %654 = vector.broadcast %653 : f32 to vector<3x256xf32>
    %655 = arith.mulf %652, %654 : vector<3x256xf32>
    %656 = arith.addf %635, %655 : vector<3x256xf32>
    %c101 = arith.constant 101 : index
    %657 = memref.load %arg2[%c101] : memref<144xf32, #tpu.memory_space<smem>>
    %658 = vector.broadcast %657 : f32 to vector<3x256xf32>
    %659 = arith.mulf %652, %658 : vector<3x256xf32>
    %660 = arith.addf %639, %659 : vector<3x256xf32>
    %c102 = arith.constant 102 : index
    %661 = memref.load %arg2[%c102] : memref<144xf32, #tpu.memory_space<smem>>
    %662 = vector.broadcast %661 : f32 to vector<3x256xf32>
    %663 = arith.mulf %652, %662 : vector<3x256xf32>
    %664 = arith.addf %643, %663 : vector<3x256xf32>
    %c103 = arith.constant 103 : index
    %665 = memref.load %arg2[%c103] : memref<144xf32, #tpu.memory_space<smem>>
    %666 = vector.broadcast %665 : f32 to vector<3x256xf32>
    %667 = arith.mulf %652, %666 : vector<3x256xf32>
    %668 = arith.addf %647, %667 : vector<3x256xf32>
    %c241_i32_102 = arith.constant 241 : i32
    %669 = tpu.dynamic_rotate %144 by %c241_i32_102 dim 1 : vector<3x256xf32>, i32 -> vector<3x256xf32>
    %cst_103 = arith.constant 0.000000e+00 : f32
    %670 = vector.shape_cast %104 : vector<1x256xi1> to vector<1x256xi1>
    %671 = vector.broadcast %670 : vector<1x256xi1> to vector<3x256xi1>
    %672 = vector.broadcast %cst_103 : f32 to vector<3x256xf32>
    %673 = arith.select %671, %669, %672 : vector<3x256xi1>, vector<3x256xf32>
    %c104 = arith.constant 104 : index
    %674 = memref.load %arg2[%c104] : memref<144xf32, #tpu.memory_space<smem>>
    %675 = vector.broadcast %674 : f32 to vector<3x256xf32>
    %676 = arith.mulf %673, %675 : vector<3x256xf32>
    %677 = arith.addf %656, %676 : vector<3x256xf32>
    %c105 = arith.constant 105 : index
    %678 = memref.load %arg2[%c105] : memref<144xf32, #tpu.memory_space<smem>>
    %679 = vector.broadcast %678 : f32 to vector<3x256xf32>
    %680 = arith.mulf %673, %679 : vector<3x256xf32>
    %681 = arith.addf %660, %680 : vector<3x256xf32>
    %c106 = arith.constant 106 : index
    %682 = memref.load %arg2[%c106] : memref<144xf32, #tpu.memory_space<smem>>
    %683 = vector.broadcast %682 : f32 to vector<3x256xf32>
    %684 = arith.mulf %673, %683 : vector<3x256xf32>
    %685 = arith.addf %664, %684 : vector<3x256xf32>
    %c107 = arith.constant 107 : index
    %686 = memref.load %arg2[%c107] : memref<144xf32, #tpu.memory_space<smem>>
    %687 = vector.broadcast %686 : f32 to vector<3x256xf32>
    %688 = arith.mulf %673, %687 : vector<3x256xf32>
    %689 = arith.addf %668, %688 : vector<3x256xf32>
    %c241_i32_104 = arith.constant 241 : i32
    %690 = tpu.dynamic_rotate %146 by %c241_i32_104 dim 1 : vector<3x256xf32>, i32 -> vector<3x256xf32>
    %cst_105 = arith.constant 0.000000e+00 : f32
    %691 = vector.shape_cast %104 : vector<1x256xi1> to vector<1x256xi1>
    %692 = vector.broadcast %691 : vector<1x256xi1> to vector<3x256xi1>
    %693 = vector.broadcast %cst_105 : f32 to vector<3x256xf32>
    %694 = arith.select %692, %690, %693 : vector<3x256xi1>, vector<3x256xf32>
    %c108 = arith.constant 108 : index
    %695 = memref.load %arg2[%c108] : memref<144xf32, #tpu.memory_space<smem>>
    %696 = vector.broadcast %695 : f32 to vector<3x256xf32>
    %697 = arith.mulf %694, %696 : vector<3x256xf32>
    %698 = arith.addf %677, %697 : vector<3x256xf32>
    %c109 = arith.constant 109 : index
    %699 = memref.load %arg2[%c109] : memref<144xf32, #tpu.memory_space<smem>>
    %700 = vector.broadcast %699 : f32 to vector<3x256xf32>
    %701 = arith.mulf %694, %700 : vector<3x256xf32>
    %702 = arith.addf %681, %701 : vector<3x256xf32>
    %c110 = arith.constant 110 : index
    %703 = memref.load %arg2[%c110] : memref<144xf32, #tpu.memory_space<smem>>
    %704 = vector.broadcast %703 : f32 to vector<3x256xf32>
    %705 = arith.mulf %694, %704 : vector<3x256xf32>
    %706 = arith.addf %685, %705 : vector<3x256xf32>
    %c111 = arith.constant 111 : index
    %707 = memref.load %arg2[%c111] : memref<144xf32, #tpu.memory_space<smem>>
    %708 = vector.broadcast %707 : f32 to vector<3x256xf32>
    %709 = arith.mulf %694, %708 : vector<3x256xf32>
    %710 = arith.addf %689, %709 : vector<3x256xf32>
    %c240_i32 = arith.constant 240 : i32
    %711 = tpu.dynamic_rotate %140 by %c240_i32 dim 1 : vector<3x256xf32>, i32 -> vector<3x256xf32>
    %cst_106 = arith.constant 0.000000e+00 : f32
    %712 = vector.shape_cast %121 : vector<1x256xi1> to vector<1x256xi1>
    %713 = vector.broadcast %712 : vector<1x256xi1> to vector<3x256xi1>
    %714 = vector.broadcast %cst_106 : f32 to vector<3x256xf32>
    %715 = arith.select %713, %711, %714 : vector<3x256xi1>, vector<3x256xf32>
    %c112 = arith.constant 112 : index
    %716 = memref.load %arg2[%c112] : memref<144xf32, #tpu.memory_space<smem>>
    %717 = vector.broadcast %716 : f32 to vector<3x256xf32>
    %718 = arith.mulf %715, %717 : vector<3x256xf32>
    %719 = arith.addf %698, %718 : vector<3x256xf32>
    %c113 = arith.constant 113 : index
    %720 = memref.load %arg2[%c113] : memref<144xf32, #tpu.memory_space<smem>>
    %721 = vector.broadcast %720 : f32 to vector<3x256xf32>
    %722 = arith.mulf %715, %721 : vector<3x256xf32>
    %723 = arith.addf %702, %722 : vector<3x256xf32>
    %c114 = arith.constant 114 : index
    %724 = memref.load %arg2[%c114] : memref<144xf32, #tpu.memory_space<smem>>
    %725 = vector.broadcast %724 : f32 to vector<3x256xf32>
    %726 = arith.mulf %715, %725 : vector<3x256xf32>
    %727 = arith.addf %706, %726 : vector<3x256xf32>
    %c115 = arith.constant 115 : index
    %728 = memref.load %arg2[%c115] : memref<144xf32, #tpu.memory_space<smem>>
    %729 = vector.broadcast %728 : f32 to vector<3x256xf32>
    %730 = arith.mulf %715, %729 : vector<3x256xf32>
    %731 = arith.addf %710, %730 : vector<3x256xf32>
    %c240_i32_107 = arith.constant 240 : i32
    %732 = tpu.dynamic_rotate %142 by %c240_i32_107 dim 1 : vector<3x256xf32>, i32 -> vector<3x256xf32>
    %cst_108 = arith.constant 0.000000e+00 : f32
    %733 = vector.shape_cast %121 : vector<1x256xi1> to vector<1x256xi1>
    %734 = vector.broadcast %733 : vector<1x256xi1> to vector<3x256xi1>
    %735 = vector.broadcast %cst_108 : f32 to vector<3x256xf32>
    %736 = arith.select %734, %732, %735 : vector<3x256xi1>, vector<3x256xf32>
    %c116 = arith.constant 116 : index
    %737 = memref.load %arg2[%c116] : memref<144xf32, #tpu.memory_space<smem>>
    %738 = vector.broadcast %737 : f32 to vector<3x256xf32>
    %739 = arith.mulf %736, %738 : vector<3x256xf32>
    %740 = arith.addf %719, %739 : vector<3x256xf32>
    %c117 = arith.constant 117 : index
    %741 = memref.load %arg2[%c117] : memref<144xf32, #tpu.memory_space<smem>>
    %742 = vector.broadcast %741 : f32 to vector<3x256xf32>
    %743 = arith.mulf %736, %742 : vector<3x256xf32>
    %744 = arith.addf %723, %743 : vector<3x256xf32>
    %c118 = arith.constant 118 : index
    %745 = memref.load %arg2[%c118] : memref<144xf32, #tpu.memory_space<smem>>
    %746 = vector.broadcast %745 : f32 to vector<3x256xf32>
    %747 = arith.mulf %736, %746 : vector<3x256xf32>
    %748 = arith.addf %727, %747 : vector<3x256xf32>
    %c119 = arith.constant 119 : index
    %749 = memref.load %arg2[%c119] : memref<144xf32, #tpu.memory_space<smem>>
    %750 = vector.broadcast %749 : f32 to vector<3x256xf32>
    %751 = arith.mulf %736, %750 : vector<3x256xf32>
    %752 = arith.addf %731, %751 : vector<3x256xf32>
    %c240_i32_109 = arith.constant 240 : i32
    %753 = tpu.dynamic_rotate %144 by %c240_i32_109 dim 1 : vector<3x256xf32>, i32 -> vector<3x256xf32>
    %cst_110 = arith.constant 0.000000e+00 : f32
    %754 = vector.shape_cast %121 : vector<1x256xi1> to vector<1x256xi1>
    %755 = vector.broadcast %754 : vector<1x256xi1> to vector<3x256xi1>
    %756 = vector.broadcast %cst_110 : f32 to vector<3x256xf32>
    %757 = arith.select %755, %753, %756 : vector<3x256xi1>, vector<3x256xf32>
    %c120 = arith.constant 120 : index
    %758 = memref.load %arg2[%c120] : memref<144xf32, #tpu.memory_space<smem>>
    %759 = vector.broadcast %758 : f32 to vector<3x256xf32>
    %760 = arith.mulf %757, %759 : vector<3x256xf32>
    %761 = arith.addf %740, %760 : vector<3x256xf32>
    %c121 = arith.constant 121 : index
    %762 = memref.load %arg2[%c121] : memref<144xf32, #tpu.memory_space<smem>>
    %763 = vector.broadcast %762 : f32 to vector<3x256xf32>
    %764 = arith.mulf %757, %763 : vector<3x256xf32>
    %765 = arith.addf %744, %764 : vector<3x256xf32>
    %c122 = arith.constant 122 : index
    %766 = memref.load %arg2[%c122] : memref<144xf32, #tpu.memory_space<smem>>
    %767 = vector.broadcast %766 : f32 to vector<3x256xf32>
    %768 = arith.mulf %757, %767 : vector<3x256xf32>
    %769 = arith.addf %748, %768 : vector<3x256xf32>
    %c123 = arith.constant 123 : index
    %770 = memref.load %arg2[%c123] : memref<144xf32, #tpu.memory_space<smem>>
    %771 = vector.broadcast %770 : f32 to vector<3x256xf32>
    %772 = arith.mulf %757, %771 : vector<3x256xf32>
    %773 = arith.addf %752, %772 : vector<3x256xf32>
    %c240_i32_111 = arith.constant 240 : i32
    %774 = tpu.dynamic_rotate %146 by %c240_i32_111 dim 1 : vector<3x256xf32>, i32 -> vector<3x256xf32>
    %cst_112 = arith.constant 0.000000e+00 : f32
    %775 = vector.shape_cast %121 : vector<1x256xi1> to vector<1x256xi1>
    %776 = vector.broadcast %775 : vector<1x256xi1> to vector<3x256xi1>
    %777 = vector.broadcast %cst_112 : f32 to vector<3x256xf32>
    %778 = arith.select %776, %774, %777 : vector<3x256xi1>, vector<3x256xf32>
    %c124 = arith.constant 124 : index
    %779 = memref.load %arg2[%c124] : memref<144xf32, #tpu.memory_space<smem>>
    %780 = vector.broadcast %779 : f32 to vector<3x256xf32>
    %781 = arith.mulf %778, %780 : vector<3x256xf32>
    %782 = arith.addf %761, %781 : vector<3x256xf32>
    %c125 = arith.constant 125 : index
    %783 = memref.load %arg2[%c125] : memref<144xf32, #tpu.memory_space<smem>>
    %784 = vector.broadcast %783 : f32 to vector<3x256xf32>
    %785 = arith.mulf %778, %784 : vector<3x256xf32>
    %786 = arith.addf %765, %785 : vector<3x256xf32>
    %c126 = arith.constant 126 : index
    %787 = memref.load %arg2[%c126] : memref<144xf32, #tpu.memory_space<smem>>
    %788 = vector.broadcast %787 : f32 to vector<3x256xf32>
    %789 = arith.mulf %778, %788 : vector<3x256xf32>
    %790 = arith.addf %769, %789 : vector<3x256xf32>
    %c127 = arith.constant 127 : index
    %791 = memref.load %arg2[%c127] : memref<144xf32, #tpu.memory_space<smem>>
    %792 = vector.broadcast %791 : f32 to vector<3x256xf32>
    %793 = arith.mulf %778, %792 : vector<3x256xf32>
    %794 = arith.addf %773, %793 : vector<3x256xf32>
    %c239_i32 = arith.constant 239 : i32
    %795 = tpu.dynamic_rotate %140 by %c239_i32 dim 1 : vector<3x256xf32>, i32 -> vector<3x256xf32>
    %cst_113 = arith.constant 0.000000e+00 : f32
    %796 = vector.shape_cast %138 : vector<1x256xi1> to vector<1x256xi1>
    %797 = vector.broadcast %796 : vector<1x256xi1> to vector<3x256xi1>
    %798 = vector.broadcast %cst_113 : f32 to vector<3x256xf32>
    %799 = arith.select %797, %795, %798 : vector<3x256xi1>, vector<3x256xf32>
    %c128 = arith.constant 128 : index
    %800 = memref.load %arg2[%c128] : memref<144xf32, #tpu.memory_space<smem>>
    %801 = vector.broadcast %800 : f32 to vector<3x256xf32>
    %802 = arith.mulf %799, %801 : vector<3x256xf32>
    %803 = arith.addf %782, %802 : vector<3x256xf32>
    %c129 = arith.constant 129 : index
    %804 = memref.load %arg2[%c129] : memref<144xf32, #tpu.memory_space<smem>>
    %805 = vector.broadcast %804 : f32 to vector<3x256xf32>
    %806 = arith.mulf %799, %805 : vector<3x256xf32>
    %807 = arith.addf %786, %806 : vector<3x256xf32>
    %c130 = arith.constant 130 : index
    %808 = memref.load %arg2[%c130] : memref<144xf32, #tpu.memory_space<smem>>
    %809 = vector.broadcast %808 : f32 to vector<3x256xf32>
    %810 = arith.mulf %799, %809 : vector<3x256xf32>
    %811 = arith.addf %790, %810 : vector<3x256xf32>
    %c131 = arith.constant 131 : index
    %812 = memref.load %arg2[%c131] : memref<144xf32, #tpu.memory_space<smem>>
    %813 = vector.broadcast %812 : f32 to vector<3x256xf32>
    %814 = arith.mulf %799, %813 : vector<3x256xf32>
    %815 = arith.addf %794, %814 : vector<3x256xf32>
    %c239_i32_114 = arith.constant 239 : i32
    %816 = tpu.dynamic_rotate %142 by %c239_i32_114 dim 1 : vector<3x256xf32>, i32 -> vector<3x256xf32>
    %cst_115 = arith.constant 0.000000e+00 : f32
    %817 = vector.shape_cast %138 : vector<1x256xi1> to vector<1x256xi1>
    %818 = vector.broadcast %817 : vector<1x256xi1> to vector<3x256xi1>
    %819 = vector.broadcast %cst_115 : f32 to vector<3x256xf32>
    %820 = arith.select %818, %816, %819 : vector<3x256xi1>, vector<3x256xf32>
    %c132 = arith.constant 132 : index
    %821 = memref.load %arg2[%c132] : memref<144xf32, #tpu.memory_space<smem>>
    %822 = vector.broadcast %821 : f32 to vector<3x256xf32>
    %823 = arith.mulf %820, %822 : vector<3x256xf32>
    %824 = arith.addf %803, %823 : vector<3x256xf32>
    %c133 = arith.constant 133 : index
    %825 = memref.load %arg2[%c133] : memref<144xf32, #tpu.memory_space<smem>>
    %826 = vector.broadcast %825 : f32 to vector<3x256xf32>
    %827 = arith.mulf %820, %826 : vector<3x256xf32>
    %828 = arith.addf %807, %827 : vector<3x256xf32>
    %c134 = arith.constant 134 : index
    %829 = memref.load %arg2[%c134] : memref<144xf32, #tpu.memory_space<smem>>
    %830 = vector.broadcast %829 : f32 to vector<3x256xf32>
    %831 = arith.mulf %820, %830 : vector<3x256xf32>
    %832 = arith.addf %811, %831 : vector<3x256xf32>
    %c135 = arith.constant 135 : index
    %833 = memref.load %arg2[%c135] : memref<144xf32, #tpu.memory_space<smem>>
    %834 = vector.broadcast %833 : f32 to vector<3x256xf32>
    %835 = arith.mulf %820, %834 : vector<3x256xf32>
    %836 = arith.addf %815, %835 : vector<3x256xf32>
    %c239_i32_116 = arith.constant 239 : i32
    %837 = tpu.dynamic_rotate %144 by %c239_i32_116 dim 1 : vector<3x256xf32>, i32 -> vector<3x256xf32>
    %cst_117 = arith.constant 0.000000e+00 : f32
    %838 = vector.shape_cast %138 : vector<1x256xi1> to vector<1x256xi1>
    %839 = vector.broadcast %838 : vector<1x256xi1> to vector<3x256xi1>
    %840 = vector.broadcast %cst_117 : f32 to vector<3x256xf32>
    %841 = arith.select %839, %837, %840 : vector<3x256xi1>, vector<3x256xf32>
    %c136 = arith.constant 136 : index
    %842 = memref.load %arg2[%c136] : memref<144xf32, #tpu.memory_space<smem>>
    %843 = vector.broadcast %842 : f32 to vector<3x256xf32>
    %844 = arith.mulf %841, %843 : vector<3x256xf32>
    %845 = arith.addf %824, %844 : vector<3x256xf32>
    %c137 = arith.constant 137 : index
    %846 = memref.load %arg2[%c137] : memref<144xf32, #tpu.memory_space<smem>>
    %847 = vector.broadcast %846 : f32 to vector<3x256xf32>
    %848 = arith.mulf %841, %847 : vector<3x256xf32>
    %849 = arith.addf %828, %848 : vector<3x256xf32>
    %c138 = arith.constant 138 : index
    %850 = memref.load %arg2[%c138] : memref<144xf32, #tpu.memory_space<smem>>
    %851 = vector.broadcast %850 : f32 to vector<3x256xf32>
    %852 = arith.mulf %841, %851 : vector<3x256xf32>
    %853 = arith.addf %832, %852 : vector<3x256xf32>
    %c139 = arith.constant 139 : index
    %854 = memref.load %arg2[%c139] : memref<144xf32, #tpu.memory_space<smem>>
    %855 = vector.broadcast %854 : f32 to vector<3x256xf32>
    %856 = arith.mulf %841, %855 : vector<3x256xf32>
    %857 = arith.addf %836, %856 : vector<3x256xf32>
    %c239_i32_118 = arith.constant 239 : i32
    %858 = tpu.dynamic_rotate %146 by %c239_i32_118 dim 1 : vector<3x256xf32>, i32 -> vector<3x256xf32>
    %cst_119 = arith.constant 0.000000e+00 : f32
    %859 = vector.shape_cast %138 : vector<1x256xi1> to vector<1x256xi1>
    %860 = vector.broadcast %859 : vector<1x256xi1> to vector<3x256xi1>
    %861 = vector.broadcast %cst_119 : f32 to vector<3x256xf32>
    %862 = arith.select %860, %858, %861 : vector<3x256xi1>, vector<3x256xf32>
    %c140 = arith.constant 140 : index
    %863 = memref.load %arg2[%c140] : memref<144xf32, #tpu.memory_space<smem>>
    %864 = vector.broadcast %863 : f32 to vector<3x256xf32>
    %865 = arith.mulf %862, %864 : vector<3x256xf32>
    %866 = arith.addf %845, %865 : vector<3x256xf32>
    %c141 = arith.constant 141 : index
    %867 = memref.load %arg2[%c141] : memref<144xf32, #tpu.memory_space<smem>>
    %868 = vector.broadcast %867 : f32 to vector<3x256xf32>
    %869 = arith.mulf %862, %868 : vector<3x256xf32>
    %870 = arith.addf %849, %869 : vector<3x256xf32>
    %c142 = arith.constant 142 : index
    %871 = memref.load %arg2[%c142] : memref<144xf32, #tpu.memory_space<smem>>
    %872 = vector.broadcast %871 : f32 to vector<3x256xf32>
    %873 = arith.mulf %862, %872 : vector<3x256xf32>
    %874 = arith.addf %853, %873 : vector<3x256xf32>
    %c143 = arith.constant 143 : index
    %875 = memref.load %arg2[%c143] : memref<144xf32, #tpu.memory_space<smem>>
    %876 = vector.broadcast %875 : f32 to vector<3x256xf32>
    %877 = arith.mulf %862, %876 : vector<3x256xf32>
    %878 = arith.addf %857, %877 : vector<3x256xf32>
    %cst_120 = arith.constant 0.000000e+00 : f32
    %879 = vector.broadcast %cst_120 : f32 to vector<3x256xf32>
    %880 = arith.maximumf %866, %879 : vector<3x256xf32>
    %cst_121 = arith.constant 0.000000e+00 : f32
    %881 = vector.broadcast %cst_121 : f32 to vector<3x256xf32>
    %882 = arith.maximumf %870, %881 : vector<3x256xf32>
    %cst_122 = arith.constant 0.000000e+00 : f32
    %883 = vector.broadcast %cst_122 : f32 to vector<3x256xf32>
    %884 = arith.maximumf %874, %883 : vector<3x256xf32>
    %cst_123 = arith.constant 0.000000e+00 : f32
    %885 = vector.broadcast %cst_123 : f32 to vector<3x256xf32>
    %886 = arith.maximumf %878, %885 : vector<3x256xf32>
    %c17_i32_124 = arith.constant 17 : i32
    %887 = tpu.dynamic_rotate %880 by %c17_i32_124 dim 1 : vector<3x256xf32>, i32 -> vector<3x256xf32>
    %cst_125 = arith.constant 0.000000e+00 : f32
    %888 = vector.shape_cast %19 : vector<1x256xi1> to vector<1x256xi1>
    %889 = vector.broadcast %888 : vector<1x256xi1> to vector<3x256xi1>
    %890 = vector.broadcast %cst_125 : f32 to vector<3x256xf32>
    %891 = arith.select %889, %887, %890 : vector<3x256xi1>, vector<3x256xf32>
    %c0_126 = arith.constant 0 : index
    %892 = memref.load %arg3[%c0_126] : memref<144xf32, #tpu.memory_space<smem>>
    %893 = vector.broadcast %892 : f32 to vector<3x256xf32>
    %894 = arith.mulf %891, %893 : vector<3x256xf32>
    %c1_127 = arith.constant 1 : index
    %895 = memref.load %arg3[%c1_127] : memref<144xf32, #tpu.memory_space<smem>>
    %896 = vector.broadcast %895 : f32 to vector<3x256xf32>
    %897 = arith.mulf %891, %896 : vector<3x256xf32>
    %c2_128 = arith.constant 2 : index
    %898 = memref.load %arg3[%c2_128] : memref<144xf32, #tpu.memory_space<smem>>
    %899 = vector.broadcast %898 : f32 to vector<3x256xf32>
    %900 = arith.mulf %891, %899 : vector<3x256xf32>
    %c3_129 = arith.constant 3 : index
    %901 = memref.load %arg3[%c3_129] : memref<144xf32, #tpu.memory_space<smem>>
    %902 = vector.broadcast %901 : f32 to vector<3x256xf32>
    %903 = arith.mulf %891, %902 : vector<3x256xf32>
    %c17_i32_130 = arith.constant 17 : i32
    %904 = tpu.dynamic_rotate %882 by %c17_i32_130 dim 1 : vector<3x256xf32>, i32 -> vector<3x256xf32>
    %cst_131 = arith.constant 0.000000e+00 : f32
    %905 = vector.shape_cast %19 : vector<1x256xi1> to vector<1x256xi1>
    %906 = vector.broadcast %905 : vector<1x256xi1> to vector<3x256xi1>
    %907 = vector.broadcast %cst_131 : f32 to vector<3x256xf32>
    %908 = arith.select %906, %904, %907 : vector<3x256xi1>, vector<3x256xf32>
    %c4_132 = arith.constant 4 : index
    %909 = memref.load %arg3[%c4_132] : memref<144xf32, #tpu.memory_space<smem>>
    %910 = vector.broadcast %909 : f32 to vector<3x256xf32>
    %911 = arith.mulf %908, %910 : vector<3x256xf32>
    %912 = arith.addf %894, %911 : vector<3x256xf32>
    %c5_133 = arith.constant 5 : index
    %913 = memref.load %arg3[%c5_133] : memref<144xf32, #tpu.memory_space<smem>>
    %914 = vector.broadcast %913 : f32 to vector<3x256xf32>
    %915 = arith.mulf %908, %914 : vector<3x256xf32>
    %916 = arith.addf %897, %915 : vector<3x256xf32>
    %c6_134 = arith.constant 6 : index
    %917 = memref.load %arg3[%c6_134] : memref<144xf32, #tpu.memory_space<smem>>
    %918 = vector.broadcast %917 : f32 to vector<3x256xf32>
    %919 = arith.mulf %908, %918 : vector<3x256xf32>
    %920 = arith.addf %900, %919 : vector<3x256xf32>
    %c7_135 = arith.constant 7 : index
    %921 = memref.load %arg3[%c7_135] : memref<144xf32, #tpu.memory_space<smem>>
    %922 = vector.broadcast %921 : f32 to vector<3x256xf32>
    %923 = arith.mulf %908, %922 : vector<3x256xf32>
    %924 = arith.addf %903, %923 : vector<3x256xf32>
    %c17_i32_136 = arith.constant 17 : i32
    %925 = tpu.dynamic_rotate %884 by %c17_i32_136 dim 1 : vector<3x256xf32>, i32 -> vector<3x256xf32>
    %cst_137 = arith.constant 0.000000e+00 : f32
    %926 = vector.shape_cast %19 : vector<1x256xi1> to vector<1x256xi1>
    %927 = vector.broadcast %926 : vector<1x256xi1> to vector<3x256xi1>
    %928 = vector.broadcast %cst_137 : f32 to vector<3x256xf32>
    %929 = arith.select %927, %925, %928 : vector<3x256xi1>, vector<3x256xf32>
    %c8_138 = arith.constant 8 : index
    %930 = memref.load %arg3[%c8_138] : memref<144xf32, #tpu.memory_space<smem>>
    %931 = vector.broadcast %930 : f32 to vector<3x256xf32>
    %932 = arith.mulf %929, %931 : vector<3x256xf32>
    %933 = arith.addf %912, %932 : vector<3x256xf32>
    %c9_139 = arith.constant 9 : index
    %934 = memref.load %arg3[%c9_139] : memref<144xf32, #tpu.memory_space<smem>>
    %935 = vector.broadcast %934 : f32 to vector<3x256xf32>
    %936 = arith.mulf %929, %935 : vector<3x256xf32>
    %937 = arith.addf %916, %936 : vector<3x256xf32>
    %c10_140 = arith.constant 10 : index
    %938 = memref.load %arg3[%c10_140] : memref<144xf32, #tpu.memory_space<smem>>
    %939 = vector.broadcast %938 : f32 to vector<3x256xf32>
    %940 = arith.mulf %929, %939 : vector<3x256xf32>
    %941 = arith.addf %920, %940 : vector<3x256xf32>
    %c11_141 = arith.constant 11 : index
    %942 = memref.load %arg3[%c11_141] : memref<144xf32, #tpu.memory_space<smem>>
    %943 = vector.broadcast %942 : f32 to vector<3x256xf32>
    %944 = arith.mulf %929, %943 : vector<3x256xf32>
    %945 = arith.addf %924, %944 : vector<3x256xf32>
    %c17_i32_142 = arith.constant 17 : i32
    %946 = tpu.dynamic_rotate %886 by %c17_i32_142 dim 1 : vector<3x256xf32>, i32 -> vector<3x256xf32>
    %cst_143 = arith.constant 0.000000e+00 : f32
    %947 = vector.shape_cast %19 : vector<1x256xi1> to vector<1x256xi1>
    %948 = vector.broadcast %947 : vector<1x256xi1> to vector<3x256xi1>
    %949 = vector.broadcast %cst_143 : f32 to vector<3x256xf32>
    %950 = arith.select %948, %946, %949 : vector<3x256xi1>, vector<3x256xf32>
    %c12_144 = arith.constant 12 : index
    %951 = memref.load %arg3[%c12_144] : memref<144xf32, #tpu.memory_space<smem>>
    %952 = vector.broadcast %951 : f32 to vector<3x256xf32>
    %953 = arith.mulf %950, %952 : vector<3x256xf32>
    %954 = arith.addf %933, %953 : vector<3x256xf32>
    %c13_145 = arith.constant 13 : index
    %955 = memref.load %arg3[%c13_145] : memref<144xf32, #tpu.memory_space<smem>>
    %956 = vector.broadcast %955 : f32 to vector<3x256xf32>
    %957 = arith.mulf %950, %956 : vector<3x256xf32>
    %958 = arith.addf %937, %957 : vector<3x256xf32>
    %c14_146 = arith.constant 14 : index
    %959 = memref.load %arg3[%c14_146] : memref<144xf32, #tpu.memory_space<smem>>
    %960 = vector.broadcast %959 : f32 to vector<3x256xf32>
    %961 = arith.mulf %950, %960 : vector<3x256xf32>
    %962 = arith.addf %941, %961 : vector<3x256xf32>
    %c15_147 = arith.constant 15 : index
    %963 = memref.load %arg3[%c15_147] : memref<144xf32, #tpu.memory_space<smem>>
    %964 = vector.broadcast %963 : f32 to vector<3x256xf32>
    %965 = arith.mulf %950, %964 : vector<3x256xf32>
    %966 = arith.addf %945, %965 : vector<3x256xf32>
    %c16_i32_148 = arith.constant 16 : i32
    %967 = tpu.dynamic_rotate %880 by %c16_i32_148 dim 1 : vector<3x256xf32>, i32 -> vector<3x256xf32>
    %cst_149 = arith.constant 0.000000e+00 : f32
    %968 = vector.shape_cast %36 : vector<1x256xi1> to vector<1x256xi1>
    %969 = vector.broadcast %968 : vector<1x256xi1> to vector<3x256xi1>
    %970 = vector.broadcast %cst_149 : f32 to vector<3x256xf32>
    %971 = arith.select %969, %967, %970 : vector<3x256xi1>, vector<3x256xf32>
    %c16_150 = arith.constant 16 : index
    %972 = memref.load %arg3[%c16_150] : memref<144xf32, #tpu.memory_space<smem>>
    %973 = vector.broadcast %972 : f32 to vector<3x256xf32>
    %974 = arith.mulf %971, %973 : vector<3x256xf32>
    %975 = arith.addf %954, %974 : vector<3x256xf32>
    %c17_151 = arith.constant 17 : index
    %976 = memref.load %arg3[%c17_151] : memref<144xf32, #tpu.memory_space<smem>>
    %977 = vector.broadcast %976 : f32 to vector<3x256xf32>
    %978 = arith.mulf %971, %977 : vector<3x256xf32>
    %979 = arith.addf %958, %978 : vector<3x256xf32>
    %c18_152 = arith.constant 18 : index
    %980 = memref.load %arg3[%c18_152] : memref<144xf32, #tpu.memory_space<smem>>
    %981 = vector.broadcast %980 : f32 to vector<3x256xf32>
    %982 = arith.mulf %971, %981 : vector<3x256xf32>
    %983 = arith.addf %962, %982 : vector<3x256xf32>
    %c19_153 = arith.constant 19 : index
    %984 = memref.load %arg3[%c19_153] : memref<144xf32, #tpu.memory_space<smem>>
    %985 = vector.broadcast %984 : f32 to vector<3x256xf32>
    %986 = arith.mulf %971, %985 : vector<3x256xf32>
    %987 = arith.addf %966, %986 : vector<3x256xf32>
    %c16_i32_154 = arith.constant 16 : i32
    %988 = tpu.dynamic_rotate %882 by %c16_i32_154 dim 1 : vector<3x256xf32>, i32 -> vector<3x256xf32>
    %cst_155 = arith.constant 0.000000e+00 : f32
    %989 = vector.shape_cast %36 : vector<1x256xi1> to vector<1x256xi1>
    %990 = vector.broadcast %989 : vector<1x256xi1> to vector<3x256xi1>
    %991 = vector.broadcast %cst_155 : f32 to vector<3x256xf32>
    %992 = arith.select %990, %988, %991 : vector<3x256xi1>, vector<3x256xf32>
    %c20_156 = arith.constant 20 : index
    %993 = memref.load %arg3[%c20_156] : memref<144xf32, #tpu.memory_space<smem>>
    %994 = vector.broadcast %993 : f32 to vector<3x256xf32>
    %995 = arith.mulf %992, %994 : vector<3x256xf32>
    %996 = arith.addf %975, %995 : vector<3x256xf32>
    %c21_157 = arith.constant 21 : index
    %997 = memref.load %arg3[%c21_157] : memref<144xf32, #tpu.memory_space<smem>>
    %998 = vector.broadcast %997 : f32 to vector<3x256xf32>
    %999 = arith.mulf %992, %998 : vector<3x256xf32>
    %1000 = arith.addf %979, %999 : vector<3x256xf32>
    %c22_158 = arith.constant 22 : index
    %1001 = memref.load %arg3[%c22_158] : memref<144xf32, #tpu.memory_space<smem>>
    %1002 = vector.broadcast %1001 : f32 to vector<3x256xf32>
    %1003 = arith.mulf %992, %1002 : vector<3x256xf32>
    %1004 = arith.addf %983, %1003 : vector<3x256xf32>
    %c23_159 = arith.constant 23 : index
    %1005 = memref.load %arg3[%c23_159] : memref<144xf32, #tpu.memory_space<smem>>
    %1006 = vector.broadcast %1005 : f32 to vector<3x256xf32>
    %1007 = arith.mulf %992, %1006 : vector<3x256xf32>
    %1008 = arith.addf %987, %1007 : vector<3x256xf32>
    %c16_i32_160 = arith.constant 16 : i32
    %1009 = tpu.dynamic_rotate %884 by %c16_i32_160 dim 1 : vector<3x256xf32>, i32 -> vector<3x256xf32>
    %cst_161 = arith.constant 0.000000e+00 : f32
    %1010 = vector.shape_cast %36 : vector<1x256xi1> to vector<1x256xi1>
    %1011 = vector.broadcast %1010 : vector<1x256xi1> to vector<3x256xi1>
    %1012 = vector.broadcast %cst_161 : f32 to vector<3x256xf32>
    %1013 = arith.select %1011, %1009, %1012 : vector<3x256xi1>, vector<3x256xf32>
    %c24_162 = arith.constant 24 : index
    %1014 = memref.load %arg3[%c24_162] : memref<144xf32, #tpu.memory_space<smem>>
    %1015 = vector.broadcast %1014 : f32 to vector<3x256xf32>
    %1016 = arith.mulf %1013, %1015 : vector<3x256xf32>
    %1017 = arith.addf %996, %1016 : vector<3x256xf32>
    %c25_163 = arith.constant 25 : index
    %1018 = memref.load %arg3[%c25_163] : memref<144xf32, #tpu.memory_space<smem>>
    %1019 = vector.broadcast %1018 : f32 to vector<3x256xf32>
    %1020 = arith.mulf %1013, %1019 : vector<3x256xf32>
    %1021 = arith.addf %1000, %1020 : vector<3x256xf32>
    %c26_164 = arith.constant 26 : index
    %1022 = memref.load %arg3[%c26_164] : memref<144xf32, #tpu.memory_space<smem>>
    %1023 = vector.broadcast %1022 : f32 to vector<3x256xf32>
    %1024 = arith.mulf %1013, %1023 : vector<3x256xf32>
    %1025 = arith.addf %1004, %1024 : vector<3x256xf32>
    %c27_165 = arith.constant 27 : index
    %1026 = memref.load %arg3[%c27_165] : memref<144xf32, #tpu.memory_space<smem>>
    %1027 = vector.broadcast %1026 : f32 to vector<3x256xf32>
    %1028 = arith.mulf %1013, %1027 : vector<3x256xf32>
    %1029 = arith.addf %1008, %1028 : vector<3x256xf32>
    %c16_i32_166 = arith.constant 16 : i32
    %1030 = tpu.dynamic_rotate %886 by %c16_i32_166 dim 1 : vector<3x256xf32>, i32 -> vector<3x256xf32>
    %cst_167 = arith.constant 0.000000e+00 : f32
    %1031 = vector.shape_cast %36 : vector<1x256xi1> to vector<1x256xi1>
    %1032 = vector.broadcast %1031 : vector<1x256xi1> to vector<3x256xi1>
    %1033 = vector.broadcast %cst_167 : f32 to vector<3x256xf32>
    %1034 = arith.select %1032, %1030, %1033 : vector<3x256xi1>, vector<3x256xf32>
    %c28_168 = arith.constant 28 : index
    %1035 = memref.load %arg3[%c28_168] : memref<144xf32, #tpu.memory_space<smem>>
    %1036 = vector.broadcast %1035 : f32 to vector<3x256xf32>
    %1037 = arith.mulf %1034, %1036 : vector<3x256xf32>
    %1038 = arith.addf %1017, %1037 : vector<3x256xf32>
    %c29_169 = arith.constant 29 : index
    %1039 = memref.load %arg3[%c29_169] : memref<144xf32, #tpu.memory_space<smem>>
    %1040 = vector.broadcast %1039 : f32 to vector<3x256xf32>
    %1041 = arith.mulf %1034, %1040 : vector<3x256xf32>
    %1042 = arith.addf %1021, %1041 : vector<3x256xf32>
    %c30_170 = arith.constant 30 : index
    %1043 = memref.load %arg3[%c30_170] : memref<144xf32, #tpu.memory_space<smem>>
    %1044 = vector.broadcast %1043 : f32 to vector<3x256xf32>
    %1045 = arith.mulf %1034, %1044 : vector<3x256xf32>
    %1046 = arith.addf %1025, %1045 : vector<3x256xf32>
    %c31_171 = arith.constant 31 : index
    %1047 = memref.load %arg3[%c31_171] : memref<144xf32, #tpu.memory_space<smem>>
    %1048 = vector.broadcast %1047 : f32 to vector<3x256xf32>
    %1049 = arith.mulf %1034, %1048 : vector<3x256xf32>
    %1050 = arith.addf %1029, %1049 : vector<3x256xf32>
    %c15_i32_172 = arith.constant 15 : i32
    %1051 = tpu.dynamic_rotate %880 by %c15_i32_172 dim 1 : vector<3x256xf32>, i32 -> vector<3x256xf32>
    %cst_173 = arith.constant 0.000000e+00 : f32
    %1052 = vector.shape_cast %53 : vector<1x256xi1> to vector<1x256xi1>
    %1053 = vector.broadcast %1052 : vector<1x256xi1> to vector<3x256xi1>
    %1054 = vector.broadcast %cst_173 : f32 to vector<3x256xf32>
    %1055 = arith.select %1053, %1051, %1054 : vector<3x256xi1>, vector<3x256xf32>
    %c32_174 = arith.constant 32 : index
    %1056 = memref.load %arg3[%c32_174] : memref<144xf32, #tpu.memory_space<smem>>
    %1057 = vector.broadcast %1056 : f32 to vector<3x256xf32>
    %1058 = arith.mulf %1055, %1057 : vector<3x256xf32>
    %1059 = arith.addf %1038, %1058 : vector<3x256xf32>
    %c33_175 = arith.constant 33 : index
    %1060 = memref.load %arg3[%c33_175] : memref<144xf32, #tpu.memory_space<smem>>
    %1061 = vector.broadcast %1060 : f32 to vector<3x256xf32>
    %1062 = arith.mulf %1055, %1061 : vector<3x256xf32>
    %1063 = arith.addf %1042, %1062 : vector<3x256xf32>
    %c34_176 = arith.constant 34 : index
    %1064 = memref.load %arg3[%c34_176] : memref<144xf32, #tpu.memory_space<smem>>
    %1065 = vector.broadcast %1064 : f32 to vector<3x256xf32>
    %1066 = arith.mulf %1055, %1065 : vector<3x256xf32>
    %1067 = arith.addf %1046, %1066 : vector<3x256xf32>
    %c35_177 = arith.constant 35 : index
    %1068 = memref.load %arg3[%c35_177] : memref<144xf32, #tpu.memory_space<smem>>
    %1069 = vector.broadcast %1068 : f32 to vector<3x256xf32>
    %1070 = arith.mulf %1055, %1069 : vector<3x256xf32>
    %1071 = arith.addf %1050, %1070 : vector<3x256xf32>
    %c15_i32_178 = arith.constant 15 : i32
    %1072 = tpu.dynamic_rotate %882 by %c15_i32_178 dim 1 : vector<3x256xf32>, i32 -> vector<3x256xf32>
    %cst_179 = arith.constant 0.000000e+00 : f32
    %1073 = vector.shape_cast %53 : vector<1x256xi1> to vector<1x256xi1>
    %1074 = vector.broadcast %1073 : vector<1x256xi1> to vector<3x256xi1>
    %1075 = vector.broadcast %cst_179 : f32 to vector<3x256xf32>
    %1076 = arith.select %1074, %1072, %1075 : vector<3x256xi1>, vector<3x256xf32>
    %c36_180 = arith.constant 36 : index
    %1077 = memref.load %arg3[%c36_180] : memref<144xf32, #tpu.memory_space<smem>>
    %1078 = vector.broadcast %1077 : f32 to vector<3x256xf32>
    %1079 = arith.mulf %1076, %1078 : vector<3x256xf32>
    %1080 = arith.addf %1059, %1079 : vector<3x256xf32>
    %c37_181 = arith.constant 37 : index
    %1081 = memref.load %arg3[%c37_181] : memref<144xf32, #tpu.memory_space<smem>>
    %1082 = vector.broadcast %1081 : f32 to vector<3x256xf32>
    %1083 = arith.mulf %1076, %1082 : vector<3x256xf32>
    %1084 = arith.addf %1063, %1083 : vector<3x256xf32>
    %c38_182 = arith.constant 38 : index
    %1085 = memref.load %arg3[%c38_182] : memref<144xf32, #tpu.memory_space<smem>>
    %1086 = vector.broadcast %1085 : f32 to vector<3x256xf32>
    %1087 = arith.mulf %1076, %1086 : vector<3x256xf32>
    %1088 = arith.addf %1067, %1087 : vector<3x256xf32>
    %c39_183 = arith.constant 39 : index
    %1089 = memref.load %arg3[%c39_183] : memref<144xf32, #tpu.memory_space<smem>>
    %1090 = vector.broadcast %1089 : f32 to vector<3x256xf32>
    %1091 = arith.mulf %1076, %1090 : vector<3x256xf32>
    %1092 = arith.addf %1071, %1091 : vector<3x256xf32>
    %c15_i32_184 = arith.constant 15 : i32
    %1093 = tpu.dynamic_rotate %884 by %c15_i32_184 dim 1 : vector<3x256xf32>, i32 -> vector<3x256xf32>
    %cst_185 = arith.constant 0.000000e+00 : f32
    %1094 = vector.shape_cast %53 : vector<1x256xi1> to vector<1x256xi1>
    %1095 = vector.broadcast %1094 : vector<1x256xi1> to vector<3x256xi1>
    %1096 = vector.broadcast %cst_185 : f32 to vector<3x256xf32>
    %1097 = arith.select %1095, %1093, %1096 : vector<3x256xi1>, vector<3x256xf32>
    %c40_186 = arith.constant 40 : index
    %1098 = memref.load %arg3[%c40_186] : memref<144xf32, #tpu.memory_space<smem>>
    %1099 = vector.broadcast %1098 : f32 to vector<3x256xf32>
    %1100 = arith.mulf %1097, %1099 : vector<3x256xf32>
    %1101 = arith.addf %1080, %1100 : vector<3x256xf32>
    %c41_187 = arith.constant 41 : index
    %1102 = memref.load %arg3[%c41_187] : memref<144xf32, #tpu.memory_space<smem>>
    %1103 = vector.broadcast %1102 : f32 to vector<3x256xf32>
    %1104 = arith.mulf %1097, %1103 : vector<3x256xf32>
    %1105 = arith.addf %1084, %1104 : vector<3x256xf32>
    %c42_188 = arith.constant 42 : index
    %1106 = memref.load %arg3[%c42_188] : memref<144xf32, #tpu.memory_space<smem>>
    %1107 = vector.broadcast %1106 : f32 to vector<3x256xf32>
    %1108 = arith.mulf %1097, %1107 : vector<3x256xf32>
    %1109 = arith.addf %1088, %1108 : vector<3x256xf32>
    %c43_189 = arith.constant 43 : index
    %1110 = memref.load %arg3[%c43_189] : memref<144xf32, #tpu.memory_space<smem>>
    %1111 = vector.broadcast %1110 : f32 to vector<3x256xf32>
    %1112 = arith.mulf %1097, %1111 : vector<3x256xf32>
    %1113 = arith.addf %1092, %1112 : vector<3x256xf32>
    %c15_i32_190 = arith.constant 15 : i32
    %1114 = tpu.dynamic_rotate %886 by %c15_i32_190 dim 1 : vector<3x256xf32>, i32 -> vector<3x256xf32>
    %cst_191 = arith.constant 0.000000e+00 : f32
    %1115 = vector.shape_cast %53 : vector<1x256xi1> to vector<1x256xi1>
    %1116 = vector.broadcast %1115 : vector<1x256xi1> to vector<3x256xi1>
    %1117 = vector.broadcast %cst_191 : f32 to vector<3x256xf32>
    %1118 = arith.select %1116, %1114, %1117 : vector<3x256xi1>, vector<3x256xf32>
    %c44_192 = arith.constant 44 : index
    %1119 = memref.load %arg3[%c44_192] : memref<144xf32, #tpu.memory_space<smem>>
    %1120 = vector.broadcast %1119 : f32 to vector<3x256xf32>
    %1121 = arith.mulf %1118, %1120 : vector<3x256xf32>
    %1122 = arith.addf %1101, %1121 : vector<3x256xf32>
    %c45_193 = arith.constant 45 : index
    %1123 = memref.load %arg3[%c45_193] : memref<144xf32, #tpu.memory_space<smem>>
    %1124 = vector.broadcast %1123 : f32 to vector<3x256xf32>
    %1125 = arith.mulf %1118, %1124 : vector<3x256xf32>
    %1126 = arith.addf %1105, %1125 : vector<3x256xf32>
    %c46_194 = arith.constant 46 : index
    %1127 = memref.load %arg3[%c46_194] : memref<144xf32, #tpu.memory_space<smem>>
    %1128 = vector.broadcast %1127 : f32 to vector<3x256xf32>
    %1129 = arith.mulf %1118, %1128 : vector<3x256xf32>
    %1130 = arith.addf %1109, %1129 : vector<3x256xf32>
    %c47_195 = arith.constant 47 : index
    %1131 = memref.load %arg3[%c47_195] : memref<144xf32, #tpu.memory_space<smem>>
    %1132 = vector.broadcast %1131 : f32 to vector<3x256xf32>
    %1133 = arith.mulf %1118, %1132 : vector<3x256xf32>
    %1134 = arith.addf %1113, %1133 : vector<3x256xf32>
    %c1_i32_196 = arith.constant 1 : i32
    %1135 = tpu.dynamic_rotate %880 by %c1_i32_196 dim 1 : vector<3x256xf32>, i32 -> vector<3x256xf32>
    %cst_197 = arith.constant 0.000000e+00 : f32
    %1136 = vector.shape_cast %70 : vector<1x256xi1> to vector<1x256xi1>
    %1137 = vector.broadcast %1136 : vector<1x256xi1> to vector<3x256xi1>
    %1138 = vector.broadcast %cst_197 : f32 to vector<3x256xf32>
    %1139 = arith.select %1137, %1135, %1138 : vector<3x256xi1>, vector<3x256xf32>
    %c48_198 = arith.constant 48 : index
    %1140 = memref.load %arg3[%c48_198] : memref<144xf32, #tpu.memory_space<smem>>
    %1141 = vector.broadcast %1140 : f32 to vector<3x256xf32>
    %1142 = arith.mulf %1139, %1141 : vector<3x256xf32>
    %1143 = arith.addf %1122, %1142 : vector<3x256xf32>
    %c49_199 = arith.constant 49 : index
    %1144 = memref.load %arg3[%c49_199] : memref<144xf32, #tpu.memory_space<smem>>
    %1145 = vector.broadcast %1144 : f32 to vector<3x256xf32>
    %1146 = arith.mulf %1139, %1145 : vector<3x256xf32>
    %1147 = arith.addf %1126, %1146 : vector<3x256xf32>
    %c50_200 = arith.constant 50 : index
    %1148 = memref.load %arg3[%c50_200] : memref<144xf32, #tpu.memory_space<smem>>
    %1149 = vector.broadcast %1148 : f32 to vector<3x256xf32>
    %1150 = arith.mulf %1139, %1149 : vector<3x256xf32>
    %1151 = arith.addf %1130, %1150 : vector<3x256xf32>
    %c51_201 = arith.constant 51 : index
    %1152 = memref.load %arg3[%c51_201] : memref<144xf32, #tpu.memory_space<smem>>
    %1153 = vector.broadcast %1152 : f32 to vector<3x256xf32>
    %1154 = arith.mulf %1139, %1153 : vector<3x256xf32>
    %1155 = arith.addf %1134, %1154 : vector<3x256xf32>
    %c1_i32_202 = arith.constant 1 : i32
    %1156 = tpu.dynamic_rotate %882 by %c1_i32_202 dim 1 : vector<3x256xf32>, i32 -> vector<3x256xf32>
    %cst_203 = arith.constant 0.000000e+00 : f32
    %1157 = vector.shape_cast %70 : vector<1x256xi1> to vector<1x256xi1>
    %1158 = vector.broadcast %1157 : vector<1x256xi1> to vector<3x256xi1>
    %1159 = vector.broadcast %cst_203 : f32 to vector<3x256xf32>
    %1160 = arith.select %1158, %1156, %1159 : vector<3x256xi1>, vector<3x256xf32>
    %c52_204 = arith.constant 52 : index
    %1161 = memref.load %arg3[%c52_204] : memref<144xf32, #tpu.memory_space<smem>>
    %1162 = vector.broadcast %1161 : f32 to vector<3x256xf32>
    %1163 = arith.mulf %1160, %1162 : vector<3x256xf32>
    %1164 = arith.addf %1143, %1163 : vector<3x256xf32>
    %c53_205 = arith.constant 53 : index
    %1165 = memref.load %arg3[%c53_205] : memref<144xf32, #tpu.memory_space<smem>>
    %1166 = vector.broadcast %1165 : f32 to vector<3x256xf32>
    %1167 = arith.mulf %1160, %1166 : vector<3x256xf32>
    %1168 = arith.addf %1147, %1167 : vector<3x256xf32>
    %c54_206 = arith.constant 54 : index
    %1169 = memref.load %arg3[%c54_206] : memref<144xf32, #tpu.memory_space<smem>>
    %1170 = vector.broadcast %1169 : f32 to vector<3x256xf32>
    %1171 = arith.mulf %1160, %1170 : vector<3x256xf32>
    %1172 = arith.addf %1151, %1171 : vector<3x256xf32>
    %c55_207 = arith.constant 55 : index
    %1173 = memref.load %arg3[%c55_207] : memref<144xf32, #tpu.memory_space<smem>>
    %1174 = vector.broadcast %1173 : f32 to vector<3x256xf32>
    %1175 = arith.mulf %1160, %1174 : vector<3x256xf32>
    %1176 = arith.addf %1155, %1175 : vector<3x256xf32>
    %c1_i32_208 = arith.constant 1 : i32
    %1177 = tpu.dynamic_rotate %884 by %c1_i32_208 dim 1 : vector<3x256xf32>, i32 -> vector<3x256xf32>
    %cst_209 = arith.constant 0.000000e+00 : f32
    %1178 = vector.shape_cast %70 : vector<1x256xi1> to vector<1x256xi1>
    %1179 = vector.broadcast %1178 : vector<1x256xi1> to vector<3x256xi1>
    %1180 = vector.broadcast %cst_209 : f32 to vector<3x256xf32>
    %1181 = arith.select %1179, %1177, %1180 : vector<3x256xi1>, vector<3x256xf32>
    %c56_210 = arith.constant 56 : index
    %1182 = memref.load %arg3[%c56_210] : memref<144xf32, #tpu.memory_space<smem>>
    %1183 = vector.broadcast %1182 : f32 to vector<3x256xf32>
    %1184 = arith.mulf %1181, %1183 : vector<3x256xf32>
    %1185 = arith.addf %1164, %1184 : vector<3x256xf32>
    %c57_211 = arith.constant 57 : index
    %1186 = memref.load %arg3[%c57_211] : memref<144xf32, #tpu.memory_space<smem>>
    %1187 = vector.broadcast %1186 : f32 to vector<3x256xf32>
    %1188 = arith.mulf %1181, %1187 : vector<3x256xf32>
    %1189 = arith.addf %1168, %1188 : vector<3x256xf32>
    %c58_212 = arith.constant 58 : index
    %1190 = memref.load %arg3[%c58_212] : memref<144xf32, #tpu.memory_space<smem>>
    %1191 = vector.broadcast %1190 : f32 to vector<3x256xf32>
    %1192 = arith.mulf %1181, %1191 : vector<3x256xf32>
    %1193 = arith.addf %1172, %1192 : vector<3x256xf32>
    %c59_213 = arith.constant 59 : index
    %1194 = memref.load %arg3[%c59_213] : memref<144xf32, #tpu.memory_space<smem>>
    %1195 = vector.broadcast %1194 : f32 to vector<3x256xf32>
    %1196 = arith.mulf %1181, %1195 : vector<3x256xf32>
    %1197 = arith.addf %1176, %1196 : vector<3x256xf32>
    %c1_i32_214 = arith.constant 1 : i32
    %1198 = tpu.dynamic_rotate %886 by %c1_i32_214 dim 1 : vector<3x256xf32>, i32 -> vector<3x256xf32>
    %cst_215 = arith.constant 0.000000e+00 : f32
    %1199 = vector.shape_cast %70 : vector<1x256xi1> to vector<1x256xi1>
    %1200 = vector.broadcast %1199 : vector<1x256xi1> to vector<3x256xi1>
    %1201 = vector.broadcast %cst_215 : f32 to vector<3x256xf32>
    %1202 = arith.select %1200, %1198, %1201 : vector<3x256xi1>, vector<3x256xf32>
    %c60_216 = arith.constant 60 : index
    %1203 = memref.load %arg3[%c60_216] : memref<144xf32, #tpu.memory_space<smem>>
    %1204 = vector.broadcast %1203 : f32 to vector<3x256xf32>
    %1205 = arith.mulf %1202, %1204 : vector<3x256xf32>
    %1206 = arith.addf %1185, %1205 : vector<3x256xf32>
    %c61_217 = arith.constant 61 : index
    %1207 = memref.load %arg3[%c61_217] : memref<144xf32, #tpu.memory_space<smem>>
    %1208 = vector.broadcast %1207 : f32 to vector<3x256xf32>
    %1209 = arith.mulf %1202, %1208 : vector<3x256xf32>
    %1210 = arith.addf %1189, %1209 : vector<3x256xf32>
    %c62_218 = arith.constant 62 : index
    %1211 = memref.load %arg3[%c62_218] : memref<144xf32, #tpu.memory_space<smem>>
    %1212 = vector.broadcast %1211 : f32 to vector<3x256xf32>
    %1213 = arith.mulf %1202, %1212 : vector<3x256xf32>
    %1214 = arith.addf %1193, %1213 : vector<3x256xf32>
    %c63_219 = arith.constant 63 : index
    %1215 = memref.load %arg3[%c63_219] : memref<144xf32, #tpu.memory_space<smem>>
    %1216 = vector.broadcast %1215 : f32 to vector<3x256xf32>
    %1217 = arith.mulf %1202, %1216 : vector<3x256xf32>
    %1218 = arith.addf %1197, %1217 : vector<3x256xf32>
    %c64_220 = arith.constant 64 : index
    %1219 = memref.load %arg3[%c64_220] : memref<144xf32, #tpu.memory_space<smem>>
    %1220 = vector.broadcast %1219 : f32 to vector<3x256xf32>
    %1221 = arith.mulf %880, %1220 : vector<3x256xf32>
    %1222 = arith.addf %1206, %1221 : vector<3x256xf32>
    %c65_221 = arith.constant 65 : index
    %1223 = memref.load %arg3[%c65_221] : memref<144xf32, #tpu.memory_space<smem>>
    %1224 = vector.broadcast %1223 : f32 to vector<3x256xf32>
    %1225 = arith.mulf %880, %1224 : vector<3x256xf32>
    %1226 = arith.addf %1210, %1225 : vector<3x256xf32>
    %c66_222 = arith.constant 66 : index
    %1227 = memref.load %arg3[%c66_222] : memref<144xf32, #tpu.memory_space<smem>>
    %1228 = vector.broadcast %1227 : f32 to vector<3x256xf32>
    %1229 = arith.mulf %880, %1228 : vector<3x256xf32>
    %1230 = arith.addf %1214, %1229 : vector<3x256xf32>
    %c67_223 = arith.constant 67 : index
    %1231 = memref.load %arg3[%c67_223] : memref<144xf32, #tpu.memory_space<smem>>
    %1232 = vector.broadcast %1231 : f32 to vector<3x256xf32>
    %1233 = arith.mulf %880, %1232 : vector<3x256xf32>
    %1234 = arith.addf %1218, %1233 : vector<3x256xf32>
    %c68_224 = arith.constant 68 : index
    %1235 = memref.load %arg3[%c68_224] : memref<144xf32, #tpu.memory_space<smem>>
    %1236 = vector.broadcast %1235 : f32 to vector<3x256xf32>
    %1237 = arith.mulf %882, %1236 : vector<3x256xf32>
    %1238 = arith.addf %1222, %1237 : vector<3x256xf32>
    %c69_225 = arith.constant 69 : index
    %1239 = memref.load %arg3[%c69_225] : memref<144xf32, #tpu.memory_space<smem>>
    %1240 = vector.broadcast %1239 : f32 to vector<3x256xf32>
    %1241 = arith.mulf %882, %1240 : vector<3x256xf32>
    %1242 = arith.addf %1226, %1241 : vector<3x256xf32>
    %c70_226 = arith.constant 70 : index
    %1243 = memref.load %arg3[%c70_226] : memref<144xf32, #tpu.memory_space<smem>>
    %1244 = vector.broadcast %1243 : f32 to vector<3x256xf32>
    %1245 = arith.mulf %882, %1244 : vector<3x256xf32>
    %1246 = arith.addf %1230, %1245 : vector<3x256xf32>
    %c71_227 = arith.constant 71 : index
    %1247 = memref.load %arg3[%c71_227] : memref<144xf32, #tpu.memory_space<smem>>
    %1248 = vector.broadcast %1247 : f32 to vector<3x256xf32>
    %1249 = arith.mulf %882, %1248 : vector<3x256xf32>
    %1250 = arith.addf %1234, %1249 : vector<3x256xf32>
    %c72_228 = arith.constant 72 : index
    %1251 = memref.load %arg3[%c72_228] : memref<144xf32, #tpu.memory_space<smem>>
    %1252 = vector.broadcast %1251 : f32 to vector<3x256xf32>
    %1253 = arith.mulf %884, %1252 : vector<3x256xf32>
    %1254 = arith.addf %1238, %1253 : vector<3x256xf32>
    %c73_229 = arith.constant 73 : index
    %1255 = memref.load %arg3[%c73_229] : memref<144xf32, #tpu.memory_space<smem>>
    %1256 = vector.broadcast %1255 : f32 to vector<3x256xf32>
    %1257 = arith.mulf %884, %1256 : vector<3x256xf32>
    %1258 = arith.addf %1242, %1257 : vector<3x256xf32>
    %c74_230 = arith.constant 74 : index
    %1259 = memref.load %arg3[%c74_230] : memref<144xf32, #tpu.memory_space<smem>>
    %1260 = vector.broadcast %1259 : f32 to vector<3x256xf32>
    %1261 = arith.mulf %884, %1260 : vector<3x256xf32>
    %1262 = arith.addf %1246, %1261 : vector<3x256xf32>
    %c75_231 = arith.constant 75 : index
    %1263 = memref.load %arg3[%c75_231] : memref<144xf32, #tpu.memory_space<smem>>
    %1264 = vector.broadcast %1263 : f32 to vector<3x256xf32>
    %1265 = arith.mulf %884, %1264 : vector<3x256xf32>
    %1266 = arith.addf %1250, %1265 : vector<3x256xf32>
    %c76_232 = arith.constant 76 : index
    %1267 = memref.load %arg3[%c76_232] : memref<144xf32, #tpu.memory_space<smem>>
    %1268 = vector.broadcast %1267 : f32 to vector<3x256xf32>
    %1269 = arith.mulf %886, %1268 : vector<3x256xf32>
    %1270 = arith.addf %1254, %1269 : vector<3x256xf32>
    %c77_233 = arith.constant 77 : index
    %1271 = memref.load %arg3[%c77_233] : memref<144xf32, #tpu.memory_space<smem>>
    %1272 = vector.broadcast %1271 : f32 to vector<3x256xf32>
    %1273 = arith.mulf %886, %1272 : vector<3x256xf32>
    %1274 = arith.addf %1258, %1273 : vector<3x256xf32>
    %c78_234 = arith.constant 78 : index
    %1275 = memref.load %arg3[%c78_234] : memref<144xf32, #tpu.memory_space<smem>>
    %1276 = vector.broadcast %1275 : f32 to vector<3x256xf32>
    %1277 = arith.mulf %886, %1276 : vector<3x256xf32>
    %1278 = arith.addf %1262, %1277 : vector<3x256xf32>
    %c79_235 = arith.constant 79 : index
    %1279 = memref.load %arg3[%c79_235] : memref<144xf32, #tpu.memory_space<smem>>
    %1280 = vector.broadcast %1279 : f32 to vector<3x256xf32>
    %1281 = arith.mulf %886, %1280 : vector<3x256xf32>
    %1282 = arith.addf %1266, %1281 : vector<3x256xf32>
    %c255_i32_236 = arith.constant 255 : i32
    %1283 = tpu.dynamic_rotate %880 by %c255_i32_236 dim 1 : vector<3x256xf32>, i32 -> vector<3x256xf32>
    %cst_237 = arith.constant 0.000000e+00 : f32
    %1284 = vector.shape_cast %87 : vector<1x256xi1> to vector<1x256xi1>
    %1285 = vector.broadcast %1284 : vector<1x256xi1> to vector<3x256xi1>
    %1286 = vector.broadcast %cst_237 : f32 to vector<3x256xf32>
    %1287 = arith.select %1285, %1283, %1286 : vector<3x256xi1>, vector<3x256xf32>
    %c80_238 = arith.constant 80 : index
    %1288 = memref.load %arg3[%c80_238] : memref<144xf32, #tpu.memory_space<smem>>
    %1289 = vector.broadcast %1288 : f32 to vector<3x256xf32>
    %1290 = arith.mulf %1287, %1289 : vector<3x256xf32>
    %1291 = arith.addf %1270, %1290 : vector<3x256xf32>
    %c81_239 = arith.constant 81 : index
    %1292 = memref.load %arg3[%c81_239] : memref<144xf32, #tpu.memory_space<smem>>
    %1293 = vector.broadcast %1292 : f32 to vector<3x256xf32>
    %1294 = arith.mulf %1287, %1293 : vector<3x256xf32>
    %1295 = arith.addf %1274, %1294 : vector<3x256xf32>
    %c82_240 = arith.constant 82 : index
    %1296 = memref.load %arg3[%c82_240] : memref<144xf32, #tpu.memory_space<smem>>
    %1297 = vector.broadcast %1296 : f32 to vector<3x256xf32>
    %1298 = arith.mulf %1287, %1297 : vector<3x256xf32>
    %1299 = arith.addf %1278, %1298 : vector<3x256xf32>
    %c83_241 = arith.constant 83 : index
    %1300 = memref.load %arg3[%c83_241] : memref<144xf32, #tpu.memory_space<smem>>
    %1301 = vector.broadcast %1300 : f32 to vector<3x256xf32>
    %1302 = arith.mulf %1287, %1301 : vector<3x256xf32>
    %1303 = arith.addf %1282, %1302 : vector<3x256xf32>
    %c255_i32_242 = arith.constant 255 : i32
    %1304 = tpu.dynamic_rotate %882 by %c255_i32_242 dim 1 : vector<3x256xf32>, i32 -> vector<3x256xf32>
    %cst_243 = arith.constant 0.000000e+00 : f32
    %1305 = vector.shape_cast %87 : vector<1x256xi1> to vector<1x256xi1>
    %1306 = vector.broadcast %1305 : vector<1x256xi1> to vector<3x256xi1>
    %1307 = vector.broadcast %cst_243 : f32 to vector<3x256xf32>
    %1308 = arith.select %1306, %1304, %1307 : vector<3x256xi1>, vector<3x256xf32>
    %c84_244 = arith.constant 84 : index
    %1309 = memref.load %arg3[%c84_244] : memref<144xf32, #tpu.memory_space<smem>>
    %1310 = vector.broadcast %1309 : f32 to vector<3x256xf32>
    %1311 = arith.mulf %1308, %1310 : vector<3x256xf32>
    %1312 = arith.addf %1291, %1311 : vector<3x256xf32>
    %c85_245 = arith.constant 85 : index
    %1313 = memref.load %arg3[%c85_245] : memref<144xf32, #tpu.memory_space<smem>>
    %1314 = vector.broadcast %1313 : f32 to vector<3x256xf32>
    %1315 = arith.mulf %1308, %1314 : vector<3x256xf32>
    %1316 = arith.addf %1295, %1315 : vector<3x256xf32>
    %c86_246 = arith.constant 86 : index
    %1317 = memref.load %arg3[%c86_246] : memref<144xf32, #tpu.memory_space<smem>>
    %1318 = vector.broadcast %1317 : f32 to vector<3x256xf32>
    %1319 = arith.mulf %1308, %1318 : vector<3x256xf32>
    %1320 = arith.addf %1299, %1319 : vector<3x256xf32>
    %c87_247 = arith.constant 87 : index
    %1321 = memref.load %arg3[%c87_247] : memref<144xf32, #tpu.memory_space<smem>>
    %1322 = vector.broadcast %1321 : f32 to vector<3x256xf32>
    %1323 = arith.mulf %1308, %1322 : vector<3x256xf32>
    %1324 = arith.addf %1303, %1323 : vector<3x256xf32>
    %c255_i32_248 = arith.constant 255 : i32
    %1325 = tpu.dynamic_rotate %884 by %c255_i32_248 dim 1 : vector<3x256xf32>, i32 -> vector<3x256xf32>
    %cst_249 = arith.constant 0.000000e+00 : f32
    %1326 = vector.shape_cast %87 : vector<1x256xi1> to vector<1x256xi1>
    %1327 = vector.broadcast %1326 : vector<1x256xi1> to vector<3x256xi1>
    %1328 = vector.broadcast %cst_249 : f32 to vector<3x256xf32>
    %1329 = arith.select %1327, %1325, %1328 : vector<3x256xi1>, vector<3x256xf32>
    %c88_250 = arith.constant 88 : index
    %1330 = memref.load %arg3[%c88_250] : memref<144xf32, #tpu.memory_space<smem>>
    %1331 = vector.broadcast %1330 : f32 to vector<3x256xf32>
    %1332 = arith.mulf %1329, %1331 : vector<3x256xf32>
    %1333 = arith.addf %1312, %1332 : vector<3x256xf32>
    %c89_251 = arith.constant 89 : index
    %1334 = memref.load %arg3[%c89_251] : memref<144xf32, #tpu.memory_space<smem>>
    %1335 = vector.broadcast %1334 : f32 to vector<3x256xf32>
    %1336 = arith.mulf %1329, %1335 : vector<3x256xf32>
    %1337 = arith.addf %1316, %1336 : vector<3x256xf32>
    %c90_252 = arith.constant 90 : index
    %1338 = memref.load %arg3[%c90_252] : memref<144xf32, #tpu.memory_space<smem>>
    %1339 = vector.broadcast %1338 : f32 to vector<3x256xf32>
    %1340 = arith.mulf %1329, %1339 : vector<3x256xf32>
    %1341 = arith.addf %1320, %1340 : vector<3x256xf32>
    %c91_253 = arith.constant 91 : index
    %1342 = memref.load %arg3[%c91_253] : memref<144xf32, #tpu.memory_space<smem>>
    %1343 = vector.broadcast %1342 : f32 to vector<3x256xf32>
    %1344 = arith.mulf %1329, %1343 : vector<3x256xf32>
    %1345 = arith.addf %1324, %1344 : vector<3x256xf32>
    %c255_i32_254 = arith.constant 255 : i32
    %1346 = tpu.dynamic_rotate %886 by %c255_i32_254 dim 1 : vector<3x256xf32>, i32 -> vector<3x256xf32>
    %cst_255 = arith.constant 0.000000e+00 : f32
    %1347 = vector.shape_cast %87 : vector<1x256xi1> to vector<1x256xi1>
    %1348 = vector.broadcast %1347 : vector<1x256xi1> to vector<3x256xi1>
    %1349 = vector.broadcast %cst_255 : f32 to vector<3x256xf32>
    %1350 = arith.select %1348, %1346, %1349 : vector<3x256xi1>, vector<3x256xf32>
    %c92_256 = arith.constant 92 : index
    %1351 = memref.load %arg3[%c92_256] : memref<144xf32, #tpu.memory_space<smem>>
    %1352 = vector.broadcast %1351 : f32 to vector<3x256xf32>
    %1353 = arith.mulf %1350, %1352 : vector<3x256xf32>
    %1354 = arith.addf %1333, %1353 : vector<3x256xf32>
    %c93_257 = arith.constant 93 : index
    %1355 = memref.load %arg3[%c93_257] : memref<144xf32, #tpu.memory_space<smem>>
    %1356 = vector.broadcast %1355 : f32 to vector<3x256xf32>
    %1357 = arith.mulf %1350, %1356 : vector<3x256xf32>
    %1358 = arith.addf %1337, %1357 : vector<3x256xf32>
    %c94_258 = arith.constant 94 : index
    %1359 = memref.load %arg3[%c94_258] : memref<144xf32, #tpu.memory_space<smem>>
    %1360 = vector.broadcast %1359 : f32 to vector<3x256xf32>
    %1361 = arith.mulf %1350, %1360 : vector<3x256xf32>
    %1362 = arith.addf %1341, %1361 : vector<3x256xf32>
    %c95_259 = arith.constant 95 : index
    %1363 = memref.load %arg3[%c95_259] : memref<144xf32, #tpu.memory_space<smem>>
    %1364 = vector.broadcast %1363 : f32 to vector<3x256xf32>
    %1365 = arith.mulf %1350, %1364 : vector<3x256xf32>
    %1366 = arith.addf %1345, %1365 : vector<3x256xf32>
    %c241_i32_260 = arith.constant 241 : i32
    %1367 = tpu.dynamic_rotate %880 by %c241_i32_260 dim 1 : vector<3x256xf32>, i32 -> vector<3x256xf32>
    %cst_261 = arith.constant 0.000000e+00 : f32
    %1368 = vector.shape_cast %104 : vector<1x256xi1> to vector<1x256xi1>
    %1369 = vector.broadcast %1368 : vector<1x256xi1> to vector<3x256xi1>
    %1370 = vector.broadcast %cst_261 : f32 to vector<3x256xf32>
    %1371 = arith.select %1369, %1367, %1370 : vector<3x256xi1>, vector<3x256xf32>
    %c96_262 = arith.constant 96 : index
    %1372 = memref.load %arg3[%c96_262] : memref<144xf32, #tpu.memory_space<smem>>
    %1373 = vector.broadcast %1372 : f32 to vector<3x256xf32>
    %1374 = arith.mulf %1371, %1373 : vector<3x256xf32>
    %1375 = arith.addf %1354, %1374 : vector<3x256xf32>
    %c97_263 = arith.constant 97 : index
    %1376 = memref.load %arg3[%c97_263] : memref<144xf32, #tpu.memory_space<smem>>
    %1377 = vector.broadcast %1376 : f32 to vector<3x256xf32>
    %1378 = arith.mulf %1371, %1377 : vector<3x256xf32>
    %1379 = arith.addf %1358, %1378 : vector<3x256xf32>
    %c98_264 = arith.constant 98 : index
    %1380 = memref.load %arg3[%c98_264] : memref<144xf32, #tpu.memory_space<smem>>
    %1381 = vector.broadcast %1380 : f32 to vector<3x256xf32>
    %1382 = arith.mulf %1371, %1381 : vector<3x256xf32>
    %1383 = arith.addf %1362, %1382 : vector<3x256xf32>
    %c99_265 = arith.constant 99 : index
    %1384 = memref.load %arg3[%c99_265] : memref<144xf32, #tpu.memory_space<smem>>
    %1385 = vector.broadcast %1384 : f32 to vector<3x256xf32>
    %1386 = arith.mulf %1371, %1385 : vector<3x256xf32>
    %1387 = arith.addf %1366, %1386 : vector<3x256xf32>
    %c241_i32_266 = arith.constant 241 : i32
    %1388 = tpu.dynamic_rotate %882 by %c241_i32_266 dim 1 : vector<3x256xf32>, i32 -> vector<3x256xf32>
    %cst_267 = arith.constant 0.000000e+00 : f32
    %1389 = vector.shape_cast %104 : vector<1x256xi1> to vector<1x256xi1>
    %1390 = vector.broadcast %1389 : vector<1x256xi1> to vector<3x256xi1>
    %1391 = vector.broadcast %cst_267 : f32 to vector<3x256xf32>
    %1392 = arith.select %1390, %1388, %1391 : vector<3x256xi1>, vector<3x256xf32>
    %c100_268 = arith.constant 100 : index
    %1393 = memref.load %arg3[%c100_268] : memref<144xf32, #tpu.memory_space<smem>>
    %1394 = vector.broadcast %1393 : f32 to vector<3x256xf32>
    %1395 = arith.mulf %1392, %1394 : vector<3x256xf32>
    %1396 = arith.addf %1375, %1395 : vector<3x256xf32>
    %c101_269 = arith.constant 101 : index
    %1397 = memref.load %arg3[%c101_269] : memref<144xf32, #tpu.memory_space<smem>>
    %1398 = vector.broadcast %1397 : f32 to vector<3x256xf32>
    %1399 = arith.mulf %1392, %1398 : vector<3x256xf32>
    %1400 = arith.addf %1379, %1399 : vector<3x256xf32>
    %c102_270 = arith.constant 102 : index
    %1401 = memref.load %arg3[%c102_270] : memref<144xf32, #tpu.memory_space<smem>>
    %1402 = vector.broadcast %1401 : f32 to vector<3x256xf32>
    %1403 = arith.mulf %1392, %1402 : vector<3x256xf32>
    %1404 = arith.addf %1383, %1403 : vector<3x256xf32>
    %c103_271 = arith.constant 103 : index
    %1405 = memref.load %arg3[%c103_271] : memref<144xf32, #tpu.memory_space<smem>>
    %1406 = vector.broadcast %1405 : f32 to vector<3x256xf32>
    %1407 = arith.mulf %1392, %1406 : vector<3x256xf32>
    %1408 = arith.addf %1387, %1407 : vector<3x256xf32>
    %c241_i32_272 = arith.constant 241 : i32
    %1409 = tpu.dynamic_rotate %884 by %c241_i32_272 dim 1 : vector<3x256xf32>, i32 -> vector<3x256xf32>
    %cst_273 = arith.constant 0.000000e+00 : f32
    %1410 = vector.shape_cast %104 : vector<1x256xi1> to vector<1x256xi1>
    %1411 = vector.broadcast %1410 : vector<1x256xi1> to vector<3x256xi1>
    %1412 = vector.broadcast %cst_273 : f32 to vector<3x256xf32>
    %1413 = arith.select %1411, %1409, %1412 : vector<3x256xi1>, vector<3x256xf32>
    %c104_274 = arith.constant 104 : index
    %1414 = memref.load %arg3[%c104_274] : memref<144xf32, #tpu.memory_space<smem>>
    %1415 = vector.broadcast %1414 : f32 to vector<3x256xf32>
    %1416 = arith.mulf %1413, %1415 : vector<3x256xf32>
    %1417 = arith.addf %1396, %1416 : vector<3x256xf32>
    %c105_275 = arith.constant 105 : index
    %1418 = memref.load %arg3[%c105_275] : memref<144xf32, #tpu.memory_space<smem>>
    %1419 = vector.broadcast %1418 : f32 to vector<3x256xf32>
    %1420 = arith.mulf %1413, %1419 : vector<3x256xf32>
    %1421 = arith.addf %1400, %1420 : vector<3x256xf32>
    %c106_276 = arith.constant 106 : index
    %1422 = memref.load %arg3[%c106_276] : memref<144xf32, #tpu.memory_space<smem>>
    %1423 = vector.broadcast %1422 : f32 to vector<3x256xf32>
    %1424 = arith.mulf %1413, %1423 : vector<3x256xf32>
    %1425 = arith.addf %1404, %1424 : vector<3x256xf32>
    %c107_277 = arith.constant 107 : index
    %1426 = memref.load %arg3[%c107_277] : memref<144xf32, #tpu.memory_space<smem>>
    %1427 = vector.broadcast %1426 : f32 to vector<3x256xf32>
    %1428 = arith.mulf %1413, %1427 : vector<3x256xf32>
    %1429 = arith.addf %1408, %1428 : vector<3x256xf32>
    %c241_i32_278 = arith.constant 241 : i32
    %1430 = tpu.dynamic_rotate %886 by %c241_i32_278 dim 1 : vector<3x256xf32>, i32 -> vector<3x256xf32>
    %cst_279 = arith.constant 0.000000e+00 : f32
    %1431 = vector.shape_cast %104 : vector<1x256xi1> to vector<1x256xi1>
    %1432 = vector.broadcast %1431 : vector<1x256xi1> to vector<3x256xi1>
    %1433 = vector.broadcast %cst_279 : f32 to vector<3x256xf32>
    %1434 = arith.select %1432, %1430, %1433 : vector<3x256xi1>, vector<3x256xf32>
    %c108_280 = arith.constant 108 : index
    %1435 = memref.load %arg3[%c108_280] : memref<144xf32, #tpu.memory_space<smem>>
    %1436 = vector.broadcast %1435 : f32 to vector<3x256xf32>
    %1437 = arith.mulf %1434, %1436 : vector<3x256xf32>
    %1438 = arith.addf %1417, %1437 : vector<3x256xf32>
    %c109_281 = arith.constant 109 : index
    %1439 = memref.load %arg3[%c109_281] : memref<144xf32, #tpu.memory_space<smem>>
    %1440 = vector.broadcast %1439 : f32 to vector<3x256xf32>
    %1441 = arith.mulf %1434, %1440 : vector<3x256xf32>
    %1442 = arith.addf %1421, %1441 : vector<3x256xf32>
    %c110_282 = arith.constant 110 : index
    %1443 = memref.load %arg3[%c110_282] : memref<144xf32, #tpu.memory_space<smem>>
    %1444 = vector.broadcast %1443 : f32 to vector<3x256xf32>
    %1445 = arith.mulf %1434, %1444 : vector<3x256xf32>
    %1446 = arith.addf %1425, %1445 : vector<3x256xf32>
    %c111_283 = arith.constant 111 : index
    %1447 = memref.load %arg3[%c111_283] : memref<144xf32, #tpu.memory_space<smem>>
    %1448 = vector.broadcast %1447 : f32 to vector<3x256xf32>
    %1449 = arith.mulf %1434, %1448 : vector<3x256xf32>
    %1450 = arith.addf %1429, %1449 : vector<3x256xf32>
    %c240_i32_284 = arith.constant 240 : i32
    %1451 = tpu.dynamic_rotate %880 by %c240_i32_284 dim 1 : vector<3x256xf32>, i32 -> vector<3x256xf32>
    %cst_285 = arith.constant 0.000000e+00 : f32
    %1452 = vector.shape_cast %121 : vector<1x256xi1> to vector<1x256xi1>
    %1453 = vector.broadcast %1452 : vector<1x256xi1> to vector<3x256xi1>
    %1454 = vector.broadcast %cst_285 : f32 to vector<3x256xf32>
    %1455 = arith.select %1453, %1451, %1454 : vector<3x256xi1>, vector<3x256xf32>
    %c112_286 = arith.constant 112 : index
    %1456 = memref.load %arg3[%c112_286] : memref<144xf32, #tpu.memory_space<smem>>
    %1457 = vector.broadcast %1456 : f32 to vector<3x256xf32>
    %1458 = arith.mulf %1455, %1457 : vector<3x256xf32>
    %1459 = arith.addf %1438, %1458 : vector<3x256xf32>
    %c113_287 = arith.constant 113 : index
    %1460 = memref.load %arg3[%c113_287] : memref<144xf32, #tpu.memory_space<smem>>
    %1461 = vector.broadcast %1460 : f32 to vector<3x256xf32>
    %1462 = arith.mulf %1455, %1461 : vector<3x256xf32>
    %1463 = arith.addf %1442, %1462 : vector<3x256xf32>
    %c114_288 = arith.constant 114 : index
    %1464 = memref.load %arg3[%c114_288] : memref<144xf32, #tpu.memory_space<smem>>
    %1465 = vector.broadcast %1464 : f32 to vector<3x256xf32>
    %1466 = arith.mulf %1455, %1465 : vector<3x256xf32>
    %1467 = arith.addf %1446, %1466 : vector<3x256xf32>
    %c115_289 = arith.constant 115 : index
    %1468 = memref.load %arg3[%c115_289] : memref<144xf32, #tpu.memory_space<smem>>
    %1469 = vector.broadcast %1468 : f32 to vector<3x256xf32>
    %1470 = arith.mulf %1455, %1469 : vector<3x256xf32>
    %1471 = arith.addf %1450, %1470 : vector<3x256xf32>
    %c240_i32_290 = arith.constant 240 : i32
    %1472 = tpu.dynamic_rotate %882 by %c240_i32_290 dim 1 : vector<3x256xf32>, i32 -> vector<3x256xf32>
    %cst_291 = arith.constant 0.000000e+00 : f32
    %1473 = vector.shape_cast %121 : vector<1x256xi1> to vector<1x256xi1>
    %1474 = vector.broadcast %1473 : vector<1x256xi1> to vector<3x256xi1>
    %1475 = vector.broadcast %cst_291 : f32 to vector<3x256xf32>
    %1476 = arith.select %1474, %1472, %1475 : vector<3x256xi1>, vector<3x256xf32>
    %c116_292 = arith.constant 116 : index
    %1477 = memref.load %arg3[%c116_292] : memref<144xf32, #tpu.memory_space<smem>>
    %1478 = vector.broadcast %1477 : f32 to vector<3x256xf32>
    %1479 = arith.mulf %1476, %1478 : vector<3x256xf32>
    %1480 = arith.addf %1459, %1479 : vector<3x256xf32>
    %c117_293 = arith.constant 117 : index
    %1481 = memref.load %arg3[%c117_293] : memref<144xf32, #tpu.memory_space<smem>>
    %1482 = vector.broadcast %1481 : f32 to vector<3x256xf32>
    %1483 = arith.mulf %1476, %1482 : vector<3x256xf32>
    %1484 = arith.addf %1463, %1483 : vector<3x256xf32>
    %c118_294 = arith.constant 118 : index
    %1485 = memref.load %arg3[%c118_294] : memref<144xf32, #tpu.memory_space<smem>>
    %1486 = vector.broadcast %1485 : f32 to vector<3x256xf32>
    %1487 = arith.mulf %1476, %1486 : vector<3x256xf32>
    %1488 = arith.addf %1467, %1487 : vector<3x256xf32>
    %c119_295 = arith.constant 119 : index
    %1489 = memref.load %arg3[%c119_295] : memref<144xf32, #tpu.memory_space<smem>>
    %1490 = vector.broadcast %1489 : f32 to vector<3x256xf32>
    %1491 = arith.mulf %1476, %1490 : vector<3x256xf32>
    %1492 = arith.addf %1471, %1491 : vector<3x256xf32>
    %c240_i32_296 = arith.constant 240 : i32
    %1493 = tpu.dynamic_rotate %884 by %c240_i32_296 dim 1 : vector<3x256xf32>, i32 -> vector<3x256xf32>
    %cst_297 = arith.constant 0.000000e+00 : f32
    %1494 = vector.shape_cast %121 : vector<1x256xi1> to vector<1x256xi1>
    %1495 = vector.broadcast %1494 : vector<1x256xi1> to vector<3x256xi1>
    %1496 = vector.broadcast %cst_297 : f32 to vector<3x256xf32>
    %1497 = arith.select %1495, %1493, %1496 : vector<3x256xi1>, vector<3x256xf32>
    %c120_298 = arith.constant 120 : index
    %1498 = memref.load %arg3[%c120_298] : memref<144xf32, #tpu.memory_space<smem>>
    %1499 = vector.broadcast %1498 : f32 to vector<3x256xf32>
    %1500 = arith.mulf %1497, %1499 : vector<3x256xf32>
    %1501 = arith.addf %1480, %1500 : vector<3x256xf32>
    %c121_299 = arith.constant 121 : index
    %1502 = memref.load %arg3[%c121_299] : memref<144xf32, #tpu.memory_space<smem>>
    %1503 = vector.broadcast %1502 : f32 to vector<3x256xf32>
    %1504 = arith.mulf %1497, %1503 : vector<3x256xf32>
    %1505 = arith.addf %1484, %1504 : vector<3x256xf32>
    %c122_300 = arith.constant 122 : index
    %1506 = memref.load %arg3[%c122_300] : memref<144xf32, #tpu.memory_space<smem>>
    %1507 = vector.broadcast %1506 : f32 to vector<3x256xf32>
    %1508 = arith.mulf %1497, %1507 : vector<3x256xf32>
    %1509 = arith.addf %1488, %1508 : vector<3x256xf32>
    %c123_301 = arith.constant 123 : index
    %1510 = memref.load %arg3[%c123_301] : memref<144xf32, #tpu.memory_space<smem>>
    %1511 = vector.broadcast %1510 : f32 to vector<3x256xf32>
    %1512 = arith.mulf %1497, %1511 : vector<3x256xf32>
    %1513 = arith.addf %1492, %1512 : vector<3x256xf32>
    %c240_i32_302 = arith.constant 240 : i32
    %1514 = tpu.dynamic_rotate %886 by %c240_i32_302 dim 1 : vector<3x256xf32>, i32 -> vector<3x256xf32>
    %cst_303 = arith.constant 0.000000e+00 : f32
    %1515 = vector.shape_cast %121 : vector<1x256xi1> to vector<1x256xi1>
    %1516 = vector.broadcast %1515 : vector<1x256xi1> to vector<3x256xi1>
    %1517 = vector.broadcast %cst_303 : f32 to vector<3x256xf32>
    %1518 = arith.select %1516, %1514, %1517 : vector<3x256xi1>, vector<3x256xf32>
    %c124_304 = arith.constant 124 : index
    %1519 = memref.load %arg3[%c124_304] : memref<144xf32, #tpu.memory_space<smem>>
    %1520 = vector.broadcast %1519 : f32 to vector<3x256xf32>
    %1521 = arith.mulf %1518, %1520 : vector<3x256xf32>
    %1522 = arith.addf %1501, %1521 : vector<3x256xf32>
    %c125_305 = arith.constant 125 : index
    %1523 = memref.load %arg3[%c125_305] : memref<144xf32, #tpu.memory_space<smem>>
    %1524 = vector.broadcast %1523 : f32 to vector<3x256xf32>
    %1525 = arith.mulf %1518, %1524 : vector<3x256xf32>
    %1526 = arith.addf %1505, %1525 : vector<3x256xf32>
    %c126_306 = arith.constant 126 : index
    %1527 = memref.load %arg3[%c126_306] : memref<144xf32, #tpu.memory_space<smem>>
    %1528 = vector.broadcast %1527 : f32 to vector<3x256xf32>
    %1529 = arith.mulf %1518, %1528 : vector<3x256xf32>
    %1530 = arith.addf %1509, %1529 : vector<3x256xf32>
    %c127_307 = arith.constant 127 : index
    %1531 = memref.load %arg3[%c127_307] : memref<144xf32, #tpu.memory_space<smem>>
    %1532 = vector.broadcast %1531 : f32 to vector<3x256xf32>
    %1533 = arith.mulf %1518, %1532 : vector<3x256xf32>
    %1534 = arith.addf %1513, %1533 : vector<3x256xf32>
    %c239_i32_308 = arith.constant 239 : i32
    %1535 = tpu.dynamic_rotate %880 by %c239_i32_308 dim 1 : vector<3x256xf32>, i32 -> vector<3x256xf32>
    %cst_309 = arith.constant 0.000000e+00 : f32
    %1536 = vector.shape_cast %138 : vector<1x256xi1> to vector<1x256xi1>
    %1537 = vector.broadcast %1536 : vector<1x256xi1> to vector<3x256xi1>
    %1538 = vector.broadcast %cst_309 : f32 to vector<3x256xf32>
    %1539 = arith.select %1537, %1535, %1538 : vector<3x256xi1>, vector<3x256xf32>
    %c128_310 = arith.constant 128 : index
    %1540 = memref.load %arg3[%c128_310] : memref<144xf32, #tpu.memory_space<smem>>
    %1541 = vector.broadcast %1540 : f32 to vector<3x256xf32>
    %1542 = arith.mulf %1539, %1541 : vector<3x256xf32>
    %1543 = arith.addf %1522, %1542 : vector<3x256xf32>
    %c129_311 = arith.constant 129 : index
    %1544 = memref.load %arg3[%c129_311] : memref<144xf32, #tpu.memory_space<smem>>
    %1545 = vector.broadcast %1544 : f32 to vector<3x256xf32>
    %1546 = arith.mulf %1539, %1545 : vector<3x256xf32>
    %1547 = arith.addf %1526, %1546 : vector<3x256xf32>
    %c130_312 = arith.constant 130 : index
    %1548 = memref.load %arg3[%c130_312] : memref<144xf32, #tpu.memory_space<smem>>
    %1549 = vector.broadcast %1548 : f32 to vector<3x256xf32>
    %1550 = arith.mulf %1539, %1549 : vector<3x256xf32>
    %1551 = arith.addf %1530, %1550 : vector<3x256xf32>
    %c131_313 = arith.constant 131 : index
    %1552 = memref.load %arg3[%c131_313] : memref<144xf32, #tpu.memory_space<smem>>
    %1553 = vector.broadcast %1552 : f32 to vector<3x256xf32>
    %1554 = arith.mulf %1539, %1553 : vector<3x256xf32>
    %1555 = arith.addf %1534, %1554 : vector<3x256xf32>
    %c239_i32_314 = arith.constant 239 : i32
    %1556 = tpu.dynamic_rotate %882 by %c239_i32_314 dim 1 : vector<3x256xf32>, i32 -> vector<3x256xf32>
    %cst_315 = arith.constant 0.000000e+00 : f32
    %1557 = vector.shape_cast %138 : vector<1x256xi1> to vector<1x256xi1>
    %1558 = vector.broadcast %1557 : vector<1x256xi1> to vector<3x256xi1>
    %1559 = vector.broadcast %cst_315 : f32 to vector<3x256xf32>
    %1560 = arith.select %1558, %1556, %1559 : vector<3x256xi1>, vector<3x256xf32>
    %c132_316 = arith.constant 132 : index
    %1561 = memref.load %arg3[%c132_316] : memref<144xf32, #tpu.memory_space<smem>>
    %1562 = vector.broadcast %1561 : f32 to vector<3x256xf32>
    %1563 = arith.mulf %1560, %1562 : vector<3x256xf32>
    %1564 = arith.addf %1543, %1563 : vector<3x256xf32>
    %c133_317 = arith.constant 133 : index
    %1565 = memref.load %arg3[%c133_317] : memref<144xf32, #tpu.memory_space<smem>>
    %1566 = vector.broadcast %1565 : f32 to vector<3x256xf32>
    %1567 = arith.mulf %1560, %1566 : vector<3x256xf32>
    %1568 = arith.addf %1547, %1567 : vector<3x256xf32>
    %c134_318 = arith.constant 134 : index
    %1569 = memref.load %arg3[%c134_318] : memref<144xf32, #tpu.memory_space<smem>>
    %1570 = vector.broadcast %1569 : f32 to vector<3x256xf32>
    %1571 = arith.mulf %1560, %1570 : vector<3x256xf32>
    %1572 = arith.addf %1551, %1571 : vector<3x256xf32>
    %c135_319 = arith.constant 135 : index
    %1573 = memref.load %arg3[%c135_319] : memref<144xf32, #tpu.memory_space<smem>>
    %1574 = vector.broadcast %1573 : f32 to vector<3x256xf32>
    %1575 = arith.mulf %1560, %1574 : vector<3x256xf32>
    %1576 = arith.addf %1555, %1575 : vector<3x256xf32>
    %c239_i32_320 = arith.constant 239 : i32
    %1577 = tpu.dynamic_rotate %884 by %c239_i32_320 dim 1 : vector<3x256xf32>, i32 -> vector<3x256xf32>
    %cst_321 = arith.constant 0.000000e+00 : f32
    %1578 = vector.shape_cast %138 : vector<1x256xi1> to vector<1x256xi1>
    %1579 = vector.broadcast %1578 : vector<1x256xi1> to vector<3x256xi1>
    %1580 = vector.broadcast %cst_321 : f32 to vector<3x256xf32>
    %1581 = arith.select %1579, %1577, %1580 : vector<3x256xi1>, vector<3x256xf32>
    %c136_322 = arith.constant 136 : index
    %1582 = memref.load %arg3[%c136_322] : memref<144xf32, #tpu.memory_space<smem>>
    %1583 = vector.broadcast %1582 : f32 to vector<3x256xf32>
    %1584 = arith.mulf %1581, %1583 : vector<3x256xf32>
    %1585 = arith.addf %1564, %1584 : vector<3x256xf32>
    %c137_323 = arith.constant 137 : index
    %1586 = memref.load %arg3[%c137_323] : memref<144xf32, #tpu.memory_space<smem>>
    %1587 = vector.broadcast %1586 : f32 to vector<3x256xf32>
    %1588 = arith.mulf %1581, %1587 : vector<3x256xf32>
    %1589 = arith.addf %1568, %1588 : vector<3x256xf32>
    %c138_324 = arith.constant 138 : index
    %1590 = memref.load %arg3[%c138_324] : memref<144xf32, #tpu.memory_space<smem>>
    %1591 = vector.broadcast %1590 : f32 to vector<3x256xf32>
    %1592 = arith.mulf %1581, %1591 : vector<3x256xf32>
    %1593 = arith.addf %1572, %1592 : vector<3x256xf32>
    %c139_325 = arith.constant 139 : index
    %1594 = memref.load %arg3[%c139_325] : memref<144xf32, #tpu.memory_space<smem>>
    %1595 = vector.broadcast %1594 : f32 to vector<3x256xf32>
    %1596 = arith.mulf %1581, %1595 : vector<3x256xf32>
    %1597 = arith.addf %1576, %1596 : vector<3x256xf32>
    %c239_i32_326 = arith.constant 239 : i32
    %1598 = tpu.dynamic_rotate %886 by %c239_i32_326 dim 1 : vector<3x256xf32>, i32 -> vector<3x256xf32>
    %cst_327 = arith.constant 0.000000e+00 : f32
    %1599 = vector.shape_cast %138 : vector<1x256xi1> to vector<1x256xi1>
    %1600 = vector.broadcast %1599 : vector<1x256xi1> to vector<3x256xi1>
    %1601 = vector.broadcast %cst_327 : f32 to vector<3x256xf32>
    %1602 = arith.select %1600, %1598, %1601 : vector<3x256xi1>, vector<3x256xf32>
    %c140_328 = arith.constant 140 : index
    %1603 = memref.load %arg3[%c140_328] : memref<144xf32, #tpu.memory_space<smem>>
    %1604 = vector.broadcast %1603 : f32 to vector<3x256xf32>
    %1605 = arith.mulf %1602, %1604 : vector<3x256xf32>
    %1606 = arith.addf %1585, %1605 : vector<3x256xf32>
    %c141_329 = arith.constant 141 : index
    %1607 = memref.load %arg3[%c141_329] : memref<144xf32, #tpu.memory_space<smem>>
    %1608 = vector.broadcast %1607 : f32 to vector<3x256xf32>
    %1609 = arith.mulf %1602, %1608 : vector<3x256xf32>
    %1610 = arith.addf %1589, %1609 : vector<3x256xf32>
    %c142_330 = arith.constant 142 : index
    %1611 = memref.load %arg3[%c142_330] : memref<144xf32, #tpu.memory_space<smem>>
    %1612 = vector.broadcast %1611 : f32 to vector<3x256xf32>
    %1613 = arith.mulf %1602, %1612 : vector<3x256xf32>
    %1614 = arith.addf %1593, %1613 : vector<3x256xf32>
    %c143_331 = arith.constant 143 : index
    %1615 = memref.load %arg3[%c143_331] : memref<144xf32, #tpu.memory_space<smem>>
    %1616 = vector.broadcast %1615 : f32 to vector<3x256xf32>
    %1617 = arith.mulf %1602, %1616 : vector<3x256xf32>
    %1618 = arith.addf %1597, %1617 : vector<3x256xf32>
    %c0_332 = arith.constant 0 : index
    %c0_333 = arith.constant 0 : index
    %c0_334 = arith.constant 0 : index
    %1619 = vector.load %arg4[%c0_332, %c0_333, %c0_334] : memref<3x4x256xf32, #tpu.memory_space<vmem>>, vector<3x1x256xf32>
    %1620 = vector.shape_cast %1619 : vector<3x1x256xf32> to vector<3x256xf32>
    %1621 = vector.shape_cast %1606 : vector<3x256xf32> to vector<3x1x256xf32>
    tpu.vector_store %arg4[%c0_332, %c0_333, %c0_334], %1621 {strides = array<i32>} : memref<3x4x256xf32, #tpu.memory_space<vmem>>, vector<3x1x256xf32>,
    %c0_335 = arith.constant 0 : index
    %c1_336 = arith.constant 1 : index
    %c0_337 = arith.constant 0 : index
    %1622 = vector.load %arg4[%c0_335, %c1_336, %c0_337] : memref<3x4x256xf32, #tpu.memory_space<vmem>>, vector<3x1x256xf32>
    %1623 = vector.shape_cast %1622 : vector<3x1x256xf32> to vector<3x256xf32>
    %1624 = vector.shape_cast %1610 : vector<3x256xf32> to vector<3x1x256xf32>
    tpu.vector_store %arg4[%c0_335, %c1_336, %c0_337], %1624 {strides = array<i32>} : memref<3x4x256xf32, #tpu.memory_space<vmem>>, vector<3x1x256xf32>,
    %c0_338 = arith.constant 0 : index
    %c2_339 = arith.constant 2 : index
    %c0_340 = arith.constant 0 : index
    %1625 = vector.load %arg4[%c0_338, %c2_339, %c0_340] : memref<3x4x256xf32, #tpu.memory_space<vmem>>, vector<3x1x256xf32>
    %1626 = vector.shape_cast %1625 : vector<3x1x256xf32> to vector<3x256xf32>
    %1627 = vector.shape_cast %1614 : vector<3x256xf32> to vector<3x1x256xf32>
    tpu.vector_store %arg4[%c0_338, %c2_339, %c0_340], %1627 {strides = array<i32>} : memref<3x4x256xf32, #tpu.memory_space<vmem>>, vector<3x1x256xf32>,
    %c0_341 = arith.constant 0 : index
    %c3_342 = arith.constant 3 : index
    %c0_343 = arith.constant 0 : index
    %1628 = vector.load %arg4[%c0_341, %c3_342, %c0_343] : memref<3x4x256xf32, #tpu.memory_space<vmem>>, vector<3x1x256xf32>
    %1629 = vector.shape_cast %1628 : vector<3x1x256xf32> to vector<3x256xf32>
    %1630 = vector.shape_cast %1618 : vector<3x256xf32> to vector<3x1x256xf32>
    tpu.vector_store %arg4[%c0_341, %c3_342, %c0_343], %1630 {strides = array<i32>} : memref<3x4x256xf32, #tpu.memory_space<vmem>>, vector<3x1x256xf32>,
    return
  }
  func.func @transform_0(%arg0: i32) -> (i32, i32, i32) {
    %c0_i32 = arith.constant 0 : i32
    %c0_i32_0 = arith.constant 0 : i32
    %c0_i32_1 = arith.constant 0 : i32
    return %arg0, %c0_i32, %c0_i32_0 : i32, i32, i32
  }
  func.func @transform_1(%arg0: i32) -> i32 {
    %c0_i32 = arith.constant 0 : i32
    %c0_i32_0 = arith.constant 0 : i32
    return %c0_i32 : i32
  }
  func.func @transform_2(%arg0: i32) -> i32 {
    %c0_i32 = arith.constant 0 : i32
    %c0_i32_0 = arith.constant 0 : i32
    return %c0_i32 : i32
  }
  func.func @transform_3(%arg0: i32) -> (i32, i32, i32) {
    %c0_i32 = arith.constant 0 : i32
    %c0_i32_0 = arith.constant 0 : i32
    %c0_i32_1 = arith.constant 0 : i32
    return %arg0, %c0_i32, %c0_i32_0 : i32, i32, i32
  }
}

</mosaic_0001>

<bundles_post_ra>
// kernel: tpu_custom_call.1
= control target key start
LH: loop header
LB: loop body
LE: loop exit
PB: predicated region body
PF: predicated region fallthrough
CT: control target
= control target key end

     0   :  { %s7390_s0 = inlined_call_operand.hbm [shape: f32[6,4,256], index: 0, kind: input, shape index: {}]   ;;  %s7391_s1 = inlined_call_operand.hbm [shape: f32[144], index: 1, kind: input, shape index: {}]   ;;  %s7392_s2 = inlined_call_operand.vmem [shape: f32[144], index: 2, kind: input, shape index: {}]   ;;  %s7393_s3 = inlined_call_operand.hbm [shape: f32[6,4,256], index: 3, kind: output, shape index: {}]  }
   0x1   :  { %7684 = sst [smem:[#allocation132_spill]] %s7390_s0 }
   0x2   :  { %7685 = sst [smem:[#allocation133_spill]] %s7391_s1 }
   0x3   :  { %7686 = sst [smem:[#allocation134_spill]] %s7392_s2 }
   0x4   :  { %7687 = sst [smem:[#allocation135_spill]] %s7393_s3 }
   0x5   :  { %8 = vsyncpa [#allocation3], 0 }
   0x6   :  { %10 = vsyncpa [#allocation3 + $0x1], 0 }
   0x7   :  { %11 = vsyncpa [#allocation5], 0 }
   0x8   :  { %12 = vsyncpa [#allocation6], 0 }
   0x9   :  { %13 = vsyncpa [#allocation4], 0 }
   0xa   :  { %15 = vsyncpa [#allocation4 + $0x1], 0  ;;  %s4143_s12 = smov 0   ;;  %s4145_s13 = smov 0  }
   0xb   :  { %s4147_s14 = smov 0   ;;  %s4149_s15 = smov 0  }
   0xc LB: > { %7688 = sst [smem:[#allocation14_spill]] %s4092_s12  ;;  %s4164_s16 = sadd.s32 4294967295, %s4104_s15   ;;  %s4104_s15 = sphi %s4149_s15, %s8590_s15   ;;  %s4100_s14 = sphi %s4147_s14, %s8593_s14   ;;  %s4096_s13 = sphi %s4145_s13, %s8592_s13   ;;  %s4092_s12 = sphi %s4143_s12, %s8591_s12  }
   0xd   : > { %7689 = sst [smem:[#allocation15_spill]] %s4096_s13  ;;  %s3568_s17 = sadd.s32 4294967294, %s4104_s15  }
   0xe   : > { %7690 = sst [smem:[#allocation16_spill]] %s4100_s14  ;;  %s4168_s18 = sadd.s32 1, %s4104_s15  }
   0xf   : > { %7691 = sst [smem:[#allocation17_spill]] %s4104_s15  ;;  %s28_s19 = sadd.s32 1, %s4100_s14 }
  0x10   : > { %7692 = sst [smem:[#allocation18_spill]] %s4164_s16  ;;  %s25_s20 = ssub.s32 %s4104_s15, %s4168_s18 }
  0x11   : > { %7693 = sst [smem:[#allocation19_spill]] %s4168_s18  ;;  %p35_p0 = scmp.ne.s32.totalorder %s4100_s14, %s4096_s13 }
  0x12   : > { %p26_p1 = scmp.eq.s32.totalorder %s25_s20, 0  ;;  %p36_p2 = scmp.eq.s32.totalorder %s4104_s15, 0 }
  0x13   : > { %p41_p3 = scmp.ne.s32.totalorder %s4096_s13, %s4092_s12  ;;  %p7394_p4 = scmp.eq.s32.totalorder %s4164_s16, 0 }
  0x14   : > { %s4180_s21 = scalar_select %p26_p1, %s4100_s14, %s28_s19  }
  0x15   : > { %p4182_p5 = por %p36_p2, %p35_p0  ;;  %p4188_p6 = por %p7394_p4, %p41_p3 }
  0x16   : > { %7694 = sst [smem:[#allocation20_spill]] %s4180_s21  ;;  %p107_p7 = scmp.eq.s32.totalorder %s4164_s16, 1 }
  0x17   : > { %s7696_s23 = scalar_select %p4188_p6, 1, 0 }
  0x18   : > { %p113_p8 = scmp.eq.s32.totalorder %s3568_s17, 1  ;;  %p3569_p9 = scmp.ge.s32.totalorder %s4104_s15, 1 }
  0x19   : > { %p120_p10 = scmp.lt.s32.totalorder %s4104_s15, 3  ;;  %p4195_p11 = por %p107_p7, %p35_p0 }
  0x1a   : > { %p4199_p12 = por %p113_p8, %p41_p3  ;;  %p3927_p4 = scmp.lt.s32.totalorder %s4104_s15, 2 }
  0x1b   : > { %s7697_s24 = scalar_select %p4195_p11, 1, 0 }
  0x1c   : > { %s7699_s25 = scalar_select %p4199_p12, 1, 0 }
  0x1d   : > { %7698 = sst [smem:[#allocation21_spill]] %s7697_s24  ;;  %p4203_p13 = pnand %p3569_p9, %p120_p10 }
  0x1e   : > { %7700 = sst [smem:[#allocation22_spill]] %s7699_s25  ;;  %p7703_p0 = scmp.eq.s32.totalorder %s4164_s16, 0 }
  0x1f   : > { %s7701_s26 = scalar_select %p4203_p13, 1, 0 }
  0x20   : > { %p3910_p2 = pneg %p4203_p13  ;;  %s7702_s2 = sld [smem:[#allocation134_spill]] }
  0x21   : > { %p4222_p3 = pnand %p3927_p4, %p4182_p5  ;;  %s153_s5 = sand.u32 1, %s4100_s14  }
  0x22   : > { %p4216_p7 = pnand %p3910_p2, %p7703_p0  ;;  %s4106_s6 = smov [#allocation7]  }
  0x23   : > { %s7706_s1 = sld [smem:[#allocation133_spill]] }
  0x24   : > { %p3991_p9 = pneg %p4216_p7 }
  0x26   : > { %s142_s29 = sshll.u32 %s7702_s2, 4  ;;  %s143_s29 = int_to_ptr.vmem [resolvable:$true] %s142_s29 }
  0x27   : > { %s3989_s9 = scalar_lea.vmem %s143_s29, 32  ;;  %p3997_p0 = scmp.lt.s32.totalorder %s143_s29, %s143_s29 }
  0x28   : > { %p3990_p8 = scmp.ne.s32.totalorder %s143_s29, %s3989_s9  ;;  %p3998_p1 = scmp.lt.s32.totalorder %s3989_s9, %s3989_s9 }
  0x29   : > { %3913 = dma.hbm_to_smem (!%p4216_p7), %s7706_s1, 32, %s4106_s6, [#allocation5]  }
  0x2a   : > { %p3992_p10 = pnand %p3991_p9, %p3990_p8  ;;  %p3999_p4 = por %p3998_p1, %p3997_p0 }
  0x2c   : > { %p3993_p2 = pneg %p3992_p10 }
  0x2e   : > { %p4000_p5 = pnand %p3999_p4, %p3993_p2 }
  0x30   : > { %4003 = shalt.err (!%p4000_p5)
}
  0x31   : > { %s4107_s10 = smov [#allocation8]   ;;  %s3896_s11 = smul.u32 24, %s153_s5 }
  0x32   : > { %3916 = dma.vmem_to_smem (!%p4216_p7), %s143_s29, 32, %s4107_s10, [#allocation6]  }
  0x33   : > { %s3894_s17 = smul.u32 384, %s4104_s15  ;;  %s7707_s0 = sld [smem:[#allocation132_spill]] }
  0x34   : > { %s157_s27 = scalar_lea.vmem [#allocation2], %s3896_s11  ;;  %s4244_s6 = scalar_lea.sflag [#allocation3], %s153_s5 }
  0x35   : > { %s165_s28 = sshll.u32 %s157_s27, 4  ;;  %p4006_p7 = pneg %p4222_p3  ;;  %s4242_s28 = int_to_ptr.vmem [resolvable:$true] %s165_s28 }
  0x39   : > { %s4240_s22 = scalar_lea.hbm %s7707_s0, %s3894_s17  ;;  %s4009_s8 = scalar_lea.hbm %s7707_s0, 768 }
  0x3a   : > { %s4004_s30 = scalar_lea.hbm %s4240_s22, 384  ;;  %p4010_p10 = scmp.lt.s32.totalorder %s4240_s22, %s7707_s0 }
  0x3b   : > { %p4005_p1 = scmp.ne.s32.totalorder %s4240_s22, %s4004_s30  ;;  %p4011_p2 = scmp.lt.s32.totalorder %s4009_s8, %s4004_s30 }
  0x3d   : > { %p4007_p8 = pnand %p4006_p7, %p4005_p1  ;;  %p4012_p0 = por %p4011_p2, %p4010_p10 }
  0x3f   : > { %p4008_p9 = pneg %p4007_p8 }
  0x41   : > { %p4013_p4 = pnand %p4012_p0, %p4008_p9 }
  0x43   : > { %4016 = shalt.err (!%p4013_p4)
}
  0x44   : > { %s4017_s5 = scalar_lea.vmem %s4242_s28, 384  ;;  %s4108_s11 = smov [#allocation2]  }
  0x45   : > { %p4018_p5 = scmp.ne.s32.totalorder %s4242_s28, %s4017_s5  ;;  %s4022_s17 = sshll.u32 %s4108_s11, 4  ;;  %s4023_s17 = int_to_ptr.vmem [resolvable:$false] %s4022_s17 }
  0x46   : > { %s4024_s19 = scalar_lea.vmem %s4023_s17, 768  ;;  %p4025_p8 = scmp.lt.s32.totalorder %s4242_s28, %s4023_s17 }
  0x47   : > { %p4020_p12 = pnand %p4018_p5, %p4006_p7  ;;  %p4026_p11 = scmp.lt.s32.totalorder %s4024_s19, %s4017_s5 }
  0x49   : > { %p4021_p1 = pneg %p4020_p12  ;;  %p4027_p6 = por %p4026_p11, %p4025_p8 }
  0x4b   : > { %p4028_p13 = pnand %p4027_p6, %p4021_p1 }
  0x4d   : > { %4031 = shalt.err (!%p4028_p13)
}
  0x4e   : > { %s4109_s20 = smov 128   ;;  %s4110_s27 = smov 8  }
  0x4f   : > { %3920 = dma.hbm_to_vmem [thread:$0]  (!%p4222_p3), %s4240_s22, 384, %s4242_s28, %s4244_s6, %s4109_s20, %s4109_s20, %s4110_s27  }
  0x50   : > { %p7708_p7 = scmp.ne.s32.totalorder %s7701_s26, 0 }
  0x52   : > { %177 = sbr.rel (%p7708_p7) target bundleno = 942 (0x3ae), region = 32 }
  0x57   : > { %s4268_s30 = sand.u32 1, %s4096_s13   ;;  %p7710_p6 = scmp.ne.s32.totalorder %s7696_s23, 0 }
  0x58   : > { %7709 = sst [smem:[#allocation23_spill]] %s4268_s30  ;;  %s7398_s29 = smul.u32 24, %s4268_s30 }
  0x59   : > { %s180_s7 = scalar_lea.sflag [#allocation3], %s4268_s30 }
  0x5a   : > { %s4274_s8 = scalar_lea.vmem [#allocation2], %s7398_s29 }
  0x5b   : > { %4075 = dma.done.wait (%p7710_p6), %s180_s7, 384  }
  0x5c   : > { %4077 = vsyncadd (%p7710_p6), %s180_s7, 4294966912  ;;  %p7711_p11 = scmp.eq.s32.totalorder %s4164_s16, 0 }
  0x5e   : > { %4079 = dma.done.wait (%p7711_p11), [#allocation5], 32   ;;  %p7712_p12 = pmov %p7711_p11 }
  0x5f   : > { %p7713_p13 = pmov %p7711_p11 }
  0x60   : > { %4081 = vsyncadd (%p7712_p12), [#allocation5], 4294967264 }
  0x61   : > { %4083 = dma.done.wait (%p7713_p13), [#allocation6], 32   ;;  %p7714_p3 = pmov %p7711_p11 }
  0x63   : > { %4085 = vsyncadd (%p7714_p3), [#allocation6], 4294967264 }
  0x64   : > { %196 = sfence }
  0x65   : > { %v7476_v0 = vlaneseq  ;;  %v4289_v1 = vld [vmem:[%s4274_s8 + $0x1] ss:$4 sm:$0x3]  ;;  %v4292_v2 = vld [vmem:[%s4274_s8 + $0x9] ss:$4 sm:$0x3] }
  0x66   : > { %v4111_v3 = vmov 1966171168   ;;  %v4296_v6 = vld [vmem:[%s4274_s8] ss:$4 sm:$0x3]  ;;  %v373_v10 = vcombine.low %v4289_v1, %v4292_v2  ;;  %s7399_s23 = smov 17  }
  0x67   : > { %v310_v4 = vunpack.c.l.s4 %v4111_v3  ;;  %v313_v5 = vshrl.u32 %v7476_v0, 7  ;;  %v4299_v7 = vld [vmem:[%s4274_s8 + $0x11] ss:$4 sm:$0x3]  ;;  %s4373_s26 = sld [smem:[#allocation7 + $0x4]]  ;;  %s7413_s19 = smov 16  }
  0x68   : > { %v4302_v8 = vld [vmem:[%s4274_s8 + $0x8] ss:$4 sm:$0x3]  ;;  %v4309_v12 = vld [vmem:[%s4274_s8 + $0x2] ss:$4 sm:$0x3] }
  0x69   : > { %v311_v9 = vunpack.c.0.s8 %v310_v4  ;;  %v308_v11 = vcombine.low %v4296_v6, %v4302_v8  ;;  %v4312_v13 = vld [vmem:[%s4274_s8 + $0xa] ss:$4 sm:$0x3]  ;;  %v4315_v14 = vld [vmem:[%s4274_s8 + $0x10] ss:$4 sm:$0x3] }
  0x6a   : > { %v4318_v15 = vld [vmem:[%s4274_s8 + $0x12] ss:$4 sm:$0x3]  ;;  %v441_v16 = vcombine.low %v4309_v12, %v4312_v13  ;;  %v4325_v18 = vld [vmem:[%s4274_s8 + $0x3] ss:$4 sm:$0x3] }
  0x6b   : > { %v4322_v17 = vsub.s32 %v311_v9, %v313_v5  ;;  %v4328_v19 = vld [vmem:[%s4274_s8 + $0xb] ss:$4 sm:$0x3]  ;;  %v4342_v31 = vld [vmem:[%s4274_s8 + $0x13] ss:$4 sm:$0x3] }
  0x6c   : > { %v509_v26 = vcombine.low %v4325_v18, %v4328_v19  ;;  %s4375_s4 = sld [smem:[#allocation7 + $0x5]]  ;;  %s7429_s24 = smov 15   ;;  %v4508_v46 = vand.u32 127, %v7476_v0 }
  0x6d   : > { %7715 = vst [vmem:[#allocation24_spill] sm:$0xff] %v4322_v17  ;;  %v380_v20 = vrot.slane %v373_v10, %v4322_v17  ;;  %v387_v21 = vrot.slane %v4299_v7, %v4322_v17  ;;  %v315_v22 = vrot.slane %v308_v11, %v4322_v17  ;;  %v322_v23 = vrot.slane %v4315_v14, %v4322_v17  ;;  %7716 = sst [smem:[#allocation25_spill]] %s4373_s26 }
  0x6e   : > { %v448_v24 = vrot.slane %v441_v16, %v4322_v17  ;;  %v455_v25 = vrot.slane %v4318_v15, %v4322_v17  ;;  %v516_v35 = vrot.slane %v509_v26, %v4322_v17  ;;  %v523_v36 = vrot.slane %v4342_v31, %v4322_v17  ;;  %s4387_s22 = sld [smem:[#allocation7 + $0x6]] }
  0x6f   : > { %v388_v27 = vcombine.low %v380_v20, %v387_v21  ;;  %v323_v28 = vcombine.low %v315_v22, %v322_v23  ;;  %v389_v29 = vcombine.high %v380_v20, %v387_v21  ;;  %v324_v30 = vcombine.high %v315_v22, %v322_v23  ;;  %s4389_s28 = sld [smem:[#allocation7 + $0x7]] }
  0x70   : > { %v457_v34 = vcombine.high %v448_v24, %v455_v25  ;;  %v456_v39 = vcombine.low %v448_v24, %v455_v25  ;;  %v525_v40 = vcombine.high %v516_v35, %v523_v36  ;;  %v524_v43 = vcombine.low %v516_v35, %v523_v36  ;;  %s4391_s6 = sld [smem:[#allocation7]] }
  0x71   : > { %v4345_v32 = vrot.slane %v388_v27, %v4322_v17  ;;  %v4348_v33 = vrot.slane %v323_v28, %v4322_v17  ;;  %v4358_v37 = vrot.slane %v389_v29, %v4322_v17  ;;  %v4361_v38 = vrot.slane %v324_v30, %v4322_v17  ;;  %s4393_s9 = sld [smem:[#allocation7 + $0x1]] }
  0x72   : > { %v4368_v41 = vrot.slane %v457_v34, %v4322_v17  ;;  %v4371_v42 = vrot.slane %v456_v39, %v4322_v17  ;;  %7717 = sst [smem:[#allocation26_spill]] %s4375_s4  ;;  %v4382_v44 = vrot.slane %v525_v40, %v4322_v17  ;;  %v4385_v45 = vrot.slane %v524_v43, %v4322_v17 }
  0x73   : > { %406 = vrot.lane.b32.xlu1 %v4345_v32, %s7399_s23  ;;  %341 = vrot.lane.b32.xlu0 %v4348_v33, %s7399_s23  ;;  %s4399_s10 = sld [smem:[#allocation7 + $0x2]]  ;;  %v4523_v47 = vadd.s32 128, %v4508_v46  ;;  %v415_v48 = vstv %s4373_s26  ;;  %v421_v49 = vstv %s4375_s4  ;;  %v220_v50 = vand.u32 15, %v4508_v46  ;;  %s7760_s26 = smov 1  }
  0x74   : > { %7718 = sst [smem:[#allocation27_spill]] %s4387_s22  ;;  %v427_v51 = vstv %s4387_s22  ;;  %v4550_v60 = vadd.s32 4294967280, %v4508_v46  ;;  %vm345_vm2 = vcmp.lt.s32.totalorder %v4508_v46, 17  ;;  %vm578_vm5 = vcmp.lt.s32.totalorder %v4508_v46, 16 }
  0x75   : > { %7719 = sst [smem:[#allocation28_spill]] %s4389_s28  ;;  %v221_v59 = vand.u32 15, %v4523_v47  ;;  %v4578_v24 = vadd.s32 4294967295, %v220_v50  ;;  %v4590_v30 = vadd.s32 1, %v220_v50  ;;  %s7530_s28 = smov 111   ;;  %vm711_vm6 = vcmp.lt.s32.totalorder %v4508_v46, 15 }
  0x76   : > { %7720 = sst [smem:[#allocation29_spill]] %s4391_s6  ;;  %s7788_s6 = smov 127   ;;  %vm224_vm0 = vcmp.ge.s32.totalorder %v4550_v60, 0  ;;  %vm844_vm10 = vcmp.lt.s32.totalorder %v4508_v46, 1  ;;  %vm1665_vm11 = vcmp.lt.s32.totalorder %v4508_v46, 127  ;;  %vm7552_vm12 = vcmp.lt.s32.totalorder %v4508_v46, 113 }
  0x77   : > { %408 = vrot.lane.b32.xlu1 %v4358_v37, %s7399_s23  ;;  %343 = vrot.lane.b32.xlu0 %v4361_v38, %s7399_s23  ;;  %7721 = sst [smem:[#allocation30_spill]] %s4393_s9  ;;  %v4582_v25 = vadd.s32 4294967295, %v221_v59  ;;  %7777 = vst [vmem:[#allocation71_spill] sm:$0xff] %v4590_v30  ;;  %vm232_vm1 = vcmp.ge.s32.totalorder %v4578_v24, 0  ;;  %vm252_vm7 = vcmp.lt.s32.totalorder %v4590_v30, 16  ;;  %vm7551_vm15 = vcmp.lt.s32.totalorder %v4508_v46, 112 }
  0x78   : > { %s4401_s5 = sld [smem:[#allocation7 + $0x3]]  ;;  %vm5004_vm4 = vmand %vm224_vm0, %vm232_vm1 }
  0x79   : > { %7722 = sst [smem:[#allocation31_spill]] %s4399_s10  ;;  %vm233_vm3 = vcmp.ge.s32.totalorder %v4582_v25, 0  ;;  %vm5221_vm9 = vmand %vm224_vm0, %vm252_vm7 }
  0x7a   : > { %s4403_s11 = sld [smem:[#allocation7 + $0x8]] }
  0x7b   : > { %476 = vrot.lane.b32.xlu1 %v4368_v41, %s7399_s23  ;;  %474 = vrot.lane.b32.xlu0 %v4371_v42, %s7399_s23  ;;  %s4405_s17 = sld [smem:[#allocation7 + $0x9]] }
  0x7c   : > { %s4411_s20 = sld [smem:[#allocation7 + $0xa]] }
  0x7d   : > { %s4413_s27 = sld [smem:[#allocation7 + $0xb]] }
  0x7e   : > { %7723 = sst [smem:[#allocation32_spill]] %s4401_s5 }
  0x7f   : > { %544 = vrot.lane.b32.xlu1 %v4382_v44, %s7399_s23  ;;  %542 = vrot.lane.b32.xlu0 %v4385_v45, %s7399_s23  ;;  %s4415_s7 = sld [smem:[#allocation7 + $0xc]] }
  0x80   : > { %7724 = sst [smem:[#allocation33_spill]] %s4403_s11 }
  0x81   : > { %7725 = sst [smem:[#allocation34_spill]] %s4405_s17 }
  0x82   : > { %s4417_s8 = sld [smem:[#allocation7 + $0xd]] }
  0x83   : > { %576 = vrot.lane.b32.xlu1 %v4361_v38, %s7413_s19  ;;  %574 = vrot.lane.b32.xlu0 %v4348_v33, %s7413_s19  ;;  %7726 = sst [smem:[#allocation35_spill]] %s4413_s27 }
  0x84   : > { %s4423_s29 = sld [smem:[#allocation7 + $0xe]] }
  0x85   : > { %s4425_s23 = sld [smem:[#allocation7 + $0xf]] }
  0x86   : > { %s4427_s0 = sld [smem:[#allocation7 + $0x10]] }
  0x87   : > { %613 = vrot.lane.b32.xlu1 %v4358_v37, %s7413_s19  ;;  %611 = vrot.lane.b32.xlu0 %v4345_v32, %s7413_s19  ;;  %s4429_s1 = sld [smem:[#allocation7 + $0x11]] }
  0x88   : > { %7727 = sst [smem:[#allocation36_spill]] %s4417_s8 }
  0x89   : > { %s4435_s2 = sld [smem:[#allocation7 + $0x12]] }
  0x8a   : > { %7728 = sst [smem:[#allocation37_spill]] %s4423_s29  ;;  %s7481_s29 = smov 127  }
  0x8b   : > { %7729 = sst [smem:[#allocation38_spill]] %s4425_s23  ;;  %645 = vrot.lane.b32.xlu1 %v4368_v41, %s7413_s19  ;;  %643 = vrot.lane.b32.xlu0 %v4371_v42, %s7413_s19 }
  0x8c   : > { %7730 = sst [smem:[#allocation39_spill]] %s4427_s0 }
  0x8d   : > { %7731 = sst [smem:[#allocation40_spill]] %s4429_s1 }
  0x8e   : > { %s4437_s21 = sld [smem:[#allocation7 + $0x13]] }
  0x8f   : > { %7732 = sst [smem:[#allocation41_spill]] %s4435_s2  ;;  %677 = vrot.lane.b32.xlu1 %v4382_v44, %s7413_s19  ;;  %675 = vrot.lane.b32.xlu0 %v4385_v45, %s7413_s19 }
  0x90   : > { %s4439_s14 = sld [smem:[#allocation7 + $0x14]] }
  0x91   : > { %s4441_s13 = sld [smem:[#allocation7 + $0x15]] }
  0x92   : > { %s4447_s18 = sld [smem:[#allocation7 + $0x16]] }
  0x93   : > { %s4449_s15 = sld [smem:[#allocation7 + $0x17]]  ;;  %709 = vrot.lane.b32.xlu1 %v4361_v38, %s7429_s24  ;;  %707 = vrot.lane.b32.xlu0 %v4348_v33, %s7429_s24 }
  0x94   : > { %7733 = sst [smem:[#allocation42_spill]] %s4437_s21 }
  0x95   : > { %s4451_s25 = sld [smem:[#allocation7 + $0x18]] }
  0x96   : > { %7734 = sst [smem:[#allocation43_spill]] %s4439_s14 }
  0x97   : > { %7735 = sst [smem:[#allocation44_spill]] %s4441_s13  ;;  %746 = vrot.lane.b32.xlu1 %v4358_v37, %s7429_s24  ;;  %744 = vrot.lane.b32.xlu0 %v4345_v32, %s7429_s24 }
  0x98   : > { %7736 = sst [smem:[#allocation45_spill]] %s4447_s18 }
  0x99   : > { %7737 = sst [smem:[#allocation46_spill]] %s4449_s15 }
  0x9a   : > { %s4453_s12 = sld [smem:[#allocation7 + $0x19]] }
  0x9b   : > { %7738 = sst [smem:[#allocation47_spill]] %s4451_s25  ;;  %778 = vrot.lane.b32.xlu1 %v4368_v41, %s7429_s24  ;;  %776 = vrot.lane.b32.xlu0 %v4371_v42, %s7429_s24 }
  0x9c   : > { %s4459_s3 = sld [smem:[#allocation7 + $0x1a]] }
  0x9d   : > { %s4461_s30 = sld [smem:[#allocation7 + $0x1b]] }
  0x9e   : > { %s4463_s19 = sld [smem:[#allocation7 + $0x1c]] }
  0x9f   : > { %s4465_s16 = sld [smem:[#allocation7 + $0x1d]]  ;;  %810 = vrot.lane.b32.xlu1 %v4382_v44, %s7429_s24  ;;  %808 = vrot.lane.b32.xlu0 %v4385_v45, %s7429_s24 }
  0xa0   : > { %7739 = sst [smem:[#allocation48_spill]] %s4453_s12 }
  0xa1   : > { %s4471_s12 = sld [smem:[#allocation7 + $0x1e]] }
  0xa2   : > { %7740 = sst [smem:[#allocation49_spill]] %s4459_s3 }
  0xa3   : > { %7741 = sst [smem:[#allocation50_spill]] %s4461_s30 }
  0xa4   : > { %7742 = sst [smem:[#allocation51_spill]] %s4463_s19 }
  0xa5   : > { %7743 = sst [smem:[#allocation52_spill]] %s4465_s16 }
  0xa6   : > { %s4473_s25 = sld [smem:[#allocation7 + $0x1f]] }
  0xa7   : > { %s4475_s15 = sld [smem:[#allocation7 + $0x20]] }
  0xa8   : > { %s4477_s18 = sld [smem:[#allocation7 + $0x21]] }
  0xa9   : > { %s4483_s16 = sld [smem:[#allocation7 + $0x22]] }
  0xaa   : > { %s4485_s19 = sld [smem:[#allocation7 + $0x23]] }
  0xab   : > { %s4487_s30 = sld [smem:[#allocation7 + $0x24]] }
  0xac   : > { %7744 = sst [smem:[#allocation53_spill]] %s4473_s25 }
  0xad   : > { %7745 = sst [smem:[#allocation54_spill]] %s4475_s15 }
  0xae   : > { %7746 = sst [smem:[#allocation55_spill]] %s4477_s18 }
  0xaf   : > { %7747 = sst [smem:[#allocation56_spill]] %s4483_s16 }
  0xb0   : > { %7748 = sst [smem:[#allocation57_spill]] %s4485_s19  ;;  %s7436_s19 = smov 1  }
  0xb1   : > { %7749 = sst [smem:[#allocation58_spill]] %s4487_s30  ;;  %842 = vrot.lane.b32.xlu1 %v4361_v38, %s7436_s19  ;;  %840 = vrot.lane.b32.xlu0 %v4348_v33, %s7436_s19 }
  0xb2   : > { %s4489_s3 = sld [smem:[#allocation7 + $0x25]] }
  0xb3   : > { %s4495_s18 = sld [smem:[#allocation7 + $0x26]] }
  0xb4   : > { %s4497_s15 = sld [smem:[#allocation7 + $0x27]] }
  0xb5   : > { %s4499_s25 = sld [smem:[#allocation7 + $0x28]]  ;;  %879 = vrot.lane.b32.xlu1 %v4358_v37, %s7436_s19  ;;  %877 = vrot.lane.b32.xlu0 %v4345_v32, %s7436_s19 }
  0xb6   : > { %s4501_s16 = sld [smem:[#allocation7 + $0x29]] }
  0xb7   : > { %s4510_s24 = sld [smem:[#allocation7 + $0x2a]] }
  0xb8   : > { %s4536_s19 = sld [smem:[#allocation7 + $0x2f]] }
  0xb9   : > { %s4542_s4 = sld [smem:[#allocation7 + $0x30]]  ;;  %911 = vrot.lane.b32.xlu1 %v4368_v41, %s7760_s26  ;;  %909 = vrot.lane.b32.xlu0 %v4371_v42, %s7760_s26 }
  0xba   : > { %7750 = sst [smem:[#allocation59_spill]] %s4497_s15 }
  0xbb   : > { %7751 = sst [smem:[#allocation60_spill]] %s4499_s25 }
  0xbc   : > { %7752 = sst [smem:[#allocation61_spill]] %s4501_s16 }
  0xbd   : > { %7753 = sst [smem:[#allocation62_spill]] %s4510_s24  ;;  %943 = vrot.lane.b32.xlu1 %v4382_v44, %s7760_s26  ;;  %941 = vrot.lane.b32.xlu0 %v4385_v45, %s7760_s26 }
  0xbe   : > { %s4512_s15 = sld [smem:[#allocation7 + $0x2b]] }
  0xbf   : > { %s4514_s16 = sld [smem:[#allocation7 + $0x2c]] }
  0xc0   : > { %s4516_s25 = sld [smem:[#allocation7 + $0x2d]] }
  0xc1   : > { %s4525_s24 = sld [smem:[#allocation7 + $0x2e]]  ;;  %1663 = vrot.lane.b32.xlu1 %v4361_v38, %s7481_s29  ;;  %1661 = vrot.lane.b32.xlu0 %v4348_v33, %s7481_s29 }
  0xc2   : > { %7758 = sst [smem:[#allocation67_spill]] %s4536_s19 }
  0xc3   : > { %7759 = sst [smem:[#allocation68_spill]] %s4542_s4 }
  0xc4   : > { %7754 = sst [smem:[#allocation63_spill]] %s4512_s15 }
  0xc5   : > { %7755 = sst [smem:[#allocation64_spill]] %s4514_s16  ;;  %1700 = vrot.lane.b32.xlu1 %v4358_v37, %s7788_s6  ;;  %1698 = vrot.lane.b32.xlu0 %v4345_v32, %s7788_s6 }
  0xc6   : > { %7756 = sst [smem:[#allocation65_spill]] %s4516_s25 }
  0xc7   : > { %7757 = sst [smem:[#allocation66_spill]] %s4525_s24 }
  0xc8   : > { %s4530_s16 = sld [smem:[#allocation7 + $0x40]] }
  0xc9   : > { %s4554_s5 = sld [smem:[#allocation7 + $0x31]]  ;;  %1732 = vrot.lane.b32.xlu1 %v4368_v41, %s7788_s6  ;;  %1730 = vrot.lane.b32.xlu0 %v4371_v42, %s7788_s6 }
  0xca   : > { %s4560_s9 = sld [smem:[#allocation7 + $0x41]] }
  0xcb   : > { %s4566_s4 = sld [smem:[#allocation7 + $0x32]] }
  0xcc   : > { %s7769_s27 = sld [smem:[#allocation51_spill]] }
  0xcd   : > { %s7770_s8 = sld [smem:[#allocation52_spill]]  ;;  %1764 = vrot.lane.b32.xlu1 %v4382_v44, %s7788_s6  ;;  %1762 = vrot.lane.b32.xlu0 %v4385_v45, %s7788_s6 }
  0xce   : > { %s4572_s23 = sld [smem:[#allocation7 + $0x33]]  ;;  %v974_v34 = vstv %s4530_s16 }
  0xcf   : > { %7763 = sst [smem:[#allocation69_spill]] %s4554_s5  ;;  %v975_v0 = vmul.f32 %v974_v34, %v4296_v6  ;;  %v976_v29 = vmul.f32 %v4302_v8, %v974_v34  ;;  %v977_v27 = vmul.f32 %v4315_v14, %v974_v34 }
  0xd0   : > { %s7772_s0 = sld [smem:[#allocation53_spill]]  ;;  %v1017_v50 = vstv %s4560_s9 }
  0xd1   : > { %7768 = sst [smem:[#allocation70_spill]] %s4566_s4  ;;  %v1018_v39 = vmul.f32 %v1017_v50, %v4296_v6  ;;  %v1019_v26 = vmul.f32 %v4302_v8, %v1017_v50  ;;  %v981_v28 = vcombine.low %v975_v0, %v976_v29  ;;  %v1020_v16 = vmul.f32 %v4315_v14, %v1017_v50 }
  0xd2   : > { %s7773_s21 = sld [smem:[#allocation54_spill]] }
  0xd3   : > { %s7774_s13 = sld [smem:[#allocation55_spill]]  ;;  %v1024_v40 = vcombine.low %v1018_v39, %v1019_v26  ;;  %v988_v26 = vrot.slane %v981_v28, %v4322_v17  ;;  %v995_v39 = vrot.slane %v977_v27, %v4322_v17  ;;  %v1038_v10 = vrot.slane %v1020_v16, %v4322_v17 }
  0xd4   : > { %7771 = sst [smem:[#allocation51_spill]] %s4572_s23 }
  0xd5   : > { %s4586_s17 = sld [smem:[#allocation7 + $0x34]]  ;;  %v1031_v20 = vrot.slane %v1024_v40, %v4322_v17  ;;  %v997_v36 = vcombine.high %v988_v26, %v995_v39 }
  0xd6   : > { %s7778_s14 = sld [smem:[#allocation57_spill]] }
  0xd7   : > { %s4592_s26 = sld [smem:[#allocation7 + $0x35]]  ;;  %v1039_v5 = vcombine.low %v1031_v20, %v1038_v10 }
  0xd8   : > { %s4599_s10 = sld [smem:[#allocation7 + $0x42]] }
  0xd9   : > { %s7782_s22 = sld [smem:[#allocation61_spill]]  ;;  %v4723_v3 = vrot.slane %v1039_v5, %v4322_v17 }
  0xda   : > { %s4605_s1 = sld [smem:[#allocation7 + $0x43]] }
  0xdb   : > { %7776 = sst [smem:[#allocation52_spill]] %s4586_s17 }
  0xdc   : > { %s4615_s9 = sld [smem:[#allocation7 + $0x44]] }
  0xdd   : > { %7779 = sst [smem:[#allocation53_spill]] %s4592_s26 }
  0xde   : > { %s4621_s11 = sld [smem:[#allocation7 + $0x45]]  ;;  %v1060_v23 = vstv %s4599_s10 }
  0xdf   : > { %s4625_s30 = sld [smem:[#allocation7 + $0x36]]  ;;  %v1061_v35 = vmul.f32 %v1060_v23, %v4296_v6  ;;  %v1062_v43 = vmul.f32 %v4302_v8, %v1060_v23 }
  0xe0   : > { %s4633_s2 = sld [smem:[#allocation7 + $0x37]]  ;;  %v1103_v22 = vstv %s4605_s1 }
  0xe1   : > { %s4642_s15 = sld [smem:[#allocation7 + $0x46]]  ;;  %v1104_v0 = vmul.f32 %v1103_v22, %v4296_v6  ;;  %v1105_v29 = vmul.f32 %v4302_v8, %v1103_v22  ;;  %v1063_v6 = vmul.f32 %v4315_v14, %v1060_v23  ;;  %v1067_v8 = vcombine.low %v1061_v35, %v1062_v43 }
  0xe2   : > { %s4652_s19 = sld [smem:[#allocation7 + $0x38]]  ;;  %v1146_v34 = vstv %s4615_s9  ;;  %v1106_v28 = vmul.f32 %v4315_v14, %v1103_v22  ;;  %v4685_v43 = vadd.s32 1, %v221_v59  ;;  %v996_v14 = vcombine.low %v988_v26, %v995_v39 }
  0xe3   : > { %s4662_s1 = sld [smem:[#allocation7 + $0x39]]  ;;  %v1147_v11 = vmul.f32 %v4289_v1, %v1146_v34  ;;  %v1148_v21 = vmul.f32 %v4292_v2, %v1146_v34  ;;  %v1110_v9 = vcombine.low %v1104_v0, %v1105_v29  ;;  %v1074_v22 = vrot.slane %v1067_v8, %v4322_v17 }
  0xe4   : > { %v1189_v50 = vstv %s4621_s11  ;;  %s4670_s10 = sld [smem:[#allocation7 + $0x47]]  ;;  %v1081_v0 = vrot.slane %v1063_v6, %v4322_v17  ;;  %v1149_v29 = vmul.f32 %v4299_v7, %v1146_v34  ;;  %v4697_v59 = vrot.slane %v1106_v28, %v4322_v17 }
  0xe5   : > { %7786 = sst [smem:[#allocation54_spill]] %s4625_s30  ;;  %v1190_v23 = vmul.f32 %v4289_v1, %v1189_v50  ;;  %v1191_v35 = vmul.f32 %v4292_v2, %v1189_v50  ;;  %v1153_v27 = vcombine.low %v1147_v11, %v1148_v21  ;;  %v1117_v8 = vrot.slane %v1110_v9, %v4322_v17 }
  0xe6   : > { %7787 = sst [smem:[#allocation55_spill]] %s4633_s2  ;;  %v1192_v6 = vmul.f32 %v4299_v7, %v1189_v50  ;;  %v4714_v26 = vrot.slane %v996_v14, %v4322_v17  ;;  %v1040_v9 = vcombine.high %v1031_v20, %v1038_v10  ;;  %v1082_v39 = vcombine.low %v1074_v22, %v1081_v0 }
  0xe7   : > { %s4688_s11 = sld [smem:[#allocation7 + $0x3a]]  ;;  %v1232_v16 = vstv %s4642_s15  ;;  %v1196_v4 = vcombine.low %v1190_v23, %v1191_v35  ;;  %s7492_s15 = smov 113   ;;  %v1160_v50 = vrot.slane %v1153_v27, %v4322_v17  ;;  %v1167_v28 = vrot.slane %v1149_v29, %v4322_v17 }
  0xe8   : > { %7789 = sst [smem:[#allocation57_spill]] %s4652_s19  ;;  %v1233_v40 = vmul.f32 %v4289_v1, %v1232_v16  ;;  %v1234_v34 = vmul.f32 %v4292_v2, %v1232_v16  ;;  %1796 = vrot.lane.b32.xlu1 %v4361_v38, %s7492_s15  ;;  %1794 = vrot.lane.b32.xlu0 %v4348_v33, %s7492_s15  ;;  %v4720_v35 = vrot.slane %v997_v36, %v4322_v17  ;;  %vm253_vm8 = vcmp.lt.s32.totalorder %v4685_v43, 16 }
  0xe9   : > { %7790 = sst [smem:[#allocation61_spill]] %s4662_s1  ;;  %v1235_v21 = vmul.f32 %v4299_v7, %v1232_v16  ;;  %v1083_v10 = vcombine.high %v1074_v22, %v1081_v0  ;;  %v1125_v20 = vcombine.low %v1117_v8, %v4697_v59  ;;  %v1203_v27 = vrot.slane %v1196_v4, %v4322_v17  ;;  %s7793_s1 = smov 113  }
  0xea   : > { %s4694_s9 = sld [smem:[#allocation7 + $0x48]]  ;;  %v1275_v23 = vstv %s4670_s10  ;;  %v1239_v11 = vcombine.low %v1233_v40, %v1234_v34  ;;  %v1210_v14 = vrot.slane %v1192_v6, %v4322_v17  ;;  %v4739_v36 = vrot.slane %v1040_v9, %v4322_v17 }
  0xeb   : > { %s4700_s6 = sld [smem:[#allocation7 + $0x49]]  ;;  %v1276_v40 = vmul.f32 %v4289_v1, %v1275_v23  ;;  %v1277_v16 = vmul.f32 %v4292_v2, %v1275_v23  ;;  %v4746_v4 = vrot.slane %v1082_v39, %v4322_v17  ;;  %v1126_v22 = vcombine.high %v1117_v8, %v4697_v59 }
  0xec   : > { %s4711_s2 = sld [smem:[#allocation7 + $0x3b]]  ;;  %1833 = vrot.lane.b32.xlu1 %v4358_v37, %s7793_s1  ;;  %1831 = vrot.lane.b32.xlu0 %v4345_v32, %s7793_s1  ;;  %v1168_v0 = vcombine.low %v1160_v50, %v1167_v28  ;;  %v1169_v6 = vcombine.high %v1160_v50, %v1167_v28  ;;  %v1246_v34 = vrot.slane %v1239_v11, %v4322_v17 }
  0xed   : > { %7791 = sst [smem:[#allocation72_spill]] %s4688_s11  ;;  %v1253_v9 = vrot.slane %v1235_v21, %v4322_v17  ;;  %v4756_v2 = vrot.slane %v1083_v10, %v4322_v17  ;;  %v4759_v5 = vrot.slane %v1125_v20, %v4322_v17  ;;  %v1211_v39 = vcombine.low %v1203_v27, %v1210_v14 }
  0xee   : > { %s4726_s15 = sld [smem:[#allocation7 + $0x4a]]  ;;  %v1212_v63 = vcombine.high %v1203_v27, %v1210_v14  ;;  %v1278_v8 = vmul.f32 %v4299_v7, %v1275_v23  ;;  %v1282_v11 = vcombine.low %v1276_v40, %v1277_v16  ;;  %v4781_v7 = vrot.slane %v1126_v22, %v4322_v17 }
  0xef   : > { %s4731_s10 = sld [smem:[#allocation7 + $0x4b]]  ;;  %v4784_v23 = vrot.slane %v1168_v0, %v4322_v17  ;;  %v4787_v27 = vrot.slane %v1169_v6, %v4322_v17  ;;  %v1254_v14 = vcombine.low %v1246_v34, %v1253_v9  ;;  %v4792_v40 = vrot.slane %v1211_v39, %v4322_v17 }
  0xf0   : > { %s4743_s19 = sld [smem:[#allocation7 + $0x4c]]  ;;  %v1318_v29 = vstv %s4694_s9  ;;  %1865 = vrot.lane.b32.xlu1 %v4368_v41, %s7793_s1  ;;  %1863 = vrot.lane.b32.xlu0 %v4371_v42, %s7793_s1  ;;  %v4795_v16 = vrot.slane %v1212_v63, %v4322_v17  ;;  %v1255_v22 = vcombine.high %v1246_v34, %v1253_v9  ;;  %v1289_v0 = vrot.slane %v1282_v11, %v4322_v17 }
  0xf1   : > { %s4750_s30 = sld [smem:[#allocation7 + $0x3c]]  ;;  %v1361_v1 = vstv %s4700_s6  ;;  %v1319_v21 = vmul.f32 %v4309_v12, %v1318_v29  ;;  %v1320_v50 = vmul.f32 %v4312_v13, %v1318_v29  ;;  %v1321_v28 = vmul.f32 %v4318_v15, %v1318_v29 }
  0xf2   : > { %7792 = sst [smem:[#allocation73_spill]] %s4711_s2  ;;  %v1362_v10 = vmul.f32 %v4309_v12, %v1361_v1  ;;  %v1363_v20 = vmul.f32 %v4312_v13, %v1361_v1  ;;  %v1296_v6 = vrot.slane %v1278_v8, %v4322_v17  ;;  %v1364_v61 = vmul.f32 %v4318_v15, %v1361_v1 }
  0xf3   : > { %s4761_s11 = sld [smem:[#allocation7 + $0x4d]]  ;;  %v1325_v39 = vcombine.low %v1319_v21, %v1320_v50  ;;  %v4809_v63 = vrot.slane %v1321_v28, %v4322_v17  ;;  %v4815_v34 = vrot.slane %v1254_v14, %v4322_v17 }
  0xf4   : > { %s4768_s9 = sld [smem:[#allocation7 + $0x3d]]  ;;  %v1404_v29 = vstv %s4726_s15  ;;  %1897 = vrot.lane.b32.xlu1 %v4382_v44, %s7793_s1  ;;  %1895 = vrot.lane.b32.xlu0 %v4385_v45, %s7793_s1  ;;  %v1368_v58 = vcombine.low %v1362_v10, %v1363_v20  ;;  %s7511_s1 = smov 112   ;;  %v4834_v10 = vrot.slane %v1255_v22, %v4322_v17  ;;  %v1298_v20 = vcombine.high %v1289_v0, %v1296_v6 }
  0xf5   : > { %s4776_s6 = sld [smem:[#allocation7 + $0x4e]]  ;;  %v1447_v59 = vstv %s4731_s10  ;;  %v1405_v9 = vmul.f32 %v4309_v12, %v1404_v29  ;;  %v1406_v8 = vmul.f32 %v4312_v13, %v1404_v29  ;;  %v4839_v14 = vrot.slane %v1325_v39, %v4322_v17 }
  0xf6   : > { %s4778_s2 = sld [smem:[#allocation7 + $0x3e]]  ;;  %v1490_v62 = vstv %s4743_s19  ;;  %v1448_v11 = vmul.f32 %v4309_v12, %v1447_v59  ;;  %v1449_v21 = vmul.f32 %v4312_v13, %v1447_v59  ;;  %v1297_v13 = vcombine.low %v1289_v0, %v1296_v6 }
  0xf7   : > { %7794 = sst [smem:[#allocation74_spill]] %s4750_s30  ;;  %v1491_v1 = vmul.f32 %v4325_v18, %v1490_v62  ;;  %v1492_v50 = vmul.f32 %v4328_v19, %v1490_v62  ;;  %v4842_v57 = vrot.slane %v1368_v58, %v4322_v17  ;;  %v4849_v12 = vrot.slane %v1364_v61, %v4322_v17 }
  0xf8   : > { %s4789_s26 = sld [smem:[#allocation7 + $0x3f]]  ;;  %1929 = vrot.lane.b32.xlu1 %v4361_v38, %s7511_s1  ;;  %1927 = vrot.lane.b32.xlu0 %v4348_v33, %s7511_s1  ;;  %v1407_v22 = vmul.f32 %v4318_v15, %v1404_v29  ;;  %v1411_v0 = vcombine.low %v1405_v9, %v1406_v8  ;;  %v1450_v39 = vmul.f32 %v4318_v15, %v1447_v59 }
  0xf9   : > { %s4806_s17 = sld [smem:[#allocation7 + $0x4f]]  ;;  %v1533_v28 = vstv %s4761_s11  ;;  %v1454_v58 = vcombine.low %v1448_v11, %v1449_v21  ;;  %v1493_v54 = vmul.f32 %v4342_v31, %v1490_v62  ;;  %v1497_v53 = vcombine.low %v1491_v1, %v1492_v50 }
  0xfa   : > { %7795 = sst [smem:[#allocation75_spill]] %s4768_s9  ;;  %v1534_v56 = vmul.f32 %v4325_v18, %v1533_v28  ;;  %v1535_v6 = vmul.f32 %v4328_v19, %v1533_v28  ;;  %v4865_v29 = vrot.slane %v1297_v13, %v4322_v17  ;;  %v4872_v62 = vrot.slane %v1298_v20, %v4322_v17 }
  0xfb   : > { %s4812_s15 = sld [smem:[#allocation7 + $0x50]]  ;;  %v1576_v55 = vstv %s4776_s6  ;;  %s7798_s6 = smov 112   ;;  %v1340_v59 = vcombine.low %v4839_v14, %v4809_v63  ;;  %v1536_v8 = vmul.f32 %v4342_v31, %v1533_v28  ;;  %v1341_v21 = vcombine.high %v4839_v14, %v4809_v63 }
  0xfc   : > { %7796 = sst [smem:[#allocation76_spill]] %s4778_s2  ;;  %1966 = vrot.lane.b32.xlu1 %v4358_v37, %s7798_s6  ;;  %1964 = vrot.lane.b32.xlu0 %v4345_v32, %s7798_s6  ;;  %v1577_v9 = vmul.f32 %v4325_v18, %v1576_v55  ;;  %v1578_v15 = vmul.f32 %v4328_v19, %v1576_v55  ;;  %7799 = vst [vmem:[#allocation78_spill] sm:$0xff] %v4872_v62 }
  0xfd   : > { %s4820_s19 = sld [smem:[#allocation7 + $0x51]]  ;;  %v1540_v11 = vcombine.low %v1534_v56, %v1535_v6  ;;  %v1418_v1 = vrot.slane %v1411_v0, %v4322_v17  ;;  %v1425_v50 = vrot.slane %v1407_v22, %v4322_v17  ;;  %v1461_v20 = vrot.slane %v1454_v58, %v4322_v17 }
  0xfe   : > { %7797 = sst [smem:[#allocation77_spill]] %s4789_s26  ;;  %v1468_v61 = vrot.slane %v1450_v39, %v4322_v17  ;;  %v1504_v52 = vrot.slane %v1497_v53, %v4322_v17  ;;  %v1511_v56 = vrot.slane %v1493_v54, %v4322_v17  ;;  %v1383_v28 = vcombine.low %v4842_v57, %v4849_v12 }
  0xff   : > { %s4826_s10 = sld [smem:[#allocation7 + $0x52]]  ;;  %v1619_v13 = vstv %s4806_s17  ;;  %v1579_v14 = vmul.f32 %v4342_v31, %v1576_v55  ;;  %v1583_v22 = vcombine.low %v1577_v9, %v1578_v15  ;;  %v1547_v53 = vrot.slane %v1540_v11, %v4322_v17 }
 0x100   : > { %s4836_s23 = sld [smem:[#allocation7 + $0x53]]  ;;  %1998 = vrot.lane.b32.xlu1 %v4368_v41, %s7798_s6  ;;  %1996 = vrot.lane.b32.xlu0 %v4371_v42, %s7798_s6  ;;  %v1554_v54 = vrot.slane %v1536_v8, %v4322_v17  ;;  %v1620_v0 = vmul.f32 %v4325_v18, %v1619_v13  ;;  %v1621_v6 = vmul.f32 %v4328_v19, %v1619_v13 }
 0x101   : > { %s4846_s11 = sld [smem:[#allocation7 + $0x54]]  ;;  %v4911_v55 = vrot.slane %v1340_v59, %v4322_v17  ;;  %v1384_v39 = vcombine.high %v4842_v57, %v4849_v12  ;;  %v1426_v58 = vcombine.low %v1418_v1, %v1425_v50  ;;  %v1427_v9 = vcombine.high %v1418_v1, %v1425_v50 }
 0x102   : > { %s4853_s1 = sld [smem:[#allocation7 + $0x55]]  ;;  %v1469_v18 = vcombine.low %v1461_v20, %v1468_v61  ;;  %v1470_v15 = vcombine.high %v1461_v20, %v1468_v61  ;;  %v1512_v19 = vcombine.low %v1504_v52, %v1511_v56  ;;  %v1513_v8 = vcombine.high %v1504_v52, %v1511_v56 }
 0x103   : > { %s4857_s30 = sld [smem:[#allocation7 + $0x56]]  ;;  %7803 = vst [vmem:[#allocation82_spill] sm:$0xff] %v4911_v55  ;;  %v4926_v57 = vrot.slane %v1341_v21, %v4322_v17  ;;  %v1590_v12 = vrot.slane %v1583_v22, %v4322_v17  ;;  %v1597_v61 = vrot.slane %v1579_v14, %v4322_v17  ;;  %v4934_v52 = vrot.slane %v1383_v28, %v4322_v17 }
 0x104   : > { %s4869_s4 = sld [smem:[#allocation7 + $0x57]]  ;;  %2030 = vrot.lane.b32.xlu1 %v4382_v44, %s7798_s6  ;;  %2028 = vrot.lane.b32.xlu0 %v4385_v45, %s7798_s6  ;;  %v1555_v11 = vcombine.low %v1547_v53, %v1554_v54  ;;  %v1622_v1 = vmul.f32 %v4342_v31, %v1619_v13  ;;  %v1626_v50 = vcombine.low %v1620_v0, %v1621_v6 }
 0x105   : > { %s4877_s9 = sld [smem:[#allocation7 + $0x58]]  ;;  %7806 = vst [vmem:[#allocation85_spill] sm:$0xff] %v4926_v57  ;;  %7808 = vst [vmem:[#allocation87_spill] sm:$0xff] %v4934_v52  ;;  %v4940_v21 = vrot.slane %v1384_v39, %v4322_v17  ;;  %v4943_v20 = vrot.slane %v1426_v58, %v4322_v17  ;;  %v4946_v56 = vrot.slane %v1427_v9, %v4322_v17 }
 0x106   : > { %s4884_s5 = sld [smem:[#allocation7 + $0x59]]  ;;  %v1556_v14 = vcombine.high %v1547_v53, %v1554_v54  ;;  %v4951_v31 = vrot.slane %v1469_v18, %v4322_v17  ;;  %v4954_v13 = vrot.slane %v1470_v15, %v4322_v17  ;;  %v4957_v28 = vrot.slane %v1512_v19, %v4322_v17  ;;  %v342_v18 = vpop.permute.xlu0 %341 }
 0x107   : > { %s4890_s29 = sld [smem:[#allocation7 + $0x5a]]  ;;  %7810 = vst [vmem:[#allocation89_spill] sm:$0xff] %v4940_v21  ;;  %7811 = vst [vmem:[#allocation90_spill] sm:$0xff] %v4943_v20  ;;  %v4960_v22 = vrot.slane %v1513_v8, %v4322_v17  ;;  %v1598_v53 = vcombine.low %v1590_v12, %v1597_v61  ;;  %v1599_v54 = vcombine.high %v1590_v12, %v1597_v61 }
 0x108   : > { %s4900_s17 = sld [smem:[#allocation7 + $0x5b]]  ;;  %7812 = vst [vmem:[#allocation91_spill] sm:$0xff] %v4946_v56  ;;  %7814 = vst [vmem:[#allocation93_spill] sm:$0xff] %v4951_v31  ;;  %2062 = vrot.lane.b32.xlu1 %v4361_v38, %s7530_s28  ;;  %2060 = vrot.lane.b32.xlu0 %v4348_v33, %s7530_s28  ;;  %v4969_v39 = vrot.slane %v1555_v11, %v4322_v17  ;;  %v4972_v58 = vrot.slane %v1626_v50, %v4322_v17  ;;  %v407_v33 = vpop.permute.xlu1 %406 }
 0x109   : > { %s4906_s24 = sld [smem:[#allocation7 + $0x5c]]  ;;  %7815 = vst [vmem:[#allocation94_spill] sm:$0xff] %v4954_v13  ;;  %7816 = vst [vmem:[#allocation95_spill] sm:$0xff] %v4957_v28  ;;  %v4975_v9 = vrot.slane %v1622_v1, %v4322_v17  ;;  %v4979_v15 = vrot.slane %v1556_v14, %v4322_v17  ;;  %v4993_v14 = vrot.slane %v1598_v53, %v4322_v17  ;;  %v7822_v1 = vmov 0 }
 0x10a   : > { %s4915_s2 = sld [smem:[#allocation7 + $0x5d]]  ;;  %7817 = vst [vmem:[#allocation96_spill] sm:$0xff] %v4960_v22  ;;  %7818 = vst [vmem:[#allocation97_spill] sm:$0xff] %v4969_v39  ;;  %v4996_v8 = vrot.slane %v1599_v54, %v4322_v17  ;;  %v7823_v1 = vsel %vm5004_vm4, 4294967295, %v7822_v1  ;;  %v344_v61 = vpop.permute.xlu0 %343 }
 0x10b   : > { %s4917_s25 = sld [smem:[#allocation7 + $0x5e]]  ;;  %7819 = vst [vmem:[#allocation98_spill] sm:$0xff] %v4979_v15  ;;  %7820 = vst [vmem:[#allocation99_spill] sm:$0xff] %v4993_v14  ;;  %v346_v50 = vsel %vm345_vm2, %v342_v18, %v344_v61  ;;  %v347_v11 = vsel %vm345_vm2, %v344_v61, %v342_v18  ;;  %v5045_v61 = vadd.s32 16, %v4523_v47 }
 0x10c   : > { %s4930_s16 = sld [smem:[#allocation7 + $0x5f]]  ;;  %2099 = vrot.lane.b32.xlu1 %v4358_v37, %s7530_s28  ;;  %2097 = vrot.lane.b32.xlu0 %v4345_v32, %s7530_s28  ;;  %7821 = vst [vmem:[#allocation100_spill] sm:$0xff] %v4996_v8  ;;  %7824 = vst [vmem:[#allocation101_spill] sm:$0xff] %v7823_v1  ;;  %v409_v54 = vpop.permute.xlu1 %408  ;;  %v352_v12 = vsel %vm5004_vm4, %v347_v11, 0.0 }
 0x10d   : > { %7800 = sst [smem:[#allocation79_spill]] %s4890_s29  ;;  %v410_v6 = vsel %vm345_vm2, %v407_v33, %v409_v54  ;;  %v411_v0 = vsel %vm345_vm2, %v409_v54, %v407_v33  ;;  %v353_v33 = vsel %vm233_vm3, %v346_v50, 0.0  ;;  %7834 = vst [vmem:[#allocation102_spill] sm:$0xff] %v5045_v61 }
 0x10e   : > { %7801 = sst [smem:[#allocation80_spill]] %s4900_s17  ;;  %v412_v19 = vsel %vm5004_vm4, %v411_v0, 0.0  ;;  %v413_v38 = vsel %vm233_vm3, %v410_v6, 0.0  ;;  %v475_v32 = vpop.permute.xlu0 %474 }
 0x10f   : > { %7802 = sst [smem:[#allocation81_spill]] %s4906_s24  ;;  %v416_v0 = vmul.f32 %v415_v48, %v412_v19  ;;  %v417_v6 = vmul.f32 %v415_v48, %v413_v38  ;;  %v422_v18 = vmul.f32 %v421_v49, %v412_v19  ;;  %v423_v11 = vmul.f32 %v421_v49, %v413_v38 }
 0x110   : > { %7804 = sst [smem:[#allocation83_spill]] %s4915_s2  ;;  %v429_v50 = vmul.f32 %v427_v51, %v413_v38  ;;  %v477_v53 = vpop.permute.xlu1 %476 }
 0x111   : > { %7805 = sst [smem:[#allocation84_spill]] %s4917_s25 }
 0x112   : > { %7807 = sst [smem:[#allocation86_spill]] %s4930_s16  ;;  %s7831_s16 = smov 111  }
 0x113   : > { %s4937_s6 = sld [smem:[#allocation7 + $0x60]]  ;;  %2131 = vrot.lane.b32.xlu1 %v4368_v41, %s7831_s16  ;;  %2129 = vrot.lane.b32.xlu0 %v4371_v42, %s7831_s16  ;;  %v428_v41 = vmul.f32 %v427_v51, %v412_v19 }
 0x114   : > { %s4948_s26 = sld [smem:[#allocation7 + $0x61]] }
 0x115   : > { %s7828_s2 = sld [smem:[#allocation28_spill]] }
 0x116   : > { %s7832_s25 = sld [smem:[#allocation31_spill]] }
 0x117   : > { %s7833_s24 = sld [smem:[#allocation32_spill]]  ;;  %2163 = vrot.lane.b32.xlu1 %v4382_v44, %s7831_s16  ;;  %2161 = vrot.lane.b32.xlu0 %v4385_v45, %s7831_s16  ;;  %v543_v44 = vpop.permute.xlu0 %542  ;;  %v479_v45 = vsel %vm345_vm2, %v477_v53, %v475_v32 }
 0x118   : > { %s7845_s29 = sld [smem:[#allocation33_spill]] }
 0x119   : > { %7809 = sst [smem:[#allocation88_spill]] %s4937_s6 }
 0x11a   : > { %7813 = sst [smem:[#allocation92_spill]] %s4948_s26 }
 0x11b   : > { %s7829_s26 = sld [smem:[#allocation29_spill]]  ;;  %v7835_v42 = vstv %s7828_s2 }
 0x11c   : > { %s7830_s6 = sld [smem:[#allocation30_spill]]  ;;  %v434_v54 = vmul.f32 %v7835_v42, %v412_v19  ;;  %v7840_v61 = vmov %v7835_v42  ;;  %v7841_v15 = vstv %s7832_s25 }
 0x11d   : > { %v435_v28 = vmul.f32 %v7840_v61, %v413_v38  ;;  %v364_v49 = vmul.f32 %v7841_v15, %v352_v12  ;;  %v7842_v22 = vmov %v7841_v15  ;;  %v7843_v31 = vstv %s7833_s24  ;;  %s7846_s2 = sld [smem:[#allocation34_spill]] }
 0x11e   : > { %v365_v13 = vmul.f32 %v7842_v22, %v353_v33  ;;  %v368_v51 = vmul.f32 %v7843_v31, %v352_v12  ;;  %v7844_v19 = vmov %v7843_v31  ;;  %v545_v31 = vpop.permute.xlu1 %544  ;;  %s7847_s24 = sld [smem:[#allocation35_spill]] }
 0x11f   : > { %v369_v42 = vmul.f32 %v7844_v19, %v353_v33  ;;  %v430_v38 = vadd.f32 %v428_v41, %v364_v49  ;;  %s7854_s25 = sld [smem:[#allocation36_spill]] }
 0x120   : > { %v431_v15 = vadd.f32 %v429_v50, %v365_v13  ;;  %v436_v22 = vadd.f32 %v434_v54, %v368_v51  ;;  %v547_v13 = vsel %vm345_vm2, %v545_v31, %v543_v44  ;;  %v7852_v50 = vstv %s4411_s20  ;;  %s7858_s28 = sld [smem:[#allocation38_spill]] }
 0x121   : > { %v7836_v37 = vstv %s7829_s26  ;;  %s7857_s26 = sld [smem:[#allocation37_spill]] }
 0x122   : > { %v356_v59 = vmul.f32 %v7836_v37, %v352_v12  ;;  %v7837_v48 = vmov %v7836_v37  ;;  %v7838_v14 = vstv %s7830_s6  ;;  %s7866_s20 = sld [smem:[#allocation39_spill]] }
 0x123   : > { %v357_v63 = vmul.f32 %v7837_v48, %v353_v33  ;;  %v360_v8 = vmul.f32 %v7838_v14, %v352_v12  ;;  %v7839_v39 = vmov %v7838_v14  ;;  %v548_v14 = vsel %vm5004_vm4, %v547_v13, 0.0  ;;  %s7867_s6 = sld [smem:[#allocation40_spill]] }
 0x124   : > { %v361_v47 = vmul.f32 %v7839_v39, %v353_v33  ;;  %v418_v37 = vadd.f32 %v416_v0, %v356_v59  ;;  %v546_v59 = vsel %vm345_vm2, %v543_v44, %v545_v31  ;;  %v7848_v0 = vstv %s7845_s29  ;;  %s7868_s17 = sld [smem:[#allocation41_spill]] }
 0x125   : > { %v419_v20 = vadd.f32 %v417_v6, %v357_v63  ;;  %v424_v48 = vadd.f32 %v422_v18, %v360_v8  ;;  %v478_v63 = vsel %vm345_vm2, %v475_v32, %v477_v53  ;;  %v480_v8 = vsel %vm5004_vm4, %v479_v45, 0.0  ;;  %v575_v45 = vpop.permute.xlu0 %574  ;;  %s7875_s29 = sld [smem:[#allocation43_spill]] }
 0x126   : > { %v425_v39 = vadd.f32 %v423_v11, %v361_v47  ;;  %v481_v12 = vsel %vm233_vm3, %v478_v63, 0.0  ;;  %v549_v33 = vsel %vm233_vm3, %v546_v59, 0.0  ;;  %v484_v32 = vmul.f32 %v7848_v0, %v480_v8  ;;  %v577_v63 = vpop.permute.xlu1 %576  ;;  %s5997_s16 = sld [smem:[#allocation8 + $0xd]] }
 0x127   : > { %v7849_v53 = vmov %v7848_v0  ;;  %v7850_v18 = vstv %s7846_s2  ;;  %v496_v54 = vmul.f32 %v7852_v50, %v480_v8  ;;  %v7853_v47 = vmov %v7852_v50  ;;  %s7877_s2 = sld [smem:[#allocation44_spill]] }
 0x128   : > { %v485_v6 = vmul.f32 %v7849_v53, %v481_v12  ;;  %v490_v61 = vmul.f32 %v7850_v18, %v480_v8  ;;  %v7851_v11 = vmov %v7850_v18  ;;  %v497_v49 = vmul.f32 %v7853_v47, %v481_v12 }
 0x129   : > { %v491_v41 = vmul.f32 %v7851_v11, %v481_v12  ;;  %v7855_v51 = vstv %s7847_s24  ;;  %v437_v59 = vadd.f32 %v435_v28, %v369_v42  ;;  %v486_v13 = vadd.f32 %v484_v32, %v418_v37  ;;  %s7880_s24 = sld [smem:[#allocation45_spill]] }
 0x12a   : > { %v502_v19 = vmul.f32 %v7855_v51, %v480_v8  ;;  %v7856_v31 = vmov %v7855_v51  ;;  %v487_v0 = vadd.f32 %v485_v6, %v419_v20  ;;  %v492_v53 = vadd.f32 %v490_v61, %v424_v48  ;;  %v614_v48 = vpop.permute.xlu1 %613 }
 0x12b   : > { %v503_v44 = vmul.f32 %v7856_v31, %v481_v12  ;;  %v493_v18 = vadd.f32 %v491_v41, %v425_v39  ;;  %v498_v11 = vadd.f32 %v496_v54, %v430_v38  ;;  %v499_v50 = vadd.f32 %v497_v49, %v431_v15  ;;  %v612_v39 = vpop.permute.xlu0 %611 }
 0x12c   : > { %v504_v1 = vadd.f32 %v502_v19, %v436_v22  ;;  %v7859_v47 = vstv %s4415_s7  ;;  %v7861_v51 = vstv %s7854_s25  ;;  %v7863_v57 = vstv %s7857_s26  ;;  %s7870_s7 = sld [smem:[#allocation42_spill]] }
 0x12d   : > { %v552_v56 = vmul.f32 %v7859_v47, %v548_v14  ;;  %v7860_v52 = vmov %v7859_v47  ;;  %v558_v12 = vmul.f32 %v7861_v51, %v548_v14  ;;  %v7862_v31 = vmov %v7861_v51  ;;  %s7882_s25 = sld [smem:[#allocation46_spill]] }
 0x12e   : > { %v553_v8 = vmul.f32 %v7860_v52, %v549_v33  ;;  %v559_v55 = vmul.f32 %v7862_v31, %v549_v33  ;;  %v505_v21 = vadd.f32 %v503_v44, %v437_v59  ;;  %v564_v62 = vmul.f32 %v7863_v57, %v548_v14  ;;  %s7889_s26 = sld [smem:[#allocation47_spill]] }
 0x12f   : > { %v7864_v28 = vmov %v7863_v57  ;;  %v7865_v20 = vstv %s7858_s28  ;;  %v554_v38 = vadd.f32 %v552_v56, %v486_v13  ;;  %v560_v22 = vadd.f32 %v558_v12, %v492_v53  ;;  %v646_v13 = vpop.permute.xlu1 %645  ;;  %s7890_s28 = sld [smem:[#allocation48_spill]] }
 0x130   : > { %v565_v42 = vmul.f32 %v7864_v28, %v549_v33  ;;  %v570_v37 = vmul.f32 %v7865_v20, %v548_v14  ;;  %v555_v15 = vadd.f32 %v553_v8, %v487_v0  ;;  %v7869_v52 = vmov %v7865_v20  ;;  %v644_v0 = vpop.permute.xlu0 %643  ;;  %8097 = sst [smem:[#allocation47_spill]] %s5997_s16 }
 0x131   : > { %v571_v32 = vmul.f32 %v7869_v52, %v549_v33  ;;  %v561_v6 = vadd.f32 %v559_v55, %v493_v18  ;;  %v566_v61 = vadd.f32 %v564_v62, %v498_v11  ;;  %v579_v14 = vsel %vm578_vm5, %v575_v45, %v577_v63  ;;  %s6217_s16 = sld [smem:[#allocation8 + $0x5a]] }
 0x132   : > { %v567_v57 = vadd.f32 %v565_v42, %v499_v50  ;;  %v572_v41 = vadd.f32 %v570_v37, %v504_v1  ;;  %v580_v54 = vsel %vm578_vm5, %v577_v63, %v575_v45  ;;  %v615_v56 = vsel %vm578_vm5, %v612_v39, %v614_v48 }
 0x133   : > { %v616_v33 = vsel %vm578_vm5, %v614_v48, %v612_v39  ;;  %v585_v55 = vsel %vm224_vm0, %v580_v54, 0.0  ;;  %v7871_v62 = vstv %s7866_s20  ;;  %v7872_v19 = vstv %s7867_s6  ;;  %s7892_s20 = sld [smem:[#allocation49_spill]] }
 0x134   : > { %v590_v49 = vmul.f32 %v7871_v62, %v579_v14  ;;  %v596_v1 = vmul.f32 %v7872_v19, %v579_v14  ;;  %v7873_v44 = vstv %s7868_s17  ;;  %v7874_v53 = vmov %v7871_v62  ;;  %v676_v62 = vpop.permute.xlu0 %675  ;;  %s7894_s6 = sld [smem:[#allocation50_spill]] }
 0x135   : > { %v602_v59 = vmul.f32 %v7873_v44, %v579_v14  ;;  %v589_v63 = vmul.f32 %v7874_v53, %v585_v55  ;;  %v7876_v45 = vmov %v7872_v19  ;;  %v7878_v11 = vmov %v7873_v44  ;;  %s7910_s17 = sld [smem:[#allocation56_spill]] }
 0x136   : > { %v595_v18 = vmul.f32 %v7876_v45, %v585_v55  ;;  %v601_v50 = vmul.f32 %v7878_v11, %v585_v55  ;;  %v7879_v47 = vstv %s7870_s7  ;;  %v573_v51 = vadd.f32 %v571_v32, %v505_v21  ;;  %s7955_s7 = sld [smem:[#allocation69_spill]] }
 0x137   : > { %v607_v8 = vmul.f32 %v7879_v47, %v585_v55  ;;  %v592_v12 = vadd.f32 %v590_v49, %v555_v15  ;;  %v598_v31 = vadd.f32 %v596_v1, %v561_v6  ;;  %v7881_v28 = vmov %v7879_v47  ;;  %v678_v6 = vpop.permute.xlu1 %677 }
 0x138   : > { %v608_v42 = vmul.f32 %v7881_v28, %v579_v14  ;;  %v591_v20 = vadd.f32 %v589_v63, %v554_v38  ;;  %v597_v37 = vadd.f32 %v595_v18, %v560_v22  ;;  %v603_v48 = vadd.f32 %v601_v50, %v566_v61  ;;  %v708_v28 = vpop.permute.xlu0 %707 }
 0x139   : > { %v604_v39 = vadd.f32 %v602_v59, %v567_v57  ;;  %v609_v52 = vadd.f32 %v607_v8, %v572_v41  ;;  %v617_v54 = vsel %vm224_vm0, %v616_v33, 0.0  ;;  %v7883_v55 = vstv %s7875_s29  ;;  %s7956_s29 = sld [smem:[#allocation70_spill]] }
 0x13a   : > { %v622_v21 = vmul.f32 %v7883_v55, %v615_v56  ;;  %v7884_v32 = vstv %s7877_s2  ;;  %v7885_v49 = vmov %v7883_v55  ;;  %v7887_v38 = vstv %s7880_s24  ;;  %s7957_s2 = sld [smem:[#allocation51_spill]] }
 0x13b   : > { %v628_v15 = vmul.f32 %v7884_v32, %v615_v56  ;;  %v621_v14 = vmul.f32 %v7885_v49, %v617_v54  ;;  %v7886_v19 = vmov %v7884_v32  ;;  %v633_v22 = vmul.f32 %v7887_v38, %v617_v54  ;;  %s7965_s24 = sld [smem:[#allocation52_spill]] }
 0x13c   : > { %v627_v1 = vmul.f32 %v7886_v19, %v617_v54  ;;  %v7888_v61 = vmov %v7887_v38  ;;  %v610_v57 = vadd.f32 %v608_v42, %v573_v51  ;;  %v624_v41 = vadd.f32 %v622_v21, %v592_v12 }
 0x13d   : > { %v634_v44 = vmul.f32 %v7888_v61, %v615_v56  ;;  %v630_v33 = vadd.f32 %v628_v15, %v598_v31  ;;  %v7891_v59 = vstv %s7882_s25  ;;  %v623_v63 = vadd.f32 %v621_v14, %v591_v20  ;;  %v710_v31 = vpop.permute.xlu1 %709  ;;  %s7967_s25 = sld [smem:[#allocation53_spill]] }
 0x13e   : > { %v639_v53 = vmul.f32 %v7891_v59, %v617_v54  ;;  %v629_v45 = vadd.f32 %v627_v1, %v597_v37  ;;  %v635_v18 = vadd.f32 %v633_v22, %v603_v48  ;;  %v7893_v11 = vmov %v7891_v59 }
 0x13f   : > { %v640_v50 = vmul.f32 %v7893_v11, %v615_v56  ;;  %v636_v47 = vadd.f32 %v634_v44, %v604_v39  ;;  %v647_v51 = vsel %vm578_vm5, %v644_v0, %v646_v13  ;;  %v648_v12 = vsel %vm578_vm5, %v646_v13, %v644_v0 }
 0x140   : > { %v641_v8 = vadd.f32 %v639_v53, %v609_v52  ;;  %v649_v42 = vsel %vm224_vm0, %v648_v12, 0.0  ;;  %v7895_v20 = vstv %s7889_s26  ;;  %v7896_v48 = vstv %s7890_s28  ;;  %v745_v12 = vpop.permute.xlu0 %744  ;;  %s7968_s26 = sld [smem:[#allocation54_spill]] }
 0x141   : > { %v654_v37 = vmul.f32 %v7895_v20, %v647_v51  ;;  %v660_v56 = vmul.f32 %v7896_v48, %v647_v51  ;;  %v7897_v54 = vstv %s7892_s20  ;;  %v7898_v39 = vmov %v7895_v20  ;;  %v747_v11 = vpop.permute.xlu1 %746  ;;  %s7969_s28 = sld [smem:[#allocation55_spill]] }
 0x142   : > { %v666_v55 = vmul.f32 %v7897_v54, %v647_v51  ;;  %v653_v52 = vmul.f32 %v7898_v39, %v649_v42  ;;  %v7899_v21 = vmov %v7896_v48  ;;  %v7900_v15 = vmov %v7897_v54  ;;  %s7978_s20 = sld [smem:[#allocation57_spill]] }
 0x143   : > { %v659_v32 = vmul.f32 %v7899_v21, %v649_v42  ;;  %v665_v49 = vmul.f32 %v7900_v15, %v649_v42  ;;  %v7901_v14 = vstv %s7894_s6  ;;  %v642_v0 = vadd.f32 %v640_v50, %v610_v57  ;;  %s7979_s6 = sld [smem:[#allocation61_spill]] }
 0x144   : > { %v671_v13 = vmul.f32 %v7901_v14, %v649_v42  ;;  %v656_v19 = vadd.f32 %v654_v37, %v624_v41  ;;  %v662_v1 = vadd.f32 %v660_v56, %v630_v33  ;;  %v668_v38 = vadd.f32 %v666_v55, %v636_v47 }
 0x145   : > { %v655_v22 = vadd.f32 %v653_v52, %v623_v63  ;;  %v661_v61 = vadd.f32 %v659_v32, %v629_v45  ;;  %v667_v44 = vadd.f32 %v665_v49, %v635_v18  ;;  %v7902_v59 = vmov %v7901_v14  ;;  %v779_v49 = vpop.permute.xlu1 %778  ;;  %v777_v14 = vpop.permute.xlu0 %776 }
 0x146   : > { %v672_v53 = vmul.f32 %v7902_v59, %v647_v51  ;;  %v673_v20 = vadd.f32 %v671_v13, %v641_v8  ;;  %v679_v57 = vsel %vm578_vm5, %v676_v62, %v678_v6  ;;  %v680_v41 = vsel %vm578_vm5, %v678_v6, %v676_v62 }
 0x147   : > { %v712_v33 = vsel %vm711_vm6, %v708_v28, %v710_v31  ;;  %v681_v63 = vsel %vm224_vm0, %v680_v41, 0.0  ;;  %v7903_v45 = vstv %s7769_s27  ;;  %v7904_v18 = vstv %s7770_s8  ;;  %s7944_s27 = sld [smem:[#allocation66_spill]] }
 0x148   : > { %v686_v50 = vmul.f32 %v7903_v45, %v679_v57  ;;  %v692_v47 = vmul.f32 %v7904_v18, %v679_v57  ;;  %v7905_v51 = vstv %s4471_s12  ;;  %v7906_v8 = vmov %v7903_v45  ;;  %s7922_s12 = sld [smem:[#allocation59_spill]] }
 0x149   : > { %v698_v42 = vmul.f32 %v7905_v51, %v679_v57  ;;  %v685_v37 = vmul.f32 %v7906_v8, %v681_v63  ;;  %v7907_v48 = vmov %v7904_v18  ;;  %v7908_v54 = vmov %v7905_v51  ;;  %s7945_s8 = sld [smem:[#allocation67_spill]] }
 0x14a   : > { %v691_v56 = vmul.f32 %v7907_v48, %v681_v63  ;;  %v697_v55 = vmul.f32 %v7908_v54, %v681_v63  ;;  %v7909_v6 = vstv %s7772_s0  ;;  %v674_v39 = vadd.f32 %v672_v53, %v642_v0  ;;  %s7921_s0 = sld [smem:[#allocation58_spill]] }
 0x14b   : > { %v703_v62 = vmul.f32 %v7909_v6, %v681_v63  ;;  %v688_v52 = vadd.f32 %v686_v50, %v656_v19  ;;  %v694_v21 = vadd.f32 %v692_v47, %v662_v1  ;;  %v700_v32 = vadd.f32 %v698_v42, %v668_v38 }
 0x14c   : > { %v687_v13 = vadd.f32 %v685_v37, %v655_v22  ;;  %v693_v0 = vadd.f32 %v691_v56, %v661_v61  ;;  %v699_v19 = vadd.f32 %v697_v55, %v667_v44  ;;  %v7913_v1 = vmov %v7909_v6  ;;  %v811_v55 = vpop.permute.xlu1 %810  ;;  %v809_v6 = vpop.permute.xlu0 %808 }
 0x14d   : > { %v704_v59 = vmul.f32 %v7913_v1, %v679_v57  ;;  %v705_v38 = vadd.f32 %v703_v62, %v673_v20  ;;  %v713_v53 = vsel %vm711_vm6, %v710_v31, %v708_v28  ;;  %v719_v41 = vsel %vm253_vm8, %v712_v33, 0.0 }
 0x14e   : > { %v748_v63 = vsel %vm711_vm6, %v745_v12, %v747_v11  ;;  %v718_v45 = vsel %vm5221_vm9, %v713_v53, 0.0  ;;  %v7914_v50 = vstv %s7773_s21  ;;  %v7915_v22 = vstv %s7774_s13  ;;  %s7931_s13 = sld [smem:[#allocation60_spill]] }
 0x14f   : > { %v723_v18 = vmul.f32 %v7914_v50, %v719_v41  ;;  %v729_v61 = vmul.f32 %v7915_v22, %v719_v41  ;;  %v7916_v44 = vstv %s7910_s17  ;;  %v7917_v20 = vmov %v7914_v50  ;;  %s7933_s21 = sld [smem:[#allocation63_spill]] }
 0x150   : > { %v735_v57 = vmul.f32 %v7916_v44, %v719_v41  ;;  %v722_v47 = vmul.f32 %v7917_v20, %v718_v45  ;;  %v7918_v51 = vmov %v7915_v22  ;;  %v7919_v28 = vmov %v7916_v44  ;;  %s7980_s17 = sld [smem:[#allocation72_spill]] }
 0x151   : > { %v728_v31 = vmul.f32 %v7918_v51, %v718_v45  ;;  %v734_v42 = vmul.f32 %v7919_v28, %v718_v45  ;;  %v7920_v33 = vstv %s7778_s14  ;;  %v706_v37 = vadd.f32 %v704_v59, %v674_v39  ;;  %s7932_s14 = sld [smem:[#allocation62_spill]] }
 0x152   : > { %v740_v8 = vmul.f32 %v7920_v33, %v718_v45  ;;  %v725_v48 = vadd.f32 %v723_v18, %v688_v52  ;;  %v731_v56 = vadd.f32 %v729_v61, %v694_v21  ;;  %v737_v54 = vadd.f32 %v735_v57, %v700_v32 }
 0x153   : > { %v724_v62 = vadd.f32 %v722_v47, %v687_v13  ;;  %v730_v1 = vadd.f32 %v728_v31, %v693_v0  ;;  %v736_v53 = vadd.f32 %v734_v42, %v699_v19  ;;  %v7923_v50 = vmov %v7920_v33 }
 0x154   : > { %v741_v22 = vmul.f32 %v7923_v50, %v719_v41  ;;  %v742_v39 = vadd.f32 %v740_v8, %v705_v38  ;;  %v749_v52 = vsel %vm711_vm6, %v747_v11, %v745_v12  ;;  %v751_v21 = vsel %vm253_vm8, %v748_v63, 0.0 }
 0x155   : > { %v780_v32 = vsel %vm711_vm6, %v777_v14, %v779_v49  ;;  %v750_v13 = vsel %vm5221_vm9, %v749_v52, 0.0  ;;  %v7924_v0 = vstv %s7921_s0  ;;  %v7925_v59 = vstv %s4489_s3  ;;  %s7942_s3 = sld [smem:[#allocation64_spill]] }
 0x156   : > { %v755_v19 = vmul.f32 %v7924_v0, %v751_v21  ;;  %v761_v41 = vmul.f32 %v7925_v59, %v751_v21  ;;  %v7926_v45 = vstv %s4495_s18  ;;  %v7927_v38 = vmov %v7924_v0  ;;  %v843_v0 = vpop.permute.xlu1 %842  ;;  %s7943_s18 = sld [smem:[#allocation65_spill]] }
 0x157   : > { %v767_v18 = vmul.f32 %v7926_v45, %v751_v21  ;;  %v754_v61 = vmul.f32 %v7927_v38, %v750_v13  ;;  %v7928_v44 = vmov %v7925_v59  ;;  %v7929_v12 = vmov %v7926_v45  ;;  %v841_v59 = vpop.permute.xlu0 %840  ;;  %s5370_s0 = sld [smem:[#allocation7 + $0x62]] }
 0x158   : > { %v760_v11 = vmul.f32 %v7928_v44, %v750_v13  ;;  %v766_v57 = vmul.f32 %v7929_v12, %v750_v13  ;;  %v7930_v63 = vstv %s7922_s12  ;;  %v743_v47 = vadd.f32 %v741_v22, %v706_v37  ;;  %s7982_s12 = sld [smem:[#allocation73_spill]] }
 0x159   : > { %v772_v20 = vmul.f32 %v7930_v63, %v750_v13  ;;  %v757_v51 = vadd.f32 %v755_v19, %v725_v48  ;;  %v763_v31 = vadd.f32 %v761_v41, %v731_v56  ;;  %v769_v28 = vadd.f32 %v767_v18, %v737_v54 }
 0x15a   : > { %v756_v42 = vadd.f32 %v754_v61, %v724_v62  ;;  %v762_v33 = vadd.f32 %v760_v11, %v730_v1  ;;  %v768_v8 = vadd.f32 %v766_v57, %v736_v53  ;;  %v7934_v50 = vmov %v7930_v63 }
 0x15b   : > { %v773_v52 = vmul.f32 %v7934_v50, %v751_v21  ;;  %v774_v45 = vadd.f32 %v772_v20, %v742_v39  ;;  %v781_v37 = vsel %vm711_vm6, %v779_v49, %v777_v14  ;;  %v783_v48 = vsel %vm253_vm8, %v780_v32, 0.0 }
 0x15c   : > { %v812_v56 = vsel %vm711_vm6, %v809_v6, %v811_v55  ;;  %v782_v54 = vsel %vm5221_vm9, %v781_v37, 0.0  ;;  %v7935_v62 = vstv %s7931_s13  ;;  %v7936_v53 = vstv %s7782_s22  ;;  %s7953_s22 = sld [smem:[#allocation68_spill]] }
 0x15d   : > { %v787_v1 = vmul.f32 %v7935_v62, %v783_v48  ;;  %v793_v22 = vmul.f32 %v7936_v53, %v783_v48  ;;  %v7937_v21 = vstv %s7932_s14  ;;  %v7938_v39 = vmov %v7935_v62  ;;  %s5374_s13 = sld [smem:[#allocation7 + $0x63]] }
 0x15e   : > { %v799_v13 = vmul.f32 %v7937_v21, %v783_v48  ;;  %v786_v19 = vmul.f32 %v7938_v39, %v782_v54  ;;  %v7939_v41 = vmov %v7936_v53  ;;  %v7940_v14 = vmov %v7937_v21  ;;  %s5382_s14 = sld [smem:[#allocation7 + $0x64]] }
 0x15f   : > { %v792_v49 = vmul.f32 %v7939_v41, %v782_v54  ;;  %v798_v18 = vmul.f32 %v7940_v14, %v782_v54  ;;  %v7941_v32 = vstv %s7933_s21  ;;  %v775_v61 = vadd.f32 %v773_v52, %v743_v47  ;;  %s5392_s21 = sld [smem:[#allocation7 + $0x65]] }
 0x160   : > { %v804_v38 = vmul.f32 %v7941_v32, %v782_v54  ;;  %v789_v44 = vadd.f32 %v787_v1, %v757_v51  ;;  %v795_v11 = vadd.f32 %v793_v22, %v763_v31  ;;  %v801_v12 = vadd.f32 %v799_v13, %v769_v28  ;;  %v880_v31 = vpop.permute.xlu1 %879  ;;  %v878_v28 = vpop.permute.xlu0 %877 }
 0x161   : > { %v788_v57 = vadd.f32 %v786_v19, %v756_v42  ;;  %v794_v63 = vadd.f32 %v792_v49, %v762_v33  ;;  %v800_v20 = vadd.f32 %v798_v18, %v768_v8  ;;  %v7946_v50 = vmov %v7941_v32 }
 0x162   : > { %v805_v37 = vmul.f32 %v7946_v50, %v783_v48  ;;  %v806_v62 = vadd.f32 %v804_v38, %v774_v45  ;;  %v813_v54 = vsel %vm711_vm6, %v811_v55, %v809_v6  ;;  %v815_v47 = vsel %vm253_vm8, %v812_v56, 0.0 }
 0x163   : > { %v845_v51 = vsel %vm844_vm10, %v841_v59, %v843_v0  ;;  %v814_v42 = vsel %vm5221_vm9, %v813_v54, 0.0  ;;  %v7947_v33 = vstv %s7942_s3  ;;  %v7948_v52 = vstv %s7943_s18  ;;  %s5402_s3 = sld [smem:[#allocation7 + $0x66]] }
 0x164   : > { %v819_v8 = vmul.f32 %v7947_v33, %v815_v47  ;;  %v825_v48 = vmul.f32 %v7948_v52, %v815_v47  ;;  %v7949_v45 = vstv %s7944_s27  ;;  %v7950_v53 = vmov %v7947_v33  ;;  %s7991_s18 = sld [smem:[#allocation74_spill]] }
 0x165   : > { %v831_v1 = vmul.f32 %v7949_v45, %v815_v47  ;;  %v818_v55 = vmul.f32 %v7950_v53, %v814_v42  ;;  %v7951_v6 = vmov %v7948_v52  ;;  %v7952_v56 = vmov %v7949_v45  ;;  %s7992_s27 = sld [smem:[#allocation75_spill]] }
 0x166   : > { %v824_v22 = vmul.f32 %v7951_v6, %v814_v42  ;;  %v830_v21 = vmul.f32 %v7952_v56, %v814_v42  ;;  %v7954_v13 = vstv %s7945_s8  ;;  %v807_v19 = vadd.f32 %v805_v37, %v775_v61  ;;  %s5406_s8 = sld [smem:[#allocation7 + $0x67]] }
 0x167   : > { %v836_v39 = vmul.f32 %v7954_v13, %v814_v42  ;;  %v821_v41 = vadd.f32 %v819_v8, %v789_v44  ;;  %v827_v49 = vadd.f32 %v825_v48, %v795_v11  ;;  %v833_v14 = vadd.f32 %v831_v1, %v801_v12 }
 0x168   : > { %v820_v18 = vadd.f32 %v818_v55, %v788_v57  ;;  %v826_v32 = vadd.f32 %v824_v22, %v794_v63  ;;  %v832_v38 = vadd.f32 %v830_v21, %v800_v20  ;;  %v7958_v50 = vmov %v7954_v13 }
 0x169   : > { %v837_v54 = vmul.f32 %v7958_v50, %v815_v47  ;;  %v838_v33 = vadd.f32 %v836_v39, %v806_v62  ;;  %v846_v52 = vsel %vm844_vm10, %v843_v0, %v841_v59  ;;  %v852_v42 = vsel %vm233_vm3, %v845_v51, 0.0  ;;  %v912_v62 = vpop.permute.xlu1 %911  ;;  %v910_v47 = vpop.permute.xlu0 %909 }
 0x16a   : > { %v881_v61 = vsel %vm844_vm10, %v878_v28, %v880_v31  ;;  %v851_v44 = vsel %vm232_vm1, %v846_v52, 0.0  ;;  %v7959_v11 = vstv %s7953_s22  ;;  %v7960_v57 = vstv %s7955_s7  ;;  %s7993_s22 = sld [smem:[#allocation76_spill]] }
 0x16b   : > { %v856_v12 = vmul.f32 %v7959_v11, %v852_v42  ;;  %v862_v63 = vmul.f32 %v7960_v57, %v852_v42  ;;  %v7961_v20 = vstv %s7956_s29  ;;  %v7962_v8 = vmov %v7959_v11  ;;  %s5408_s7 = sld [smem:[#allocation7 + $0x68]] }
 0x16c   : > { %v868_v37 = vmul.f32 %v7961_v20, %v852_v42  ;;  %v855_v0 = vmul.f32 %v7962_v8, %v851_v44  ;;  %v7963_v59 = vmov %v7960_v57  ;;  %v7964_v51 = vmov %v7961_v20  ;;  %s7994_s29 = sld [smem:[#allocation77_spill]] }
 0x16d   : > { %v861_v48 = vmul.f32 %v7963_v59, %v851_v44  ;;  %v867_v45 = vmul.f32 %v7964_v51, %v851_v44  ;;  %v7966_v1 = vstv %s7957_s2  ;;  %v839_v55 = vadd.f32 %v837_v54, %v807_v19  ;;  %v942_v8 = vpop.permute.xlu0 %941  ;;  %s5418_s2 = sld [smem:[#allocation7 + $0x69]] }
 0x16e   : > { %v873_v53 = vmul.f32 %v7966_v1, %v851_v44  ;;  %v858_v6 = vadd.f32 %v856_v12, %v821_v41  ;;  %v864_v22 = vadd.f32 %v862_v63, %v827_v49  ;;  %v870_v56 = vadd.f32 %v868_v37, %v833_v14  ;;  %v944_v37 = vpop.permute.xlu1 %943 }
 0x16f   : > { %v857_v21 = vadd.f32 %v855_v0, %v820_v18  ;;  %v863_v13 = vadd.f32 %v861_v48, %v826_v32  ;;  %v869_v39 = vadd.f32 %v867_v45, %v832_v38  ;;  %v7970_v50 = vmov %v7966_v1 }
 0x170   : > { %v874_v52 = vmul.f32 %v7970_v50, %v852_v42  ;;  %v875_v11 = vadd.f32 %v873_v53, %v838_v33  ;;  %v882_v57 = vsel %vm844_vm10, %v880_v31, %v878_v28  ;;  %v884_v44 = vsel %vm233_vm3, %v881_v61, 0.0 }
 0x171   : > { %v913_v19 = vsel %vm844_vm10, %v910_v47, %v912_v62  ;;  %v883_v41 = vsel %vm232_vm1, %v882_v57, 0.0  ;;  %v7971_v49 = vstv %s7965_s24  ;;  %v7972_v18 = vstv %s7967_s25  ;;  %s5428_s24 = sld [smem:[#allocation7 + $0x6a]] }
 0x172   : > { %v888_v14 = vmul.f32 %v7971_v49, %v884_v44  ;;  %v894_v32 = vmul.f32 %v7972_v18, %v884_v44  ;;  %v7973_v38 = vstv %s7968_s26  ;;  %v7974_v33 = vmov %v7971_v49  ;;  %s5439_s25 = sld [smem:[#allocation7 + $0x6b]] }
 0x173   : > { %v900_v54 = vmul.f32 %v7973_v38, %v884_v44  ;;  %v887_v42 = vmul.f32 %v7974_v33, %v883_v41  ;;  %v7975_v12 = vmov %v7972_v18  ;;  %v7976_v28 = vmov %v7973_v38  ;;  %s5443_s26 = sld [smem:[#allocation7 + $0x6c]] }
 0x174   : > { %v893_v31 = vmul.f32 %v7975_v12, %v883_v41  ;;  %v899_v63 = vmul.f32 %v7976_v28, %v883_v41  ;;  %v7977_v61 = vstv %s7969_s28  ;;  %v876_v0 = vadd.f32 %v874_v52, %v839_v55  ;;  %s5445_s28 = sld [smem:[#allocation7 + $0x6d]] }
 0x175   : > { %v905_v20 = vmul.f32 %v7977_v61, %v883_v41  ;;  %v890_v59 = vadd.f32 %v888_v14, %v858_v6  ;;  %v896_v48 = vadd.f32 %v894_v32, %v864_v22  ;;  %v902_v51 = vadd.f32 %v900_v54, %v870_v56 }
 0x176   : > { %v889_v45 = vadd.f32 %v887_v42, %v857_v21  ;;  %v895_v1 = vadd.f32 %v893_v31, %v863_v13  ;;  %v901_v53 = vadd.f32 %v899_v63, %v869_v39  ;;  %v7981_v50 = vmov %v7977_v61 }
 0x177   : > { %v906_v57 = vmul.f32 %v7981_v50, %v884_v44  ;;  %v907_v55 = vadd.f32 %v905_v20, %v875_v11  ;;  %v914_v6 = vsel %vm844_vm10, %v912_v62, %v910_v47  ;;  %v916_v22 = vsel %vm233_vm3, %v913_v19, 0.0 }
 0x178   : > { %v945_v56 = vsel %vm844_vm10, %v942_v8, %v944_v37  ;;  %v915_v21 = vsel %vm232_vm1, %v914_v6, 0.0  ;;  %v7983_v13 = vstv %s7978_s20  ;;  %v7984_v52 = vstv %s7979_s6  ;;  %s5450_s20 = sld [smem:[#allocation7 + $0x6e]] }
 0x179   : > { %v920_v39 = vmul.f32 %v7983_v13, %v916_v22  ;;  %v926_v44 = vmul.f32 %v7984_v52, %v916_v22  ;;  %v7985_v11 = vstv %s7980_s17  ;;  %v7986_v62 = vmov %v7983_v13  ;;  %s5456_s6 = sld [smem:[#allocation7 + $0x6f]] }
 0x17a   : > { %v932_v41 = vmul.f32 %v7985_v11, %v916_v22  ;;  %v919_v47 = vmul.f32 %v7986_v62, %v915_v21  ;;  %v7987_v19 = vmov %v7984_v52  ;;  %v7988_v14 = vmov %v7985_v11  ;;  %s5468_s17 = sld [smem:[#allocation7 + $0x70]] }
 0x17b   : > { %v925_v49 = vmul.f32 %v7987_v19, %v915_v21  ;;  %v931_v18 = vmul.f32 %v7988_v14, %v915_v21  ;;  %v7989_v32 = vstv %s7982_s12  ;;  %v908_v54 = vadd.f32 %v906_v57, %v876_v0  ;;  %v5414_v57 = vpop.permute.xlu1 %1663  ;;  %s5474_s12 = sld [smem:[#allocation7 + $0x71]] }
 0x17c   : > { %v937_v38 = vmul.f32 %v7989_v32, %v915_v21  ;;  %v922_v33 = vadd.f32 %v920_v39, %v890_v59  ;;  %v928_v42 = vadd.f32 %v926_v44, %v896_v48  ;;  %v7990_v12 = vmov %v7989_v32 }
 0x17d   : > { %v938_v31 = vmul.f32 %v7990_v12, %v916_v22  ;;  %v921_v28 = vadd.f32 %v919_v47, %v889_v45  ;;  %v927_v63 = vadd.f32 %v925_v49, %v895_v1  ;;  %v933_v61 = vadd.f32 %v931_v18, %v901_v53  ;;  %v5416_v45 = vpop.permute.xlu0 %1661 }
 0x17e   : > { %v934_v20 = vadd.f32 %v932_v41, %v902_v51  ;;  %v939_v0 = vadd.f32 %v937_v38, %v907_v55  ;;  %v946_v48 = vsel %vm844_vm10, %v944_v37, %v942_v8  ;;  %v948_v50 = vsel %vm233_vm3, %v945_v56, 0.0 }
 0x17f   : > { %v940_v59 = vadd.f32 %v938_v31, %v908_v54  ;;  %v947_v51 = vsel %vm232_vm1, %v946_v48, 0.0  ;;  %v7995_v1 = vstv %s7991_s18  ;;  %v7996_v55 = vstv %s7992_s27  ;;  %s5738_s18 = sld [smem:[#allocation7 + $0x79]] }
 0x180   : > { %v952_v53 = vmul.f32 %v7995_v1, %v948_v50  ;;  %v958_v6 = vmul.f32 %v7996_v55, %v948_v50  ;;  %v7997_v22 = vstv %s7993_s22  ;;  %v7998_v37 = vmov %v7995_v1  ;;  %s5746_s27 = sld [smem:[#allocation7 + $0x7a]] }
 0x181   : > { %v964_v21 = vmul.f32 %v7997_v22, %v948_v50  ;;  %v951_v8 = vmul.f32 %v7998_v37, %v947_v51  ;;  %v7999_v56 = vmov %v7996_v55  ;;  %v8000_v39 = vmov %v7997_v22  ;;  %s5765_s22 = sld [smem:[#allocation7 + $0x7c]] }
 0x182   : > { %v957_v13 = vmul.f32 %v7999_v56, %v947_v51  ;;  %v963_v52 = vmul.f32 %v8000_v39, %v947_v51  ;;  %v8001_v44 = vstv %s7994_s29  ;;  %v954_v41 = vadd.f32 %v952_v53, %v922_v33  ;;  %v8005_v53 = vld [vmem:[#allocation78_spill] sm:$0xff]  ;;  %s5772_s29 = sld [smem:[#allocation7 + $0x7e]] }
 0x183   : > { %v969_v11 = vmul.f32 %v8001_v44, %v947_v51  ;;  %v960_v62 = vadd.f32 %v958_v6, %v928_v42  ;;  %v966_v47 = vadd.f32 %v964_v21, %v934_v20  ;;  %v8002_v19 = vmov %v8001_v44  ;;  %v1701_v20 = vpop.permute.xlu1 %1700  ;;  %v8009_v44 = vld [vmem:[#allocation87_spill] sm:$0xff] }
 0x184   : > { %v970_v49 = vmul.f32 %v8002_v19, %v948_v50  ;;  %v953_v14 = vadd.f32 %v951_v8, %v921_v28  ;;  %v959_v18 = vadd.f32 %v957_v13, %v927_v63  ;;  %v965_v32 = vadd.f32 %v963_v52, %v933_v61  ;;  %v8011_v19 = vld [vmem:[#allocation90_spill] sm:$0xff] }
 0x185   : > { %v971_v38 = vadd.f32 %v969_v11, %v939_v0  ;;  %v1015_v12 = vadd.f32 %v4720_v35, %v954_v41  ;;  %v1058_v31 = vadd.f32 %v4739_v36, %v960_v62  ;;  %v1101_v33 = vadd.f32 %v4756_v2, %v966_v47  ;;  %v1699_v0 = vpop.permute.xlu0 %1698  ;;  %v8010_v41 = vld [vmem:[#allocation91_spill] sm:$0xff] }
 0x186   : > { %v972_v54 = vadd.f32 %v970_v49, %v940_v59  ;;  %v1014_v42 = vadd.f32 %v4714_v26, %v953_v14  ;;  %v1057_v28 = vadd.f32 %v4723_v3, %v959_v18  ;;  %v1100_v63 = vadd.f32 %v4746_v4, %v965_v32  ;;  %v8012_v14 = vld [vmem:[#allocation93_spill] sm:$0xff]  ;;  %v8013_v32 = vld [vmem:[#allocation94_spill] sm:$0xff] }
 0x187   : > { %v1143_v61 = vadd.f32 %v4759_v5, %v971_v38  ;;  %v8003_v36 = vcombine.low %v4972_v58, %v4975_v9  ;;  %v8004_v3 = vcombine.high %v4972_v58, %v4975_v9  ;;  %v1820_v5 = vstv %s5370_s0  ;;  %s5707_s0 = sld [smem:[#allocation7 + $0x74]] }
 0x188   : > { %v1144_v35 = vadd.f32 %v4781_v7, %v972_v54  ;;  %v1187_v4 = vadd.f32 %v4787_v27, %v1015_v12  ;;  %v1230_v7 = vadd.f32 %v4795_v16, %v1058_v31  ;;  %v1826_v59 = vstv %s5374_s13  ;;  %s5717_s13 = sld [smem:[#allocation7 + $0x75]] }
 0x189   : > { %v1649_v2 = vrot.slane %v8003_v36, %v4322_v17  ;;  %v1656_v26 = vrot.slane %v8004_v3, %v4322_v17  ;;  %v1840_v48 = vstv %s5382_s14  ;;  %v1186_v50 = vadd.f32 %v4784_v23, %v1014_v42  ;;  %v8006_v23 = vld [vmem:[#allocation85_spill] sm:$0xff]  ;;  %v1731_v13 = vpop.permute.xlu0 %1730  ;;  %s5721_s14 = sld [smem:[#allocation7 + $0x76]] }
 0x18a   : > { %v1229_v58 = vadd.f32 %v4792_v40, %v1057_v28  ;;  %v1273_v9 = vadd.f32 %v4834_v10, %v1101_v33  ;;  %v1846_v51 = vstv %s5392_s21  ;;  %v1272_v1 = vadd.f32 %v4815_v34, %v1100_v63  ;;  %v8007_v40 = vld [vmem:[#allocation89_spill] sm:$0xff]  ;;  %v1733_v10 = vpop.permute.xlu1 %1732  ;;  %v8014_v28 = vld [vmem:[#allocation96_spill] sm:$0xff]  ;;  %s5726_s21 = sld [smem:[#allocation7 + $0x77]] }
 0x18b   : > { %v1315_v27 = vadd.f32 %v4865_v29, %v1143_v61  ;;  %v1316_v55 = vadd.f32 %v8005_v53, %v1144_v35  ;;  %v1852_v16 = vstv %s5402_s3  ;;  %v1858_v6 = vstv %s5406_s8  ;;  %v8008_v29 = vld [vmem:[#allocation82_spill] sm:$0xff]  ;;  %v8015_v61 = vld [vmem:[#allocation98_spill] sm:$0xff]  ;;  %s5736_s3 = sld [smem:[#allocation7 + $0x78]] }
 0x18c   : > { %v1872_v22 = vstv %s5408_s7  ;;  %v1878_v21 = vstv %s5418_s2  ;;  %v1884_v37 = vstv %s5428_s24  ;;  %v1359_v8 = vadd.f32 %v8006_v23, %v1187_v4  ;;  %v8016_v4 = vld [vmem:[#allocation95_spill] sm:$0xff]  ;;  %s5756_s8 = sld [smem:[#allocation7 + $0x7b]] }
 0x18d   : > { %v1402_v56 = vadd.f32 %v8007_v40, %v1230_v7  ;;  %v1890_v34 = vstv %s5439_s25  ;;  %v1904_v39 = vstv %s5443_s26  ;;  %v1358_v52 = vadd.f32 %v8008_v29, %v1186_v50  ;;  %v8018_v50 = vld [vmem:[#allocation100_spill] sm:$0xff]  ;;  %v1763_v40 = vpop.permute.xlu0 %1762  ;;  %s5768_s7 = sld [smem:[#allocation7 + $0x7d]] }
 0x18e   : > { %v1401_v11 = vadd.f32 %v8009_v44, %v1229_v58  ;;  %v1445_v62 = vadd.f32 %v8010_v41, %v1273_v9  ;;  %v1666_v47 = vsel %vm1665_vm11, %v5416_v45, %v5414_v57  ;;  %v1444_v49 = vadd.f32 %v8011_v19, %v1272_v1  ;;  %v8019_v1 = vld [vmem:[#allocation99_spill] sm:$0xff]  ;;  %s5780_s2 = sld [smem:[#allocation7 + $0x7f]] }
 0x18f   : > { %v1487_v18 = vadd.f32 %v8012_v14, %v1315_v27  ;;  %v1488_v38 = vadd.f32 %v8013_v32, %v1316_v55  ;;  %v1667_v54 = vsel %vm1665_vm11, %v5414_v57, %v5416_v45  ;;  %v1910_v12 = vstv %s5445_s28  ;;  %v8017_v57 = vld [vmem:[#allocation97_spill] sm:$0xff]  ;;  %s5786_s24 = sld [smem:[#allocation7 + $0x80]] }
 0x190   : > { %v1916_v31 = vstv %s5450_s20  ;;  %v1922_v33 = vstv %s5456_s6  ;;  %v1941_v42 = vstv %s5468_s17  ;;  %v1531_v63 = vadd.f32 %v8014_v28, %v1359_v8  ;;  %v1765_v8 = vpop.permute.xlu1 %1764  ;;  %s5791_s25 = sld [smem:[#allocation7 + $0x81]] }
 0x191   : > { %v1574_v35 = vadd.f32 %v8015_v61, %v1402_v56  ;;  %v1672_v36 = vsel %vm252_vm7, %v1666_v47, 0.0  ;;  %v1947_v3 = vstv %s5474_s12  ;;  %v1530_v7 = vadd.f32 %v8016_v4, %v1358_v52  ;;  %s5794_s26 = sld [smem:[#allocation7 + $0x82]] }
 0x192   : > { %v1573_v45 = vadd.f32 %v8017_v57, %v1401_v11  ;;  %v1617_v58 = vadd.f32 %v8018_v50, %v1445_v62  ;;  %v1673_v9 = vsel %vm253_vm8, %v1667_v54, 0.0  ;;  %v1616_v27 = vadd.f32 %v8019_v1, %v1444_v49  ;;  %v8028_v50 = vld [vmem:[#allocation102_spill] sm:$0xff]  ;;  %s5799_s28 = sld [smem:[#allocation7 + $0x83]] }
 0x193   : > { %v1659_v53 = vadd.f32 %v1649_v2, %v1487_v18  ;;  %v1660_v55 = vadd.f32 %v1656_v26, %v1488_v38  ;;  %v1702_v23 = vsel %vm1665_vm11, %v1699_v0, %v1701_v20  ;;  %v8020_v56 = vstv %s4812_s15  ;;  %s8045_s15 = sld [smem:[#allocation83_spill]] }
 0x194   : > { %v1676_v29 = vmul.f32 %v8020_v56, %v1672_v36  ;;  %v8021_v52 = vstv %s4820_s19  ;;  %v8022_v11 = vstv %s4826_s10  ;;  %v1703_v62 = vsel %vm1665_vm11, %v1701_v20, %v1699_v0  ;;  %s8047_s19 = sld [smem:[#allocation84_spill]] }
 0x195   : > { %v1682_v44 = vmul.f32 %v8021_v52, %v1672_v36  ;;  %v1688_v41 = vmul.f32 %v8022_v11, %v1672_v36  ;;  %v8023_v47 = vmov %v8020_v56  ;;  %v8024_v49 = vmov %v8021_v52  ;;  %s8060_s10 = sld [smem:[#allocation92_spill]] }
 0x196   : > { %v1677_v19 = vmul.f32 %v8023_v47, %v1673_v9  ;;  %v1683_v2 = vmul.f32 %v8024_v49, %v1673_v9  ;;  %v8025_v14 = vmov %v8022_v11  ;;  %v8026_v18 = vstv %s4836_s23  ;;  %v1795_v11 = vpop.permute.xlu0 %1794  ;;  %s8036_s23 = sld [smem:[#allocation79_spill]] }
 0x197   : > { %v1689_v26 = vmul.f32 %v8025_v14, %v1673_v9  ;;  %v1694_v32 = vmul.f32 %v8026_v18, %v1672_v36  ;;  %v1678_v38 = vadd.f32 %v1676_v29, %v1530_v7  ;;  %v1684_v54 = vadd.f32 %v1682_v44, %v1573_v45  ;;  %v1797_v44 = vpop.permute.xlu1 %1796  ;;  %s5801_s20 = sld [smem:[#allocation7 + $0x84]] }
 0x198   : > { %v8027_v28 = vmov %v8026_v18  ;;  %v1704_v20 = vsel %vm252_vm7, %v1702_v23, 0.0  ;;  %v1679_v0 = vadd.f32 %v1677_v19, %v1531_v63  ;;  %v1685_v4 = vadd.f32 %v1683_v2, %v1574_v35  ;;  %s5804_s6 = sld [smem:[#allocation7 + $0x85]] }
 0x199   : > { %v1695_v61 = vmul.f32 %v8027_v28, %v1673_v9  ;;  %v1690_v57 = vadd.f32 %v1688_v41, %v1616_v27  ;;  %v1705_v36 = vsel %vm253_vm8, %v1703_v62, 0.0  ;;  %vm273_vm13 = vcmp.lt.s32.totalorder %v8028_v50, 256  ;;  %s5815_s17 = sld [smem:[#allocation7 + $0x86]] }
 0x19a   : > { %v1691_v1 = vadd.f32 %v1689_v26, %v1617_v58  ;;  %v1696_v7 = vadd.f32 %v1694_v32, %v1659_v53  ;;  %v1734_v9 = vsel %vm1665_vm11, %v1731_v13, %v1733_v10  ;;  %v8029_v56 = vstv %s4846_s11  ;;  %vm5607_vm14 = vmand %vm273_vm13, %vm233_vm3  ;;  %s5681_s11 = sld [smem:[#allocation7 + $0x73]] }
 0x19b   : > { %v1697_v45 = vadd.f32 %v1695_v61, %v1660_v55  ;;  %v1708_v23 = vmul.f32 %v8029_v56, %v1704_v20  ;;  %v8030_v63 = vstv %s4853_s1  ;;  %v8031_v35 = vstv %s4857_s30  ;;  %s5573_s30 = sld [smem:[#allocation7 + $0x72]] }
 0x19c   : > { %v1714_v29 = vmul.f32 %v8030_v63, %v1704_v20  ;;  %v1720_v52 = vmul.f32 %v8031_v35, %v1704_v20  ;;  %v1735_v27 = vsel %vm1665_vm11, %v1733_v10, %v1731_v13  ;;  %v8032_v41 = vmov %v8029_v56  ;;  %s8038_s1 = sld [smem:[#allocation80_spill]] }
 0x19d   : > { %v1709_v62 = vmul.f32 %v8032_v41, %v1705_v36  ;;  %v8033_v58 = vmov %v8030_v63  ;;  %v8034_v55 = vmov %v8031_v35  ;;  %v8035_v19 = vstv %s4869_s4  ;;  %s8043_s4 = sld [smem:[#allocation81_spill]] }
 0x19e   : > { %v1715_v53 = vmul.f32 %v8033_v58, %v1705_v36  ;;  %v1721_v47 = vmul.f32 %v8034_v55, %v1705_v36  ;;  %v1726_v49 = vmul.f32 %v8035_v19, %v1704_v20  ;;  %v1710_v2 = vadd.f32 %v1708_v23, %v1678_v38  ;;  %s5821_s12 = sld [smem:[#allocation7 + $0x87]] }
 0x19f   : > { %v1716_v14 = vadd.f32 %v1714_v29, %v1684_v54  ;;  %v1722_v26 = vadd.f32 %v1720_v52, %v1690_v57  ;;  %v1736_v10 = vsel %vm252_vm7, %v1734_v9, 0.0  ;;  %v1711_v13 = vadd.f32 %v1709_v62, %v1679_v0 }
 0x1a0   : > { %v8037_v18 = vmov %v8035_v19  ;;  %v1737_v28 = vsel %vm253_vm8, %v1735_v27, 0.0  ;;  %v1766_v61 = vsel %vm1665_vm11, %v1763_v40, %v1765_v8  ;;  %v1717_v38 = vadd.f32 %v1715_v53, %v1685_v4 }
 0x1a1   : > { %v1727_v32 = vmul.f32 %v8037_v18, %v1705_v36  ;;  %v1723_v54 = vadd.f32 %v1721_v47, %v1691_v1  ;;  %v1728_v20 = vadd.f32 %v1726_v49, %v1696_v7  ;;  %v1767_v57 = vsel %vm1665_vm11, %v1765_v8, %v1763_v40  ;;  %v1834_v8 = vpop.permute.xlu1 %1833  ;;  %v1832_v40 = vpop.permute.xlu0 %1831 }
 0x1a2   : > { %v8039_v56 = vstv %s4877_s9  ;;  %v8040_v23 = vstv %s4884_s5  ;;  %v8041_v63 = vstv %s8036_s23  ;;  %v1768_v7 = vsel %vm252_vm7, %v1766_v61, 0.0  ;;  %s8050_s5 = sld [smem:[#allocation86_spill]] }
 0x1a3   : > { %v1729_v9 = vadd.f32 %v1727_v32, %v1697_v45  ;;  %v1740_v0 = vmul.f32 %v8039_v56, %v1736_v10  ;;  %v1746_v36 = vmul.f32 %v8040_v23, %v1736_v10  ;;  %v1752_v29 = vmul.f32 %v8041_v63, %v1736_v10  ;;  %s8058_s9 = sld [smem:[#allocation88_spill]] }
 0x1a4   : > { %v8042_v35 = vmov %v8039_v56  ;;  %v8044_v27 = vmov %v8040_v23  ;;  %v8046_v4 = vmov %v8041_v63  ;;  %v8048_v62 = vstv %s8038_s1  ;;  %s5828_s23 = sld [smem:[#allocation7 + $0x88]] }
 0x1a5   : > { %v1741_v52 = vmul.f32 %v8042_v35, %v1737_v28  ;;  %v1747_v41 = vmul.f32 %v8044_v27, %v1737_v28  ;;  %v1753_v1 = vmul.f32 %v8046_v4, %v1737_v28  ;;  %v1742_v45 = vadd.f32 %v1740_v0, %v1710_v2  ;;  %s5844_s1 = sld [smem:[#allocation7 + $0x8a]] }
 0x1a6   : > { %v1758_v58 = vmul.f32 %v8048_v62, %v1736_v10  ;;  %v1769_v53 = vsel %vm253_vm8, %v1767_v57, 0.0  ;;  %v1799_v55 = vsel %vm7552_vm12, %v1795_v11, %v1797_v44  ;;  %v1748_v19 = vadd.f32 %v1746_v36, %v1716_v14 }
 0x1a7   : > { %v1743_v47 = vadd.f32 %v1741_v52, %v1711_v13  ;;  %v1754_v49 = vadd.f32 %v1752_v29, %v1722_v26  ;;  %v8049_v18 = vmov %v8048_v62  ;;  %v1749_v61 = vadd.f32 %v1747_v41, %v1717_v38 }
 0x1a8   : > { %v1759_v32 = vmul.f32 %v8049_v18, %v1737_v28  ;;  %v8051_v56 = vstv %s8043_s4  ;;  %v8052_v2 = vstv %s8045_s15  ;;  %v8053_v10 = vmov 0  ;;  %s5852_s4 = sld [smem:[#allocation7 + $0x8c]] }
 0x1a9   : > { %v1772_v23 = vmul.f32 %v8051_v56, %v1768_v7  ;;  %v1778_v0 = vmul.f32 %v8052_v2, %v1768_v7  ;;  %v8054_v10 = vsel %vm5607_vm14, 4294967295, %v8053_v10  ;;  %v1800_v14 = vsel %vm7552_vm12, %v1797_v44, %v1795_v11  ;;  %s5855_s15 = sld [smem:[#allocation7 + $0x8d]] }
 0x1aa   : > { %8055 = vst [vmem:[#allocation78_spill] sm:$0xff] %v8054_v10  ;;  %v8056_v26 = vmov %v8051_v56  ;;  %v8057_v28 = vmov %v8052_v2  ;;  %v8059_v57 = vstv %s8047_s19  ;;  %v1805_v63 = vsel %vm232_vm1, %v1799_v55, 0.0  ;;  %v1866_v56 = vpop.permute.xlu1 %1865  ;;  %v1864_v55 = vpop.permute.xlu0 %1863  ;;  %s5862_s19 = sld [smem:[#allocation7 + $0x8e]] }
 0x1ab   : > { %v1773_v13 = vmul.f32 %v8056_v26, %v1769_v53  ;;  %v1779_v38 = vmul.f32 %v8057_v28, %v1769_v53  ;;  %v1784_v36 = vmul.f32 %v8059_v57, %v1768_v7  ;;  %v1755_v29 = vadd.f32 %v1753_v1, %v1723_v54 }
 0x1ac   : > { %v1760_v35 = vadd.f32 %v1758_v58, %v1728_v20  ;;  %v1761_v52 = vadd.f32 %v1759_v32, %v1729_v9  ;;  %v8061_v41 = vmov %v8059_v57  ;;  %v8062_v11 = vstv %s8050_s5  ;;  %s5868_s5 = sld [smem:[#allocation7 + $0x8b]] }
 0x1ad   : > { %v1785_v44 = vmul.f32 %v8061_v41, %v1769_v53  ;;  %v1790_v4 = vmul.f32 %v8062_v11, %v1768_v7  ;;  %v1806_v62 = vsel %vm5607_vm14, %v1800_v14, 0.0  ;;  %v1835_v18 = vsel %vm7552_vm12, %v1832_v40, %v1834_v8 }
 0x1ae   : > { %v1774_v54 = vadd.f32 %v1772_v23, %v1742_v45  ;;  %v8063_v20 = vmov %v8062_v11  ;;  %v8064_v1 = vstv %s8058_s9  ;;  %v8065_v32 = vstv %s8060_s10  ;;  %s5875_s9 = sld [smem:[#allocation7 + $0x8f]] }
 0x1af   : > { %v1791_v9 = vmul.f32 %v8063_v20, %v1769_v53  ;;  %v1809_v58 = vmul.f32 %v8064_v1, %v1805_v63  ;;  %v1815_v2 = vmul.f32 %v8065_v32, %v1805_v63  ;;  %v1775_v26 = vadd.f32 %v1773_v13, %v1743_v47  ;;  %s5891_s10 = sld [smem:[#allocation8 + $0x40]] }
 0x1b0   : > { %v1780_v7 = vadd.f32 %v1778_v0, %v1748_v19  ;;  %v1781_v28 = vadd.f32 %v1779_v38, %v1749_v61  ;;  %v1786_v14 = vadd.f32 %v1784_v36, %v1754_v49  ;;  %v8066_v57 = vmov %v8064_v1  ;;  %v1898_v36 = vpop.permute.xlu1 %1897 }
 0x1b1   : > { %v1810_v41 = vmul.f32 %v8066_v57, %v1806_v62  ;;  %v1821_v11 = vmul.f32 %v1820_v5, %v1805_v63  ;;  %v1836_v27 = vsel %vm7552_vm12, %v1834_v8, %v1832_v40  ;;  %v1837_v45 = vsel %vm232_vm1, %v1835_v18, 0.0 }
 0x1b2   : > { %v1787_v53 = vadd.f32 %v1785_v44, %v1755_v29  ;;  %v8067_v23 = vmov %v8065_v32  ;;  %v1822_v47 = vmul.f32 %v1820_v5, %v1806_v62  ;;  %v1827_v19 = vmul.f32 %v1826_v59, %v1805_v63  ;;  %v1896_v29 = vpop.permute.xlu0 %1895 }
 0x1b3   : > { %v1816_v20 = vmul.f32 %v8067_v23, %v1806_v62  ;;  %v1792_v49 = vadd.f32 %v1790_v4, %v1760_v35  ;;  %v1793_v61 = vadd.f32 %v1791_v9, %v1761_v52  ;;  %v1811_v0 = vadd.f32 %v1809_v58, %v1774_v54 }
 0x1b4   : > { %v1817_v13 = vadd.f32 %v1815_v2, %v1780_v7  ;;  %v1828_v38 = vmul.f32 %v1826_v59, %v1806_v62  ;;  %v1838_v8 = vsel %vm5607_vm14, %v1836_v27, 0.0  ;;  %v1841_v40 = vmul.f32 %v1840_v48, %v1837_v45  ;;  %v1930_v57 = vpop.permute.xlu1 %1929 }
 0x1b5   : > { %v1867_v5 = vsel %vm7552_vm12, %v1864_v55, %v1866_v56  ;;  %v1812_v63 = vadd.f32 %v1810_v41, %v1775_v26  ;;  %v1823_v35 = vadd.f32 %v1821_v11, %v1786_v14  ;;  %v1847_v52 = vmul.f32 %v1846_v51, %v1837_v45 }
 0x1b6   : > { %v1853_v59 = vmul.f32 %v1852_v16, %v1837_v45  ;;  %v1818_v44 = vadd.f32 %v1816_v20, %v1781_v28  ;;  %v1824_v27 = vadd.f32 %v1822_v47, %v1787_v53  ;;  %v1829_v4 = vadd.f32 %v1827_v19, %v1792_v49  ;;  %v1928_v41 = vpop.permute.xlu0 %1927 }
 0x1b7   : > { %v1868_v62 = vsel %vm7552_vm12, %v1866_v56, %v1864_v55  ;;  %v1842_v18 = vmul.f32 %v1840_v48, %v1838_v8  ;;  %v1848_v54 = vmul.f32 %v1846_v51, %v1838_v8  ;;  %v1854_v9 = vmul.f32 %v1852_v16, %v1838_v8 }
 0x1b8   : > { %v1869_v1 = vsel %vm232_vm1, %v1867_v5, 0.0  ;;  %v1830_v58 = vadd.f32 %v1828_v38, %v1793_v61  ;;  %v1843_v32 = vadd.f32 %v1841_v40, %v1811_v0  ;;  %v1859_v2 = vmul.f32 %v1858_v6, %v1837_v45 }
 0x1b9   : > { %v1899_v26 = vsel %vm7552_vm12, %v1896_v29, %v1898_v36  ;;  %v1849_v7 = vadd.f32 %v1847_v52, %v1817_v13  ;;  %v1855_v56 = vadd.f32 %v1853_v59, %v1823_v35  ;;  %v1860_v48 = vmul.f32 %v1858_v6, %v1838_v8  ;;  %v1967_v52 = vpop.permute.xlu1 %1966 }
 0x1ba   : > { %v1870_v51 = vsel %vm5607_vm14, %v1868_v62, 0.0  ;;  %v1873_v16 = vmul.f32 %v1872_v22, %v1869_v1  ;;  %v1879_v55 = vmul.f32 %v1878_v21, %v1869_v1  ;;  %v1885_v28 = vmul.f32 %v1884_v37, %v1869_v1 }
 0x1bb   : > { %v1900_v14 = vsel %vm7552_vm12, %v1898_v36, %v1896_v29  ;;  %v1844_v6 = vadd.f32 %v1842_v18, %v1812_v63  ;;  %v1850_v11 = vadd.f32 %v1848_v54, %v1818_v44  ;;  %v1856_v45 = vadd.f32 %v1854_v9, %v1824_v27 }
 0x1bc   : > { %v1901_v53 = vsel %vm232_vm1, %v1899_v26, 0.0  ;;  %v1874_v23 = vmul.f32 %v1872_v22, %v1870_v51  ;;  %v1880_v20 = vmul.f32 %v1878_v21, %v1870_v51  ;;  %v1886_v47 = vmul.f32 %v1884_v37, %v1870_v51 }
 0x1bd   : > { %v1902_v19 = vsel %vm5607_vm14, %v1900_v14, 0.0  ;;  %v1861_v49 = vadd.f32 %v1859_v2, %v1829_v4  ;;  %v1862_v61 = vadd.f32 %v1860_v48, %v1830_v58  ;;  %v1891_v0 = vmul.f32 %v1890_v34, %v1869_v1 }
 0x1be   : > { %v1892_v13 = vmul.f32 %v1890_v34, %v1870_v51  ;;  %v1875_v38 = vadd.f32 %v1873_v16, %v1843_v32  ;;  %v1881_v8 = vadd.f32 %v1879_v55, %v1849_v7  ;;  %v1887_v40 = vadd.f32 %v1885_v28, %v1855_v56 }
 0x1bf   : > { %v1905_v5 = vmul.f32 %v1904_v39, %v1901_v53  ;;  %v1906_v22 = vmul.f32 %v1904_v39, %v1902_v19  ;;  %v1911_v21 = vmul.f32 %v1910_v12, %v1901_v53  ;;  %v1917_v37 = vmul.f32 %v1916_v31, %v1901_v53  ;;  %v1965_v39 = vpop.permute.xlu0 %1964 }
 0x1c0   : > { %v1933_v36 = vsel %vm7551_vm15, %v1930_v57, %v1928_v41  ;;  %v1876_v34 = vadd.f32 %v1874_v23, %v1844_v6  ;;  %v1882_v29 = vadd.f32 %v1880_v20, %v1850_v11  ;;  %v1888_v63 = vadd.f32 %v1886_v47, %v1856_v45  ;;  %v1999_v6 = vpop.permute.xlu1 %1998 }
 0x1c1   : > { %v1912_v35 = vmul.f32 %v1910_v12, %v1902_v19  ;;  %v1893_v59 = vadd.f32 %v1891_v0, %v1861_v49  ;;  %v1894_v44 = vadd.f32 %v1892_v13, %v1862_v61  ;;  %v1959_v27 = vstv %s5681_s11  ;;  %s5897_s11 = sld [smem:[#allocation8 + $0x41]] }
 0x1c2   : > { %v1932_v4 = vsel %vm7551_vm15, %v1928_v41, %v1930_v57  ;;  %v1918_v62 = vmul.f32 %v1916_v31, %v1902_v19  ;;  %v1923_v12 = vmul.f32 %v1922_v33, %v1901_v53  ;;  %v1924_v18 = vmul.f32 %v1922_v33, %v1902_v19 }
 0x1c3   : > { %v1939_v54 = vsel %vm273_vm13, %v1933_v36, 0.0  ;;  %v1907_v9 = vadd.f32 %v1905_v5, %v1875_v38  ;;  %v1908_v1 = vadd.f32 %v1906_v22, %v1876_v34  ;;  %v1913_v58 = vadd.f32 %v1911_v21, %v1881_v8  ;;  %v1997_v11 = vpop.permute.xlu0 %1996 }
 0x1c4   : > { %v1919_v32 = vadd.f32 %v1917_v37, %v1887_v40  ;;  %v1914_v2 = vadd.f32 %v1912_v35, %v1882_v29  ;;  %v1942_v31 = vmul.f32 %v1941_v42, %v1932_v4  ;;  %v1948_v26 = vmul.f32 %v1947_v3, %v1932_v4 }
 0x1c5   : > { %v8068_v7 = vstv %s5573_s30  ;;  %v1943_v56 = vmul.f32 %v1941_v42, %v1939_v54  ;;  %v1949_v48 = vmul.f32 %v1947_v3, %v1939_v54  ;;  %v1969_v55 = vsel %vm7551_vm15, %v1967_v52, %v1965_v39  ;;  %s5838_s30 = sld [smem:[#allocation7 + $0x89]] }
 0x1c6   : > { %v1954_v33 = vmul.f32 %v8068_v7, %v1932_v4  ;;  %v8069_v51 = vmov %v8068_v7  ;;  %v1920_v28 = vadd.f32 %v1918_v62, %v1888_v63  ;;  %v1925_v14 = vadd.f32 %v1923_v12, %v1893_v59 }
 0x1c7   : > { %v1955_v16 = vmul.f32 %v8069_v51, %v1939_v54  ;;  %v1926_v57 = vadd.f32 %v1924_v18, %v1894_v44  ;;  %v1960_v41 = vmul.f32 %v1959_v27, %v1932_v4  ;;  %v1961_v45 = vmul.f32 %v1959_v27, %v1939_v54 }
 0x1c8   : > { %v1973_v53 = vstv %s5707_s0  ;;  %v1979_v42 = vstv %s5717_s13  ;;  %v1968_v3 = vsel %vm7551_vm15, %v1965_v39, %v1967_v52  ;;  %v1944_v23 = vadd.f32 %v1942_v31, %v1907_v9  ;;  %v2031_v52 = vpop.permute.xlu1 %2030  ;;  %v2029_v39 = vpop.permute.xlu0 %2028  ;;  %s5903_s0 = sld [smem:[#allocation8 + $0x42]]  ;;  %s8073_s13 = smov 17  }
 0x1c9   : > { %v1950_v20 = vadd.f32 %v1948_v26, %v1913_v58  ;;  %v1985_v47 = vstv %s5721_s14  ;;  %v1971_v19 = vsel %vm273_vm13, %v1969_v55, 0.0  ;;  %v1945_v49 = vadd.f32 %v1943_v56, %v1908_v1  ;;  %s5909_s14 = sld [smem:[#allocation8 + $0x43]] }
 0x1ca   : > { %v1951_v61 = vadd.f32 %v1949_v48, %v1914_v2  ;;  %v1956_v0 = vadd.f32 %v1954_v33, %v1919_v32  ;;  %v1957_v13 = vadd.f32 %v1955_v16, %v1920_v28  ;;  %v1962_v38 = vadd.f32 %v1960_v41, %v1925_v14 }
 0x1cb   : > { %v1991_v8 = vstv %s5726_s21  ;;  %v1974_v40 = vmul.f32 %v1973_v53, %v1968_v3  ;;  %v1980_v5 = vmul.f32 %v1979_v42, %v1968_v3  ;;  %v1963_v22 = vadd.f32 %v1961_v45, %v1926_v57  ;;  %s5911_s21 = sld [smem:[#allocation8 + $0x44]] }
 0x1cc   : > { %v1975_v21 = vmul.f32 %v1973_v53, %v1971_v19  ;;  %v1986_v37 = vmul.f32 %v1985_v47, %v1968_v3  ;;  %v2001_v36 = vsel %vm7551_vm15, %v1999_v6, %v1997_v11  ;;  %v1981_v34 = vmul.f32 %v1979_v42, %v1971_v19  ;;  %v2063_v57 = vpop.permute.xlu1 %2062  ;;  %v2061_v41 = vpop.permute.xlu0 %2060 }
 0x1cd   : > { %v2005_v29 = vstv %s5736_s3  ;;  %v2011_v63 = vstv %s5738_s18  ;;  %v2000_v35 = vsel %vm7551_vm15, %v1997_v11, %v1999_v6  ;;  %v1987_v59 = vmul.f32 %v1985_v47, %v1971_v19  ;;  %s5917_s3 = sld [smem:[#allocation8 + $0x45]] }
 0x1ce   : > { %v1992_v44 = vmul.f32 %v1991_v8, %v1968_v3  ;;  %v2017_v27 = vstv %s5746_s27  ;;  %v2023_v4 = vstv %s5756_s8  ;;  %v1976_v62 = vadd.f32 %v1974_v40, %v1944_v23  ;;  %s5919_s18 = sld [smem:[#allocation8 + $0x46]] }
 0x1cf   : > { %v1982_v12 = vadd.f32 %v1980_v5, %v1950_v20  ;;  %v1993_v18 = vmul.f32 %v1991_v8, %v1971_v19  ;;  %v2003_v54 = vsel %vm273_vm13, %v2001_v36, 0.0  ;;  %v1977_v9 = vadd.f32 %v1975_v21, %v1945_v49  ;;  %s5925_s27 = sld [smem:[#allocation8 + $0x47]] }
 0x1d0   : > { %v1988_v1 = vadd.f32 %v1986_v37, %v1956_v0  ;;  %v2006_v58 = vmul.f32 %v2005_v29, %v2000_v35  ;;  %v2012_v32 = vmul.f32 %v2011_v63, %v2000_v35  ;;  %v1983_v2 = vadd.f32 %v1981_v34, %v1951_v61  ;;  %s5927_s8 = sld [smem:[#allocation8 + $0x48]] }
 0x1d1   : > { %v2018_v31 = vmul.f32 %v2017_v27, %v2000_v35  ;;  %v2024_v26 = vmul.f32 %v2023_v4, %v2000_v35  ;;  %v2033_v7 = vsel %vm7551_vm15, %v2031_v52, %v2029_v39  ;;  %v2007_v33 = vmul.f32 %v2005_v29, %v2003_v54  ;;  %v2098_v35 = vpop.permute.xlu0 %2097 }
 0x1d2   : > { %v2013_v56 = vmul.f32 %v2011_v63, %v2003_v54  ;;  %v2037_v48 = vstv %s5765_s22  ;;  %v2032_v51 = vsel %vm7551_vm15, %v2029_v39, %v2031_v52  ;;  %v1989_v16 = vadd.f32 %v1987_v59, %v1957_v13  ;;  %vm5810_vm15 = vmand %vm273_vm13, %vm253_vm8  ;;  %v2100_v63 = vpop.permute.xlu1 %2099  ;;  %s5933_s22 = sld [smem:[#allocation8 + $0x49]] }
 0x1d3   : > { %v1994_v55 = vadd.f32 %v1992_v44, %v1962_v38  ;;  %v1995_v28 = vadd.f32 %v1993_v18, %v1963_v22  ;;  %v2043_v14 = vstv %s5768_s7  ;;  %v2008_v6 = vadd.f32 %v2006_v58, %v1976_v62  ;;  %s5935_s7 = sld [smem:[#allocation8 + $0x4a]] }
 0x1d4   : > { %v2014_v11 = vadd.f32 %v2012_v32, %v1982_v12  ;;  %v2049_v45 = vstv %s5772_s29  ;;  %v2035_v53 = vsel %vm273_vm13, %v2033_v7, 0.0  ;;  %v2019_v42 = vmul.f32 %v2017_v27, %v2003_v54  ;;  %s5941_s29 = sld [smem:[#allocation8 + $0x4b]] }
 0x1d5   : > { %v2020_v3 = vadd.f32 %v2018_v31, %v1988_v1  ;;  %v2025_v23 = vmul.f32 %v2023_v4, %v2003_v54  ;;  %v2038_v20 = vmul.f32 %v2037_v48, %v2032_v51  ;;  %v2009_v47 = vadd.f32 %v2007_v33, %v1977_v9  ;;  %8074 = sst [smem:[#allocation25_spill]] %s5925_s27 }
 0x1d6   : > { %v2015_v19 = vadd.f32 %v2013_v56, %v1983_v2  ;;  %v2026_v49 = vadd.f32 %v2024_v26, %v1994_v55  ;;  %v2055_v61 = vstv %s5780_s2  ;;  %v2039_v0 = vmul.f32 %v2037_v48, %v2035_v53  ;;  %8075 = sst [smem:[#allocation26_spill]] %s5927_s8 }
 0x1d7   : > { %v2044_v13 = vmul.f32 %v2043_v14, %v2032_v51  ;;  %v2050_v38 = vmul.f32 %v2049_v45, %v2032_v51  ;;  %v8070_v8 = vmov 0  ;;  %vm2064_vm12 = vcmp.lt.s32.totalorder %v4508_v46, 111  ;;  %s5943_s2 = sld [smem:[#allocation8 + $0x4c]] }
 0x1d8   : > { %v8071_v8 = vsel %vm5810_vm15, 4294967295, %v8070_v8  ;;  %v2045_v40 = vmul.f32 %v2043_v14, %v2035_v53  ;;  %v2051_v5 = vmul.f32 %v2049_v45, %v2035_v53  ;;  %v2065_v22 = vsel %vm2064_vm12, %v2061_v41, %v2063_v57  ;;  %8076 = sst [smem:[#allocation27_spill]] %s5933_s22 }
 0x1d9   : > { %8072 = vst [vmem:[#allocation85_spill] sm:$0xff] %v8071_v8  ;;  %v2066_v21 = vsel %vm2064_vm12, %v2063_v57, %v2061_v41  ;;  %v2021_v37 = vadd.f32 %v2019_v42, %v1989_v16  ;;  %v2027_v36 = vadd.f32 %v2025_v23, %v1995_v28  ;;  %v2040_v34 = vadd.f32 %v2038_v20, %v2008_v6  ;;  %v2132_v6 = vpop.permute.xlu1 %2131  ;;  %8077 = sst [smem:[#allocation28_spill]] %s5935_s7  ;;  %s8103_s7 = smov 15  }
 0x1da   : > { %v2056_v29 = vmul.f32 %v2055_v61, %v2032_v51  ;;  %v2057_v52 = vmul.f32 %v2055_v61, %v2035_v53  ;;  %v2074_v39 = vstv %s5786_s24  ;;  %v2071_v59 = vsel %vm252_vm7, %v2065_v22, 0.0  ;;  %8078 = sst [smem:[#allocation29_spill]] %s5941_s29 }
 0x1db   : > { %v2072_v44 = vsel %vm5810_vm15, %v2066_v21, 0.0  ;;  %v2041_v27 = vadd.f32 %v2039_v0, %v2009_v47  ;;  %v2046_v4 = vadd.f32 %v2044_v13, %v2014_v11  ;;  %v2052_v62 = vadd.f32 %v2050_v38, %v2020_v3  ;;  %v2130_v11 = vpop.permute.xlu0 %2129  ;;  %s5949_s24 = sld [smem:[#allocation8 + $0x4d]] }
 0x1dc   : > { %v2080_v12 = vstv %s5791_s25  ;;  %v2047_v18 = vadd.f32 %v2045_v40, %v2015_v19  ;;  %v2053_v54 = vadd.f32 %v2051_v5, %v2021_v37  ;;  %v2101_v9 = vsel %vm2064_vm12, %v2098_v35, %v2100_v63  ;;  %s5951_s25 = sld [smem:[#allocation8 + $0x4e]] }
 0x1dd   : > { %v2102_v1 = vsel %vm2064_vm12, %v2100_v63, %v2098_v35  ;;  %v5835_v58 = vadd.f32 %v2056_v29, %v2026_v49  ;;  %v2086_v32 = vstv %s5794_s26  ;;  %v2075_v2 = vmul.f32 %v2074_v39, %v2071_v59  ;;  %8079 = sst [smem:[#allocation30_spill]] %s5943_s2 }
 0x1de   : > { %v2076_v31 = vmul.f32 %v2074_v39, %v2072_v44  ;;  %v5840_v26 = vadd.f32 %v2057_v52, %v2027_v36  ;;  %v2092_v7 = vstv %s5799_s28  ;;  %v2081_v33 = vmul.f32 %v2080_v12, %v2071_v59  ;;  %v2164_v39 = vpop.permute.xlu1 %2163  ;;  %s5957_s26 = sld [smem:[#allocation8 + $0x4f]] }
 0x1df   : > { %v2106_v56 = vstv %s5801_s20  ;;  %v2112_v48 = vstv %s5804_s6  ;;  %v2118_v51 = vstv %s5815_s17  ;;  %v2103_v16 = vsel %vm252_vm7, %v2101_v9, 0.0  ;;  %s5959_s28 = sld [smem:[#allocation8]]  ;;  %s8086_s17 = smov 16  }
 0x1e0   : > { %v2104_v55 = vsel %vm5810_vm15, %v2102_v1, 0.0  ;;  %v2082_v28 = vmul.f32 %v2080_v12, %v2072_v44  ;;  %v2087_v14 = vmul.f32 %v2086_v32, %v2071_v59  ;;  %v2088_v57 = vmul.f32 %v2086_v32, %v2072_v44  ;;  %s5961_s20 = sld [smem:[#allocation8 + $0x1]] }
 0x1e1   : > { %v2124_v41 = vstv %s5821_s12  ;;  %v2077_v45 = vadd.f32 %v2075_v2, %v2040_v34  ;;  %v2078_v53 = vadd.f32 %v2076_v31, %v2041_v27  ;;  %v5857_v42 = vmul.f32 %v2092_v7, %v2071_v59  ;;  %v2162_v59 = vpop.permute.xlu0 %2161  ;;  %8080 = sst [smem:[#allocation31_spill]] %s5949_s24 }
 0x1e2   : > { %v5859_v3 = vmul.f32 %v2092_v7, %v2072_v44  ;;  %v2083_v23 = vadd.f32 %v2081_v33, %v2046_v4  ;;  %v2107_v20 = vmul.f32 %v2106_v56, %v2103_v16  ;;  %v2108_v47 = vmul.f32 %v2106_v56, %v2104_v55  ;;  %8081 = sst [smem:[#allocation32_spill]] %s5951_s25 }
 0x1e3   : > { %v2138_v19 = vstv %s5828_s23  ;;  %v2113_v49 = vmul.f32 %v2112_v48, %v2103_v16  ;;  %v2114_v61 = vmul.f32 %v2112_v48, %v2104_v55  ;;  %v2133_v0 = vsel %vm2064_vm12, %v2130_v11, %v2132_v6  ;;  %s5963_s6 = sld [smem:[#allocation8 + $0x2]] }
 0x1e4   : > { %v2134_v13 = vsel %vm2064_vm12, %v2132_v6, %v2130_v11  ;;  %v2084_v38 = vadd.f32 %v2082_v28, %v2047_v18  ;;  %v2089_v40 = vadd.f32 %v2087_v14, %v2052_v62  ;;  %v2135_v5 = vsel %vm252_vm7, %v2133_v0, 0.0  ;;  %8082 = sst [smem:[#allocation33_spill]] %s5957_s26 }
 0x1e5   : > { %v2136_v22 = vsel %vm5810_vm15, %v2134_v13, 0.0  ;;  %v2090_v21 = vadd.f32 %v2088_v57, %v2053_v54  ;;  %v2119_v37 = vmul.f32 %v2118_v51, %v2103_v16  ;;  %v2144_v36 = vstv %s5838_s30  ;;  %8083 = sst [smem:[#allocation34_spill]] %s5959_s28 }
 0x1e6   : > { %v2139_v34 = vmul.f32 %v2138_v19, %v2135_v5  ;;  %v2120_v29 = vmul.f32 %v2118_v51, %v2104_v55  ;;  %v2125_v63 = vmul.f32 %v2124_v41, %v2103_v16  ;;  %v2126_v35 = vmul.f32 %v2124_v41, %v2104_v55  ;;  %8084 = sst [smem:[#allocation35_spill]] %s5961_s20 }
 0x1e7   : > { %v2140_v52 = vmul.f32 %v2138_v19, %v2136_v22  ;;  %v2109_v44 = vadd.f32 %v2107_v20, %v2077_v45  ;;  %v2110_v27 = vadd.f32 %v2108_v47, %v2078_v53  ;;  %v2115_v4 = vadd.f32 %v2113_v49, %v2083_v23  ;;  %s5969_s12 = sld [smem:[#allocation8 + $0x3]] }
 0x1e8   : > { %v2116_v62 = vadd.f32 %v2114_v61, %v2084_v38  ;;  %v2150_v12 = vstv %s5844_s1  ;;  %v2145_v18 = vmul.f32 %v2144_v36, %v2135_v5  ;;  %v2170_v54 = vstv %s5852_s4  ;;  %s5971_s23 = sld [smem:[#allocation8 + $0x4]] }
 0x1e9   : > { %v2176_v9 = vstv %s5855_s15  ;;  %v2141_v1 = vadd.f32 %v2139_v34, %v2109_v44  ;;  %v2146_v32 = vmul.f32 %v2144_v36, %v2136_v22  ;;  %v2165_v2 = vsel %vm2064_vm12, %v2162_v59, %v2164_v39  ;;  %8085 = sst [smem:[#allocation36_spill]] %s5963_s6 }
 0x1ea   : > { %v2166_v31 = vsel %vm2064_vm12, %v2164_v39, %v2162_v59  ;;  %v2142_v7 = vadd.f32 %v2140_v52, %v2110_v27  ;;  %v2182_v33 = vstv %s5862_s19  ;;  %v2167_v56 = vsel %vm252_vm7, %v2165_v2, 0.0  ;;  %s5973_s30 = sld [smem:[#allocation8 + $0x5]] }
 0x1eb   : > { %v2168_v48 = vsel %vm5810_vm15, %v2166_v31, 0.0  ;;  %v2171_v51 = vmul.f32 %v2170_v54, %v2167_v56  ;;  %v2177_v55 = vmul.f32 %v2176_v9, %v2167_v56  ;;  %v2121_v14 = vadd.f32 %v2119_v37, %v2089_v40  ;;  %s5975_s1 = sld [smem:[#allocation8 + $0x6]] }
 0x1ec   : > { %v2172_v16 = vmul.f32 %v2170_v54, %v2168_v48  ;;  %v2178_v28 = vmul.f32 %v2176_v9, %v2168_v48  ;;  %v2156_v57 = vstv %s5868_s5  ;;  %v2151_v41 = vmul.f32 %v2150_v12, %v2135_v5  ;;  %s5981_s4 = sld [smem:[#allocation8 + $0x7]] }
 0x1ed   : > { %v2152_v6 = vmul.f32 %v2150_v12, %v2136_v22  ;;  %v2147_v11 = vadd.f32 %v2145_v18, %v2115_v4  ;;  %v2148_v45 = vadd.f32 %v2146_v32, %v2116_v62  ;;  %v2173_v53 = vadd.f32 %v2171_v51, %v2141_v1  ;;  %8087 = sst [smem:[#allocation37_spill]] %s5969_s12 }
 0x1ee   : > { %v2174_v23 = vadd.f32 %v2172_v16, %v2142_v7  ;;  %v2122_v20 = vadd.f32 %v2120_v29, %v2090_v21  ;;  %v2188_v47 = vstv %s5875_s9  ;;  %v2183_v19 = vmul.f32 %v2182_v33, %v2167_v56  ;;  %8088 = sst [smem:[#allocation38_spill]] %s5971_s23 }
 0x1ef   : > { %v2184_v49 = vmul.f32 %v2182_v33, %v2168_v48  ;;  %v2179_v61 = vadd.f32 %v2177_v55, %v2147_v11  ;;  %v2180_v0 = vadd.f32 %v2178_v28, %v2148_v45  ;;  %v5893_v13 = vmax.f32 %v2173_v53, 0.0  ;;  %s5983_s15 = sld [smem:[#allocation8 + $0x8]] }
 0x1f0   : > { %v5895_v38 = vmax.f32 %v2174_v23, 0.0  ;;  %v2095_v40 = vadd.f32 %v5857_v42, %v5835_v58  ;;  %v2096_v37 = vadd.f32 %v5859_v3, %v5840_v26  ;;  %v2157_v21 = vmul.f32 %v2156_v57, %v2135_v5  ;;  %8089 = sst [smem:[#allocation39_spill]] %s5973_s30 }
 0x1f1   : > { %v2153_v36 = vadd.f32 %v2151_v41, %v2121_v14  ;;  %v2154_v34 = vadd.f32 %v2152_v6, %v2122_v20  ;;  %v2158_v29 = vmul.f32 %v2156_v57, %v2136_v22  ;;  %2201 = vrot.lane.b32.xlu0 %v5893_v13, %s8073_s13  ;;  %v2189_v58 = vmul.f32 %v2188_v47, %v2167_v56  ;;  %8090 = sst [smem:[#allocation40_spill]] %s5975_s1 }
 0x1f2   : > { %2203 = vrot.lane.b32.xlu1 %v5895_v38, %s8073_s13  ;;  %v2127_v52 = vadd.f32 %v2125_v63, %v2095_v40  ;;  %v2128_v39 = vadd.f32 %v2126_v35, %v2096_v37  ;;  %v2190_v42 = vmul.f32 %v2188_v47, %v2168_v48  ;;  %v5913_v5 = vmax.f32 %v2179_v61, 0.0  ;;  %8091 = sst [smem:[#allocation41_spill]] %s5981_s4 }
 0x1f3   : > { %v2185_v26 = vadd.f32 %v2183_v19, %v2153_v36  ;;  %v2186_v3 = vadd.f32 %v2184_v49, %v2154_v34  ;;  %v5915_v59 = vmax.f32 %v2180_v0, 0.0  ;;  %s5985_s19 = sld [smem:[#allocation8 + $0x9]]  ;;  %v2210_v18 = vstv %s5959_s28 }
 0x1f4   : > { %v2159_v22 = vadd.f32 %v2157_v21, %v2127_v52  ;;  %v2160_v44 = vadd.f32 %v2158_v29, %v2128_v39  ;;  %s5987_s5 = sld [smem:[#allocation8 + $0xa]]  ;;  %v2214_v54 = vstv %s5961_s20  ;;  %v2706_v51 = vstv %s5891_s10 }
 0x1f5   : > { %2225 = vrot.lane.b32.xlu0 %v5913_v5, %s8073_s13  ;;  %v5929_v27 = vmax.f32 %v2185_v26, 0.0  ;;  %v5931_v4 = vmax.f32 %v2186_v3, 0.0  ;;  %8092 = sst [smem:[#allocation42_spill]] %s5983_s15  ;;  %v2712_v16 = vstv %s5897_s11  ;;  %v2718_v55 = vstv %s5903_s0 }
 0x1f6   : > { %2227 = vrot.lane.b32.xlu1 %v5915_v59, %s8073_s13  ;;  %v2191_v63 = vadd.f32 %v2189_v58, %v2159_v22  ;;  %v2192_v35 = vadd.f32 %v2190_v42, %v2160_v44  ;;  %s5993_s9 = sld [smem:[#allocation8 + $0xb]]  ;;  %v2724_v28 = vstv %s5909_s14  ;;  %v2730_v14 = vstv %s5911_s21 }
 0x1f7   : > { %s5999_s26 = sld [smem:[#allocation8 + $0xe]]  ;;  %v2736_v11 = vstv %s5917_s3  ;;  %v6198_v45 = vmul.f32 %v2706_v51, %v5893_v13  ;;  %v6201_v53 = vmul.f32 %v2712_v16, %v5893_v13  ;;  %v6204_v23 = vmul.f32 %v2718_v55, %v5893_v13 }
 0x1f8   : > { %v5945_v62 = vmax.f32 %v2191_v63, 0.0  ;;  %v5947_v12 = vmax.f32 %v2192_v35, 0.0  ;;  %s6005_s25 = sld [smem:[#allocation8 + $0xf]]  ;;  %v2742_v20 = vstv %s5919_s18  ;;  %v6211_v19 = vmul.f32 %v2724_v28, %v5893_v13 }
 0x1f9   : > { %2257 = vrot.lane.b32.xlu0 %v5929_v27, %s8073_s13  ;;  %8093 = sst [smem:[#allocation43_spill]] %s5985_s19  ;;  %v6214_v49 = vmul.f32 %v2730_v14, %v5913_v5  ;;  %v6225_v40 = vmul.f32 %v2730_v14, %v5915_v59  ;;  %v6228_v37 = vmul.f32 %v2736_v11, %v5913_v5  ;;  %v6231_v21 = vmul.f32 %v2736_v11, %v5915_v59 }
 0x1fa   : > { %2259 = vrot.lane.b32.xlu1 %v5931_v4, %s8073_s13  ;;  %8094 = sst [smem:[#allocation44_spill]] %s5987_s5  ;;  %v6237_v34 = vmul.f32 %v2742_v20, %v5913_v5  ;;  %v6240_v29 = vmul.f32 %v2742_v20, %v5915_v59  ;;  %v6257_v22 = vmul.f32 %v2706_v51, %v5895_v38  ;;  %v6260_v44 = vmul.f32 %v2712_v16, %v5895_v38 }
 0x1fb   : > { %s6007_s24 = sld [smem:[#allocation8 + $0x10]]  ;;  %v6271_v51 = vmul.f32 %v2718_v55, %v5895_v38  ;;  %v6274_v16 = vmul.f32 %v2724_v28, %v5895_v38 }
 0x1fc   : > { %8095 = sst [smem:[#allocation45_spill]] %s5993_s9 }
 0x1fd   : > { %2289 = vrot.lane.b32.xlu0 %v5945_v62, %s8073_s13  ;;  %8098 = sst [smem:[#allocation48_spill]] %s5999_s26 }
 0x1fe   : > { %2291 = vrot.lane.b32.xlu1 %v5947_v12, %s8073_s13  ;;  %s5995_s13 = sld [smem:[#allocation8 + $0xc]] }
 0x1ff   : > { %8099 = sst [smem:[#allocation49_spill]] %s6005_s25 }
 0x200   : > { %s6009_s2 = sld [smem:[#allocation8 + $0x11]] }
 0x201   : > { %2321 = vrot.lane.b32.xlu0 %v5893_v13, %s8086_s17  ;;  %8100 = sst [smem:[#allocation50_spill]] %s6007_s24 }
 0x202   : > { %2323 = vrot.lane.b32.xlu1 %v5895_v38, %s8086_s17  ;;  %s6011_s29 = sld [smem:[#allocation8 + $0x12]] }
 0x203   : > { %s6017_s22 = sld [smem:[#allocation8 + $0x13]] }
 0x204   : > { %8096 = sst [smem:[#allocation46_spill]] %s5995_s13 }
 0x205   : > { %2353 = vrot.lane.b32.xlu0 %v5913_v5, %s8086_s17  ;;  %s6019_s8 = sld [smem:[#allocation8 + $0x14]] }
 0x206   : > { %2355 = vrot.lane.b32.xlu1 %v5915_v59, %s8086_s17  ;;  %8101 = sst [smem:[#allocation56_spill]] %s6009_s2 }
 0x207   : > { %s6021_s27 = sld [smem:[#allocation8 + $0x15]] }
 0x208   : > { %8102 = sst [smem:[#allocation58_spill]] %s6011_s29 }
 0x209   : > { %2385 = vrot.lane.b32.xlu0 %v5929_v27, %s8086_s17  ;;  %8104 = sst [smem:[#allocation59_spill]] %s6017_s22 }
 0x20a   : > { %2387 = vrot.lane.b32.xlu1 %v5931_v4, %s8086_s17  ;;  %s6029_s29 = sld [smem:[#allocation8 + $0x17]] }
 0x20b   : > { %8105 = sst [smem:[#allocation60_spill]] %s6019_s8 }
 0x20c   : > { %s6031_s2 = sld [smem:[#allocation8 + $0x18]] }
 0x20d   : > { %2417 = vrot.lane.b32.xlu0 %v5945_v62, %s8086_s17  ;;  %8106 = sst [smem:[#allocation62_spill]] %s6021_s27 }
 0x20e   : > { %2419 = vrot.lane.b32.xlu1 %v5947_v12, %s8086_s17  ;;  %s6023_s17 = sld [smem:[#allocation8 + $0x16]] }
 0x20f   : > { %s6033_s24 = sld [smem:[#allocation8 + $0x19]] }
 0x210   : > { %8108 = sst [smem:[#allocation64_spill]] %s6029_s29 }
 0x211   : > { %2449 = vrot.lane.b32.xlu0 %v5893_v13, %s8103_s7  ;;  %s6035_s25 = sld [smem:[#allocation8 + $0x1a]] }
 0x212   : > { %2451 = vrot.lane.b32.xlu1 %v5895_v38, %s8103_s7  ;;  %8109 = sst [smem:[#allocation65_spill]] %s6031_s2 }
 0x213   : > { %s6043_s27 = sld [smem:[#allocation8 + $0x1c]] }
 0x214   : > { %8107 = sst [smem:[#allocation63_spill]] %s6023_s17 }
 0x215   : > { %2481 = vrot.lane.b32.xlu0 %v5913_v5, %s8103_s7  ;;  %8110 = sst [smem:[#allocation66_spill]] %s6033_s24 }
 0x216   : > { %2483 = vrot.lane.b32.xlu1 %v5915_v59, %s8103_s7  ;;  %s6041_s17 = sld [smem:[#allocation8 + $0x1b]] }
 0x217   : > { %8111 = sst [smem:[#allocation67_spill]] %s6035_s25 }
 0x218   : > { %s6045_s8 = sld [smem:[#allocation8 + $0x1d]] }
 0x219   : > { %2513 = vrot.lane.b32.xlu0 %v5929_v27, %s8103_s7  ;;  %8113 = sst [smem:[#allocation69_spill]] %s6043_s27 }
 0x21a   : > { %2515 = vrot.lane.b32.xlu1 %v5931_v4, %s8103_s7  ;;  %s6047_s22 = sld [smem:[#allocation8 + $0x1e]] }
 0x21b   : > { %s6053_s25 = sld [smem:[#allocation8 + $0x1f]] }
 0x21c   : > { %8112 = sst [smem:[#allocation68_spill]] %s6041_s17  ;;  %s8120_s17 = smov 1  }
 0x21d   : > { %2545 = vrot.lane.b32.xlu0 %v5945_v62, %s8103_s7  ;;  %s6055_s24 = sld [smem:[#allocation8 + $0x20]] }
 0x21e   : > { %8114 = sst [smem:[#allocation70_spill]] %s6045_s8  ;;  %2547 = vrot.lane.b32.xlu1 %v5947_v12, %s8103_s7 }
 0x21f   : > { %s6057_s2 = sld [smem:[#allocation8 + $0x21]] }
 0x220   : > { %8115 = sst [smem:[#allocation51_spill]] %s6047_s22 }
 0x221   : > { %8116 = sst [smem:[#allocation52_spill]] %s6053_s25  ;;  %2577 = vrot.lane.b32.xlu0 %v5893_v13, %s8120_s17 }
 0x222   : > { %s6059_s29 = sld [smem:[#allocation8 + $0x22]]  ;;  %2579 = vrot.lane.b32.xlu1 %v5895_v38, %s8120_s17 }
 0x223   : > { %8117 = sst [smem:[#allocation53_spill]] %s6055_s24 }
 0x224   : > { %s6065_s22 = sld [smem:[#allocation8 + $0x23]] }
 0x225   : > { %8118 = sst [smem:[#allocation54_spill]] %s6057_s2  ;;  %2609 = vrot.lane.b32.xlu0 %v5913_v5, %s8120_s17 }
 0x226   : > { %s6067_s8 = sld [smem:[#allocation8 + $0x24]]  ;;  %2611 = vrot.lane.b32.xlu1 %v5915_v59, %s8120_s17 }
 0x227   : > { %s6069_s27 = sld [smem:[#allocation8 + $0x25]] }
 0x228   : > { %8119 = sst [smem:[#allocation55_spill]] %s6059_s29 }
 0x229   : > { %s6071_s7 = sld [smem:[#allocation8 + $0x26]]  ;;  %2641 = vrot.lane.b32.xlu0 %v5929_v27, %s8120_s17 }
 0x22a   : > { %8121 = sst [smem:[#allocation57_spill]] %s6065_s22  ;;  %2643 = vrot.lane.b32.xlu1 %v5931_v4, %s8120_s17 }
 0x22b   : > { %s6077_s29 = sld [smem:[#allocation8 + $0x27]] }
 0x22c   : > { %8122 = sst [smem:[#allocation61_spill]] %s6067_s8 }
 0x22d   : > { %8123 = sst [smem:[#allocation72_spill]] %s6069_s27  ;;  %2673 = vrot.lane.b32.xlu0 %v5945_v62, %s8120_s17 }
 0x22e   : > { %s6079_s2 = sld [smem:[#allocation8 + $0x28]]  ;;  %2675 = vrot.lane.b32.xlu1 %v5947_v12, %s8120_s17 }
 0x22f   : > { %8124 = sst [smem:[#allocation73_spill]] %s6071_s7 }
 0x230   : > { %s6081_s24 = sld [smem:[#allocation8 + $0x29]] }
 0x231   : > { %8125 = sst [smem:[#allocation74_spill]] %s6077_s29 }
 0x232   : > { %s6083_s25 = sld [smem:[#allocation8 + $0x2a]] }
 0x233   : > { %s6089_s7 = sld [smem:[#allocation8 + $0x2b]] }
 0x234   : > { %8126 = sst [smem:[#allocation75_spill]] %s6079_s2 }
 0x235   : > { %s6091_s27 = sld [smem:[#allocation8 + $0x2c]] }
 0x236   : > { %8127 = sst [smem:[#allocation76_spill]] %s6081_s24 }
 0x237   : > { %s6093_s8 = sld [smem:[#allocation8 + $0x2d]] }
 0x238   : > { %8128 = sst [smem:[#allocation77_spill]] %s6083_s25 }
 0x239   : > { %8129 = sst [smem:[#allocation79_spill]] %s6089_s7  ;;  %s8137_s7 = smov 127  }
 0x23a   : > { %s6095_s22 = sld [smem:[#allocation8 + $0x2e]]  ;;  %2801 = vrot.lane.b32.xlu0 %v5893_v13, %s8137_s7  ;;  %2803 = vrot.lane.b32.xlu1 %v5895_v38, %s8137_s7 }
 0x23b   : > { %8130 = sst [smem:[#allocation80_spill]] %s6091_s27 }
 0x23c   : > { %s6101_s25 = sld [smem:[#allocation8 + $0x2f]] }
 0x23d   : > { %8131 = sst [smem:[#allocation81_spill]] %s6093_s8 }
 0x23e   : > { %s6103_s24 = sld [smem:[#allocation8 + $0x30]]  ;;  %2833 = vrot.lane.b32.xlu0 %v5913_v5, %s8137_s7  ;;  %2835 = vrot.lane.b32.xlu1 %v5915_v59, %s8137_s7 }
 0x23f   : > { %s6105_s2 = sld [smem:[#allocation8 + $0x31]] }
 0x240   : > { %8132 = sst [smem:[#allocation83_spill]] %s6095_s22 }
 0x241   : > { %s6107_s29 = sld [smem:[#allocation8 + $0x32]] }
 0x242   : > { %8133 = sst [smem:[#allocation84_spill]] %s6101_s25  ;;  %2865 = vrot.lane.b32.xlu0 %v5929_v27, %s8137_s7  ;;  %2867 = vrot.lane.b32.xlu1 %v5931_v4, %s8137_s7  ;;  %s8262_s25 = smov 111  }
 0x243   : > { %s6113_s22 = sld [smem:[#allocation8 + $0x33]] }
 0x244   : > { %8134 = sst [smem:[#allocation86_spill]] %s6103_s24 }
 0x245   : > { %8135 = sst [smem:[#allocation88_spill]] %s6105_s2 }
 0x246   : > { %s6115_s8 = sld [smem:[#allocation8 + $0x34]]  ;;  %2897 = vrot.lane.b32.xlu0 %v5945_v62, %s8137_s7  ;;  %2899 = vrot.lane.b32.xlu1 %v5947_v12, %s8137_s7 }
 0x247   : > { %8136 = sst [smem:[#allocation92_spill]] %s6107_s29 }
 0x248   : > { %s6117_s27 = sld [smem:[#allocation8 + $0x35]] }
 0x249   : > { %8138 = sst [smem:[#allocation103_spill]] %s6113_s22 }
 0x24a   : > { %s6119_s17 = sld [smem:[#allocation8 + $0x36]] }
 0x24b   : > { %s6125_s29 = sld [smem:[#allocation8 + $0x37]] }
 0x24c   : > { %8139 = sst [smem:[#allocation104_spill]] %s6115_s8 }
 0x24d   : > { %s6127_s2 = sld [smem:[#allocation8 + $0x38]] }
 0x24e   : > { %8140 = sst [smem:[#allocation105_spill]] %s6117_s27 }
 0x24f   : > { %s6129_s24 = sld [smem:[#allocation8 + $0x39]] }
 0x250   : > { %8141 = sst [smem:[#allocation106_spill]] %s6119_s17 }
 0x251   : > { %8142 = sst [smem:[#allocation107_spill]] %s6125_s29  ;;  %s8153_s29 = smov 113  }
 0x252   : > { %s6131_s22 = sld [smem:[#allocation8 + $0x3a]]  ;;  %2929 = vrot.lane.b32.xlu0 %v5893_v13, %s8153_s29  ;;  %2931 = vrot.lane.b32.xlu1 %v5895_v38, %s8153_s29 }
 0x253   : > { %8143 = sst [smem:[#allocation108_spill]] %s6127_s2 }
 0x254   : > { %s6137_s17 = sld [smem:[#allocation8 + $0x3b]] }
 0x255   : > { %8144 = sst [smem:[#allocation109_spill]] %s6129_s24 }
 0x256   : > { %s6139_s27 = sld [smem:[#allocation8 + $0x3c]]  ;;  %2961 = vrot.lane.b32.xlu0 %v5913_v5, %s8153_s29  ;;  %2963 = vrot.lane.b32.xlu1 %v5915_v59, %s8153_s29 }
 0x257   : > { %s6141_s2 = sld [smem:[#allocation8 + $0x3d]] }
 0x258   : > { %8145 = sst [smem:[#allocation110_spill]] %s6131_s22 }
 0x259   : > { %s6143_s24 = sld [smem:[#allocation8 + $0x3e]] }
 0x25a   : > { %8146 = sst [smem:[#allocation111_spill]] %s6137_s17  ;;  %2993 = vrot.lane.b32.xlu0 %v5929_v27, %s8153_s29  ;;  %2995 = vrot.lane.b32.xlu1 %v5931_v4, %s8153_s29 }
 0x25b   : > { %s6149_s22 = sld [smem:[#allocation8 + $0x3f]] }
 0x25c   : > { %8147 = sst [smem:[#allocation112_spill]] %s6139_s27 }
 0x25d   : > { %8148 = sst [smem:[#allocation113_spill]] %s6141_s2 }
 0x25e   : > { %s6151_s17 = sld [smem:[#allocation8 + $0x50]]  ;;  %3025 = vrot.lane.b32.xlu0 %v5945_v62, %s8153_s29  ;;  %3027 = vrot.lane.b32.xlu1 %v5947_v12, %s8153_s29 }
 0x25f   : > { %8149 = sst [smem:[#allocation114_spill]] %s6143_s24 }
 0x260   : > { %s6153_s27 = sld [smem:[#allocation8 + $0x51]] }
 0x261   : > { %8150 = sst [smem:[#allocation115_spill]] %s6149_s22 }
 0x262   : > { %s6155_s2 = sld [smem:[#allocation8 + $0x52]] }
 0x263   : > { %s6163_s7 = sld [smem:[#allocation8 + $0x53]] }
 0x264   : > { %s6175_s28 = sld [smem:[#allocation8 + $0x55]]  ;;  %v2204_v31 = vpop.permute.xlu1 %2203 }
 0x265   : > { %s6181_s12 = sld [smem:[#allocation8 + $0x56]] }
 0x266   : > { %8151 = sst [smem:[#allocation116_spill]] %s6153_s27 }
 0x267   : > { %s8158_s15 = sld [smem:[#allocation25_spill]] }
 0x268   : > { %8152 = sst [smem:[#allocation117_spill]] %s6155_s2 }
 0x269   : > { %8154 = sst [smem:[#allocation118_spill]] %s6163_s7 }
 0x26a   : > { %s6169_s2 = sld [smem:[#allocation8 + $0x54]] }
 0x26b   : > { %8156 = sst [smem:[#allocation120_spill]] %s6175_s28 }
 0x26c   : > { %8157 = sst [smem:[#allocation121_spill]] %s6181_s12 }
 0x26d   : > { %s6189_s19 = sld [smem:[#allocation8 + $0x57]]  ;;  %v2748_v61 = vstv %s8158_s15 }
 0x26e   : > { %s6195_s11 = sld [smem:[#allocation8 + $0x58]]  ;;  %v6247_v58 = vmul.f32 %v2748_v61, %v5913_v5  ;;  %v6250_v42 = vmul.f32 %v2748_v61, %v5915_v59 }
 0x26f   : > { %s6207_s14 = sld [smem:[#allocation8 + $0x59]] }
 0x270   : > { %8155 = sst [smem:[#allocation119_spill]] %s6169_s2 }
 0x271   : > { %s8164_s21 = sld [smem:[#allocation26_spill]] }
 0x272   : > { %8166 = sst [smem:[#allocation26_spill]] %s6217_s16 }
 0x273   : > { %8159 = sst [smem:[#allocation25_spill]] %s6189_s19 }
 0x274   : > { %8161 = sst [smem:[#allocation122_spill]] %s6195_s11 }
 0x275   : > { %8163 = sst [smem:[#allocation123_spill]] %s6207_s14 }
 0x276   : > { %s8167_s13 = sld [smem:[#allocation27_spill]] }
 0x277   : > { %s8169_s26 = sld [smem:[#allocation28_spill]]  ;;  %v2754_v52 = vstv %s8164_s21 }
 0x278   : > { %s6233_s15 = sld [smem:[#allocation8 + $0x5b]]  ;;  %v6277_v14 = vmul.f32 %v2754_v52, %v5929_v27  ;;  %v6282_v11 = vmul.f32 %v2754_v52, %v5931_v4 }
 0x279   : > { %s6243_s10 = sld [smem:[#allocation8 + $0x5c]] }
 0x27a   : > { %s6253_s5 = sld [smem:[#allocation8 + $0x5d]]  ;;  %8182 = vst [vmem:[#allocation89_spill] sm:$0xff] %v6277_v14 }
 0x27b   : > { %s8174_s0 = sld [smem:[#allocation29_spill]] }
 0x27c   : > { %v2760_v26 = vstv %s8167_s13  ;;  %s6263_s3 = sld [smem:[#allocation8 + $0x5e]] }
 0x27d   : > { %v2766_v63 = vstv %s8169_s26  ;;  %s8180_s1 = sld [smem:[#allocation30_spill]]  ;;  %v6285_v20 = vmul.f32 %v2760_v26, %v5929_v27  ;;  %v6288_v61 = vmul.f32 %v2760_v26, %v5931_v4 }
 0x27e   : > { %8170 = sst [smem:[#allocation27_spill]] %s6233_s15  ;;  %v6296_v3 = vmul.f32 %v2766_v63, %v5929_v27  ;;  %v6299_v52 = vmul.f32 %v2766_v63, %v5931_v4 }
 0x27f   : > { %8172 = sst [smem:[#allocation28_spill]] %s6243_s10  ;;  %8184 = vst [vmem:[#allocation82_spill] sm:$0xff] %v6285_v20  ;;  %s8198_s10 = smov 112  }
 0x280   : > { %8173 = sst [smem:[#allocation124_spill]] %s6253_s5  ;;  %8189 = vst [vmem:[#allocation87_spill] sm:$0xff] %v6296_v3  ;;  %3057 = vrot.lane.b32.xlu0 %v5893_v13, %s8198_s10  ;;  %3059 = vrot.lane.b32.xlu1 %v5895_v38, %s8198_s10 }
 0x281   : > { %s8181_s26 = sld [smem:[#allocation31_spill]]  ;;  %v2772_v55 = vstv %s8174_s0 }
 0x282   : > { %8177 = sst [smem:[#allocation29_spill]] %s6263_s3  ;;  %v6314_v63 = vmul.f32 %v2772_v55, %v5929_v27  ;;  %v6317_v39 = vmul.f32 %v2772_v55, %v5931_v4 }
 0x283   : > { %s6279_s30 = sld [smem:[#allocation8 + $0x5f]]  ;;  %v2778_v0 = vstv %s8180_s1 }
 0x284   : > { %s8185_s29 = sld [smem:[#allocation32_spill]]  ;;  %8201 = vst [vmem:[#allocation91_spill] sm:$0xff] %v6314_v63  ;;  %8203 = vst [vmem:[#allocation90_spill] sm:$0xff] %v6317_v39  ;;  %3089 = vrot.lane.b32.xlu0 %v5913_v5, %s8198_s10  ;;  %3091 = vrot.lane.b32.xlu1 %v5915_v59, %s8198_s10  ;;  %v6348_v1 = vmul.f32 %v2778_v0, %v5945_v62  ;;  %v6351_v41 = vmul.f32 %v2778_v0, %v5947_v12 }
 0x285   : > { %s6291_s9 = sld [smem:[#allocation8 + $0x60]] }
 0x286   : > { %s8187_s23 = sld [smem:[#allocation33_spill]]  ;;  %8221 = vst [vmem:[#allocation93_spill] sm:$0xff] %v6348_v1  ;;  %8223 = vst [vmem:[#allocation94_spill] sm:$0xff] %v6351_v41 }
 0x287   : > { %s6301_s3 = sld [smem:[#allocation8 + $0x61]]  ;;  %v2784_v47 = vstv %s8181_s26 }
 0x288   : > { %s6307_s21 = sld [smem:[#allocation8 + $0x62]]  ;;  %3121 = vrot.lane.b32.xlu0 %v5929_v27, %s8198_s10  ;;  %3123 = vrot.lane.b32.xlu1 %v5931_v4, %s8198_s10  ;;  %v6380_v7 = vmul.f32 %v2784_v47, %v5945_v62  ;;  %v6383_v48 = vmul.f32 %v2784_v47, %v5947_v12 }
 0x289   : > { %8183 = sst [smem:[#allocation30_spill]] %s6279_s30 }
 0x28a   : > { %v2790_v26 = vstv %s8185_s29  ;;  %s6321_s13 = sld [smem:[#allocation8 + $0x63]]  ;;  %8238 = vst [vmem:[#allocation96_spill] sm:$0xff] %v6380_v7  ;;  %8239 = vst [vmem:[#allocation98_spill] sm:$0xff] %v6383_v48 }
 0x28b   : > { %8186 = sst [smem:[#allocation31_spill]] %s6291_s9  ;;  %v6412_v6 = vmul.f32 %v2790_v26, %v5945_v62  ;;  %v6417_v56 = vmul.f32 %v2790_v26, %v5947_v12 }
 0x28c   : > { %v2796_v35 = vstv %s8187_s23  ;;  %s6327_s14 = sld [smem:[#allocation8 + $0x64]]  ;;  %3153 = vrot.lane.b32.xlu0 %v5945_v62, %s8198_s10  ;;  %3155 = vrot.lane.b32.xlu1 %v5947_v12, %s8198_s10 }
 0x28d   : > { %8192 = sst [smem:[#allocation32_spill]] %s6301_s3  ;;  %8249 = vst [vmem:[#allocation95_spill] sm:$0xff] %v6412_v6  ;;  %8251 = vst [vmem:[#allocation97_spill] sm:$0xff] %v6417_v56  ;;  %v6446_v55 = vmul.f32 %v2796_v35, %v5945_v62  ;;  %v6451_v47 = vmul.f32 %v2796_v35, %v5947_v12 }
 0x28e   : > { %8197 = sst [smem:[#allocation125_spill]] %s6307_s21 }
 0x28f   : > { %s6333_s28 = sld [smem:[#allocation8 + $0x65]]  ;;  %8263 = vst [vmem:[#allocation100_spill] sm:$0xff] %v6446_v55  ;;  %8264 = vst [vmem:[#allocation99_spill] sm:$0xff] %v6451_v47 }
 0x290   : > { %s6339_s5 = sld [smem:[#allocation8 + $0x66]]  ;;  %3185 = vrot.lane.b32.xlu0 %v5893_v13, %s8262_s25  ;;  %3187 = vrot.lane.b32.xlu1 %v5895_v38, %s8262_s25  ;;  %v2202_v13 = vpop.permute.xlu0 %2201 }
 0x291   : > { %s6353_s1 = sld [smem:[#allocation8 + $0x67]]  ;;  %v2205_v0 = vsel %vm345_vm2, %v2202_v13, %v2204_v31  ;;  %v2206_v33 = vsel %vm345_vm2, %v2204_v31, %v2202_v13 }
 0x292   : > { %8208 = sst [smem:[#allocation126_spill]] %s6327_s14  ;;  %v2207_v35 = vsel %vm5004_vm4, %v2206_v33, 0.0  ;;  %v2208_v32 = vsel %vm233_vm3, %v2205_v0, 0.0 }
 0x293   : > { %s6359_s0 = sld [smem:[#allocation8 + $0x68]]  ;;  %v2211_v33 = vmul.f32 %v2210_v18, %v2207_v35  ;;  %v2212_v0 = vmul.f32 %v2210_v18, %v2208_v32  ;;  %v2215_v13 = vmul.f32 %v2214_v54, %v2207_v35  ;;  %v2216_v38 = vmul.f32 %v2214_v54, %v2208_v32 }
 0x294   : > { %s6371_s23 = sld [smem:[#allocation8 + $0x6a]]  ;;  %3217 = vrot.lane.b32.xlu0 %v5913_v5, %s8262_s25  ;;  %3219 = vrot.lane.b32.xlu1 %v5915_v59, %s8262_s25  ;;  %v2226_v57 = vpop.permute.xlu0 %2225  ;;  %v2228_v5 = vpop.permute.xlu1 %2227 }
 0x295   : > { %8212 = sst [smem:[#allocation127_spill]] %s6333_s28  ;;  %v2229_v28 = vsel %vm345_vm2, %v2226_v57, %v2228_v5  ;;  %v2230_v18 = vsel %vm345_vm2, %v2228_v5, %v2226_v57 }
 0x296   : > { %8217 = sst [smem:[#allocation128_spill]] %s6339_s5  ;;  %v2231_v59 = vsel %vm5004_vm4, %v2230_v18, 0.0  ;;  %v2232_v54 = vsel %vm233_vm3, %v2229_v28, 0.0 }
 0x297   : > { %8224 = sst [smem:[#allocation129_spill]] %s6353_s1 }
 0x298   : > { %s6365_s5 = sld [smem:[#allocation8 + $0x69]]  ;;  %3249 = vrot.lane.b32.xlu0 %v5929_v27, %s8262_s25  ;;  %3251 = vrot.lane.b32.xlu1 %v5931_v4, %s8262_s25  ;;  %v2258_v27 = vpop.permute.xlu0 %2257  ;;  %v2260_v7 = vpop.permute.xlu1 %2259 }
 0x299   : > { %8227 = sst [smem:[#allocation130_spill]] %s6359_s0 }
 0x29a   : > { %s6385_s26 = sld [smem:[#allocation8 + $0x6b]] }
 0x29b   : > { %s6391_s16 = sld [smem:[#allocation8 + $0x6c]] }
 0x29c   : > { %s8240_s4 = sld [smem:[#allocation117_spill]]  ;;  %3281 = vrot.lane.b32.xlu0 %v5945_v62, %s8262_s25  ;;  %3283 = vrot.lane.b32.xlu1 %v5947_v12, %s8262_s25 }
 0x29d   : > { %s6397_s18 = sld [smem:[#allocation8 + $0x6d]] }
 0x29e   : > { %8230 = sst [smem:[#allocation131_spill]] %s6365_s5 }
 0x29f   : > { %s8243_s3 = sld [smem:[#allocation121_spill]] }
 0x2a0   : > { %s8244_s21 = sld [smem:[#allocation25_spill]] }
 0x2a1   : > { %s8245_s28 = sld [smem:[#allocation122_spill]] }
 0x2a2   : > { %s6403_s8 = sld [smem:[#allocation8 + $0x6e]] }
 0x2a3   : > { %8241 = sst [smem:[#allocation117_spill]] %s6397_s18 }
 0x2a4   : > { %s8247_s19 = sld [smem:[#allocation123_spill]] }
 0x2a5   : > { %s8248_s20 = sld [smem:[#allocation26_spill]] }
 0x2a6   : > { %s8250_s24 = sld [smem:[#allocation27_spill]] }
 0x2a7   : > { %s8252_s22 = sld [smem:[#allocation28_spill]] }
 0x2a8   : > { %8246 = sst [smem:[#allocation121_spill]] %s6403_s8 }
 0x2a9   : > { %s6421_s9 = sld [smem:[#allocation8 + $0x6f]] }
 0x2aa   : > { %s8255_s10 = sld [smem:[#allocation29_spill]] }
 0x2ab   : > { %s8256_s11 = sld [smem:[#allocation30_spill]] }
 0x2ac   : > { %s6427_s15 = sld [smem:[#allocation8 + $0x70]] }
 0x2ad   : > { %s8258_s6 = sld [smem:[#allocation32_spill]] }
 0x2ae   : > { %s8259_s8 = sld [smem:[#allocation125_spill]] }
 0x2af   : > { %s6433_s27 = sld [smem:[#allocation8 + $0x71]] }
 0x2b0   : > { %s8265_s12 = sld [smem:[#allocation121_spill]] }
 0x2b1   : > { %s6463_s30 = sld [smem:[#allocation8 + $0x72]] }
 0x2b2   : > { %s6471_s14 = sld [smem:[#allocation8 + $0x73]] }
 0x2b3   : > { %s8269_s5 = sld [smem:[#allocation36_spill]] }
 0x2b4   : > { %s8270_s0 = sld [smem:[#allocation38_spill]] }
 0x2b5   : > { %s8271_s2 = sld [smem:[#allocation39_spill]] }
 0x2b6   : > { %s8272_s7 = sld [smem:[#allocation40_spill]] }
 0x2b7   : > { %s8273_s18 = sld [smem:[#allocation41_spill]] }
 0x2b8   : > { %s8276_s29 = sld [smem:[#allocation37_spill]] }
 0x2b9   : > { %v8274_v26 = vstv %s8269_s5  ;;  %s8287_s5 = sld [smem:[#allocation42_spill]] }
 0x2ba   : > { %v2219_v36 = vmul.f32 %v8274_v26, %v2207_v35  ;;  %v8275_v31 = vmov %v8274_v26  ;;  %v8277_v57 = vstv %s8270_s0  ;;  %s8299_s25 = sld [smem:[#allocation50_spill]] }
 0x2bb   : > { %v2220_v9 = vmul.f32 %v8275_v31, %v2208_v32  ;;  %v2235_v26 = vmul.f32 %v8277_v57, %v2231_v59  ;;  %v8278_v5 = vmov %v8277_v57  ;;  %v8279_v31 = vstv %s8271_s2  ;;  %s8288_s2 = sld [smem:[#allocation43_spill]] }
 0x2bc   : > { %v2236_v17 = vmul.f32 %v8278_v5, %v2232_v54  ;;  %v2241_v8 = vmul.f32 %v8279_v31, %v2231_v59  ;;  %v8280_v50 = vmov %v8279_v31  ;;  %v8281_v18 = vstv %s8272_s7  ;;  %s8289_s7 = sld [smem:[#allocation44_spill]] }
 0x2bd   : > { %v2242_v10 = vmul.f32 %v8280_v50, %v2232_v54  ;;  %v2247_v47 = vmul.f32 %v8281_v18, %v2231_v59  ;;  %v8282_v56 = vmov %v8281_v18  ;;  %v8283_v28 = vstv %s8273_s18  ;;  %s8290_s18 = sld [smem:[#allocation45_spill]] }
 0x2be   : > { %v2248_v48 = vmul.f32 %v8282_v56, %v2232_v54  ;;  %v2253_v55 = vmul.f32 %v8283_v28, %v2231_v59  ;;  %v8284_v30 = vmov %v8283_v28  ;;  %v8285_v41 = vstv %s8276_s29  ;;  %s8300_s0 = sld [smem:[#allocation46_spill]] }
 0x2bf   : > { %v2254_v6 = vmul.f32 %v8284_v30, %v2232_v54  ;;  %v2223_v4 = vmul.f32 %v8285_v41, %v2207_v35  ;;  %v8286_v39 = vmov %v8285_v41  ;;  %v2237_v63 = vadd.f32 %v2235_v26, %v2211_v33  ;;  %s8301_s1 = sld [smem:[#allocation47_spill]] }
 0x2c0   : > { %v2224_v57 = vmul.f32 %v8286_v39, %v2208_v32  ;;  %v2238_v31 = vadd.f32 %v2236_v17, %v2212_v0  ;;  %v2243_v50 = vadd.f32 %v2241_v8, %v2215_v13  ;;  %v2244_v18 = vadd.f32 %v2242_v10, %v2216_v38  ;;  %s8302_s29 = sld [smem:[#allocation48_spill]] }
 0x2c1   : > { %v2249_v30 = vadd.f32 %v2247_v47, %v2219_v36  ;;  %v2250_v56 = vadd.f32 %v2248_v48, %v2220_v9  ;;  %v2261_v32 = vsel %vm345_vm2, %v2258_v27, %v2260_v7  ;;  %v2262_v17 = vsel %vm345_vm2, %v2260_v7, %v2258_v27  ;;  %v2290_v9 = vpop.permute.xlu0 %2289  ;;  %v2292_v48 = vpop.permute.xlu1 %2291 }
 0x2c2   : > { %v2255_v10 = vadd.f32 %v2253_v55, %v2223_v4  ;;  %v2256_v8 = vadd.f32 %v2254_v6, %v2224_v57  ;;  %v2263_v62 = vsel %vm5004_vm4, %v2262_v17, 0.0  ;;  %v2264_v41 = vsel %vm233_vm3, %v2261_v32, 0.0 }
 0x2c3   : > { %v8291_v36 = vstv %s8287_s5  ;;  %v8293_v35 = vstv %s8288_s2  ;;  %v8295_v0 = vstv %s8289_s7  ;;  %v8297_v59 = vstv %s8290_s18  ;;  %s8303_s5 = sld [smem:[#allocation49_spill]] }
 0x2c4   : > { %v2267_v39 = vmul.f32 %v8291_v36, %v2263_v62  ;;  %v8292_v47 = vmov %v8291_v36  ;;  %v2273_v13 = vmul.f32 %v8293_v35, %v2263_v62  ;;  %v8294_v7 = vmov %v8293_v35  ;;  %s8311_s2 = sld [smem:[#allocation56_spill]] }
 0x2c5   : > { %v2268_v38 = vmul.f32 %v8292_v47, %v2264_v41  ;;  %v2274_v33 = vmul.f32 %v8294_v7, %v2264_v41  ;;  %v2279_v12 = vmul.f32 %v8295_v0, %v2263_v62  ;;  %v8296_v55 = vmov %v8295_v0  ;;  %v2322_v7 = vpop.permute.xlu0 %2321  ;;  %s8314_s7 = sld [smem:[#allocation58_spill]] }
 0x2c6   : > { %v2280_v6 = vmul.f32 %v8296_v55, %v2264_v41  ;;  %v2285_v54 = vmul.f32 %v8297_v59, %v2263_v62  ;;  %v8298_v26 = vmov %v8297_v59  ;;  %v2269_v27 = vadd.f32 %v2267_v39, %v2237_v63  ;;  %v2324_v62 = vpop.permute.xlu1 %2323  ;;  %s8315_s18 = sld [smem:[#allocation59_spill]] }
 0x2c7   : > { %v2286_v28 = vmul.f32 %v8298_v26, %v2264_v41  ;;  %v2270_v4 = vadd.f32 %v2268_v38, %v2238_v31  ;;  %v2275_v57 = vadd.f32 %v2273_v13, %v2243_v50  ;;  %v2276_v32 = vadd.f32 %v2274_v33, %v2244_v18 }
 0x2c8   : > { %v2281_v17 = vadd.f32 %v2279_v12, %v2249_v30  ;;  %v2282_v36 = vadd.f32 %v2280_v6, %v2250_v56  ;;  %v2287_v47 = vadd.f32 %v2285_v54, %v2255_v10  ;;  %v2293_v63 = vsel %vm345_vm2, %v2290_v9, %v2292_v48 }
 0x2c9   : > { %v2288_v35 = vadd.f32 %v2286_v28, %v2256_v8  ;;  %v2294_v31 = vsel %vm345_vm2, %v2292_v48, %v2290_v9  ;;  %v2325_v50 = vsel %vm578_vm5, %v2322_v7, %v2324_v62  ;;  %v2326_v18 = vsel %vm578_vm5, %v2324_v62, %v2322_v7  ;;  %v2354_v62 = vpop.permute.xlu0 %2353 }
 0x2ca   : > { %v2295_v30 = vsel %vm5004_vm4, %v2294_v31, 0.0  ;;  %v2296_v56 = vsel %vm233_vm3, %v2293_v63, 0.0  ;;  %v2327_v10 = vsel %vm224_vm0, %v2326_v18, 0.0  ;;  %v8304_v8 = vstv %s8299_s25  ;;  %v2356_v63 = vpop.permute.xlu1 %2355 }
 0x2cb   : > { %v2332_v41 = vmul.f32 %v8304_v8, %v2325_v50  ;;  %v8305_v39 = vstv %s8300_s0  ;;  %v8307_v13 = vstv %s8301_s1  ;;  %v8309_v55 = vstv %s8302_s29  ;;  %s8320_s0 = sld [smem:[#allocation60_spill]] }
 0x2cc   : > { %v2299_v38 = vmul.f32 %v8305_v39, %v2295_v30  ;;  %v8306_v9 = vmov %v8305_v39  ;;  %v2305_v33 = vmul.f32 %v8307_v13, %v2295_v30  ;;  %v8308_v0 = vmov %v8307_v13  ;;  %s8322_s1 = sld [smem:[#allocation62_spill]] }
 0x2cd   : > { %v2300_v48 = vmul.f32 %v8306_v9, %v2296_v56  ;;  %v2306_v12 = vmul.f32 %v8308_v0, %v2296_v56  ;;  %v2311_v2 = vmul.f32 %v8309_v55, %v2295_v30  ;;  %v8310_v6 = vmov %v8309_v55  ;;  %s8324_s29 = sld [smem:[#allocation63_spill]] }
 0x2ce   : > { %v2312_v59 = vmul.f32 %v8310_v6, %v2296_v56  ;;  %v8312_v54 = vstv %s8303_s5  ;;  %v2301_v31 = vadd.f32 %v2299_v38, %v2269_v27  ;;  %v2307_v8 = vadd.f32 %v2305_v33, %v2275_v57  ;;  %s8326_s5 = sld [smem:[#allocation64_spill]] }
 0x2cf   : > { %v2317_v26 = vmul.f32 %v8312_v54, %v2295_v30  ;;  %v8313_v28 = vmov %v8312_v54  ;;  %v2302_v18 = vadd.f32 %v2300_v48, %v2270_v4  ;;  %v2308_v39 = vadd.f32 %v2306_v12, %v2276_v32 }
 0x2d0   : > { %v2318_v7 = vmul.f32 %v8313_v28, %v2296_v56  ;;  %v2313_v9 = vadd.f32 %v2311_v2, %v2281_v17  ;;  %v2314_v13 = vadd.f32 %v2312_v59, %v2282_v36  ;;  %v8316_v6 = vstv %s8299_s25  ;;  %v2386_v36 = vpop.permute.xlu0 %2385  ;;  %s8331_s25 = sld [smem:[#allocation65_spill]] }
 0x2d1   : > { %v2319_v0 = vadd.f32 %v2317_v26, %v2287_v47  ;;  %v2331_v5 = vmul.f32 %v8316_v6, %v2327_v10  ;;  %v2334_v1 = vadd.f32 %v2332_v41, %v2302_v18  ;;  %v8317_v30 = vstv %s8311_s2  ;;  %v2388_v47 = vpop.permute.xlu1 %2387  ;;  %s8333_s2 = sld [smem:[#allocation66_spill]] }
 0x2d2   : > { %v2320_v55 = vadd.f32 %v2318_v7, %v2288_v35  ;;  %v2337_v54 = vmul.f32 %v8317_v30, %v2327_v10  ;;  %v8318_v3 = vmov %v8317_v30  ;;  %v8319_v28 = vstv %s8314_s7  ;;  %s8336_s7 = sld [smem:[#allocation67_spill]] }
 0x2d3   : > { %v2338_v56 = vmul.f32 %v8318_v3, %v2325_v50  ;;  %v2343_v20 = vmul.f32 %v8319_v28, %v2327_v10  ;;  %v8321_v14 = vmov %v8319_v28  ;;  %v8323_v4 = vstv %s8315_s18  ;;  %s8338_s18 = sld [smem:[#allocation68_spill]] }
 0x2d4   : > { %v2344_v27 = vmul.f32 %v8321_v14, %v2325_v50  ;;  %v2349_v57 = vmul.f32 %v8323_v4, %v2327_v10  ;;  %v8325_v32 = vmov %v8323_v4  ;;  %v2333_v35 = vadd.f32 %v2331_v5, %v2301_v31 }
 0x2d5   : > { %v2350_v17 = vmul.f32 %v8325_v32, %v2325_v50  ;;  %v2339_v41 = vadd.f32 %v2337_v54, %v2307_v8  ;;  %v2340_v38 = vadd.f32 %v2338_v56, %v2308_v39  ;;  %v2357_v3 = vsel %vm578_vm5, %v2354_v62, %v2356_v63 }
 0x2d6   : > { %v2345_v48 = vadd.f32 %v2343_v20, %v2313_v9  ;;  %v2346_v33 = vadd.f32 %v2344_v27, %v2314_v13  ;;  %v2351_v12 = vadd.f32 %v2349_v57, %v2319_v0  ;;  %v2358_v10 = vsel %vm578_vm5, %v2356_v63, %v2354_v62  ;;  %v2418_v62 = vpop.permute.xlu0 %2417  ;;  %v2420_v63 = vpop.permute.xlu1 %2419 }
 0x2d7   : > { %v2352_v14 = vadd.f32 %v2350_v17, %v2320_v55  ;;  %v8327_v50 = vstv %s8320_s0  ;;  %v8328_v59 = vstv %s8322_s1  ;;  %v8329_v26 = vstv %s8324_s29  ;;  %s8342_s0 = sld [smem:[#allocation69_spill]] }
 0x2d8   : > { %v2364_v2 = vmul.f32 %v8327_v50, %v2357_v3  ;;  %v2370_v5 = vmul.f32 %v8328_v59, %v2357_v3  ;;  %v2376_v7 = vmul.f32 %v8329_v26, %v2357_v3  ;;  %v2359_v31 = vsel %vm224_vm0, %v2358_v10, 0.0  ;;  %s8346_s1 = sld [smem:[#allocation70_spill]] }
 0x2d9   : > { %v8330_v18 = vstv %s8326_s5  ;;  %v2389_v8 = vsel %vm578_vm5, %v2386_v36, %v2388_v47  ;;  %v2390_v39 = vsel %vm578_vm5, %v2388_v47, %v2386_v36  ;;  %v8332_v9 = vmov %v8327_v50  ;;  %s8347_s29 = sld [smem:[#allocation51_spill]] }
 0x2da   : > { %v2382_v20 = vmul.f32 %v8330_v18, %v2357_v3  ;;  %v2363_v13 = vmul.f32 %v8332_v9, %v2359_v31  ;;  %v2366_v0 = vadd.f32 %v2364_v2, %v2334_v1  ;;  %v8334_v55 = vmov %v8328_v59  ;;  %s8349_s5 = sld [smem:[#allocation52_spill]] }
 0x2db   : > { %v2369_v6 = vmul.f32 %v8334_v55, %v2359_v31  ;;  %v2372_v30 = vadd.f32 %v2370_v5, %v2340_v38  ;;  %v8335_v54 = vmov %v8329_v26  ;;  %v2378_v28 = vadd.f32 %v2376_v7, %v2346_v33  ;;  %v2450_v33 = vpop.permute.xlu0 %2449  ;;  %v2452_v5 = vpop.permute.xlu1 %2451 }
 0x2dc   : > { %v2375_v56 = vmul.f32 %v8335_v54, %v2359_v31  ;;  %v8337_v27 = vmov %v8330_v18  ;;  %v2384_v57 = vadd.f32 %v2382_v20, %v2352_v14  ;;  %v2365_v32 = vadd.f32 %v2363_v13, %v2333_v35 }
 0x2dd   : > { %v2381_v4 = vmul.f32 %v8337_v27, %v2359_v31  ;;  %v2371_v17 = vadd.f32 %v2369_v6, %v2339_v41  ;;  %v2391_v36 = vsel %vm224_vm0, %v2390_v39, 0.0  ;;  %v8339_v1 = vstv %s8331_s25  ;;  %s8358_s25 = sld [smem:[#allocation53_spill]] }
 0x2de   : > { %v2396_v47 = vmul.f32 %v8339_v1, %v2389_v8  ;;  %v2377_v3 = vadd.f32 %v2375_v56, %v2345_v48  ;;  %v8340_v10 = vmov %v8339_v1  ;;  %v8341_v2 = vstv %s8333_s2  ;;  %s8359_s2 = sld [smem:[#allocation54_spill]] }
 0x2df   : > { %v2383_v38 = vadd.f32 %v2381_v4, %v2351_v12  ;;  %v2395_v50 = vmul.f32 %v8340_v10, %v2391_v36  ;;  %v2401_v59 = vmul.f32 %v8341_v2, %v2391_v36  ;;  %v8343_v14 = vmov %v8341_v2  ;;  %v2484_v1 = vpop.permute.xlu1 %2483 }
 0x2e0   : > { %v2398_v26 = vadd.f32 %v2396_v47, %v2366_v0  ;;  %v2402_v35 = vmul.f32 %v8343_v14, %v2389_v8  ;;  %v8344_v7 = vstv %s8336_s7  ;;  %v8348_v48 = vstv %s8338_s18  ;;  %s8361_s7 = sld [smem:[#allocation55_spill]] }
 0x2e1   : > { %v2407_v41 = vmul.f32 %v8344_v7, %v2391_v36  ;;  %v8345_v31 = vmov %v8344_v7  ;;  %v2397_v20 = vadd.f32 %v2395_v50, %v2365_v32  ;;  %v2403_v39 = vadd.f32 %v2401_v59, %v2371_v17  ;;  %s8362_s18 = sld [smem:[#allocation57_spill]] }
 0x2e2   : > { %v2408_v18 = vmul.f32 %v8345_v31, %v2389_v8  ;;  %v2413_v12 = vmul.f32 %v8348_v48, %v2391_v36  ;;  %v8350_v9 = vmov %v8348_v48  ;;  %v2404_v55 = vadd.f32 %v2402_v35, %v2372_v30  ;;  %v2482_v36 = vpop.permute.xlu0 %2481 }
 0x2e3   : > { %v2414_v13 = vmul.f32 %v8350_v9, %v2389_v8  ;;  %v2409_v6 = vadd.f32 %v2407_v41, %v2377_v3  ;;  %v2421_v54 = vsel %vm578_vm5, %v2418_v62, %v2420_v63  ;;  %v2422_v4 = vsel %vm578_vm5, %v2420_v63, %v2418_v62 }
 0x2e4   : > { %v2410_v0 = vadd.f32 %v2408_v18, %v2378_v28  ;;  %v2415_v56 = vadd.f32 %v2413_v12, %v2383_v38  ;;  %v8351_v32 = vstv %s8342_s0  ;;  %v2423_v8 = vsel %vm224_vm0, %v2422_v4, 0.0  ;;  %s8370_s0 = sld [smem:[#allocation61_spill]] }
 0x2e5   : > { %v2416_v27 = vadd.f32 %v2414_v13, %v2384_v57  ;;  %v2428_v17 = vmul.f32 %v8351_v32, %v2421_v54  ;;  %v8352_v30 = vstv %s8346_s1  ;;  %v8353_v3 = vstv %s8347_s29  ;;  %v2516_v13 = vpop.permute.xlu1 %2515  ;;  %s8371_s1 = sld [smem:[#allocation72_spill]] }
 0x2e6   : > { %v2434_v47 = vmul.f32 %v8352_v30, %v2421_v54  ;;  %v2440_v28 = vmul.f32 %v8353_v3, %v2421_v54  ;;  %v8354_v10 = vstv %s8349_s5  ;;  %v8355_v2 = vmov %v8351_v32  ;;  %v2514_v9 = vpop.permute.xlu0 %2513  ;;  %s8372_s29 = sld [smem:[#allocation73_spill]] }
 0x2e7   : > { %v2446_v50 = vmul.f32 %v8354_v10, %v2421_v54  ;;  %v2427_v38 = vmul.f32 %v8355_v2, %v2423_v8  ;;  %v2430_v59 = vadd.f32 %v2428_v17, %v2398_v26  ;;  %v8356_v57 = vmov %v8352_v30  ;;  %s8374_s5 = sld [smem:[#allocation74_spill]] }
 0x2e8   : > { %v2433_v14 = vmul.f32 %v8356_v57, %v2423_v8  ;;  %v8357_v35 = vmov %v8353_v3  ;;  %v2436_v63 = vadd.f32 %v2434_v47, %v2404_v55  ;;  %v2442_v7 = vadd.f32 %v2440_v28, %v2410_v0 }
 0x2e9   : > { %v2439_v62 = vmul.f32 %v8357_v35, %v2423_v8  ;;  %v8360_v41 = vmov %v8354_v10  ;;  %v2448_v31 = vadd.f32 %v2446_v50, %v2416_v27  ;;  %v2429_v18 = vadd.f32 %v2427_v38, %v2397_v20 }
 0x2ea   : > { %v2445_v60 = vmul.f32 %v8360_v41, %v2423_v8  ;;  %v2435_v48 = vadd.f32 %v2433_v14, %v2403_v39  ;;  %v2453_v26 = vsel %vm711_vm6, %v2450_v33, %v2452_v5  ;;  %v2454_v0 = vsel %vm711_vm6, %v2452_v5, %v2450_v33  ;;  %v2546_v35 = vpop.permute.xlu0 %2545 }
 0x2eb   : > { %v2441_v12 = vadd.f32 %v2439_v62, %v2409_v6  ;;  %v2456_v54 = vsel %vm253_vm8, %v2453_v26, 0.0  ;;  %v2485_v20 = vsel %vm711_vm6, %v2482_v36, %v2484_v1  ;;  %v2455_v39 = vsel %vm5221_vm9, %v2454_v0, 0.0  ;;  %v2548_v62 = vpop.permute.xlu1 %2547 }
 0x2ec   : > { %v2447_v55 = vadd.f32 %v2445_v60, %v2415_v56  ;;  %v8363_v6 = vstv %s8358_s25  ;;  %v8364_v4 = vstv %s8359_s2  ;;  %v8365_v17 = vstv %s8361_s7  ;;  %s8382_s25 = sld [smem:[#allocation75_spill]] }
 0x2ed   : > { %v2460_v27 = vmul.f32 %v8363_v6, %v2456_v54  ;;  %v2466_v32 = vmul.f32 %v8364_v4, %v2456_v54  ;;  %v2472_v8 = vmul.f32 %v8365_v17, %v2456_v54  ;;  %v8366_v30 = vmov %v8363_v6  ;;  %s8383_s2 = sld [smem:[#allocation76_spill]] }
 0x2ee   : > { %v2459_v56 = vmul.f32 %v8366_v30, %v2455_v39  ;;  %v8367_v47 = vmov %v8364_v4  ;;  %v8368_v33 = vmov %v8365_v17  ;;  %v8369_v28 = vstv %s8362_s18  ;;  %s8384_s7 = sld [smem:[#allocation77_spill]] }
 0x2ef   : > { %v2465_v3 = vmul.f32 %v8367_v47, %v2455_v39  ;;  %v2471_v5 = vmul.f32 %v8368_v33, %v2455_v39  ;;  %v2477_v10 = vmul.f32 %v8369_v28, %v2455_v39  ;;  %v2462_v50 = vadd.f32 %v2460_v27, %v2430_v59  ;;  %s8386_s18 = sld [smem:[#allocation79_spill]] }
 0x2f0   : > { %v2468_v2 = vadd.f32 %v2466_v32, %v2436_v63  ;;  %v2474_v38 = vadd.f32 %v2472_v8, %v2442_v7  ;;  %v8373_v57 = vmov %v8369_v28  ;;  %v2461_v41 = vadd.f32 %v2459_v56, %v2429_v18  ;;  %v2580_v28 = vpop.permute.xlu1 %2579 }
 0x2f1   : > { %v2478_v14 = vmul.f32 %v8373_v57, %v2456_v54  ;;  %v2467_v60 = vadd.f32 %v2465_v3, %v2435_v48  ;;  %v2473_v26 = vadd.f32 %v2471_v5, %v2441_v12  ;;  %v2479_v0 = vadd.f32 %v2477_v10, %v2447_v55  ;;  %v2578_v5 = vpop.permute.xlu0 %2577 }
 0x2f2   : > { %v2486_v59 = vsel %vm711_vm6, %v2484_v1, %v2482_v36  ;;  %v2488_v63 = vsel %vm253_vm8, %v2485_v20, 0.0  ;;  %v2517_v7 = vsel %vm711_vm6, %v2514_v9, %v2516_v13  ;;  %v8375_v6 = vstv %s8370_s0  ;;  %s8394_s0 = sld [smem:[#allocation80_spill]] }
 0x2f3   : > { %v2480_v39 = vadd.f32 %v2478_v14, %v2448_v31  ;;  %v2487_v54 = vsel %vm5221_vm9, %v2486_v59, 0.0  ;;  %v2492_v27 = vmul.f32 %v8375_v6, %v2488_v63  ;;  %v8376_v18 = vstv %s8371_s1  ;;  %s8395_s1 = sld [smem:[#allocation81_spill]] }
 0x2f4   : > { %v2498_v48 = vmul.f32 %v8376_v18, %v2488_v63  ;;  %v8377_v12 = vstv %s8372_s29  ;;  %v8378_v4 = vmov %v8375_v6  ;;  %v8379_v32 = vmov %v8376_v18  ;;  %s8396_s29 = sld [smem:[#allocation83_spill]] }
 0x2f5   : > { %v2504_v55 = vmul.f32 %v8377_v12, %v2488_v63  ;;  %v2491_v31 = vmul.f32 %v8378_v4, %v2487_v54  ;;  %v2497_v17 = vmul.f32 %v8379_v32, %v2487_v54  ;;  %v8380_v36 = vmov %v8377_v12 }
 0x2f6   : > { %v2503_v1 = vmul.f32 %v8380_v36, %v2487_v54  ;;  %v8381_v8 = vstv %s8374_s5  ;;  %v2494_v30 = vadd.f32 %v2492_v27, %v2462_v50  ;;  %v2500_v56 = vadd.f32 %v2498_v48, %v2468_v2  ;;  %s8398_s5 = sld [smem:[#allocation84_spill]] }
 0x2f7   : > { %v2509_v20 = vmul.f32 %v8381_v8, %v2487_v54  ;;  %v2506_v47 = vadd.f32 %v2504_v55, %v2474_v38  ;;  %v8385_v3 = vmov %v8381_v8  ;;  %v2493_v10 = vadd.f32 %v2491_v31, %v2461_v41 }
 0x2f8   : > { %v2510_v33 = vmul.f32 %v8385_v3, %v2488_v63  ;;  %v2499_v57 = vadd.f32 %v2497_v17, %v2467_v60  ;;  %v2505_v14 = vadd.f32 %v2503_v1, %v2473_v26  ;;  %v2518_v50 = vsel %vm711_vm6, %v2516_v13, %v2514_v9 }
 0x2f9   : > { %v2511_v59 = vadd.f32 %v2509_v20, %v2479_v0  ;;  %v2520_v2 = vsel %vm253_vm8, %v2517_v7, 0.0  ;;  %v2549_v38 = vsel %vm711_vm6, %v2546_v35, %v2548_v62  ;;  %v2519_v63 = vsel %vm5221_vm9, %v2518_v50, 0.0  ;;  %v2612_v50 = vpop.permute.xlu1 %2611 }
 0x2fa   : > { %v2512_v54 = vadd.f32 %v2510_v33, %v2480_v39  ;;  %v8387_v6 = vstv %s8382_s25  ;;  %v8388_v41 = vstv %s8383_s2  ;;  %v8389_v26 = vstv %s8384_s7  ;;  %v2610_v33 = vpop.permute.xlu0 %2609  ;;  %s8406_s25 = sld [smem:[#allocation86_spill]] }
 0x2fb   : > { %v2524_v27 = vmul.f32 %v8387_v6, %v2520_v2  ;;  %v2530_v60 = vmul.f32 %v8388_v41, %v2520_v2  ;;  %v2536_v0 = vmul.f32 %v8389_v26, %v2520_v2  ;;  %v8390_v18 = vmov %v8387_v6  ;;  %s8407_s2 = sld [smem:[#allocation88_spill]] }
 0x2fc   : > { %v2523_v39 = vmul.f32 %v8390_v18, %v2519_v63  ;;  %v8391_v48 = vmov %v8388_v41  ;;  %v8392_v9 = vmov %v8389_v26  ;;  %v8393_v55 = vstv %s8386_s18  ;;  %s8408_s7 = sld [smem:[#allocation92_spill]] }
 0x2fd   : > { %v2529_v12 = vmul.f32 %v8391_v48, %v2519_v63  ;;  %v2535_v13 = vmul.f32 %v8392_v9, %v2519_v63  ;;  %v2541_v7 = vmul.f32 %v8393_v55, %v2519_v63  ;;  %v2526_v4 = vadd.f32 %v2524_v27, %v2494_v30  ;;  %s8410_s18 = sld [smem:[#allocation103_spill]] }
 0x2fe   : > { %v2532_v31 = vadd.f32 %v2530_v60, %v2500_v56  ;;  %v2538_v32 = vadd.f32 %v2536_v0, %v2506_v47  ;;  %v8397_v17 = vmov %v8393_v55  ;;  %v2525_v1 = vadd.f32 %v2523_v39, %v2493_v10 }
 0x2ff   : > { %v2542_v36 = vmul.f32 %v8397_v17, %v2520_v2  ;;  %v2531_v8 = vadd.f32 %v2529_v12, %v2499_v57  ;;  %v2537_v20 = vadd.f32 %v2535_v13, %v2505_v14  ;;  %v2543_v3 = vadd.f32 %v2541_v7, %v2511_v59 }
 0x300   : > { %v2550_v30 = vsel %vm711_vm6, %v2548_v62, %v2546_v35  ;;  %v2552_v56 = vsel %vm253_vm8, %v2549_v38, 0.0  ;;  %v2581_v47 = vsel %vm844_vm10, %v2578_v5, %v2580_v28  ;;  %v8399_v57 = vstv %s8394_s0  ;;  %s8417_s0 = sld [smem:[#allocation104_spill]] }
 0x301   : > { %v2544_v63 = vadd.f32 %v2542_v36, %v2512_v54  ;;  %v2551_v10 = vsel %vm5221_vm9, %v2550_v30, 0.0  ;;  %v2556_v2 = vmul.f32 %v8399_v57, %v2552_v56  ;;  %v8400_v14 = vstv %s8395_s1  ;;  %v2644_v30 = vpop.permute.xlu1 %2643  ;;  %s8419_s1 = sld [smem:[#allocation105_spill]] }
 0x302   : > { %v2562_v59 = vmul.f32 %v8400_v14, %v2552_v56  ;;  %v8401_v6 = vstv %s8396_s29  ;;  %v8402_v41 = vmov %v8399_v57  ;;  %v8403_v60 = vmov %v8400_v14  ;;  %s8420_s29 = sld [smem:[#allocation106_spill]] }
 0x303   : > { %v2568_v27 = vmul.f32 %v8401_v6, %v2552_v56  ;;  %v2555_v54 = vmul.f32 %v8402_v41, %v2551_v10  ;;  %v2561_v26 = vmul.f32 %v8403_v60, %v2551_v10  ;;  %v8404_v35 = vmov %v8401_v6 }
 0x304   : > { %v2567_v62 = vmul.f32 %v8404_v35, %v2551_v10  ;;  %v8405_v0 = vstv %s8398_s5  ;;  %v2558_v18 = vadd.f32 %v2556_v2, %v2526_v4  ;;  %v2564_v39 = vadd.f32 %v2562_v59, %v2532_v31  ;;  %s8422_s5 = sld [smem:[#allocation107_spill]] }
 0x305   : > { %v2573_v38 = vmul.f32 %v8405_v0, %v2551_v10  ;;  %v2570_v15 = vadd.f32 %v2568_v27, %v2538_v32  ;;  %v8409_v48 = vmov %v8405_v0  ;;  %v2557_v9 = vadd.f32 %v2555_v54, %v2525_v1  ;;  %v2642_v32 = vpop.permute.xlu0 %2641 }
 0x306   : > { %v2574_v12 = vmul.f32 %v8409_v48, %v2552_v56  ;;  %v2563_v13 = vadd.f32 %v2561_v26, %v2531_v8  ;;  %v2569_v55 = vadd.f32 %v2567_v62, %v2537_v20  ;;  %v2582_v36 = vsel %vm844_vm10, %v2580_v28, %v2578_v5 }
 0x307   : > { %v2575_v7 = vadd.f32 %v2573_v38, %v2543_v3  ;;  %v2584_v4 = vsel %vm233_vm3, %v2581_v47, 0.0  ;;  %v2613_v31 = vsel %vm844_vm10, %v2610_v33, %v2612_v50  ;;  %v2583_v1 = vsel %vm232_vm1, %v2582_v36, 0.0 }
 0x308   : > { %v2576_v17 = vadd.f32 %v2574_v12, %v2544_v63  ;;  %v8411_v8 = vstv %s8406_s25  ;;  %v8412_v20 = vstv %s8407_s2  ;;  %v8413_v63 = vstv %s8408_s7  ;;  %s8429_s25 = sld [smem:[#allocation108_spill]] }
 0x309   : > { %v2588_v56 = vmul.f32 %v8411_v8, %v2584_v4  ;;  %v2594_v3 = vmul.f32 %v8412_v20, %v2584_v4  ;;  %v2600_v10 = vmul.f32 %v8413_v63, %v2584_v4  ;;  %v8414_v57 = vmov %v8411_v8  ;;  %s8431_s2 = sld [smem:[#allocation109_spill]] }
 0x30a   : > { %v2587_v5 = vmul.f32 %v8414_v57, %v2583_v1  ;;  %v8415_v28 = vmov %v8412_v20  ;;  %v8416_v14 = vmov %v8413_v63  ;;  %v8418_v59 = vstv %s8410_s18  ;;  %s8432_s7 = sld [smem:[#allocation110_spill]] }
 0x30b   : > { %v2593_v2 = vmul.f32 %v8415_v28, %v2583_v1  ;;  %v2599_v47 = vmul.f32 %v8416_v14, %v2583_v1  ;;  %v2605_v6 = vmul.f32 %v8418_v59, %v2583_v1  ;;  %v2590_v27 = vadd.f32 %v2588_v56, %v2558_v18  ;;  %v2676_v1 = vpop.permute.xlu1 %2675  ;;  %s8434_s18 = sld [smem:[#allocation111_spill]] }
 0x30c   : > { %v2596_v41 = vadd.f32 %v2594_v3, %v2564_v39  ;;  %v2602_v54 = vadd.f32 %v2600_v10, %v2570_v15  ;;  %v8421_v60 = vmov %v8418_v59  ;;  %v2589_v35 = vadd.f32 %v2587_v5, %v2557_v9 }
 0x30d   : > { %v2606_v26 = vmul.f32 %v8421_v60, %v2584_v4  ;;  %v2595_v62 = vadd.f32 %v2593_v2, %v2563_v13  ;;  %v2601_v0 = vadd.f32 %v2599_v47, %v2569_v55  ;;  %v2607_v38 = vadd.f32 %v2605_v6, %v2575_v7 }
 0x30e   : > { %v2614_v12 = vsel %vm844_vm10, %v2612_v50, %v2610_v33  ;;  %v2616_v18 = vsel %vm233_vm3, %v2613_v31, 0.0  ;;  %v2645_v39 = vsel %vm844_vm10, %v2642_v32, %v2644_v30  ;;  %v8423_v9 = vstv %s8417_s0  ;;  %s8442_s0 = sld [smem:[#allocation112_spill]] }
 0x30f   : > { %v2608_v48 = vadd.f32 %v2606_v26, %v2576_v17  ;;  %v2615_v15 = vsel %vm232_vm1, %v2614_v12, 0.0  ;;  %v2620_v36 = vmul.f32 %v8423_v9, %v2616_v18  ;;  %v8424_v13 = vstv %s8419_s1  ;;  %v2674_v17 = vpop.permute.xlu0 %2673  ;;  %s8443_s1 = sld [smem:[#allocation113_spill]] }
 0x310   : > { %v2626_v4 = vmul.f32 %v8424_v13, %v2616_v18  ;;  %v8425_v55 = vstv %s8420_s29  ;;  %v8426_v8 = vmov %v8423_v9  ;;  %v8427_v50 = vmov %v8424_v13  ;;  %s8444_s29 = sld [smem:[#allocation114_spill]] }
 0x311   : > { %v2632_v7 = vmul.f32 %v8425_v55, %v2616_v18  ;;  %v2619_v33 = vmul.f32 %v8426_v8, %v2615_v15  ;;  %v2625_v56 = vmul.f32 %v8427_v50, %v2615_v15  ;;  %v8428_v20 = vmov %v8425_v55  ;;  %v6845_v55 = vpop.permute.xlu1 %2803 }
 0x312   : > { %v2631_v31 = vmul.f32 %v8428_v20, %v2615_v15  ;;  %v8430_v3 = vstv %s8422_s5  ;;  %v2622_v10 = vadd.f32 %v2620_v36, %v2590_v27  ;;  %v2628_v57 = vadd.f32 %v2626_v4, %v2596_v41  ;;  %s8446_s5 = sld [smem:[#allocation115_spill]] }
 0x313   : > { %v2637_v63 = vmul.f32 %v8430_v3, %v2615_v15  ;;  %v2634_v5 = vadd.f32 %v2632_v7, %v2602_v54  ;;  %v8433_v28 = vmov %v8430_v3  ;;  %v2621_v14 = vadd.f32 %v2619_v33, %v2589_v35  ;;  %v6843_v4 = vpop.permute.xlu0 %2801 }
 0x314   : > { %v2638_v2 = vmul.f32 %v8433_v28, %v2616_v18  ;;  %v2627_v47 = vadd.f32 %v2625_v56, %v2595_v62  ;;  %v2633_v59 = vadd.f32 %v2631_v31, %v2601_v0  ;;  %v2646_v26 = vsel %vm844_vm10, %v2644_v30, %v2642_v32 }
 0x315   : > { %v2639_v6 = vadd.f32 %v2637_v63, %v2607_v38  ;;  %v2648_v27 = vsel %vm233_vm3, %v2645_v39, 0.0  ;;  %v2677_v41 = vsel %vm844_vm10, %v2674_v17, %v2676_v1  ;;  %v2647_v54 = vsel %vm232_vm1, %v2646_v26, 0.0 }
 0x316   : > { %v2640_v60 = vadd.f32 %v2638_v2, %v2608_v48  ;;  %v8435_v12 = vstv %s8429_s25  ;;  %v8436_v35 = vstv %s8431_s2  ;;  %v8437_v0 = vstv %s8432_s7  ;;  %s6857_s25 = sld [smem:[#allocation8 + $0x74]] }
 0x317   : > { %v2652_v18 = vmul.f32 %v8435_v12, %v2648_v27  ;;  %v2658_v62 = vmul.f32 %v8436_v35, %v2648_v27  ;;  %v2664_v38 = vmul.f32 %v8437_v0, %v2648_v27  ;;  %v8438_v48 = vmov %v8435_v12  ;;  %s6867_s2 = sld [smem:[#allocation8 + $0x75]] }
 0x318   : > { %v2651_v15 = vmul.f32 %v8438_v48, %v2647_v54  ;;  %v8439_v9 = vmov %v8436_v35  ;;  %v8440_v30 = vmov %v8437_v0  ;;  %v8441_v13 = vstv %s8434_s18  ;;  %s6877_s7 = sld [smem:[#allocation8 + $0x76]] }
 0x319   : > { %v2657_v32 = vmul.f32 %v8439_v9, %v2647_v54  ;;  %v2663_v36 = vmul.f32 %v8440_v30, %v2647_v54  ;;  %v2669_v39 = vmul.f32 %v8441_v13, %v2647_v54  ;;  %v2654_v7 = vadd.f32 %v2652_v18, %v2622_v10  ;;  %v6883_v9 = vpop.permute.xlu1 %2835  ;;  %s6885_s18 = sld [smem:[#allocation8 + $0x77]] }
 0x31a   : > { %v2660_v8 = vadd.f32 %v2658_v62, %v2628_v57  ;;  %v2666_v33 = vadd.f32 %v2664_v38, %v2634_v5  ;;  %v8445_v50 = vmov %v8441_v13  ;;  %v2653_v20 = vadd.f32 %v2651_v15, %v2621_v14  ;;  %v6881_v15 = vpop.permute.xlu0 %2833 }
 0x31b   : > { %v2670_v56 = vmul.f32 %v8445_v50, %v2648_v27  ;;  %v2659_v31 = vadd.f32 %v2657_v32, %v2627_v47  ;;  %v2665_v3 = vadd.f32 %v2663_v36, %v2633_v59  ;;  %v2671_v63 = vadd.f32 %v2669_v39, %v2639_v6 }
 0x31c   : > { %v2678_v2 = vsel %vm844_vm10, %v2676_v1, %v2674_v17  ;;  %v2680_v10 = vsel %vm233_vm3, %v2677_v41, 0.0  ;;  %v2805_v57 = vsel %vm1665_vm11, %v6843_v4, %v6845_v55  ;;  %v8447_v14 = vstv %s8442_s0  ;;  %s6887_s0 = sld [smem:[#allocation8 + $0x78]] }
 0x31d   : > { %v2672_v28 = vadd.f32 %v2670_v56, %v2640_v60  ;;  %v2679_v5 = vsel %vm232_vm1, %v2678_v2, 0.0  ;;  %v2684_v47 = vmul.f32 %v8447_v14, %v2680_v10  ;;  %v8448_v59 = vstv %s8443_s1  ;;  %s8460_s1 = sld [smem:[#allocation116_spill]] }
 0x31e   : > { %v2690_v6 = vmul.f32 %v8448_v59, %v2680_v10  ;;  %v8449_v60 = vstv %s8444_s29  ;;  %v8450_v25 = vmov %v8447_v14  ;;  %v8451_v26 = vmov %v8448_v59  ;;  %s8470_s29 = sld [smem:[#allocation118_spill]] }
 0x31f   : > { %v2696_v17 = vmul.f32 %v8449_v60, %v2680_v10  ;;  %v2683_v1 = vmul.f32 %v8450_v25, %v2679_v5  ;;  %v2689_v27 = vmul.f32 %v8451_v26, %v2679_v5  ;;  %v8452_v41 = vmov %v8449_v60  ;;  %v8464_v26 = vld [vmem:[#allocation96_spill] sm:$0xff] }
 0x320   : > { %v2695_v54 = vmul.f32 %v8452_v41, %v2679_v5  ;;  %v8453_v12 = vstv %s8446_s5  ;;  %v2686_v35 = vadd.f32 %v2684_v47, %v2654_v7  ;;  %v2692_v62 = vadd.f32 %v2690_v6, %v2660_v8  ;;  %v8465_v41 = vld [vmem:[#allocation95_spill] sm:$0xff]  ;;  %s8476_s5 = sld [smem:[#allocation119_spill]] }
 0x321   : > { %v2701_v18 = vmul.f32 %v8453_v12, %v2679_v5  ;;  %v2698_v0 = vadd.f32 %v2696_v17, %v2666_v33  ;;  %v8454_v38 = vmov %v8453_v12  ;;  %v2685_v32 = vadd.f32 %v2683_v1, %v2653_v20  ;;  %v8458_v5 = vld [vmem:[#allocation87_spill] sm:$0xff]  ;;  %v8463_v17 = vld [vmem:[#allocation94_spill] sm:$0xff] }
 0x322   : > { %v2702_v48 = vmul.f32 %v8454_v38, %v2680_v10  ;;  %v2691_v30 = vadd.f32 %v2689_v27, %v2659_v31  ;;  %v2697_v36 = vadd.f32 %v2695_v54, %v2665_v3  ;;  %8455 = sst [smem:[#allocation25_spill]] %s6887_s0  ;;  %v2710_v50 = vadd.f32 %v6257_v22, %v2686_v35  ;;  %v8457_v10 = vld [vmem:[#allocation82_spill] sm:$0xff]  ;;  %v8468_v38 = vld [vmem:[#allocation98_spill] sm:$0xff] }
 0x323   : > { %v2703_v13 = vadd.f32 %v2701_v18, %v2671_v63  ;;  %v2716_v7 = vadd.f32 %v6260_v44, %v2692_v62  ;;  %v2722_v8 = vadd.f32 %v6271_v51, %v2698_v0  ;;  %v2709_v33 = vadd.f32 %v6198_v45, %v2685_v32  ;;  %v2866_v51 = vpop.permute.xlu0 %2865  ;;  %v8467_v62 = vld [vmem:[#allocation100_spill] sm:$0xff]  ;;  %v8469_v32 = vld [vmem:[#allocation97_spill] sm:$0xff] }
 0x324   : > { %v2704_v39 = vadd.f32 %v2702_v48, %v2672_v28  ;;  %v2715_v56 = vadd.f32 %v6201_v53, %v2691_v30  ;;  %v2721_v2 = vadd.f32 %v6204_v23, %v2697_v36  ;;  %v2734_v3 = vadd.f32 %v6225_v40, %v2710_v50 }
 0x325   : > { %v2727_v20 = vadd.f32 %v6211_v19, %v2703_v13  ;;  %v2740_v63 = vadd.f32 %v6231_v21, %v2716_v7  ;;  %v2746_v22 = vadd.f32 %v6240_v29, %v2722_v8  ;;  %v2733_v44 = vadd.f32 %v6214_v49, %v2709_v33  ;;  %v8456_v49 = vld [vmem:[#allocation89_spill] sm:$0xff] }
 0x326   : > { %v2728_v31 = vadd.f32 %v6274_v16, %v2704_v39  ;;  %v2739_v45 = vadd.f32 %v6228_v37, %v2715_v56  ;;  %v2745_v53 = vadd.f32 %v6237_v34, %v2721_v2  ;;  %v2758_v40 = vadd.f32 %v6282_v11, %v2734_v3  ;;  %v2868_v16 = vpop.permute.xlu1 %2867  ;;  %v8459_v34 = vld [vmem:[#allocation91_spill] sm:$0xff]  ;;  %v8474_v56 = vld [vmem:[#allocation99_spill] sm:$0xff] }
 0x327   : > { %v2751_v23 = vadd.f32 %v6247_v58, %v2727_v20  ;;  %v2764_v21 = vadd.f32 %v6288_v61, %v2740_v63  ;;  %v2770_v29 = vadd.f32 %v6299_v52, %v2746_v22  ;;  %v2757_v28 = vadd.f32 %v8456_v49, %v2733_v44  ;;  %v8461_v61 = vld [vmem:[#allocation93_spill] sm:$0xff]  ;;  %v8462_v52 = vld [vmem:[#allocation90_spill] sm:$0xff] }
 0x328   : > { %v2752_v19 = vadd.f32 %v6250_v42, %v2728_v31  ;;  %v2763_v37 = vadd.f32 %v8457_v10, %v2739_v45  ;;  %v2769_v14 = vadd.f32 %v8458_v5, %v2745_v53  ;;  %v3098_v58 = vstv %s6857_s25  ;;  %s7217_s25 = sld [smem:[#allocation8 + $0x86]] }
 0x329   : > { %v2775_v47 = vadd.f32 %v8459_v34, %v2751_v23  ;;  %v3104_v42 = vstv %s6867_s2  ;;  %v3110_v11 = vstv %s6877_s7  ;;  %v3116_v59 = vstv %s6885_s18  ;;  %s7219_s2 = sld [smem:[#allocation8 + $0x87]] }
 0x32a   : > { %v2781_v6 = vadd.f32 %v8461_v61, %v2757_v28  ;;  %v2776_v60 = vadd.f32 %v8462_v52, %v2752_v19  ;;  %v2782_v25 = vadd.f32 %v8463_v17, %v2758_v40  ;;  %v3130_v1 = vstv %s6887_s0  ;;  %v2900_v33 = vpop.permute.xlu1 %2899  ;;  %s8478_s0 = sld [smem:[#allocation120_spill]] }
 0x32b   : > { %v2787_v27 = vadd.f32 %v8464_v26, %v2763_v37  ;;  %v2793_v54 = vadd.f32 %v8465_v41, %v2769_v14  ;;  %v2806_v12 = vsel %vm1665_vm11, %v6845_v55, %v6843_v4  ;;  %v2807_v35 = vsel %vm252_vm7, %v2805_v57, 0.0  ;;  %v2898_v57 = vpop.permute.xlu0 %2897  ;;  %s7229_s7 = sld [smem:[#allocation8 + $0x88]] }
 0x32c   : > { %v2799_v0 = vadd.f32 %v8467_v62, %v2775_v47  ;;  %v2788_v48 = vadd.f32 %v8468_v38, %v2764_v21  ;;  %v2794_v30 = vadd.f32 %v8469_v32, %v2770_v29  ;;  %v2808_v36 = vsel %vm253_vm8, %v2806_v12, 0.0  ;;  %s7233_s18 = sld [smem:[#allocation8 + $0x89]] }
 0x32d   : > { %v8471_v13 = vstv %s6151_s17  ;;  %v8472_v50 = vstv %s8460_s1  ;;  %v8473_v8 = vstv %s8240_s4  ;;  %v2837_v55 = vsel %vm1665_vm11, %v6881_v15, %v6883_v9  ;;  %s8494_s4 = sld [smem:[#allocation124_spill]] }
 0x32e   : > { %v2811_v39 = vmul.f32 %v8471_v13, %v2807_v35  ;;  %v2817_v7 = vmul.f32 %v8472_v50, %v2807_v35  ;;  %v2823_v4 = vmul.f32 %v8473_v8, %v2807_v35  ;;  %v2800_v2 = vadd.f32 %v8474_v56, %v2776_v60  ;;  %v2932_v62 = vpop.permute.xlu1 %2931  ;;  %s8542_s17 = sld [smem:[#allocation117_spill]] }
 0x32f   : > { %v8475_v20 = vmov %v8471_v13  ;;  %v8477_v3 = vmov %v8472_v50  ;;  %v8479_v22 = vmov %v8473_v8  ;;  %v8480_v19 = vstv %s8470_s29  ;;  %s7239_s1 = sld [smem:[#allocation8 + $0x8b]] }
 0x330   : > { %v2812_v31 = vmul.f32 %v8475_v20, %v2808_v36  ;;  %v2818_v63 = vmul.f32 %v8477_v3, %v2808_v36  ;;  %v2824_v44 = vmul.f32 %v8479_v22, %v2808_v36  ;;  %v2813_v45 = vadd.f32 %v2811_v39, %v2781_v6  ;;  %s7251_s29 = sld [smem:[#allocation8 + $0x8c]] }
 0x331   : > { %v2819_v53 = vadd.f32 %v2817_v7, %v2787_v27  ;;  %v2825_v23 = vadd.f32 %v2823_v4, %v2793_v54  ;;  %v2829_v40 = vmul.f32 %v8480_v19, %v2807_v35  ;;  %v8481_v29 = vmov %v8480_v19  ;;  %v2930_v35 = vpop.permute.xlu0 %2929 }
 0x332   : > { %v2814_v21 = vadd.f32 %v2812_v31, %v2782_v25  ;;  %v2830_v49 = vmul.f32 %v8481_v29, %v2808_v36  ;;  %v2838_v28 = vsel %vm1665_vm11, %v6883_v9, %v6881_v15  ;;  %v2839_v10 = vsel %vm252_vm7, %v2837_v55, 0.0 }
 0x333   : > { %v2820_v37 = vadd.f32 %v2818_v63, %v2788_v48  ;;  %v2826_v5 = vadd.f32 %v2824_v44, %v2794_v30  ;;  %v2831_v14 = vadd.f32 %v2829_v40, %v2799_v0  ;;  %v2840_v34 = vsel %vm253_vm8, %v2838_v28, 0.0 }
 0x334   : > { %v8482_v47 = vstv %s8476_s5  ;;  %v8483_v6 = vstv %s8478_s0  ;;  %v8484_v60 = vstv %s8243_s3  ;;  %v2869_v15 = vsel %vm1665_vm11, %v2866_v51, %v2868_v16  ;;  %s7175_s3 = sld [smem:[#allocation8 + $0x7f]] }
 0x335   : > { %v2843_v61 = vmul.f32 %v8482_v47, %v2839_v10  ;;  %v2849_v52 = vmul.f32 %v8483_v6, %v2839_v10  ;;  %v2855_v17 = vmul.f32 %v8484_v60, %v2839_v10  ;;  %v2832_v9 = vadd.f32 %v2830_v49, %v2800_v2  ;;  %s7237_s0 = sld [smem:[#allocation8 + $0x8a]] }
 0x336   : > { %v8485_v25 = vmov %v8482_v47  ;;  %v8486_v27 = vmov %v8483_v6  ;;  %v8487_v54 = vmov %v8484_v60  ;;  %v8488_v32 = vstv %s8244_s21  ;;  %s7193_s21 = sld [smem:[#allocation8 + $0x81]] }
 0x337   : > { %v2844_v26 = vmul.f32 %v8485_v25, %v2840_v34  ;;  %v2850_v41 = vmul.f32 %v8486_v27, %v2840_v34  ;;  %v2856_v12 = vmul.f32 %v8487_v54, %v2840_v34  ;;  %v2845_v0 = vadd.f32 %v2843_v61, %v2813_v45  ;;  %s7253_s5 = sld [smem:[#allocation8 + $0x8d]] }
 0x338   : > { %v2851_v38 = vadd.f32 %v2849_v52, %v2819_v53  ;;  %v2857_v48 = vadd.f32 %v2855_v17, %v2825_v23  ;;  %v2861_v30 = vmul.f32 %v8488_v32, %v2839_v10  ;;  %v8489_v13 = vmov %v8488_v32 }
 0x339   : > { %v2846_v36 = vadd.f32 %v2844_v26, %v2814_v21  ;;  %v2862_v39 = vmul.f32 %v8489_v13, %v2840_v34  ;;  %v2870_v50 = vsel %vm1665_vm11, %v2868_v16, %v2866_v51  ;;  %v2871_v7 = vsel %vm252_vm7, %v2869_v15, 0.0 }
 0x33a   : > { %v2852_v8 = vadd.f32 %v2850_v41, %v2820_v37  ;;  %v2858_v4 = vadd.f32 %v2856_v12, %v2826_v5  ;;  %v2863_v55 = vadd.f32 %v2861_v30, %v2831_v14  ;;  %v2872_v56 = vsel %vm253_vm8, %v2870_v50, 0.0  ;;  %v2962_v37 = vpop.permute.xlu0 %2961  ;;  %v2964_v5 = vpop.permute.xlu1 %2963 }
 0x33b   : > { %v8490_v2 = vstv %s8245_s28  ;;  %v8491_v31 = vstv %s8247_s19  ;;  %v8492_v63 = vstv %s8248_s20  ;;  %v2901_v51 = vsel %vm1665_vm11, %v2898_v57, %v2900_v33  ;;  %s8517_s28 = sld [smem:[#allocation127_spill]] }
 0x33c   : > { %v2875_v20 = vmul.f32 %v8490_v2, %v2871_v7  ;;  %v2881_v3 = vmul.f32 %v8491_v31, %v2871_v7  ;;  %v2887_v22 = vmul.f32 %v8492_v63, %v2871_v7  ;;  %v2864_v16 = vadd.f32 %v2862_v39, %v2832_v9  ;;  %s8518_s20 = sld [smem:[#allocation128_spill]] }
 0x33d   : > { %v8493_v44 = vmov %v8490_v2  ;;  %v8495_v53 = vmov %v8491_v31  ;;  %v8496_v19 = vmov %v8492_v63  ;;  %v8497_v28 = vstv %s8250_s24  ;;  %s8504_s24 = sld [smem:[#allocation31_spill]] }
 0x33e   : > { %v2876_v45 = vmul.f32 %v8493_v44, %v2872_v56  ;;  %v2882_v23 = vmul.f32 %v8495_v53, %v2872_v56  ;;  %v2888_v40 = vmul.f32 %v8496_v19, %v2872_v56  ;;  %v2877_v21 = vadd.f32 %v2875_v20, %v2845_v0  ;;  %v2994_v2 = vpop.permute.xlu0 %2993  ;;  %v2996_v20 = vpop.permute.xlu1 %2995  ;;  %s8531_s19 = sld [smem:[#allocation131_spill]] }
 0x33f   : > { %v2883_v29 = vadd.f32 %v2881_v3, %v2851_v38  ;;  %v2889_v49 = vadd.f32 %v2887_v22, %v2857_v48  ;;  %v2893_v10 = vmul.f32 %v8497_v28, %v2871_v7  ;;  %v8498_v34 = vmov %v8497_v28 }
 0x340   : > { %v2878_v14 = vadd.f32 %v2876_v45, %v2846_v36  ;;  %v2894_v47 = vmul.f32 %v8498_v34, %v2872_v56  ;;  %v2902_v61 = vsel %vm1665_vm11, %v2900_v33, %v2898_v57  ;;  %v2903_v6 = vsel %vm252_vm7, %v2901_v51, 0.0 }
 0x341   : > { %v2904_v52 = vsel %vm253_vm8, %v2902_v61, 0.0  ;;  %v8499_v60 = vstv %s8252_s22  ;;  %v8500_v15 = vstv %s8494_s4  ;;  %v8501_v25 = vstv %s8255_s10  ;;  %s8515_s22 = sld [smem:[#allocation126_spill]] }
 0x342   : > { %v2907_v17 = vmul.f32 %v8499_v60, %v2903_v6  ;;  %v2913_v9 = vmul.f32 %v8500_v15, %v2903_v6  ;;  %v2919_v26 = vmul.f32 %v8501_v25, %v2903_v6  ;;  %v2884_v27 = vadd.f32 %v2882_v23, %v2852_v8  ;;  %s7209_s10 = sld [smem:[#allocation8 + $0x84]] }
 0x343   : > { %v2890_v41 = vadd.f32 %v2888_v40, %v2858_v4  ;;  %v8502_v54 = vmov %v8499_v60  ;;  %vm8503_vm0 = vcmp.lt.s32.totalorder %v4508_v46, 113  ;;  %v2895_v33 = vadd.f32 %v2893_v10, %v2863_v55  ;;  %s7257_s4 = sld [smem:[#allocation8 + $0x8e]] }
 0x344   : > { %v2908_v12 = vmul.f32 %v8502_v54, %v2904_v52  ;;  %v2933_v57 = vsel %vm8503_vm0, %v2930_v35, %v2932_v62  ;;  %v2896_v0 = vadd.f32 %v2894_v47, %v2864_v16  ;;  %v8505_v43 = vmov %v8500_v15  ;;  %vm8509_vm2 = vmmov %vm8503_vm0 }
 0x345   : > { %v2914_v38 = vmul.f32 %v8505_v43, %v2904_v52  ;;  %v8506_v48 = vmov %v8501_v25  ;;  %v2909_v30 = vadd.f32 %v2907_v17, %v2877_v21  ;;  %v2915_v36 = vadd.f32 %v2913_v9, %v2883_v29  ;;  %vm8516_vm3 = vmmov %vm8503_vm0 }
 0x346   : > { %v2920_v32 = vmul.f32 %v8506_v48, %v2904_v52  ;;  %v8507_v13 = vstv %s8256_s11  ;;  %v2910_v8 = vadd.f32 %v2908_v12, %v2878_v14  ;;  %v2921_v4 = vadd.f32 %v2919_v26, %v2889_v49  ;;  %vm8523_vm4 = vmmov %vm8503_vm0  ;;  %s7168_s11 = sld [smem:[#allocation8 + $0x7e]] }
 0x347   : > { %v2925_v39 = vmul.f32 %v8507_v13, %v2903_v6  ;;  %v8508_v50 = vmov %v8507_v13  ;;  %v2934_v55 = vsel %vm8509_vm2, %v2932_v62, %v2930_v35  ;;  %v2935_v56 = vsel %vm232_vm1, %v2933_v57, 0.0  ;;  %vm8530_vm5 = vmmov %vm8503_vm0 }
 0x348   : > { %v2926_v7 = vmul.f32 %v8508_v50, %v2904_v52  ;;  %v2936_v3 = vsel %vm5607_vm14, %v2934_v55, 0.0  ;;  %v8511_v63 = vstv %s8504_s24  ;;  %v8512_v51 = vstv %s8258_s6  ;;  %s8529_s6 = sld [smem:[#allocation130_spill]]  ;;  %vm8536_vm6 = vmmov %vm8503_vm0 }
 0x349   : > { %v2939_v22 = vmul.f32 %v8511_v63, %v2935_v56  ;;  %v2945_v16 = vmul.f32 %v8512_v51, %v2935_v56  ;;  %v8513_v44 = vstv %s8259_s8  ;;  %v2916_v53 = vadd.f32 %v2914_v38, %v2884_v27  ;;  %s8525_s8 = sld [smem:[#allocation129_spill]]  ;;  %vm8541_vm8 = vmmov %vm8503_vm0 }
 0x34a   : > { %v2951_v45 = vmul.f32 %v8513_v44, %v2935_v56  ;;  %v2922_v23 = vadd.f32 %v2920_v32, %v2890_v41  ;;  %v8514_v19 = vmov %v8511_v63  ;;  %v2965_v62 = vsel %vm8516_vm3, %v2962_v37, %v2964_v5  ;;  %vm8547_vm9 = vmmov %vm8503_vm0  ;;  %s7259_s24 = sld [smem:[#allocation8 + $0x8f]] }
 0x34b   : > { %v2940_v35 = vmul.f32 %v8514_v19, %v2936_v3  ;;  %v2927_v40 = vadd.f32 %v2925_v39, %v2895_v33  ;;  %v2928_v21 = vadd.f32 %v2926_v7, %v2896_v0  ;;  %v8519_v29 = vmov %v8512_v51  ;;  %v3026_v33 = vpop.permute.xlu0 %3025  ;;  %v3028_v0 = vpop.permute.xlu1 %3027 }
 0x34c   : > { %v2946_v49 = vmul.f32 %v8519_v29, %v2936_v3  ;;  %v8520_v28 = vmov %v8513_v44  ;;  %v2941_v14 = vadd.f32 %v2939_v22, %v2909_v30  ;;  %v2947_v34 = vadd.f32 %v2945_v16, %v2915_v36 }
 0x34d   : > { %v2952_v10 = vmul.f32 %v8520_v28, %v2936_v3  ;;  %v8521_v47 = vstv %s6321_s13  ;;  %v2942_v60 = vadd.f32 %v2940_v35, %v2910_v8  ;;  %v2953_v17 = vadd.f32 %v2951_v45, %v2921_v4  ;;  %s7198_s13 = sld [smem:[#allocation8 + $0x82]] }
 0x34e   : > { %v2957_v61 = vmul.f32 %v8521_v47, %v2935_v56  ;;  %v8522_v6 = vmov %v8521_v47  ;;  %v2966_v15 = vsel %vm8523_vm4, %v2964_v5, %v2962_v37  ;;  %v2967_v9 = vsel %vm232_vm1, %v2965_v62, 0.0 }
 0x34f   : > { %v2958_v52 = vmul.f32 %v8522_v6, %v2936_v3  ;;  %v2968_v25 = vsel %vm5607_vm14, %v2966_v15, 0.0  ;;  %v8524_v26 = vstv %s8515_s22  ;;  %v8526_v41 = vstv %s8517_s28  ;;  %v3060_v28 = vpop.permute.xlu1 %3059  ;;  %s8575_s22 = sld [smem:[#allocation18_spill]] }
 0x350   : > { %v2971_v27 = vmul.f32 %v8524_v26, %v2967_v9  ;;  %v2977_v54 = vmul.f32 %v8526_v41, %v2967_v9  ;;  %v8527_v12 = vstv %s8518_s20  ;;  %v2948_v43 = vadd.f32 %v2946_v49, %v2916_v53  ;;  %s8576_s28 = sld [smem:[#allocation23_spill]] }
 0x351   : > { %v2983_v57 = vmul.f32 %v8527_v12, %v2967_v9  ;;  %v2954_v38 = vadd.f32 %v2952_v10, %v2922_v23  ;;  %v8528_v48 = vmov %v8524_v26  ;;  %v2997_v5 = vsel %vm8530_vm5, %v2994_v2, %v2996_v20 }
 0x352   : > { %v2972_v37 = vmul.f32 %v8528_v48, %v2968_v25  ;;  %v2959_v32 = vadd.f32 %v2957_v61, %v2927_v40  ;;  %v2960_v30 = vadd.f32 %v2958_v52, %v2928_v21  ;;  %v8532_v36 = vmov %v8526_v41 }
 0x353   : > { %v2978_v13 = vmul.f32 %v8532_v36, %v2968_v25  ;;  %v8533_v39 = vmov %v8527_v12  ;;  %v2973_v7 = vadd.f32 %v2971_v27, %v2941_v14  ;;  %v2979_v8 = vadd.f32 %v2977_v54, %v2947_v34 }
 0x354   : > { %v2984_v50 = vmul.f32 %v8533_v39, %v2968_v25  ;;  %v8534_v4 = vstv %s8525_s8  ;;  %v2974_v63 = vadd.f32 %v2972_v37, %v2942_v60  ;;  %v2985_v22 = vadd.f32 %v2983_v57, %v2953_v17 }
 0x355   : > { %v2989_v55 = vmul.f32 %v8534_v4, %v2967_v9  ;;  %v8535_v56 = vmov %v8534_v4  ;;  %v2998_v51 = vsel %vm8536_vm6, %v2996_v20, %v2994_v2  ;;  %v2999_v16 = vsel %vm232_vm1, %v2997_v5, 0.0  ;;  %v3058_v20 = vpop.permute.xlu0 %3057  ;;  %v3092_v4 = vpop.permute.xlu1 %3091  ;;  %s3895_s20 = smul.u32 384, %s8575_s22 }
 0x356   : > { %v2990_v3 = vmul.f32 %v8535_v56, %v2968_v25  ;;  %v3000_v44 = vsel %vm5607_vm14, %v2998_v51, 0.0  ;;  %v8537_v45 = vstv %s8529_s6  ;;  %v8538_v23 = vstv %s8531_s19  ;;  %s8581_s8 = smul.u32 24, %s8576_s28 }
 0x357   : > { %v3003_v53 = vmul.f32 %v8537_v45, %v2999_v16  ;;  %v3009_v19 = vmul.f32 %v8538_v23, %v2999_v16  ;;  %v8539_v35 = vstv %s6371_s23  ;;  %v2980_v40 = vadd.f32 %v2978_v13, %v2948_v43  ;;  %s7138_s23 = sld [smem:[#allocation8 + $0x7a]] }
 0x358   : > { %v3015_v62 = vmul.f32 %v8539_v35, %v2999_v16  ;;  %v2986_v21 = vadd.f32 %v2984_v50, %v2954_v38  ;;  %v8540_v29 = vmov %v8537_v45  ;;  %v3029_v2 = vsel %vm8541_vm8, %v3026_v33, %v3028_v0  ;;  %s7295_s6 = scalar_lea.vmem [#allocation9], %s8581_s8 }
 0x359   : > { %v3004_v49 = vmul.f32 %v8540_v29, %v3000_v44  ;;  %v2991_v10 = vadd.f32 %v2989_v55, %v2959_v32  ;;  %v2992_v14 = vadd.f32 %v2990_v3, %v2960_v30  ;;  %v8543_v34 = vmov %v8538_v23  ;;  %s3471_s19 = sshll.u32 %s7295_s6, 4  ;;  %s7315_s19 = int_to_ptr.vmem [resolvable:$true] %s3471_s19 }
 0x35a   : > { %v3010_v47 = vmul.f32 %v8543_v34, %v3000_v44  ;;  %v8544_v61 = vmov %v8539_v35  ;;  %v3005_v52 = vadd.f32 %v3003_v53, %v2973_v7  ;;  %v3011_v60 = vadd.f32 %v3009_v19, %v2979_v8  ;;  %v3090_v8 = vpop.permute.xlu0 %3089 }
 0x35b   : > { %v3016_v6 = vmul.f32 %v8544_v61, %v3000_v44  ;;  %v8545_v17 = vstv %s6385_s26  ;;  %v3006_v26 = vadd.f32 %v3004_v49, %v2974_v63  ;;  %v3017_v27 = vadd.f32 %v3015_v62, %v2985_v22  ;;  %s7200_s26 = sld [smem:[#allocation8 + $0x83]] }
 0x35c   : > { %v3021_v15 = vmul.f32 %v8545_v17, %v2999_v16  ;;  %v8546_v9 = vmov %v8545_v17  ;;  %v3030_v41 = vsel %vm8547_vm9, %v3028_v0, %v3026_v33  ;;  %v3031_v54 = vsel %vm232_vm1, %v3029_v2, 0.0 }
 0x35d   : > { %v3022_v25 = vmul.f32 %v8546_v9, %v3000_v44  ;;  %v3032_v12 = vsel %vm5607_vm14, %v3030_v41, 0.0  ;;  %v8548_v57 = vstv %s6391_s16  ;;  %v8549_v38 = vstv %s8542_s17  ;;  %s7128_s16 = sld [smem:[#allocation8 + $0x79]] }
 0x35e   : > { %v3035_v43 = vmul.f32 %v8548_v57, %v3031_v54  ;;  %v3041_v48 = vmul.f32 %v8549_v38, %v3031_v54  ;;  %v8550_v37 = vstv %s8265_s12  ;;  %v3012_v32 = vadd.f32 %v3010_v47, %v2980_v40  ;;  %s7213_s12 = sld [smem:[#allocation8 + $0x85]] }
 0x35f   : > { %v3047_v5 = vmul.f32 %v8550_v37, %v3031_v54  ;;  %v3018_v30 = vadd.f32 %v3016_v6, %v2986_v21  ;;  %v8551_v36 = vmov %v8548_v57  ;;  %vm8552_vm10 = vcmp.lt.s32.totalorder %v4508_v46, 112 }
 0x360   : > { %v3036_v13 = vmul.f32 %v8551_v36, %v3032_v12  ;;  %v3061_v24 = vsel %vm8552_vm10, %v3058_v20, %v3060_v28  ;;  %v3023_v33 = vadd.f32 %v3021_v15, %v2991_v10  ;;  %v3024_v31 = vadd.f32 %v3022_v25, %v2992_v14  ;;  %vm8557_vm1 = vmmov %vm8552_vm10 }
 0x361   : > { %v8553_v0 = vmov %v8549_v38  ;;  %v8554_v50 = vstv %s6421_s9  ;;  %v3037_v55 = vadd.f32 %v3035_v43, %v3005_v52  ;;  %v3043_v56 = vadd.f32 %v3041_v48, %v3011_v60  ;;  %vm8562_vm11 = vmmov %vm8557_vm1  ;;  %s7144_s9 = sld [smem:[#allocation8 + $0x7b]] }
 0x362   : > { %v3042_v39 = vmul.f32 %v8553_v0, %v3032_v12  ;;  %v3053_v7 = vmul.f32 %v8554_v50, %v3031_v54  ;;  %v8555_v3 = vmov %v8550_v37  ;;  %v3049_v22 = vadd.f32 %v3047_v5, %v3017_v27  ;;  %vm8568_vm14 = vmmov %vm8557_vm1  ;;  %v3122_v5 = vpop.permute.xlu0 %3121 }
 0x363   : > { %v3048_v63 = vmul.f32 %v8555_v3, %v3032_v12  ;;  %v3038_v51 = vadd.f32 %v3036_v13, %v3006_v26  ;;  %v8556_v16 = vmov %v8554_v50  ;;  %v3062_v45 = vsel %vm8557_vm1, %v3060_v28, %v3058_v20  ;;  %vm8570_vm0 = vmmov %vm8557_vm1 }
 0x364   : > { %v3054_v44 = vmul.f32 %v8556_v16, %v3032_v12  ;;  %v8558_v53 = vstv %s6427_s15  ;;  %v3064_v35 = vsel %vm273_vm13, %v3062_v45, 0.0  ;;  %v8560_v62 = vstv %s6433_s27  ;;  %s7160_s27 = sld [smem:[#allocation8 + $0x7c]]  ;;  %vm8571_vm2 = vmmov %vm8570_vm0 }
 0x365   : > { %v3067_v23 = vmul.f32 %v8558_v53, %v3061_v24  ;;  %v3073_v40 = vmul.f32 %v8560_v62, %v3061_v24  ;;  %v8561_v21 = vstv %s6463_s30  ;;  %v3093_v49 = vsel %vm8562_vm11, %v3090_v8, %v3092_v4  ;;  %s7166_s30 = sld [smem:[#allocation8 + $0x7d]]  ;;  %vm8572_vm3 = vmmov %vm8570_vm0 }
 0x366   : > { %v3079_v29 = vmul.f32 %v8561_v21, %v3061_v24  ;;  %v3044_v2 = vadd.f32 %v3042_v39, %v3012_v32  ;;  %v3055_v20 = vadd.f32 %v3053_v7, %v3023_v33  ;;  %v8563_v28 = vmov %v8558_v53  ;;  %v3124_v32 = vpop.permute.xlu1 %3123  ;;  %s7187_s15 = sld [smem:[#allocation8 + $0x80]]  ;;  %v3154_v45 = vpop.permute.xlu0 %3153  ;;  %vm8573_vm4 = vmmov %vm8570_vm0 }
 0x367   : > { %v3068_v10 = vmul.f32 %v8563_v28, %v3064_v35  ;;  %v8564_v14 = vstv %s6471_s14  ;;  %v3050_v47 = vadd.f32 %v3048_v63, %v3018_v30  ;;  %v8565_v61 = vmov %v8560_v62  ;;  %s4120_s14 = smov [#allocation9]  }
 0x368   : > { %v3085_v34 = vmul.f32 %v8564_v14, %v3061_v24  ;;  %v3074_v6 = vmul.f32 %v8565_v61, %v3064_v35  ;;  %v8566_v52 = vmov %v8561_v21  ;;  %v8567_v17 = vmov %v8564_v14 }
 0x369   : > { %v3080_v60 = vmul.f32 %v8566_v52, %v3064_v35  ;;  %v3086_v15 = vmul.f32 %v8567_v17, %v3064_v35  ;;  %v3056_v9 = vadd.f32 %v3054_v44, %v3024_v31  ;;  %v3069_v25 = vadd.f32 %v3067_v23, %v3037_v55 }
 0x36a   : > { %v3094_v26 = vsel %vm8568_vm14, %v3092_v4, %v3090_v8  ;;  %v3099_v27 = vmul.f32 %v3098_v58, %v3093_v49  ;;  %v3075_v41 = vadd.f32 %v3073_v40, %v3043_v56  ;;  %v3081_v54 = vadd.f32 %v3079_v29, %v3049_v22  ;;  %v3156_v53 = vpop.permute.xlu1 %3155 }
 0x36b   : > { %v3096_v12 = vsel %vm273_vm13, %v3094_v26, 0.0  ;;  %v3105_v57 = vmul.f32 %v3104_v42, %v3093_v49  ;;  %v3070_v43 = vadd.f32 %v3068_v10, %v3038_v51  ;;  %v3087_v38 = vadd.f32 %v3085_v34, %v3055_v20 }
 0x36c   : > { %v3100_v48 = vmul.f32 %v3098_v58, %v3096_v12  ;;  %v3106_v37 = vmul.f32 %v3104_v42, %v3096_v12  ;;  %v3076_v30 = vadd.f32 %v3074_v6, %v3044_v2  ;;  %v3082_v36 = vadd.f32 %v3080_v60, %v3050_v47 }
 0x36d   : > { %v3088_v13 = vadd.f32 %v3086_v15, %v3056_v9  ;;  %v3101_v24 = vadd.f32 %v3099_v27, %v3069_v25  ;;  %v3107_v33 = vadd.f32 %v3105_v57, %v3075_v41  ;;  %v3111_v58 = vmul.f32 %v3110_v11, %v3093_v49  ;;  %v3186_v27 = vpop.permute.xlu0 %3185 }
 0x36e   : > { %v3112_v31 = vmul.f32 %v3110_v11, %v3096_v12  ;;  %v3136_v42 = vstv %s7128_s16  ;;  %v3102_v0 = vadd.f32 %v3100_v48, %v3070_v43  ;;  %v3117_v39 = vmul.f32 %v3116_v59, %v3093_v49  ;;  %v3188_v41 = vpop.permute.xlu1 %3187 }
 0x36f   : > { %v3118_v50 = vmul.f32 %v3116_v59, %v3096_v12  ;;  %v3142_v7 = vstv %s7138_s23  ;;  %v3108_v8 = vadd.f32 %v3106_v37, %v3076_v30  ;;  %v3148_v4 = vstv %s7144_s9  ;;  %s8582_s23 = sld [smem:[#allocation135_spill]] }
 0x370   : > { %v3125_v55 = vsel %vm8570_vm0, %v3122_v5, %v3124_v32  ;;  %v3126_v56 = vsel %vm8571_vm2, %v3124_v32, %v3122_v5  ;;  %v3113_v59 = vadd.f32 %v3111_v58, %v3081_v54  ;;  %v3114_v51 = vadd.f32 %v3112_v31, %v3082_v36 }
 0x371   : > { %v3128_v11 = vsel %vm273_vm13, %v3126_v56, 0.0  ;;  %v3131_v3 = vmul.f32 %v3130_v1, %v3125_v55  ;;  %v3137_v63 = vmul.f32 %v3136_v42, %v3125_v55  ;;  %v3143_v22 = vmul.f32 %v3142_v7, %v3125_v55  ;;  %v3218_v56 = vpop.permute.xlu0 %3217 }
 0x372   : > { %v3132_v16 = vmul.f32 %v3130_v1, %v3128_v11  ;;  %v3138_v44 = vmul.f32 %v3136_v42, %v3128_v11  ;;  %v3119_v23 = vadd.f32 %v3117_v39, %v3087_v38  ;;  %v3120_v35 = vadd.f32 %v3118_v50, %v3088_v13 }
 0x373   : > { %v3144_v62 = vmul.f32 %v3142_v7, %v3128_v11  ;;  %v3162_v40 = vstv %s7160_s27  ;;  %v3133_v21 = vadd.f32 %v3131_v3, %v3101_v24  ;;  %v3139_v29 = vadd.f32 %v3137_v63, %v3107_v33  ;;  %s8583_s27 = sld [smem:[#allocation21_spill]] }
 0x374   : > { %v3145_v49 = vadd.f32 %v3143_v22, %v3113_v59  ;;  %v3149_v2 = vmul.f32 %v3148_v4, %v3125_v55  ;;  %v3134_v20 = vadd.f32 %v3132_v16, %v3102_v0  ;;  %v3150_v1 = vmul.f32 %v3148_v4, %v3128_v11  ;;  %v3220_v11 = vpop.permute.xlu1 %3219 }
 0x375   : > { %v3168_v28 = vstv %s7166_s30  ;;  %v3174_v10 = vstv %s7168_s11  ;;  %v3140_v14 = vadd.f32 %v3138_v44, %v3108_v8  ;;  %v3180_v34 = vstv %s7175_s3  ;;  %s7313_s9 = scalar_lea.hbm %s8582_s23, %s3895_s20  ;;  %s3457_s30 = scalar_lea.sflag [#allocation4], %s8576_s28 }
 0x376   : > { %v3157_v47 = vsel %vm8572_vm3, %v3154_v45, %v3156_v53  ;;  %v3158_v61 = vsel %vm8573_vm4, %v3156_v53, %v3154_v45  ;;  %v3146_v15 = vadd.f32 %v3144_v62, %v3114_v51  ;;  %v3151_v9 = vadd.f32 %v3149_v2, %v3119_v23  ;;  %s4032_s11 = scalar_lea.vmem %s7315_s19, 384  ;;  %s4036_s3 = sshll.u32 %s4120_s14, 4  ;;  %s4037_s3 = int_to_ptr.vmem [resolvable:$false] %s4036_s3 }
 0x377   : > { %v3160_v6 = vsel %vm273_vm13, %v3158_v61, 0.0  ;;  %v3163_v52 = vmul.f32 %v3162_v40, %v3157_v47  ;;  %v3169_v60 = vmul.f32 %v3168_v28, %v3157_v47  ;;  %v3175_v17 = vmul.f32 %v3174_v10, %v3157_v47  ;;  %v3250_v61 = vpop.permute.xlu0 %3249  ;;  %p4033_p9 = scmp.ne.s32.totalorder %s7315_s19, %s4032_s11  ;;  %p4039_p4 = scmp.lt.s32.totalorder %s7315_s19, %s4037_s3 }
 0x378   : > { %v3164_v25 = vmul.f32 %v3162_v40, %v3160_v6  ;;  %v3170_v26 = vmul.f32 %v3168_v28, %v3160_v6  ;;  %v3152_v54 = vadd.f32 %v3150_v1, %v3120_v35  ;;  %v3176_v12 = vmul.f32 %v3174_v10, %v3160_v6 }
 0x379   : > { %v3194_v57 = vstv %s7187_s15  ;;  %v3200_v43 = vstv %s7193_s21  ;;  %v3165_v19 = vadd.f32 %v3163_v52, %v3133_v21  ;;  %v3171_v38 = vadd.f32 %v3169_v60, %v3139_v29  ;;  %p8584_p10 = scmp.ne.s32.totalorder %s8583_s27, 0  ;;  %s4038_s15 = scalar_lea.vmem %s4037_s3, 768 }
 0x37a   : > { %v3177_v48 = vadd.f32 %v3175_v17, %v3145_v49  ;;  %v3181_v37 = vmul.f32 %v3180_v34, %v3157_v47  ;;  %v3166_v5 = vadd.f32 %v3164_v25, %v3134_v20  ;;  %v3182_v32 = vmul.f32 %v3180_v34, %v3160_v6  ;;  %v3252_v6 = vpop.permute.xlu1 %3251  ;;  %p4040_p5 = scmp.lt.s32.totalorder %s4038_s15, %s4032_s11 }
 0x37b   : > { %v3206_v30 = vstv %s7198_s13  ;;  %v3189_v36 = vsel %vm2064_vm12, %v3186_v27, %v3188_v41  ;;  %v3172_v13 = vadd.f32 %v3170_v26, %v3140_v14  ;;  %v3212_v24 = vstv %s7200_s26  ;;  %p4034_p2 = pnand %p4033_p9, %p8584_p10 }
 0x37c   : > { %v3190_v33 = vsel %vm2064_vm12, %v3188_v41, %v3186_v27  ;;  %v3191_v58 = vsel %vm252_vm7, %v3189_v36, 0.0  ;;  %v3178_v7 = vadd.f32 %v3176_v12, %v3146_v15  ;;  %v3183_v8 = vadd.f32 %v3181_v37, %v3151_v9  ;;  %p4041_p1 = por %p4040_p5, %p4039_p4 }
 0x37d   : > { %v3192_v42 = vsel %vm5810_vm15, %v3190_v33, 0.0  ;;  %v3195_v0 = vmul.f32 %v3194_v57, %v3191_v58  ;;  %v3201_v39 = vmul.f32 %v3200_v43, %v3191_v58  ;;  %v3207_v50 = vmul.f32 %v3206_v30, %v3191_v58  ;;  %p4035_p0 = pneg %p4034_p2 }
 0x37e   : > { %v3196_v4 = vmul.f32 %v3194_v57, %v3192_v42  ;;  %v3202_v55 = vmul.f32 %v3200_v43, %v3192_v42  ;;  %v3184_v3 = vadd.f32 %v3182_v32, %v3152_v54  ;;  %v3208_v63 = vmul.f32 %v3206_v30, %v3192_v42 }
 0x37f   : > { %v3226_v22 = vstv %s7209_s10  ;;  %v3232_v59 = vstv %s7213_s12  ;;  %v3197_v51 = vadd.f32 %v3195_v0, %v3165_v19  ;;  %v3203_v16 = vadd.f32 %v3201_v39, %v3171_v38  ;;  %p4042_p8 = pnand %p4041_p1, %p4035_p0 }
 0x380   : > { %v3209_v44 = vadd.f32 %v3207_v50, %v3177_v48  ;;  %v3213_v45 = vmul.f32 %v3212_v24, %v3191_v58  ;;  %v3198_v53 = vadd.f32 %v3196_v4, %v3166_v5  ;;  %v3214_v23 = vmul.f32 %v3212_v24, %v3192_v42  ;;  %v3282_v50 = vpop.permute.xlu0 %3281 }
 0x381   : > { %v3238_v35 = vstv %s7217_s25  ;;  %v3221_v62 = vsel %vm2064_vm12, %v3218_v56, %v3220_v11  ;;  %v3204_v40 = vadd.f32 %v3202_v55, %v3172_v13  ;;  %v3244_v21 = vstv %s7219_s2 }
 0x382   : > { %v3222_v29 = vsel %vm2064_vm12, %v3220_v11, %v3218_v56  ;;  %v3223_v49 = vsel %vm252_vm7, %v3221_v62, 0.0  ;;  %v3210_v10 = vadd.f32 %v3208_v63, %v3178_v7  ;;  %v3215_v14 = vadd.f32 %v3213_v45, %v3183_v8  ;;  %v3284_v7 = vpop.permute.xlu1 %3283 }
 0x383   : > { %v3224_v2 = vsel %vm5810_vm15, %v3222_v29, 0.0  ;;  %v3227_v20 = vmul.f32 %v3226_v22, %v3223_v49  ;;  %v3233_v1 = vmul.f32 %v3232_v59, %v3223_v49  ;;  %v3239_v28 = vmul.f32 %v3238_v35, %v3223_v49 }
 0x384   : > { %v3228_v34 = vmul.f32 %v3226_v22, %v3224_v2  ;;  %v3234_v47 = vmul.f32 %v3232_v59, %v3224_v2  ;;  %v3216_v52 = vadd.f32 %v3214_v23, %v3184_v3  ;;  %v3240_v60 = vmul.f32 %v3238_v35, %v3224_v2 }
 0x385   : > { %v3258_v17 = vstv %s7229_s7  ;;  %v3264_v15 = vstv %s7233_s18  ;;  %v3229_v9 = vadd.f32 %v3227_v20, %v3197_v51  ;;  %v3235_v25 = vadd.f32 %v3233_v1, %v3203_v16 }
 0x386   : > { %v3241_v26 = vadd.f32 %v3239_v28, %v3209_v44  ;;  %v3245_v27 = vmul.f32 %v3244_v21, %v3223_v49  ;;  %v3230_v41 = vadd.f32 %v3228_v34, %v3198_v53  ;;  %v3246_v54 = vmul.f32 %v3244_v21, %v3224_v2 }
 0x387   : > { %v3270_v12 = vstv %s7237_s0  ;;  %v3253_v57 = vsel %vm2064_vm12, %v3250_v61, %v3252_v6  ;;  %v3236_v43 = vadd.f32 %v3234_v47, %v3204_v40  ;;  %v3276_v19 = vstv %s7239_s1 }
 0x388   : > { %v3254_v38 = vsel %vm2064_vm12, %v3252_v6, %v3250_v61  ;;  %v3255_v48 = vsel %vm252_vm7, %v3253_v57, 0.0  ;;  %v3242_v36 = vadd.f32 %v3240_v60, %v3210_v10  ;;  %v3247_v58 = vadd.f32 %v3245_v27, %v3215_v14 }
 0x389   : > { %v3256_v37 = vsel %vm5810_vm15, %v3254_v38, 0.0  ;;  %v3259_v5 = vmul.f32 %v3258_v17, %v3255_v48  ;;  %v3265_v32 = vmul.f32 %v3264_v15, %v3255_v48  ;;  %v3271_v30 = vmul.f32 %v3270_v12, %v3255_v48 }
 0x38a   : > { %v3260_v13 = vmul.f32 %v3258_v17, %v3256_v37  ;;  %v3266_v24 = vmul.f32 %v3264_v15, %v3256_v37  ;;  %v3272_v33 = vmul.f32 %v3270_v12, %v3256_v37  ;;  %v3248_v42 = vadd.f32 %v3246_v54, %v3216_v52  ;;  %v8577_v17 = vld [vmem:[#allocation24_spill] sm:$0xff] }
 0x38b   : > { %v3277_v0 = vmul.f32 %v3276_v19, %v3255_v48  ;;  %v3278_v39 = vmul.f32 %v3276_v19, %v3256_v37  ;;  %v3261_v8 = vadd.f32 %v3259_v5, %v3229_v9  ;;  %v3267_v4 = vadd.f32 %v3265_v32, %v3235_v25 }
 0x38c   : > { %v3290_v55 = vstv %s7251_s29  ;;  %v3296_v56 = vstv %s7253_s5  ;;  %v3262_v11 = vadd.f32 %v3260_v13, %v3230_v41  ;;  %v3268_v3 = vadd.f32 %v3266_v24, %v3236_v43 }
 0x38d   : > { %v3273_v63 = vadd.f32 %v3271_v30, %v3241_v26  ;;  %v3274_v22 = vadd.f32 %v3272_v33, %v3242_v36  ;;  %v3302_v59 = vstv %s7257_s4  ;;  %v3308_v51 = vstv %s7259_s24 }
 0x38e   : > { %v3285_v16 = vsel %vm2064_vm12, %v3282_v50, %v3284_v7  ;;  %v3286_v44 = vsel %vm2064_vm12, %v3284_v7, %v3282_v50  ;;  %v3279_v45 = vadd.f32 %v3277_v0, %v3247_v58  ;;  %v3280_v53 = vadd.f32 %v3278_v39, %v3248_v42 }
 0x38f   : > { %v3287_v23 = vsel %vm252_vm7, %v3285_v16, 0.0  ;;  %v3288_v35 = vsel %vm5810_vm15, %v3286_v44, 0.0  ;;  %v8578_v25 = vlaneseq }
 0x390   : > { %v3291_v62 = vmul.f32 %v3290_v55, %v3287_v23  ;;  %v3292_v40 = vmul.f32 %v3290_v55, %v3288_v35  ;;  %v3297_v21 = vmul.f32 %v3296_v56, %v3287_v23  ;;  %v3298_v29 = vmul.f32 %v3296_v56, %v3288_v35 }
 0x391   : > { %v3303_v49 = vmul.f32 %v3302_v59, %v3287_v23  ;;  %v3304_v2 = vmul.f32 %v3302_v59, %v3288_v35  ;;  %v3309_v20 = vmul.f32 %v3308_v51, %v3287_v23  ;;  %v3310_v1 = vmul.f32 %v3308_v51, %v3288_v35 }
 0x392   : > { %v3293_v28 = vadd.f32 %v3291_v62, %v3261_v8  ;;  %v3294_v46 = vadd.f32 %v3292_v40, %v3262_v11  ;;  %v3299_v10 = vadd.f32 %v3297_v21, %v3267_v4  ;;  %v3300_v14 = vadd.f32 %v3298_v29, %v3268_v3 }
 0x393   : > { %v3305_v34 = vadd.f32 %v3303_v49, %v3273_v63  ;;  %v3306_v18 = vadd.f32 %v3304_v2, %v3274_v22  ;;  %v3311_v47 = vadd.f32 %v3309_v20, %v3279_v45  ;;  %v3312_v61 = vadd.f32 %v3310_v1, %v3280_v53 }
 0x394   : > { %v3315_v31 = vcombine.low %v3293_v28, %v3294_v46  ;;  %v3353_v6 = vcombine.low %v3299_v10, %v3300_v14  ;;  %vm7287_vm7 = vcmp.lt.s32.totalorder %v8578_v25, 256 }
 0x395   : > { %v3388_v52 = vcombine.low %v3305_v34, %v3306_v18  ;;  %v3423_v60 = vcombine.low %v3311_v47, %v3312_v61 }
 0x396   : > { %v3322_v15 = vrot.slane %v3315_v31, %v8577_v17  ;;  %v3360_v9 = vrot.slane %v3353_v6, %v8577_v17 }
 0x397   : > { %v3395_v27 = vrot.slane %v3388_v52, %v8577_v17  ;;  %v3430_v41 = vrot.slane %v3423_v60, %v8577_v17 }
 0x398   : > { %v3323_v54 = vcombine.high %v3322_v15, %v3322_v15  ;;  %v3330_v12 = vrot.slane %v3322_v15, %v8577_v17  ;;  %v3361_v57 = vcombine.high %v3360_v9, %v3360_v9  ;;  %v3368_v43 = vrot.slane %v3360_v9, %v8577_v17 }
 0x399   : > { %v3396_v19 = vcombine.high %v3395_v27, %v3395_v27  ;;  %v3403_v38 = vrot.slane %v3395_v27, %v8577_v17  ;;  %v3431_v48 = vcombine.high %v3430_v41, %v3430_v41  ;;  %v3438_v37 = vrot.slane %v3430_v41, %v8577_v17 }
 0x39a   : > { %v3337_v5 = vrot.slane %v3323_v54, %v8577_v17  ;;  %v3338_v32 = vcombine.high %v3330_v12, %v3330_v12  ;;  %3346 = vst.msk [vmem:[%s7295_s6] ss:$4 sm:$0x3] %vm7287_vm7, %v3330_v12  ;;  %v3375_v30 = vrot.slane %v3361_v57, %v8577_v17  ;;  %v3376_v36 = vcombine.high %v3368_v43, %v3368_v43 }
 0x39b   : > { %3877 = vst.msk [vmem:[%s7295_s6 + $0x1] ss:$4 sm:$0x3] %vm7287_vm7, %v3368_v43  ;;  %v3410_v13 = vrot.slane %v3396_v19, %v8577_v17  ;;  %v3411_v24 = vcombine.high %v3403_v38, %v3403_v38  ;;  %3880 = vst.msk [vmem:[%s7295_s6 + $0x2] ss:$4 sm:$0x3] %vm7287_vm7, %v3403_v38  ;;  %v3445_v33 = vrot.slane %v3431_v48, %v8577_v17 }
 0x39c   : > { %v3446_v58 = vcombine.high %v3438_v37, %v3438_v37  ;;  %3883 = vst.msk [vmem:[%s7295_s6 + $0x3] ss:$4 sm:$0x3] %vm7287_vm7, %v3438_v37  ;;  %3875 = vst.msk [vmem:[%s7295_s6 + $0x8] ss:$4 sm:$0x3] %vm7287_vm7, %v3337_v5 }
 0x39d   : > { %3876 = vst.msk [vmem:[%s7295_s6 + $0x10] ss:$4 sm:$0x3] %vm7287_vm7, %v3338_v32  ;;  %3878 = vst.msk [vmem:[%s7295_s6 + $0x9] ss:$4 sm:$0x3] %vm7287_vm7, %v3375_v30 }
 0x39e   : > { %3879 = vst.msk [vmem:[%s7295_s6 + $0x11] ss:$4 sm:$0x3] %vm7287_vm7, %v3376_v36  ;;  %3881 = vst.msk [vmem:[%s7295_s6 + $0xa] ss:$4 sm:$0x3] %vm7287_vm7, %v3410_v13 }
 0x39f   : > { %3882 = vst.msk [vmem:[%s7295_s6 + $0x12] ss:$4 sm:$0x3] %vm7287_vm7, %v3411_v24  ;;  %3884 = vst.msk [vmem:[%s7295_s6 + $0xb] ss:$4 sm:$0x3] %vm7287_vm7, %v3445_v33 }
 0x3a0   : > { %3885 = vst.msk [vmem:[%s7295_s6 + $0x13] ss:$4 sm:$0x3] %vm7287_vm7, %v3446_v58 }
 0x3a1   : > { %4045 = shalt.err (!%p4042_p8)
}
 0x3a2   : > { %s4046_s21 = scalar_lea.hbm %s7313_s9, 384  ;;  %s4050_s10 = scalar_lea.hbm %s8582_s23, 768 }
 0x3a3   : > { %p4047_p7 = scmp.ne.s32.totalorder %s7313_s9, %s4046_s21  ;;  %p4051_p12 = scmp.lt.s32.totalorder %s7313_s9, %s8582_s23 }
 0x3a4   : > { %p4052_p13 = scmp.lt.s32.totalorder %s4050_s10, %s4046_s21 }
 0x3a5   : > { %p4048_p6 = pnand %p4047_p7, %p8584_p10 }
 0x3a6   : > { %p4053_p3 = por %p4052_p13, %p4051_p12 }
 0x3a7   : > { %p4049_p11 = pneg %p4048_p6 }
 0x3a9   : > { %p4054_p9 = pnand %p4053_p3, %p4049_p11 }
 0x3ab   : > { %4057 = shalt.err (!%p4054_p9)
}
 0x3ac   : > { %s4121_s2 = smov 128   ;;  %s4122_s7 = smov 8  }
 0x3ad   : > { %3908 = dma.vmem_to_hbm [thread:$0]  (%p8584_p10), %s7315_s19, 384, %s7313_s9, %s3457_s30, %s4121_s2, %s4121_s2, %s4122_s7  }
 0x3ae PF: > { %s8585_s18 = sld [smem:[#allocation14_spill]] }
 0x3af   : > { %s8586_s0 = sld [smem:[#allocation22_spill]] }
 0x3b0   : > { %s8587_s1 = sld [smem:[#allocation17_spill]] }
 0x3b4   : > { %s3486_s29 = sand.u32 1, %s8585_s18  }
 0x3b5   : > { %p8588_p2 = scmp.ne.s32.totalorder %s8586_s0, 0  ;;  %s3487_s5 = scalar_lea.sflag [#allocation4], %s3486_s29 }
 0x3b6   : > { %p8589_p0 = scmp.ge.s32.totalorder %s8587_s1, 2 }
 0x3b8   : > { %p3922_p4 = pnand %p8589_p0, %p8588_p2 }
 0x3ba   : > { %p3923_p5 = pneg %p3922_p4 }
 0x3bc   : > { %4087 = dma.done.wait (%p3923_p5), %s3487_s5, 384  }
 0x3bd   : > { %4089 = vsyncadd (%p3923_p5), %s3487_s5, 4294966912  ;;  %s8590_s15 = sld [smem:[#allocation19_spill]] }
 0x3be   : > { %s8591_s12 = sld [smem:[#allocation15_spill]] }
 0x3bf   : > { %s8592_s13 = sld [smem:[#allocation16_spill]] }
 0x3c0   : > { %s8593_s14 = sld [smem:[#allocation20_spill]] }
 0x3c3   : > { %p18_p1 = scmp.ge.s32.totalorder %s8590_s15, 4  }
 0x3c5   :  { %20 = sbr.rel (!%p18_p1) target bundleno = 12 (0xc), region = 109 }
 0x3ca   :  { %3492 = vsyncpa [#allocation3], 1 }
 0x3cb   :  { %3494 = vsyncpa [#allocation3 + $0x1], 1 }
 0x3cc   :  { %3495 = vsyncpa [#allocation4], 1 }
 0x3cd   :  { %3497 = vsyncpa [#allocation4 + $0x1], 1 }
 0x3ce   :  { %3498 = vsyncpa [#allocation5], 1 }
 0x3cf   :  { %3500 = vsyncpa [#allocation5 + $0x1], 1 }
 0x3d0   :  { %3501 = vsyncpa [#allocation6], 1 }
 0x3d1   :  { %3503 = vsyncpa [#allocation6 + $0x1], 1 }

</bundles_post_ra>
